<compile_context>
chip_gen: v7x
topology: tpu7x:2x2x1
jax: 0.10.0
libtpu: 0.0.40
codegen_flags: <defaults>
</compile_context>

<pallas_src>
import functools

import jax
import jax.numpy as jnp
from jax import lax
from jax.experimental import pallas as pl
from jax.experimental.pallas import tpu as pltpu

EPS = 1e-5
LANE = 128
SUBLANE = 16          # row-tile alignment (covers f32 (8,128) and bf16 (16,128))

try:
    _VMEM_CAP = int(pltpu.get_tpu_info().vmem_capacity_bytes)
except Exception:     # fallback: assume v5e/v6e-sized VMEM
    _VMEM_CAP = 128 << 20
# Leave headroom: on v7x (64 MiB physical) this caps requests at ~48 MiB.
_VMEM_BUDGET = min((_VMEM_CAP * 3) // 4, 100 << 20)


def _round_up(x, m):
    return (x + m - 1) // m * m


def _pad_last(a, target):
    pad = target - a.shape[-1]
    if pad == 0:
        return a
    cfg = [(0, 0)] * (a.ndim - 1) + [(0, pad)]
    return jnp.pad(a, cfg)


def _pad_axis(a, axis, target):
    pad = target - a.shape[axis]
    if pad == 0:
        return a
    cfg = [(0, 0)] * a.ndim
    cfg[axis] = (0, pad)
    return jnp.pad(a, cfg)


# --------------------------------------------------------------------------
# Single-buffered resident operands (pl.Buffered(1)) — probed once for safety.
# --------------------------------------------------------------------------
_BUFFERED_OK = None


def _single_buffer_supported():
    global _BUFFERED_OK
    if _BUFFERED_OK is not None:
        return _BUFFERED_OK
    try:
        spec = pl.BlockSpec((8, LANE), lambda i: (0, 0),
                            pipeline_mode=pl.Buffered(1))

        def _probe(x_ref, o_ref):
            o_ref[...] = x_ref[...] + 1.0

        out = pl.pallas_call(
            _probe, grid=(1,), in_specs=[spec],
            out_specs=pl.BlockSpec((8, LANE), lambda i: (0, 0)),
            out_shape=jax.ShapeDtypeStruct((8, LANE), jnp.float32),
        )(jnp.zeros((8, LANE), jnp.float32))
        jax.block_until_ready(out)
        _BUFFERED_OK = True
    except Exception:
        _BUFFERED_OK = False
    return _BUFFERED_OK


def _const_spec(shape):
    """Grid-invariant operand: constant index_map, single-buffered if possible
    (double-buffering resident weights like the 9*Cm*Cm conv2 tensor only
    wastes VMEM — significant against v7x's 64 MiB)."""
    idx = lambda *_: (0,) * len(shape)
    if _single_buffer_supported():
        return pl.BlockSpec(shape, idx, pipeline_mode=pl.Buffered(1))
    return pl.BlockSpec(shape, idx)


# --------------------------------------------------------------------------
# In-kernel helpers
# --------------------------------------------------------------------------
def _col_sums(y):
    """Per-channel sum / sum-of-squares of a (rows, C) f32 tile via a small
    ones @ y MXU matmul — keeps the cross-sublane reduction off the VPU/XLU."""
    ones = jnp.ones((8, y.shape[0]), jnp.float32)
    s = jnp.dot(ones, y, preferred_element_type=jnp.float32)[0:1]
    ss = jnp.dot(ones, y * y, preferred_element_type=jnp.float32)[0:1]
    return s, ss


# --------------------------------------------------------------------------
# Kernels
# --------------------------------------------------------------------------
def _conv1x1_stats_kernel(x_ref, w_ref, y_ref, s_ref, ss_ref):
    y = jnp.dot(x_ref[0], w_ref[...], preferred_element_type=jnp.float32)
    y_ref[0] = y.astype(y_ref.dtype)
    s, ss = _col_sums(y)
    s_ref[0] = s
    ss_ref[0] = ss


def _bn_relu_conv3x3_stats_kernel(img_w, mask_center,
                                  y1_ref, m_ref, a_ref, b_ref, w2_ref,
                                  y2_ref, s_ref, ss_ref):
    hwp = y1_ref.shape[1]
    cdt = w2_ref.dtype
    # Fused BN1 (folded scale/shift) + ReLU in f32.
    z = jnp.maximum(y1_ref[0].astype(jnp.float32) * a_ref[...] + b_ref[...], 0.0)

    # 3x3 conv as im2col-in-registers: 9 sublane rolls (XLU) masked by
    # host-precomputed edge masks, concatenated on the lane axis -> a single
    # K = 9*Cm matmul (fills the 256-deep MXU on v6e/v7x).
    taps = []
    for t in range(9):
        dy, dx = t // 3, t % 3
        shift = (dy - 1) * img_w + (dx - 1)
        zt = pltpu.roll(z, (-shift) % hwp, axis=0) if shift % hwp else z
        if t == 4 and not mask_center:
            taps.append(zt.astype(cdt))              # centre tap: no mask needed
        else:
            taps.append((zt * m_ref[t]).astype(cdt))
    z9 = jnp.concatenate(taps, axis=1)               # (hwp, 9*Cm)
    acc = jnp.dot(z9, w2_ref[...], preferred_element_type=jnp.float32)

    y2_ref[0] = acc.astype(y2_ref.dtype)
    s, ss = _col_sums(acc)
    s_ref[0] = s
    ss_ref[0] = ss


def _bn_relu_conv1x1_stats_kernel(y2_ref, a_ref, b_ref, rmask_ref, w_ref,
                                  y_ref, s_ref, ss_ref):
    cdt = w_ref.dtype
    z = jnp.maximum(y2_ref[0].astype(jnp.float32) * a_ref[...] + b_ref[...], 0.0)
    # rmask zeroes rows added by HW -> HW_p padding so BN3 stats stay exact.
    z = (z * rmask_ref[...]).astype(cdt)
    y = jnp.dot(z, w_ref[...], preferred_element_type=jnp.float32)
    y_ref[0] = y.astype(y_ref.dtype)
    s, ss = _col_sums(y)
    s_ref[0] = s
    ss_ref[0] = ss


def _bn_residual_relu_kernel(y3_ref, a_ref, b_ref, x_ref, out_ref):
    y3 = y3_ref[0].astype(jnp.float32)
    idn = x_ref[0].astype(jnp.float32)
    out = jnp.maximum(y3 * a_ref[...] + b_ref[...] + idn, 0.0)
    out_ref[0] = out.astype(out_ref.dtype)


# --------------------------------------------------------------------------
# Host-side glue
# --------------------------------------------------------------------------
def _fold_bn(s, ss, gamma_p, beta_p, count):
    """Combine per-tile partial sums into fused BN scale/shift (f32, tiny)."""
    total = jnp.sum(s, axis=0)                              # (1, C)
    total_sq = jnp.sum(ss, axis=0)
    mean = total / count
    var = jnp.maximum(total_sq / count - mean * mean, 0.0)  # biased variance
    a = gamma_p * lax.rsqrt(var + EPS)
    b = beta_p - mean * a
    return a.astype(jnp.float32), b.astype(jnp.float32)


def _pick_row_tile(hw, row_bytes, row_tile=None):
    """Choose (TILE, n_tiles): TILE is a multiple of 16 sublanes, targeting
    ~2 MiB activation blocks per stream (bounds VMEM on v7x, keeps the
    pipeline several steps deep)."""
    if row_tile is not None:
        tile = _round_up(int(row_tile), SUBLANE)
        return tile, -(-hw // tile)
    target = _round_up(int(max(256, min(2048, (2 << 20) // max(1, row_bytes)))),
                       SUBLANE)
    hw_a = _round_up(hw, SUBLANE)
    if hw_a <= target:
        return hw_a, 1
    n_tiles = -(-hw_a // target)
    tile = _round_up(-(-hw_a // n_tiles), SUBLANE)
    return tile, n_tiles


def bottleneck_pallas_nhwc(x_nhwc, params, *, compute_dtype=jnp.float32,
                           out_dtype=None, row_tile=None):
    """Bottleneck forward in NHWC.  x_nhwc: (N, H, W, Cin) -> (N, H, W, Cout).

    compute_dtype=jnp.bfloat16 is recommended on v5e/v6e/v7x (halves HBM/VMEM
    traffic of the bandwidth-bound passes); BN / mask math stays float32."""
    w1, g1, b1, w2, g2, b2, w3, g3, b3 = params
    N, H, W, Cin = x_nhwc.shape
    width = w1.shape[1]
    Cout = w3.shape[1]
    assert Cin == Cout, "downsample=None requires inplanes == planes*expansion"
    HW = H * W
    count = N * HW

    cdt = jnp.dtype(compute_dtype)
    odt = jnp.dtype(out_dtype) if out_dtype is not None else cdt
    isz = cdt.itemsize

    Ci = _round_up(Cin, LANE)
    Cm = _round_up(width, LANE)
    Co = _round_up(Cout, LANE)
    TILE, n_tiles = _pick_row_tile(HW, max(Ci, Cm, Co) * isz, row_tile)
    HWp = TILE * n_tiles

    # ---- parameters packed once (lane-dense channel dims) ----
    w1p = _pad_last(_pad_axis(w1, 0, Ci), Cm).astype(cdt)                 # (Ci, Cm)
    w2p = _pad_last(_pad_axis(w2, 1, Cm), Cm).astype(cdt).reshape(9 * Cm, Cm)
    w3p = _pad_last(_pad_axis(w3, 0, Cm), Co).astype(cdt)                 # (Cm, Co)
    g1p, b1p = _pad_last(g1, Cm), _pad_last(b1, Cm)
    g2p, b2p = _pad_last(g2, Cm), _pad_last(b2, Cm)
    g3p, b3p = _pad_last(g3, Co), _pad_last(b3, Co)

    # Activations: NHWC -> (N, HW_p, Cpad), rows on the sublane axis.
    x_p = _pad_axis(_pad_last(x_nhwc, Ci).reshape(N, HW, Ci), 1, HWp).astype(cdt)

    # Host-precomputed masks: conv padding edges + HW->HWp padded rows.
    r = jnp.arange(HWp, dtype=jnp.int32)
    hh, ww = r // W, r % W
    in_img = r < HW
    masks = []
    for dy in range(3):
        for dx in range(3):
            hi, wi = hh + dy - 1, ww + dx - 1
            masks.append(in_img & (hi >= 0) & (hi < H) & (wi >= 0) & (wi < W))
    masks9 = jnp.stack(masks).astype(jnp.float32).reshape(9, HWp, 1)
    rmask = in_img.astype(jnp.float32).reshape(HWp, 1)
    mask_center = HWp != HW          # centre tap only needs a mask if HW is padded

    def row_spec(c):
        return pl.BlockSpec((1, TILE, c), lambda n, t: (n, t, 0))

    def stat_spec(c):
        return pl.BlockSpec((1, 1, c), lambda n, t: (n * n_tiles + t, 0, 0))

    def stat_shape(c):
        return jax.ShapeDtypeStruct((N * n_tiles, 1, c), jnp.float32)

    def img_spec(c):                 # per-image block (pass 2)
        return pl.BlockSpec((1, HWp, c), lambda n: (n, 0, 0))

    def cparams(est_bytes, ndim):
        limit = int(min(_VMEM_BUDGET, max(16 << 20, est_bytes + (4 << 20))))
        return pltpu.CompilerParams(
            dimension_semantics=("parallel",) * ndim,
            vmem_limit_bytes=limit)

    # -------- pass 1: conv1 (1x1) + BN1 partial stats --------
    y1_raw, s1, ss1 = pl.pallas_call(
        _conv1x1_stats_kernel,
        grid=(N, n_tiles),
        in_specs=[row_spec(Ci), _const_spec((Ci, Cm))],
        out_specs=[row_spec(Cm), stat_spec(Cm), stat_spec(Cm)],
        out_shape=[jax.ShapeDtypeStruct((N, HWp, Cm), cdt),
                   stat_shape(Cm), stat_shape(Cm)],
        compiler_params=cparams(
            2 * TILE * (Ci + Cm) * isz + Ci * Cm * isz + TILE * Cm * 4, 2),
        cost_estimate=pl.CostEstimate(
            flops=2 * N * HWp * Ci * Cm, transcendentals=0,
            bytes_accessed=(N * HWp * (Ci + Cm) + Ci * Cm) * isz),
    )(x_p, w1p)
    a1, sh1 = _fold_bn(s1, ss1, g1p, b1p, count)

    # -------- pass 2: BN1+ReLU -> conv2 (3x3, pad=1) + BN2 partial stats --------
    y2_raw, s2, ss2 = pl.pallas_call(
        functools.partial(_bn_relu_conv3x3_stats_kernel, W, mask_center),
        grid=(N,),
        in_specs=[img_spec(Cm), _const_spec((9, HWp, 1)), _const_spec((1, Cm)),
                  _const_spec((1, Cm)), _const_spec((9 * Cm, Cm))],
        out_specs=[img_spec(Cm),
                   pl.BlockSpec((1, 1, Cm), lambda n: (n, 0, 0)),
                   pl.BlockSpec((1, 1, Cm), lambda n: (n, 0, 0))],
        out_shape=[jax.ShapeDtypeStruct((N, HWp, Cm), cdt),
                   jax.ShapeDtypeStruct((N, 1, Cm), jnp.float32),
                   jax.ShapeDtypeStruct((N, 1, Cm), jnp.float32)],
        compiler_params=cparams(
            4 * HWp * Cm * isz + 9 * HWp * 4 + 9 * Cm * Cm * isz
            + HWp * Cm * (9 * isz + 12), 1),
        cost_estimate=pl.CostEstimate(
            flops=18 * N * HWp * Cm * Cm + 6 * N * HWp * Cm, transcendentals=0,
            bytes_accessed=(2 * N * HWp * Cm + 9 * Cm * Cm) * isz),
    )(y1_raw, masks9, a1, sh1, w2p)
    a2, sh2 = _fold_bn(s2, ss2, g2p, b2p, count)

    # -------- pass 3: BN2+ReLU -> conv3 (1x1) + BN3 partial stats --------
    y3_raw, s3, ss3 = pl.pallas_call(
        _bn_relu_conv1x1_stats_kernel,
        grid=(N, n_tiles),
        in_specs=[row_spec(Cm), _const_spec((1, Cm)), _const_spec((1, Cm)),
                  pl.BlockSpec((TILE, 1), lambda n, t: (t, 0)),
                  _const_spec((Cm, Co))],
        out_specs=[row_spec(Co), stat_spec(Co), stat_spec(Co)],
        out_shape=[jax.ShapeDtypeStruct((N, HWp, Co), cdt),
                   stat_shape(Co), stat_shape(Co)],
        compiler_params=cparams(
            2 * TILE * (Cm + Co) * isz + Cm * Co * isz
            + TILE * (Cm + Co) * 4, 2),
        cost_estimate=pl.CostEstimate(
            flops=2 * N * HWp * Cm * Co + 4 * N * HWp * Cm, transcendentals=0,
            bytes_accessed=(N * HWp * (Cm + Co) + Cm * Co) * isz),
    )(y2_raw, a2, sh2, rmask, w3p)
    a3, sh3 = _fold_bn(s3, ss3, g3p, b3p, count)

    # -------- pass 4: BN3 + identity residual + final ReLU --------
    out_p = pl.pallas_call(
        _bn_residual_relu_kernel,
        grid=(N, n_tiles),
        in_specs=[row_spec(Co), _const_spec((1, Co)), _const_spec((1, Co)),
                  row_spec(Ci)],
        out_specs=row_spec(Co),
        out_shape=jax.ShapeDtypeStruct((N, HWp, Co), odt),
        compiler_params=cparams(
            2 * TILE * (Co + Ci) * isz + 2 * TILE * Co * odt.itemsize
            + TILE * Co * 4, 2),
        cost_estimate=pl.CostEstimate(
            flops=4 * N * HWp * Co, transcendentals=0,
            bytes_accessed=N * HWp * ((Co + Ci) * isz + Co * odt.itemsize)),
    )(y3_raw, a3, sh3, x_p)

    return out_p[:, :HW, :Cout].reshape(N, H, W, Cout)


def bottleneck_pallas(x_nchw, params, *, compute_dtype=jnp.float32,
                      out_dtype=None, row_tile=None):
    """PyTorch-layout adapter: NCHW in / NCHW out.  The Pallas pipeline is NHWC;
    keep a real model NHWC end-to-end to avoid these boundary transposes."""
    x_nhwc = jnp.transpose(x_nchw, (0, 2, 3, 1))
    out_nhwc = bottleneck_pallas_nhwc(x_nhwc, params, compute_dtype=compute_dtype,
                                      out_dtype=out_dtype, row_tile=row_tile)
    return jnp.transpose(out_nhwc, (0, 3, 1, 2))


# ---------------- pure-JAX reference (for correctness check) ----------------
def bottleneck_ref(x_nchw, params):
    w1, g1, b1, w2, g2, b2, w3, g3, b3 = params
    x = jnp.transpose(x_nchw, (0, 2, 3, 1)).astype(jnp.float32)  # NHWC

    def bn_relu(y, g, b, relu=True):
        m = jnp.mean(y, axis=(0, 1, 2), keepdims=True)
        v = jnp.mean((y - m) ** 2, axis=(0, 1, 2), keepdims=True)
        yn = (y - m) * lax.rsqrt(v + EPS) * g.reshape(1, 1, 1, -1) \
            + b.reshape(1, 1, 1, -1)
        return jnp.maximum(yn, 0.0) if relu else yn

    dn = ('NHWC', 'HWIO', 'NHWC')
    y = lax.conv_general_dilated(x, w1.reshape(1, 1, *w1.shape), (1, 1), 'VALID',
                                 dimension_numbers=dn)
    y = bn_relu(y, g1, b1)
    w2_hwio = w2.reshape(3, 3, w2.shape[1], w2.shape[2])
    y = lax.conv_general_dilated(y, w2_hwio, (1, 1), ((1, 1), (1, 1)),
                                 dimension_numbers=dn)
    y = bn_relu(y, g2, b2)
    y = lax.conv_general_dilated(y, w3.reshape(1, 1, *w3.shape), (1, 1), 'VALID',
                                 dimension_numbers=dn)
    y = bn_relu(y, g3, b3, relu=False)
    y = jnp.maximum(y + x, 0.0)
    return jnp.transpose(y, (0, 3, 1, 2))


def make_params(key, inplanes, planes, expansion=4):
    width = planes  # base_width=64, groups=1 -> width = planes
    cout = planes * expansion
    k1, k2, k3 = jax.random.split(key, 3)
    scale = 0.1
    # Kernel-friendly layouts:
    #   w1: (Cin, width) [1x1], w2: (9, width, width) [kpos, in, out],
    #   w3: (width, Cout)
    w1 = scale * jax.random.normal(k1, (inplanes, width), jnp.float32)
    w2 = scale * jax.random.normal(k2, (9, width, width), jnp.float32)
    w3 = scale * jax.random.normal(k3, (width, cout), jnp.float32)
    g1 = jnp.ones((1, width), jnp.float32); b1 = jnp.zeros((1, width), jnp.float32)
    g2 = jnp.ones((1, width), jnp.float32); b2 = jnp.zeros((1, width), jnp.float32)
    g3 = jnp.ones((1, cout), jnp.float32);  b3 = jnp.zeros((1, cout), jnp.float32)
    return (w1, g1, b1, w2, g2, b2, w3, g3, b3)


if __name__ == "__main__":
    _single_buffer_supported()   # probe pl.Buffered(1) support once, eagerly

    key = jax.random.PRNGKey(0)
    kx, kp, kx2 = jax.random.split(key, 3)

    # Config A: N=2, planes=4 -> inplanes=16 (so identity add is valid), 16x16.
    N, planes, H, W = 2, 4, 16, 16
    inplanes = planes * 4
    x = jax.random.normal(kx, (N, inplanes, H, W), jnp.float32)   # NCHW input
    params = make_params(kp, inplanes, planes)
    ref = bottleneck_ref(x, params)

    # float32 MXU operands: faithful to the PyTorch module numerics.
    out = jax.block_until_ready(jax.jit(bottleneck_pallas)(x, params))
    assert out.shape == (N, inplanes, H, W)
    assert jnp.allclose(out, ref, atol=1e-4, rtol=1e-4), "f32 kernel mismatch"

    # bfloat16 MXU operands + bf16 inter-pass / output storage (recommended on
    # v5e/v6e/v7x: passes 1/3/4 are HBM-bandwidth bound).  BN math stays f32.
    out_bf16 = jax.block_until_ready(
        jax.jit(functools.partial(bottleneck_pallas,
                                  compute_dtype=jnp.bfloat16))(x, params))
    assert out_bf16.shape == (N, inplanes, H, W)
    assert float(jnp.max(jnp.abs(out_bf16.astype(jnp.float32) - ref))) < 0.25, \
        "bf16 kernel diverged"

    # Config B: non-aligned spatial (10x10 -> HW padded to 128) + forced
    # row_tile=64 to exercise the multi-tile grid and padded-row masking.
    H2 = W2 = 10
    x2 = jax.random.normal(kx2, (N, inplanes, H2, W2), jnp.float32)
    ref2 = bottleneck_ref(x2, params)
    out2 = jax.block_until_ready(
        jax.jit(functools.partial(bottleneck_pallas, row_tile=64))(x2, params))
    assert out2.shape == (N, inplanes, H2, W2)
    assert jnp.allclose(out2, ref2, atol=1e-4, rtol=1e-4), \
        "padded/tiled kernel mismatch"

    print("KERNEL_OK")
</pallas_src>

<mosaic_0001>
module attributes {stable_mosaic.version = 11 : i64} {
  func.func @_probe(%arg0: i32, %arg1: memref<8x128xf32, #tpu.memory_space<vmem>>, %arg2: memref<8x128xf32, #tpu.memory_space<vmem>>) attributes {dimension_semantics = [#tpu.dimension_semantics<arbitrary>], iteration_bounds = array<i64: 1>, scalar_prefetch = 0 : i64, scratch_operands = 0 : i64, tpu.core_type = #tpu.core_type<tc>, window_params = [{pipeline_mode = #tpu.pipeline_mode<synchronous>, transform_indices = @transform_0, window_bounds = array<i64: 8, 128>}, {pipeline_mode = #tpu.pipeline_mode<synchronous>, transform_indices = @transform_1, window_bounds = array<i64: 8, 128>}]} {
    %c0 = arith.constant 0 : index
    %c0_0 = arith.constant 0 : index
    %0 = vector.load %arg1[%c0, %c0_0] : memref<8x128xf32, #tpu.memory_space<vmem>>, vector<8x128xf32>
    %cst = arith.constant 1.000000e+00 : f32
    %1 = vector.broadcast %cst : f32 to vector<8x128xf32>
    %2 = arith.addf %0, %1 : vector<8x128xf32>
    %c0_1 = arith.constant 0 : index
    %c0_2 = arith.constant 0 : index
    %3 = vector.load %arg2[%c0_1, %c0_2] : memref<8x128xf32, #tpu.memory_space<vmem>>, vector<8x128xf32>
    tpu.vector_store %arg2[%c0_1, %c0_2], %2 {strides = array<i32>} : memref<8x128xf32, #tpu.memory_space<vmem>>, vector<8x128xf32>,
    return
  }
  func.func @transform_0(%arg0: i32) -> (i32, i32) {
    %c0_i32 = arith.constant 0 : i32
    %c0_i32_0 = arith.constant 0 : i32
    %c0_i32_1 = arith.constant 0 : i32
    return %c0_i32, %c0_i32_0 : i32, i32
  }
  func.func @transform_1(%arg0: i32) -> (i32, i32) {
    %c0_i32 = arith.constant 0 : i32
    %c0_i32_0 = arith.constant 0 : i32
    %c0_i32_1 = arith.constant 0 : i32
    return %c0_i32, %c0_i32_0 : i32, i32
  }
}

module attributes {stable_mosaic.version = 11 : i64} {
  func.func @_conv1x1_stats_kernel(%arg0: i32, %arg1: i32, %arg2: memref<1x256x128xf32, #tpu.memory_space<vmem>>, %arg3: memref<128x128xf32, #tpu.memory_space<vmem>>, %arg4: memref<1x256x128xf32, #tpu.memory_space<vmem>>, %arg5: memref<1x1x128xf32, #tpu.memory_space<vmem>>, %arg6: memref<1x1x128xf32, #tpu.memory_space<vmem>>) attributes {dimension_semantics = [#tpu.dimension_semantics<parallel>, #tpu.dimension_semantics<parallel>], iteration_bounds = array<i64: 2, 1>, scalar_prefetch = 0 : i64, scratch_operands = 0 : i64, tpu.core_type = #tpu.core_type<tc>, window_params = [{transform_indices = @transform_0, window_bounds = array<i64: 1, 256, 128>}, {pipeline_mode = #tpu.pipeline_mode<synchronous>, transform_indices = @transform_1, window_bounds = array<i64: 128, 128>}, {transform_indices = @transform_2, window_bounds = array<i64: 1, 256, 128>}, {transform_indices = @transform_3, window_bounds = array<i64: 1, 1, 128>}, {transform_indices = @transform_4, window_bounds = array<i64: 1, 1, 128>}]} {
    %c0 = arith.constant 0 : index
    %c0_0 = arith.constant 0 : index
    %c0_1 = arith.constant 0 : index
    %0 = vector.load %arg2[%c0, %c0_0, %c0_1] : memref<1x256x128xf32, #tpu.memory_space<vmem>>, vector<1x256x128xf32>
    %1 = vector.shape_cast %0 : vector<1x256x128xf32> to vector<256x128xf32>
    %c0_2 = arith.constant 0 : index
    %c0_3 = arith.constant 0 : index
    %2 = vector.load %arg3[%c0_2, %c0_3] : memref<128x128xf32, #tpu.memory_space<vmem>>, vector<128x128xf32>
    %cst = arith.constant dense<0.000000e+00> : vector<256x128xf32>
    %3 = tpu.matmul %1, %2, %cst {dimension_numbers = #tpu.dot_dimension_numbers<[1], [0], [0], [1], [0, 0, 1, 1], [], []>} : vector<256x128xf32>, vector<128x128xf32>, vector<256x128xf32> -> vector<256x128xf32>
    %c0_4 = arith.constant 0 : index
    %c0_5 = arith.constant 0 : index
    %c0_6 = arith.constant 0 : index
    %4 = vector.load %arg4[%c0_4, %c0_5, %c0_6] : memref<1x256x128xf32, #tpu.memory_space<vmem>>, vector<1x256x128xf32>
    %5 = vector.shape_cast %4 : vector<1x256x128xf32> to vector<256x128xf32>
    %6 = vector.shape_cast %3 : vector<256x128xf32> to vector<1x256x128xf32>
    tpu.vector_store %arg4[%c0_4, %c0_5, %c0_6], %6 {strides = array<i32>} : memref<1x256x128xf32, #tpu.memory_space<vmem>>, vector<1x256x128xf32>,
    %cst_7 = arith.constant 1.000000e+00 : f32
    %7 = vector.broadcast %cst_7 : f32 to vector<8x256xf32>
    %cst_8 = arith.constant dense<0.000000e+00> : vector<8x128xf32>
    %8 = tpu.matmul %7, %3, %cst_8 {dimension_numbers = #tpu.dot_dimension_numbers<[1], [0], [0], [1], [0, 0, 1, 1], [], []>} : vector<8x256xf32>, vector<256x128xf32>, vector<8x128xf32> -> vector<8x128xf32>
    %9 = vector.extract_strided_slice %8 {offsets = [0, 0], sizes = [1, 128], strides = [1, 1]} : vector<8x128xf32> to vector<1x128xf32>
    %10 = arith.mulf %3, %3 : vector<256x128xf32>
    %cst_9 = arith.constant dense<0.000000e+00> : vector<8x128xf32>
    %11 = tpu.matmul %7, %10, %cst_9 {dimension_numbers = #tpu.dot_dimension_numbers<[1], [0], [0], [1], [0, 0, 1, 1], [], []>} : vector<8x256xf32>, vector<256x128xf32>, vector<8x128xf32> -> vector<8x128xf32>
    %12 = vector.extract_strided_slice %11 {offsets = [0, 0], sizes = [1, 128], strides = [1, 1]} : vector<8x128xf32> to vector<1x128xf32>
    %c0_10 = arith.constant 0 : index
    %c0_11 = arith.constant 0 : index
    %c0_12 = arith.constant 0 : index
    %13 = vector.load %arg5[%c0_10, %c0_11, %c0_12] : memref<1x1x128xf32, #tpu.memory_space<vmem>>, vector<1x1x128xf32>
    %14 = vector.shape_cast %13 : vector<1x1x128xf32> to vector<1x128xf32>
    %15 = vector.shape_cast %9 : vector<1x128xf32> to vector<1x1x128xf32>
    tpu.vector_store %arg5[%c0_10, %c0_11, %c0_12], %15 {strides = array<i32>} : memref<1x1x128xf32, #tpu.memory_space<vmem>>, vector<1x1x128xf32>,
    %c0_13 = arith.constant 0 : index
    %c0_14 = arith.constant 0 : index
    %c0_15 = arith.constant 0 : index
    %16 = vector.load %arg6[%c0_13, %c0_14, %c0_15] : memref<1x1x128xf32, #tpu.memory_space<vmem>>, vector<1x1x128xf32>
    %17 = vector.shape_cast %16 : vector<1x1x128xf32> to vector<1x128xf32>
    %18 = vector.shape_cast %12 : vector<1x128xf32> to vector<1x1x128xf32>
    tpu.vector_store %arg6[%c0_13, %c0_14, %c0_15], %18 {strides = array<i32>} : memref<1x1x128xf32, #tpu.memory_space<vmem>>, vector<1x1x128xf32>,
    return
  }
  func.func @transform_0(%arg0: i32, %arg1: i32) -> (i32, i32, i32) {
    %c0_i32 = arith.constant 0 : i32
    %c0_i32_0 = arith.constant 0 : i32
    return %arg0, %arg1, %c0_i32 : i32, i32, i32
  }
  func.func @transform_1(%arg0: i32, %arg1: i32) -> (i32, i32) {
    %c0_i32 = arith.constant 0 : i32
    %c0_i32_0 = arith.constant 0 : i32
    %c0_i32_1 = arith.constant 0 : i32
    return %c0_i32, %c0_i32_0 : i32, i32
  }
  func.func @transform_2(%arg0: i32, %arg1: i32) -> (i32, i32, i32) {
    %c0_i32 = arith.constant 0 : i32
    %c0_i32_0 = arith.constant 0 : i32
    return %arg0, %arg1, %c0_i32 : i32, i32, i32
  }
  func.func @transform_3(%arg0: i32, %arg1: i32) -> (i32, i32, i32) {
    %c1_i32 = arith.constant 1 : i32
    %0 = arith.muli %arg0, %c1_i32 : i32
    %1 = arith.addi %0, %arg1 : i32
    %c0_i32 = arith.constant 0 : i32
    %c0_i32_0 = arith.constant 0 : i32
    %c0_i32_1 = arith.constant 0 : i32
    return %1, %c0_i32, %c0_i32_0 : i32, i32, i32
  }
  func.func @transform_4(%arg0: i32, %arg1: i32) -> (i32, i32, i32) {
    %c1_i32 = arith.constant 1 : i32
    %0 = arith.muli %arg0, %c1_i32 : i32
    %1 = arith.addi %0, %arg1 : i32
    %c0_i32 = arith.constant 0 : i32
    %c0_i32_0 = arith.constant 0 : i32
    %c0_i32_1 = arith.constant 0 : i32
    return %1, %c0_i32, %c0_i32_0 : i32, i32, i32
  }
}

module attributes {stable_mosaic.version = 11 : i64} {
  func.func @_bn_relu_conv1x1_stats_kernel(%arg0: i32, %arg1: i32, %arg2: memref<1x256x128xf32, #tpu.memory_space<vmem>>, %arg3: memref<1x128xf32, #tpu.memory_space<vmem>>, %arg4: memref<1x128xf32, #tpu.memory_space<vmem>>, %arg5: memref<256x1xf32, #tpu.memory_space<vmem>>, %arg6: memref<128x128xf32, #tpu.memory_space<vmem>>, %arg7: memref<1x256x128xf32, #tpu.memory_space<vmem>>, %arg8: memref<1x1x128xf32, #tpu.memory_space<vmem>>, %arg9: memref<1x1x128xf32, #tpu.memory_space<vmem>>) attributes {dimension_semantics = [#tpu.dimension_semantics<parallel>, #tpu.dimension_semantics<parallel>], iteration_bounds = array<i64: 2, 1>, scalar_prefetch = 0 : i64, scratch_operands = 0 : i64, tpu.core_type = #tpu.core_type<tc>, window_params = [{transform_indices = @transform_0, window_bounds = array<i64: 1, 256, 128>}, {pipeline_mode = #tpu.pipeline_mode<synchronous>, transform_indices = @transform_1, window_bounds = array<i64: 1, 128>}, {pipeline_mode = #tpu.pipeline_mode<synchronous>, transform_indices = @transform_2, window_bounds = array<i64: 1, 128>}, {transform_indices = @transform_3, window_bounds = array<i64: 256, 1>}, {pipeline_mode = #tpu.pipeline_mode<synchronous>, transform_indices = @transform_4, window_bounds = array<i64: 128, 128>}, {transform_indices = @transform_5, window_bounds = array<i64: 1, 256, 128>}, {transform_indices = @transform_6, window_bounds = array<i64: 1, 1, 128>}, {transform_indices = @transform_7, window_bounds = array<i64: 1, 1, 128>}]} {
    %c0 = arith.constant 0 : index
    %c0_0 = arith.constant 0 : index
    %c0_1 = arith.constant 0 : index
    %0 = vector.load %arg2[%c0, %c0_0, %c0_1] : memref<1x256x128xf32, #tpu.memory_space<vmem>>, vector<1x256x128xf32>
    %1 = vector.shape_cast %0 : vector<1x256x128xf32> to vector<256x128xf32>
    %c0_2 = arith.constant 0 : index
    %c0_3 = arith.constant 0 : index
    %2 = vector.load %arg3[%c0_2, %c0_3] : memref<1x128xf32, #tpu.memory_space<vmem>>, vector<1x128xf32>
    %3 = vector.broadcast %2 : vector<1x128xf32> to vector<256x128xf32>
    %4 = arith.mulf %1, %3 : vector<256x128xf32>
    %c0_4 = arith.constant 0 : index
    %c0_5 = arith.constant 0 : index
    %5 = vector.load %arg4[%c0_4, %c0_5] : memref<1x128xf32, #tpu.memory_space<vmem>>, vector<1x128xf32>
    %6 = vector.broadcast %5 : vector<1x128xf32> to vector<256x128xf32>
    %7 = arith.addf %4, %6 : vector<256x128xf32>
    %cst = arith.constant 0.000000e+00 : f32
    %8 = vector.broadcast %cst : f32 to vector<256x128xf32>
    %9 = arith.maximumf %7, %8 : vector<256x128xf32>
    %c0_6 = arith.constant 0 : index
    %c0_7 = arith.constant 0 : index
    %10 = vector.load %arg5[%c0_6, %c0_7] : memref<256x1xf32, #tpu.memory_space<vmem>>, vector<256x1xf32>
    %11 = vector.broadcast %10 : vector<256x1xf32> to vector<256x128xf32>
    %12 = arith.mulf %9, %11 : vector<256x128xf32>
    %c0_8 = arith.constant 0 : index
    %c0_9 = arith.constant 0 : index
    %13 = vector.load %arg6[%c0_8, %c0_9] : memref<128x128xf32, #tpu.memory_space<vmem>>, vector<128x128xf32>
    %cst_10 = arith.constant dense<0.000000e+00> : vector<256x128xf32>
    %14 = tpu.matmul %12, %13, %cst_10 {dimension_numbers = #tpu.dot_dimension_numbers<[1], [0], [0], [1], [0, 0, 1, 1], [], []>} : vector<256x128xf32>, vector<128x128xf32>, vector<256x128xf32> -> vector<256x128xf32>
    %c0_11 = arith.constant 0 : index
    %c0_12 = arith.constant 0 : index
    %c0_13 = arith.constant 0 : index
    %15 = vector.load %arg7[%c0_11, %c0_12, %c0_13] : memref<1x256x128xf32, #tpu.memory_space<vmem>>, vector<1x256x128xf32>
    %16 = vector.shape_cast %15 : vector<1x256x128xf32> to vector<256x128xf32>
    %17 = vector.shape_cast %14 : vector<256x128xf32> to vector<1x256x128xf32>
    tpu.vector_store %arg7[%c0_11, %c0_12, %c0_13], %17 {strides = array<i32>} : memref<1x256x128xf32, #tpu.memory_space<vmem>>, vector<1x256x128xf32>,
    %cst_14 = arith.constant 1.000000e+00 : f32
    %18 = vector.broadcast %cst_14 : f32 to vector<8x256xf32>
    %cst_15 = arith.constant dense<0.000000e+00> : vector<8x128xf32>
    %19 = tpu.matmul %18, %14, %cst_15 {dimension_numbers = #tpu.dot_dimension_numbers<[1], [0], [0], [1], [0, 0, 1, 1], [], []>} : vector<8x256xf32>, vector<256x128xf32>, vector<8x128xf32> -> vector<8x128xf32>
    %20 = vector.extract_strided_slice %19 {offsets = [0, 0], sizes = [1, 128], strides = [1, 1]} : vector<8x128xf32> to vector<1x128xf32>
    %21 = arith.mulf %14, %14 : vector<256x128xf32>
    %cst_16 = arith.constant dense<0.000000e+00> : vector<8x128xf32>
    %22 = tpu.matmul %18, %21, %cst_16 {dimension_numbers = #tpu.dot_dimension_numbers<[1], [0], [0], [1], [0, 0, 1, 1], [], []>} : vector<8x256xf32>, vector<256x128xf32>, vector<8x128xf32> -> vector<8x128xf32>
    %23 = vector.extract_strided_slice %22 {offsets = [0, 0], sizes = [1, 128], strides = [1, 1]} : vector<8x128xf32> to vector<1x128xf32>
    %c0_17 = arith.constant 0 : index
    %c0_18 = arith.constant 0 : index
    %c0_19 = arith.constant 0 : index
    %24 = vector.load %arg8[%c0_17, %c0_18, %c0_19] : memref<1x1x128xf32, #tpu.memory_space<vmem>>, vector<1x1x128xf32>
    %25 = vector.shape_cast %24 : vector<1x1x128xf32> to vector<1x128xf32>
    %26 = vector.shape_cast %20 : vector<1x128xf32> to vector<1x1x128xf32>
    tpu.vector_store %arg8[%c0_17, %c0_18, %c0_19], %26 {strides = array<i32>} : memref<1x1x128xf32, #tpu.memory_space<vmem>>, vector<1x1x128xf32>,
    %c0_20 = arith.constant 0 : index
    %c0_21 = arith.constant 0 : index
    %c0_22 = arith.constant 0 : index
    %27 = vector.load %arg9[%c0_20, %c0_21, %c0_22] : memref<1x1x128xf32, #tpu.memory_space<vmem>>, vector<1x1x128xf32>
    %28 = vector.shape_cast %27 : vector<1x1x128xf32> to vector<1x128xf32>
    %29 = vector.shape_cast %23 : vector<1x128xf32> to vector<1x1x128xf32>
    tpu.vector_store %arg9[%c0_20, %c0_21, %c0_22], %29 {strides = array<i32>} : memref<1x1x128xf32, #tpu.memory_space<vmem>>, vector<1x1x128xf32>,
    return
  }
  func.func @transform_0(%arg0: i32, %arg1: i32) -> (i32, i32, i32) {
    %c0_i32 = arith.constant 0 : i32
    %c0_i32_0 = arith.constant 0 : i32
    return %arg0, %arg1, %c0_i32 : i32, i32, i32
  }
  func.func @transform_1(%arg0: i32, %arg1: i32) -> (i32, i32) {
    %c0_i32 = arith.constant 0 : i32
    %c0_i32_0 = arith.constant 0 : i32
    %c0_i32_1 = arith.constant 0 : i32
    return %c0_i32, %c0_i32_0 : i32, i32
  }
  func.func @transform_2(%arg0: i32, %arg1: i32) -> (i32, i32) {
    %c0_i32 = arith.constant 0 : i32
    %c0_i32_0 = arith.constant 0 : i32
    %c0_i32_1 = arith.constant 0 : i32
    return %c0_i32, %c0_i32_0 : i32, i32
  }
  func.func @transform_3(%arg0: i32, %arg1: i32) -> (i32, i32) {
    %c0_i32 = arith.constant 0 : i32
    %c0_i32_0 = arith.constant 0 : i32
    return %arg1, %c0_i32 : i32, i32
  }
  func.func @transform_4(%arg0: i32, %arg1: i32) -> (i32, i32) {
    %c0_i32 = arith.constant 0 : i32
    %c0_i32_0 = arith.constant 0 : i32
    %c0_i32_1 = arith.constant 0 : i32
    return %c0_i32, %c0_i32_0 : i32, i32
  }
  func.func @transform_5(%arg0: i32, %arg1: i32) -> (i32, i32, i32) {
    %c0_i32 = arith.constant 0 : i32
    %c0_i32_0 = arith.constant 0 : i32
    return %arg0, %arg1, %c0_i32 : i32, i32, i32
  }
  func.func @transform_6(%arg0: i32, %arg1: i32) -> (i32, i32, i32) {
    %c1_i32 = arith.constant 1 : i32
    %0 = arith.muli %arg0, %c1_i32 : i32
    %1 = arith.addi %0, %arg1 : i32
    %c0_i32 = arith.constant 0 : i32
    %c0_i32_0 = arith.constant 0 : i32
    %c0_i32_1 = arith.constant 0 : i32
    return %1, %c0_i32, %c0_i32_0 : i32, i32, i32
  }
  func.func @transform_7(%arg0: i32, %arg1: i32) -> (i32, i32, i32) {
    %c1_i32 = arith.constant 1 : i32
    %0 = arith.muli %arg0, %c1_i32 : i32
    %1 = arith.addi %0, %arg1 : i32
    %c0_i32 = arith.constant 0 : i32
    %c0_i32_0 = arith.constant 0 : i32
    %c0_i32_1 = arith.constant 0 : i32
    return %1, %c0_i32, %c0_i32_0 : i32, i32, i32
  }
}

module attributes {stable_mosaic.version = 11 : i64} {
  func.func @_bn_relu_conv3x3_stats_kernel(%arg0: i32, %arg1: memref<1x256x128xf32, #tpu.memory_space<vmem>>, %arg2: memref<9x256x1xf32, #tpu.memory_space<vmem>>, %arg3: memref<1x128xf32, #tpu.memory_space<vmem>>, %arg4: memref<1x128xf32, #tpu.memory_space<vmem>>, %arg5: memref<1152x128xf32, #tpu.memory_space<vmem>>, %arg6: memref<1x256x128xf32, #tpu.memory_space<vmem>>, %arg7: memref<1x1x128xf32, #tpu.memory_space<vmem>>, %arg8: memref<1x1x128xf32, #tpu.memory_space<vmem>>) attributes {dimension_semantics = [#tpu.dimension_semantics<parallel>], iteration_bounds = array<i64: 2>, scalar_prefetch = 0 : i64, scratch_operands = 0 : i64, tpu.core_type = #tpu.core_type<tc>, window_params = [{transform_indices = @transform_0, window_bounds = array<i64: 1, 256, 128>}, {pipeline_mode = #tpu.pipeline_mode<synchronous>, transform_indices = @transform_1, window_bounds = array<i64: 9, 256, 1>}, {pipeline_mode = #tpu.pipeline_mode<synchronous>, transform_indices = @transform_2, window_bounds = array<i64: 1, 128>}, {pipeline_mode = #tpu.pipeline_mode<synchronous>, transform_indices = @transform_3, window_bounds = array<i64: 1, 128>}, {pipeline_mode = #tpu.pipeline_mode<synchronous>, transform_indices = @transform_4, window_bounds = array<i64: 1152, 128>}, {transform_indices = @transform_5, window_bounds = array<i64: 1, 256, 128>}, {transform_indices = @transform_6, window_bounds = array<i64: 1, 1, 128>}, {transform_indices = @transform_7, window_bounds = array<i64: 1, 1, 128>}]} {
    %c0 = arith.constant 0 : index
    %c0_0 = arith.constant 0 : index
    %c0_1 = arith.constant 0 : index
    %0 = vector.load %arg1[%c0, %c0_0, %c0_1] : memref<1x256x128xf32, #tpu.memory_space<vmem>>, vector<1x256x128xf32>
    %1 = vector.shape_cast %0 : vector<1x256x128xf32> to vector<256x128xf32>
    %c0_2 = arith.constant 0 : index
    %c0_3 = arith.constant 0 : index
    %2 = vector.load %arg3[%c0_2, %c0_3] : memref<1x128xf32, #tpu.memory_space<vmem>>, vector<1x128xf32>
    %3 = vector.broadcast %2 : vector<1x128xf32> to vector<256x128xf32>
    %4 = arith.mulf %1, %3 : vector<256x128xf32>
    %c0_4 = arith.constant 0 : index
    %c0_5 = arith.constant 0 : index
    %5 = vector.load %arg4[%c0_4, %c0_5] : memref<1x128xf32, #tpu.memory_space<vmem>>, vector<1x128xf32>
    %6 = vector.broadcast %5 : vector<1x128xf32> to vector<256x128xf32>
    %7 = arith.addf %4, %6 : vector<256x128xf32>
    %cst = arith.constant 0.000000e+00 : f32
    %8 = vector.broadcast %cst : f32 to vector<256x128xf32>
    %9 = arith.maximumf %7, %8 : vector<256x128xf32>
    %c17_i32 = arith.constant 17 : i32
    %10 = tpu.dynamic_rotate %9 by %c17_i32 dim 0 : vector<256x128xf32>, i32 -> vector<256x128xf32>
    %c0_6 = arith.constant 0 : index
    %c0_7 = arith.constant 0 : index
    %c0_8 = arith.constant 0 : index
    %11 = vector.load %arg2[%c0_6, %c0_7, %c0_8] : memref<9x256x1xf32, #tpu.memory_space<vmem>>, vector<1x256x1xf32>
    %12 = vector.shape_cast %11 : vector<1x256x1xf32> to vector<256x1xf32>
    %13 = vector.broadcast %12 : vector<256x1xf32> to vector<256x128xf32>
    %14 = arith.mulf %10, %13 : vector<256x128xf32>
    %c16_i32 = arith.constant 16 : i32
    %15 = tpu.dynamic_rotate %9 by %c16_i32 dim 0 : vector<256x128xf32>, i32 -> vector<256x128xf32>
    %c1 = arith.constant 1 : index
    %c0_9 = arith.constant 0 : index
    %c0_10 = arith.constant 0 : index
    %16 = vector.load %arg2[%c1, %c0_9, %c0_10] : memref<9x256x1xf32, #tpu.memory_space<vmem>>, vector<1x256x1xf32>
    %17 = vector.shape_cast %16 : vector<1x256x1xf32> to vector<256x1xf32>
    %18 = vector.broadcast %17 : vector<256x1xf32> to vector<256x128xf32>
    %19 = arith.mulf %15, %18 : vector<256x128xf32>
    %c15_i32 = arith.constant 15 : i32
    %20 = tpu.dynamic_rotate %9 by %c15_i32 dim 0 : vector<256x128xf32>, i32 -> vector<256x128xf32>
    %c2 = arith.constant 2 : index
    %c0_11 = arith.constant 0 : index
    %c0_12 = arith.constant 0 : index
    %21 = vector.load %arg2[%c2, %c0_11, %c0_12] : memref<9x256x1xf32, #tpu.memory_space<vmem>>, vector<1x256x1xf32>
    %22 = vector.shape_cast %21 : vector<1x256x1xf32> to vector<256x1xf32>
    %23 = vector.broadcast %22 : vector<256x1xf32> to vector<256x128xf32>
    %24 = arith.mulf %20, %23 : vector<256x128xf32>
    %c1_i32 = arith.constant 1 : i32
    %25 = tpu.dynamic_rotate %9 by %c1_i32 dim 0 : vector<256x128xf32>, i32 -> vector<256x128xf32>
    %c3 = arith.constant 3 : index
    %c0_13 = arith.constant 0 : index
    %c0_14 = arith.constant 0 : index
    %26 = vector.load %arg2[%c3, %c0_13, %c0_14] : memref<9x256x1xf32, #tpu.memory_space<vmem>>, vector<1x256x1xf32>
    %27 = vector.shape_cast %26 : vector<1x256x1xf32> to vector<256x1xf32>
    %28 = vector.broadcast %27 : vector<256x1xf32> to vector<256x128xf32>
    %29 = arith.mulf %25, %28 : vector<256x128xf32>
    %c255_i32 = arith.constant 255 : i32
    %30 = tpu.dynamic_rotate %9 by %c255_i32 dim 0 : vector<256x128xf32>, i32 -> vector<256x128xf32>
    %c5 = arith.constant 5 : index
    %c0_15 = arith.constant 0 : index
    %c0_16 = arith.constant 0 : index
    %31 = vector.load %arg2[%c5, %c0_15, %c0_16] : memref<9x256x1xf32, #tpu.memory_space<vmem>>, vector<1x256x1xf32>
    %32 = vector.shape_cast %31 : vector<1x256x1xf32> to vector<256x1xf32>
    %33 = vector.broadcast %32 : vector<256x1xf32> to vector<256x128xf32>
    %34 = arith.mulf %30, %33 : vector<256x128xf32>
    %c241_i32 = arith.constant 241 : i32
    %35 = tpu.dynamic_rotate %9 by %c241_i32 dim 0 : vector<256x128xf32>, i32 -> vector<256x128xf32>
    %c6 = arith.constant 6 : index
    %c0_17 = arith.constant 0 : index
    %c0_18 = arith.constant 0 : index
    %36 = vector.load %arg2[%c6, %c0_17, %c0_18] : memref<9x256x1xf32, #tpu.memory_space<vmem>>, vector<1x256x1xf32>
    %37 = vector.shape_cast %36 : vector<1x256x1xf32> to vector<256x1xf32>
    %38 = vector.broadcast %37 : vector<256x1xf32> to vector<256x128xf32>
    %39 = arith.mulf %35, %38 : vector<256x128xf32>
    %c240_i32 = arith.constant 240 : i32
    %40 = tpu.dynamic_rotate %9 by %c240_i32 dim 0 : vector<256x128xf32>, i32 -> vector<256x128xf32>
    %c7 = arith.constant 7 : index
    %c0_19 = arith.constant 0 : index
    %c0_20 = arith.constant 0 : index
    %41 = vector.load %arg2[%c7, %c0_19, %c0_20] : memref<9x256x1xf32, #tpu.memory_space<vmem>>, vector<1x256x1xf32>
    %42 = vector.shape_cast %41 : vector<1x256x1xf32> to vector<256x1xf32>
    %43 = vector.broadcast %42 : vector<256x1xf32> to vector<256x128xf32>
    %44 = arith.mulf %40, %43 : vector<256x128xf32>
    %c239_i32 = arith.constant 239 : i32
    %45 = tpu.dynamic_rotate %9 by %c239_i32 dim 0 : vector<256x128xf32>, i32 -> vector<256x128xf32>
    %c8 = arith.constant 8 : index
    %c0_21 = arith.constant 0 : index
    %c0_22 = arith.constant 0 : index
    %46 = vector.load %arg2[%c8, %c0_21, %c0_22] : memref<9x256x1xf32, #tpu.memory_space<vmem>>, vector<1x256x1xf32>
    %47 = vector.shape_cast %46 : vector<1x256x1xf32> to vector<256x1xf32>
    %48 = vector.broadcast %47 : vector<256x1xf32> to vector<256x128xf32>
    %49 = arith.mulf %45, %48 : vector<256x128xf32>
    %50 = tpu.concatenate %14, %19, %24, %29, %9, %34, %39, %44, %49 in 1 : vector<256x128xf32>, vector<256x128xf32>, vector<256x128xf32>, vector<256x128xf32>, vector<256x128xf32>, vector<256x128xf32>, vector<256x128xf32>, vector<256x128xf32>, vector<256x128xf32> -> vector<256x1152xf32>
    %c0_23 = arith.constant 0 : index
    %c0_24 = arith.constant 0 : index
    %51 = vector.load %arg5[%c0_23, %c0_24] : memref<1152x128xf32, #tpu.memory_space<vmem>>, vector<1152x128xf32>
    %cst_25 = arith.constant dense<0.000000e+00> : vector<256x128xf32>
    %52 = tpu.matmul %50, %51, %cst_25 {dimension_numbers = #tpu.dot_dimension_numbers<[1], [0], [0], [1], [0, 0, 1, 1], [], []>} : vector<256x1152xf32>, vector<1152x128xf32>, vector<256x128xf32> -> vector<256x128xf32>
    %c0_26 = arith.constant 0 : index
    %c0_27 = arith.constant 0 : index
    %c0_28 = arith.constant 0 : index
    %53 = vector.load %arg6[%c0_26, %c0_27, %c0_28] : memref<1x256x128xf32, #tpu.memory_space<vmem>>, vector<1x256x128xf32>
    %54 = vector.shape_cast %53 : vector<1x256x128xf32> to vector<256x128xf32>
    %55 = vector.shape_cast %52 : vector<256x128xf32> to vector<1x256x128xf32>
    tpu.vector_store %arg6[%c0_26, %c0_27, %c0_28], %55 {strides = array<i32>} : memref<1x256x128xf32, #tpu.memory_space<vmem>>, vector<1x256x128xf32>,
    %cst_29 = arith.constant 1.000000e+00 : f32
    %56 = vector.broadcast %cst_29 : f32 to vector<8x256xf32>
    %cst_30 = arith.constant dense<0.000000e+00> : vector<8x128xf32>
    %57 = tpu.matmul %56, %52, %cst_30 {dimension_numbers = #tpu.dot_dimension_numbers<[1], [0], [0], [1], [0, 0, 1, 1], [], []>} : vector<8x256xf32>, vector<256x128xf32>, vector<8x128xf32> -> vector<8x128xf32>
    %58 = vector.extract_strided_slice %57 {offsets = [0, 0], sizes = [1, 128], strides = [1, 1]} : vector<8x128xf32> to vector<1x128xf32>
    %59 = arith.mulf %52, %52 : vector<256x128xf32>
    %cst_31 = arith.constant dense<0.000000e+00> : vector<8x128xf32>
    %60 = tpu.matmul %56, %59, %cst_31 {dimension_numbers = #tpu.dot_dimension_numbers<[1], [0], [0], [1], [0, 0, 1, 1], [], []>} : vector<8x256xf32>, vector<256x128xf32>, vector<8x128xf32> -> vector<8x128xf32>
    %61 = vector.extract_strided_slice %60 {offsets = [0, 0], sizes = [1, 128], strides = [1, 1]} : vector<8x128xf32> to vector<1x128xf32>
    %c0_32 = arith.constant 0 : index
    %c0_33 = arith.constant 0 : index
    %c0_34 = arith.constant 0 : index
    %62 = vector.load %arg7[%c0_32, %c0_33, %c0_34] : memref<1x1x128xf32, #tpu.memory_space<vmem>>, vector<1x1x128xf32>
    %63 = vector.shape_cast %62 : vector<1x1x128xf32> to vector<1x128xf32>
    %64 = vector.shape_cast %58 : vector<1x128xf32> to vector<1x1x128xf32>
    tpu.vector_store %arg7[%c0_32, %c0_33, %c0_34], %64 {strides = array<i32>} : memref<1x1x128xf32, #tpu.memory_space<vmem>>, vector<1x1x128xf32>,
    %c0_35 = arith.constant 0 : index
    %c0_36 = arith.constant 0 : index
    %c0_37 = arith.constant 0 : index
    %65 = vector.load %arg8[%c0_35, %c0_36, %c0_37] : memref<1x1x128xf32, #tpu.memory_space<vmem>>, vector<1x1x128xf32>
    %66 = vector.shape_cast %65 : vector<1x1x128xf32> to vector<1x128xf32>
    %67 = vector.shape_cast %61 : vector<1x128xf32> to vector<1x1x128xf32>
    tpu.vector_store %arg8[%c0_35, %c0_36, %c0_37], %67 {strides = array<i32>} : memref<1x1x128xf32, #tpu.memory_space<vmem>>, vector<1x1x128xf32>,
    return
  }
  func.func @transform_0(%arg0: i32) -> (i32, i32, i32) {
    %c0_i32 = arith.constant 0 : i32
    %c0_i32_0 = arith.constant 0 : i32
    %c0_i32_1 = arith.constant 0 : i32
    return %arg0, %c0_i32, %c0_i32_0 : i32, i32, i32
  }
  func.func @transform_1(%arg0: i32) -> (i32, i32, i32) {
    %c0_i32 = arith.constant 0 : i32
    %c0_i32_0 = arith.constant 0 : i32
    %c0_i32_1 = arith.constant 0 : i32
    %c0_i32_2 = arith.constant 0 : i32
    return %c0_i32, %c0_i32_0, %c0_i32_1 : i32, i32, i32
  }
  func.func @transform_2(%arg0: i32) -> (i32, i32) {
    %c0_i32 = arith.constant 0 : i32
    %c0_i32_0 = arith.constant 0 : i32
    %c0_i32_1 = arith.constant 0 : i32
    return %c0_i32, %c0_i32_0 : i32, i32
  }
  func.func @transform_3(%arg0: i32) -> (i32, i32) {
    %c0_i32 = arith.constant 0 : i32
    %c0_i32_0 = arith.constant 0 : i32
    %c0_i32_1 = arith.constant 0 : i32
    return %c0_i32, %c0_i32_0 : i32, i32
  }
  func.func @transform_4(%arg0: i32) -> (i32, i32) {
    %c0_i32 = arith.constant 0 : i32
    %c0_i32_0 = arith.constant 0 : i32
    %c0_i32_1 = arith.constant 0 : i32
    return %c0_i32, %c0_i32_0 : i32, i32
  }
  func.func @transform_5(%arg0: i32) -> (i32, i32, i32) {
    %c0_i32 = arith.constant 0 : i32
    %c0_i32_0 = arith.constant 0 : i32
    %c0_i32_1 = arith.constant 0 : i32
    return %arg0, %c0_i32, %c0_i32_0 : i32, i32, i32
  }
  func.func @transform_6(%arg0: i32) -> (i32, i32, i32) {
    %c0_i32 = arith.constant 0 : i32
    %c0_i32_0 = arith.constant 0 : i32
    %c0_i32_1 = arith.constant 0 : i32
    return %arg0, %c0_i32, %c0_i32_0 : i32, i32, i32
  }
  func.func @transform_7(%arg0: i32) -> (i32, i32, i32) {
    %c0_i32 = arith.constant 0 : i32
    %c0_i32_0 = arith.constant 0 : i32
    %c0_i32_1 = arith.constant 0 : i32
    return %arg0, %c0_i32, %c0_i32_0 : i32, i32, i32
  }
}

module attributes {stable_mosaic.version = 11 : i64} {
  func.func @_bn_residual_relu_kernel(%arg0: i32, %arg1: i32, %arg2: memref<1x256x128xf32, #tpu.memory_space<vmem>>, %arg3: memref<1x128xf32, #tpu.memory_space<vmem>>, %arg4: memref<1x128xf32, #tpu.memory_space<vmem>>, %arg5: memref<1x256x128xf32, #tpu.memory_space<vmem>>, %arg6: memref<1x256x128xf32, #tpu.memory_space<vmem>>) attributes {dimension_semantics = [#tpu.dimension_semantics<parallel>, #tpu.dimension_semantics<parallel>], iteration_bounds = array<i64: 2, 1>, scalar_prefetch = 0 : i64, scratch_operands = 0 : i64, tpu.core_type = #tpu.core_type<tc>, window_params = [{transform_indices = @transform_0, window_bounds = array<i64: 1, 256, 128>}, {pipeline_mode = #tpu.pipeline_mode<synchronous>, transform_indices = @transform_1, window_bounds = array<i64: 1, 128>}, {pipeline_mode = #tpu.pipeline_mode<synchronous>, transform_indices = @transform_2, window_bounds = array<i64: 1, 128>}, {transform_indices = @transform_3, window_bounds = array<i64: 1, 256, 128>}, {transform_indices = @transform_4, window_bounds = array<i64: 1, 256, 128>}]} {
    %c0 = arith.constant 0 : index
    %c0_0 = arith.constant 0 : index
    %c0_1 = arith.constant 0 : index
    %0 = vector.load %arg2[%c0, %c0_0, %c0_1] : memref<1x256x128xf32, #tpu.memory_space<vmem>>, vector<1x256x128xf32>
    %1 = vector.shape_cast %0 : vector<1x256x128xf32> to vector<256x128xf32>
    %c0_2 = arith.constant 0 : index
    %c0_3 = arith.constant 0 : index
    %c0_4 = arith.constant 0 : index
    %2 = vector.load %arg5[%c0_2, %c0_3, %c0_4] : memref<1x256x128xf32, #tpu.memory_space<vmem>>, vector<1x256x128xf32>
    %3 = vector.shape_cast %2 : vector<1x256x128xf32> to vector<256x128xf32>
    %c0_5 = arith.constant 0 : index
    %c0_6 = arith.constant 0 : index
    %4 = vector.load %arg3[%c0_5, %c0_6] : memref<1x128xf32, #tpu.memory_space<vmem>>, vector<1x128xf32>
    %5 = vector.broadcast %4 : vector<1x128xf32> to vector<256x128xf32>
    %6 = arith.mulf %1, %5 : vector<256x128xf32>
    %c0_7 = arith.constant 0 : index
    %c0_8 = arith.constant 0 : index
    %7 = vector.load %arg4[%c0_7, %c0_8] : memref<1x128xf32, #tpu.memory_space<vmem>>, vector<1x128xf32>
    %8 = vector.broadcast %7 : vector<1x128xf32> to vector<256x128xf32>
    %9 = arith.addf %6, %8 : vector<256x128xf32>
    %10 = arith.addf %9, %3 : vector<256x128xf32>
    %cst = arith.constant 0.000000e+00 : f32
    %11 = vector.broadcast %cst : f32 to vector<256x128xf32>
    %12 = arith.maximumf %10, %11 : vector<256x128xf32>
    %c0_9 = arith.constant 0 : index
    %c0_10 = arith.constant 0 : index
    %c0_11 = arith.constant 0 : index
    %13 = vector.load %arg6[%c0_9, %c0_10, %c0_11] : memref<1x256x128xf32, #tpu.memory_space<vmem>>, vector<1x256x128xf32>
    %14 = vector.shape_cast %13 : vector<1x256x128xf32> to vector<256x128xf32>
    %15 = vector.shape_cast %12 : vector<256x128xf32> to vector<1x256x128xf32>
    tpu.vector_store %arg6[%c0_9, %c0_10, %c0_11], %15 {strides = array<i32>} : memref<1x256x128xf32, #tpu.memory_space<vmem>>, vector<1x256x128xf32>,
    return
  }
  func.func @transform_0(%arg0: i32, %arg1: i32) -> (i32, i32, i32) {
    %c0_i32 = arith.constant 0 : i32
    %c0_i32_0 = arith.constant 0 : i32
    return %arg0, %arg1, %c0_i32 : i32, i32, i32
  }
  func.func @transform_1(%arg0: i32, %arg1: i32) -> (i32, i32) {
    %c0_i32 = arith.constant 0 : i32
    %c0_i32_0 = arith.constant 0 : i32
    %c0_i32_1 = arith.constant 0 : i32
    return %c0_i32, %c0_i32_0 : i32, i32
  }
  func.func @transform_2(%arg0: i32, %arg1: i32) -> (i32, i32) {
    %c0_i32 = arith.constant 0 : i32
    %c0_i32_0 = arith.constant 0 : i32
    %c0_i32_1 = arith.constant 0 : i32
    return %c0_i32, %c0_i32_0 : i32, i32
  }
  func.func @transform_3(%arg0: i32, %arg1: i32) -> (i32, i32, i32) {
    %c0_i32 = arith.constant 0 : i32
    %c0_i32_0 = arith.constant 0 : i32
    return %arg0, %arg1, %c0_i32 : i32, i32, i32
  }
  func.func @transform_4(%arg0: i32, %arg1: i32) -> (i32, i32, i32) {
    %c0_i32 = arith.constant 0 : i32
    %c0_i32_0 = arith.constant 0 : i32
    return %arg0, %arg1, %c0_i32 : i32, i32, i32
  }
}

</mosaic_0001>

<bundles_post_ra>
// kernel: tpu_custom_call.1
= control target key start
LH: loop header
LB: loop body
LE: loop exit
PB: predicated region body
PF: predicated region fallthrough
CT: control target
= control target key end

     0   :  { %6 = vsyncpa [#allocation3], 0  ;;  %s125_s0 = inlined_call_operand.hbm [shape: f32[8,128], index: 0, kind: input, shape index: {}]   ;;  %s126_s1 = inlined_call_operand.hbm [shape: f32[8,128], index: 1, kind: output, shape index: {}]  }
   0x1   :  { %7 = vsyncpa [#allocation4], 0  ;;  %s89_s6 = smov [#allocation2]   ;;  %s41_s10 = scalar_lea.hbm %s125_s0, 128 }
   0x2   :  { %s14_s7 = sshll.u32 %s89_s6, 4  ;;  %p42_p0 = scmp.ne.s32.totalorder %s125_s0, %s41_s10  ;;  %s15_s7 = int_to_ptr.vmem [resolvable:$true] %s14_s7 }
   0x3   :  { %p45_p1 = scmp.lt.u32.totalorder %s41_s10, %s125_s0 }
   0x5   :  { %p47_p2 = pnand %p45_p1, %p42_p0 }
   0x7   :  { %50 = shalt.err (!%p47_p2)
}
   0x8   :  { %s51_s15 = scalar_lea.vmem %s15_s7, 128  ;;  %p56_p4 = scmp.lt.s32.totalorder %s15_s7, %s15_s7 }
   0x9   :  { %p52_p3 = scmp.ne.s32.totalorder %s15_s7, %s51_s15  ;;  %p57_p5 = scmp.lt.s32.totalorder %s51_s15, %s51_s15 }
   0xb   :  { %p58_p6 = por %p57_p5, %p56_p4 }
   0xd   :  { %p59_p7 = pnand %p58_p6, %p52_p3 }
   0xf   :  { %62 = shalt.err (!%p59_p7)
}
  0x10   :  { %17 = dma.hbm_to_vmem [thread:$0]  %s125_s0, 128, %s15_s7, [#allocation3]  }
  0x11   :  { %85 = dma.done.wait [#allocation3], 128  }
  0x12   :  { %86 = vsyncadd [#allocation3], 4294967168  ;;  %s90_s18 = smov [#allocation5]   ;;  %v21_v0 = vld [vmem:[#allocation2] sm:$0xff] }
  0x13   :  { %s30_s19 = sshll.u32 %s90_s18, 4  ;;  %v22_v1 = vadd.f32 1.0, %v21_v0  ;;  %s31_s19 = int_to_ptr.vmem [resolvable:$true] %s30_s19 }
  0x14   :  { %s63_s20 = scalar_lea.vmem %s31_s19, 128  ;;  %p68_p9 = scmp.lt.s32.totalorder %s31_s19, %s31_s19 }
  0x15   :  { %23 = vst [vmem:[#allocation5] sm:$0xff] %v22_v1  ;;  %p64_p8 = scmp.ne.s32.totalorder %s31_s19, %s63_s20  ;;  %p69_p10 = scmp.lt.s32.totalorder %s63_s20, %s63_s20 }
  0x17   :  { %p70_p11 = por %p69_p10, %p68_p9 }
  0x19   :  { %p71_p12 = pnand %p70_p11, %p64_p8 }
  0x1b   :  { %74 = shalt.err (!%p71_p12)
}
  0x1c   :  { %s75_s23 = scalar_lea.hbm %s126_s1, 128 }
  0x1d   :  { %p76_p13 = scmp.ne.s32.totalorder %s126_s1, %s75_s23  ;;  %p79_p0 = scmp.lt.u32.totalorder %s75_s23, %s126_s1 }
  0x1f   :  { %p81_p1 = pnand %p79_p0, %p76_p13 }
  0x21   :  { %84 = shalt.err (!%p81_p1)
}
  0x22   :  { %33 = dma.vmem_to_hbm [thread:$0]  %s31_s19, 128, %s126_s1, [#allocation4]  }
  0x23   :  { %87 = dma.done.wait [#allocation4], 128  }
  0x24   :  { %88 = vsyncadd [#allocation4], 4294967168 }
  0x25   :  { %37 = vsyncpa [#allocation3], 1 }
  0x26   :  { %38 = vsyncpa [#allocation4], 1 }

// kernel: bottleneck_pallas.4
= control target key start
LH: loop header
LB: loop body
LE: loop exit
PB: predicated region body
PF: predicated region fallthrough
CT: control target
= control target key end

     0   :  { %s1268_s15 = smov 0   ;;  %s1270_s16 = smov 0   ;;  %s1649_s0 = inlined_call_operand.vmem [shape: f32[2,256,128], index: 0, kind: input, shape index: {}]   ;;  %s1650_s1 = inlined_call_operand.vmem [shape: f32[128,128], index: 1, kind: input, shape index: {}]   ;;  %s1651_s2 = inlined_call_operand.vmem [shape: f32[2,256,128], index: 2, kind: output, shape index: {0}]   ;;  %s1652_s3 = inlined_call_operand.vmem [shape: f32[2,1,128], index: 3, kind: output, shape index: {1}]   ;;  %s1653_s4 = inlined_call_operand.vmem [shape: f32[2,1,128], index: 4, kind: output, shape index: {2}]  }
   0x1   :  { %s1272_s17 = smov 0  }
   0x2 LB: > { %s27_s18 = sadd.s32 1, %s1236_s16  ;;  %p890_p0 = scmp.ge.s32.totalorder %s1240_s17, 1  ;;  %s1240_s17 = sphi %s1272_s17, %s15_s17   ;;  %s1236_s16 = sphi %s1270_s16, %s1655_s16   ;;  %s1232_s15 = sphi %s1268_s15, %s1654_s15  }
   0x3   : > { %p29_p1 = scmp.ge.s32.totalorder %s27_s18, 2  ;;  %p192_p2 = scmp.lt.s32.totalorder %s1240_s17, 3 }
   0x5   : > { %s1657_s18 = smov (%p29_p1, %s27_s18), 0  ;;  %p193_p3 = pnand %p890_p0, %p192_p2 }
   0x6   : > { %v296_v0 = vld [vmem:[%s1650_s1] sm:$0xff] (!%p193_p3)  ;;  %v297_v1 = vld [vmem:[%s1650_s1 + $0x8] sm:$0xff] (!%p193_p3)  ;;  %v298_v2 = vld [vmem:[%s1650_s1 + $0x10] sm:$0xff] (!%p193_p3)  ;;  %p235_p4 = scmp.lt.s32.totalorder (!%p193_p3), %s1232_s15, 1  ;;  %v1242_v56 = vmov (!%p193_p3), 1.0  }
   0x7   : > { %196 = sbr.rel (%p193_p3) target bundleno = 568 (0x238), region = 28  ;;  %v1097_v3 = vpack.c.bf16 (!%p193_p3), %v297_v1, %v296_v0  ;;  %v299_v4 = vld [vmem:[%s1650_s1 + $0x18] sm:$0xff] (!%p193_p3)  ;;  %v300_v6 = vld [vmem:[%s1650_s1 + $0x20] sm:$0xff] (!%p193_p3)  ;;  %v301_v7 = vld [vmem:[%s1650_s1 + $0x28] sm:$0xff] (!%p193_p3)  ;;  %633 = vmatprep.mubr.f32.mxu1 (!%p193_p3), %v1242_v56 }
   0x8   : > { %v1101_v5 = vpack.c.bf16 (!%p193_p3), %v299_v4, %v298_v2  ;;  %v1105_v8 = vpack.c.bf16 (!%p193_p3), %v301_v7, %v300_v6  ;;  %v302_v9 = vld [vmem:[%s1650_s1 + $0x30] sm:$0xff] (!%p193_p3)  ;;  %v303_v10 = vld [vmem:[%s1650_s1 + $0x38] sm:$0xff] (!%p193_p3)  ;;  %v304_v13 = vld [vmem:[%s1650_s1 + $0x40] sm:$0xff] (!%p193_p3) }
   0x9   : > { %1098 = vmatprep.subr.bf16.mxu0 (!%p193_p3), %v1097_v3  ;;  %v1109_v12 = vpack.c.bf16 (!%p193_p3), %v303_v10, %v302_v9  ;;  %v305_v14 = vld [vmem:[%s1650_s1 + $0x48] sm:$0xff] (!%p193_p3)  ;;  %v306_v16 = vld [vmem:[%s1650_s1 + $0x50] sm:$0xff] (!%p193_p3)  ;;  %v307_v17 = vld [vmem:[%s1650_s1 + $0x58] sm:$0xff] (!%p193_p3) }
   0xa   : > { %1100 = vmatpush3.bf16.msra.mxu0 (!%p193_p3), %v1097_v3  ;;  %v1113_v15 = vpack.c.bf16 (!%p193_p3), %v305_v14, %v304_v13  ;;  %v1117_v18 = vpack.c.bf16 (!%p193_p3), %v307_v17, %v306_v16  ;;  %v308_v19 = vld [vmem:[%s1650_s1 + $0x60] sm:$0xff] (!%p193_p3)  ;;  %v309_v20 = vld [vmem:[%s1650_s1 + $0x68] sm:$0xff] (!%p193_p3)  ;;  %v310_v22 = vld [vmem:[%s1650_s1 + $0x70] sm:$0xff] (!%p193_p3) }
   0xb   : > { %1102 = vmatprep.subr.bf16.mxu0 (!%p193_p3), %v1101_v5  ;;  %v1121_v21 = vpack.c.bf16 (!%p193_p3), %v309_v20, %v308_v19  ;;  %v311_v23 = vld [vmem:[%s1650_s1 + $0x78] sm:$0xff] (!%p193_p3) }
   0xc   : > { %v1125_v24 = vpack.c.bf16 (!%p193_p3), %v311_v23, %v310_v22 }
   0xe   : > { %s1659_s15 = smov (!%p235_p4, %s1232_s15), 1  ;;  %1104 = vmatpush3.bf16.msra.mxu0 %v1101_v5 }
   0xf   : > { %s897_s5 = sshll.u32 %s1659_s15, 8  ;;  %1106 = vmatprep.subr.bf16.mxu0 %v1105_v8  ;;  %s257_s12 = scalar_lea.vmem %s1652_s3, %s1659_s15 }
  0x10   : > { %s1312_s8 = scalar_lea.vmem %s1649_s0, %s897_s5  ;;  %s1382_s11 = scalar_lea.vmem %s1651_s2, %s897_s5 }
  0x11   : > { %v264_v11 = vld [vmem:[%s1312_s8] sm:$0xff]  ;;  %v265_v25 = vld [vmem:[%s1312_s8 + $0x8] sm:$0xff]  ;;  %v266_v26 = vld [vmem:[%s1312_s8 + $0x10] sm:$0xff]  ;;  %s262_s19 = scalar_lea.vmem %s1653_s4, %s1659_s15 }
  0x12   : > { %1049 = vmatprep.mubr.f32.mxu0 %v264_v11  ;;  %1108 = vmatpush3.bf16.msra.mxu0 %v1105_v8  ;;  %v267_v27 = vld [vmem:[%s1312_s8 + $0x18] sm:$0xff]  ;;  %v268_v28 = vld [vmem:[%s1312_s8 + $0x20] sm:$0xff]  ;;  %v269_v29 = vld [vmem:[%s1312_s8 + $0x28] sm:$0xff] }
  0x13   : > { %1110 = vmatprep.subr.bf16.mxu0 %v1109_v12  ;;  %v270_v30 = vld [vmem:[%s1312_s8 + $0x30] sm:$0xff]  ;;  %v271_v31 = vld [vmem:[%s1312_s8 + $0x38] sm:$0xff]  ;;  %v272_v32 = vld [vmem:[%s1312_s8 + $0x40] sm:$0xff] }
  0x14   : > { %v273_v33 = vld [vmem:[%s1312_s8 + $0x48] sm:$0xff]  ;;  %v274_v34 = vld [vmem:[%s1312_s8 + $0x50] sm:$0xff]  ;;  %v275_v35 = vld [vmem:[%s1312_s8 + $0x58] sm:$0xff] }
  0x15   : > { %v276_v36 = vld [vmem:[%s1312_s8 + $0x60] sm:$0xff]  ;;  %v277_v37 = vld [vmem:[%s1312_s8 + $0x68] sm:$0xff]  ;;  %v278_v38 = vld [vmem:[%s1312_s8 + $0x70] sm:$0xff] }
  0x16   : > { %1112 = vmatpush3.bf16.msra.mxu0 %v1109_v12  ;;  %v279_v39 = vld [vmem:[%s1312_s8 + $0x78] sm:$0xff]  ;;  %v280_v40 = vld [vmem:[%s1312_s8 + $0x80] sm:$0xff]  ;;  %v281_v41 = vld [vmem:[%s1312_s8 + $0x88] sm:$0xff] }
  0x17   : > { %1114 = vmatprep.subr.bf16.mxu0 %v1113_v15  ;;  %v282_v42 = vld [vmem:[%s1312_s8 + $0x90] sm:$0xff]  ;;  %v283_v43 = vld [vmem:[%s1312_s8 + $0x98] sm:$0xff]  ;;  %v284_v44 = vld [vmem:[%s1312_s8 + $0xa0] sm:$0xff] }
  0x18   : > { %v285_v45 = vld [vmem:[%s1312_s8 + $0xa8] sm:$0xff]  ;;  %v286_v46 = vld [vmem:[%s1312_s8 + $0xb0] sm:$0xff]  ;;  %v287_v47 = vld [vmem:[%s1312_s8 + $0xb8] sm:$0xff] }
  0x19   : > { %v288_v48 = vld [vmem:[%s1312_s8 + $0xc0] sm:$0xff]  ;;  %v289_v49 = vld [vmem:[%s1312_s8 + $0xc8] sm:$0xff]  ;;  %v290_v50 = vld [vmem:[%s1312_s8 + $0xd0] sm:$0xff] }
  0x1a   : > { %1116 = vmatpush3.bf16.msra.mxu0 %v1113_v15  ;;  %v291_v51 = vld [vmem:[%s1312_s8 + $0xd8] sm:$0xff]  ;;  %v292_v52 = vld [vmem:[%s1312_s8 + $0xe0] sm:$0xff]  ;;  %v293_v53 = vld [vmem:[%s1312_s8 + $0xe8] sm:$0xff] }
  0x1b   : > { %1118 = vmatprep.subr.bf16.mxu0 %v1117_v18  ;;  %v294_v54 = vld [vmem:[%s1312_s8 + $0xf0] sm:$0xff]  ;;  %v295_v55 = vld [vmem:[%s1312_s8 + $0xf8] sm:$0xff] }
  0x1e   : > { %1120 = vmatpush3.bf16.msra.mxu0 %v1117_v18 }
  0x1f   : > { %1122 = vmatprep.subr.bf16.mxu0 %v1121_v21 }
  0x22   : > { %1124 = vmatpush3.bf16.msra.mxu0 %v1121_v21 }
  0x23   : > { %1126 = vmatprep.subr.bf16.mxu0 %v1125_v24 }
  0x26   : > { %1128 = vmatpush3.bf16.msra.mxu0 %v1125_v24 }
  0x29   : > { %1050 = vmatmul.mubr.f32.vlgmr.msra.gmra.mrb[0].mxu0 %v265_v25 }
  0x2a   : > { %1052 = vmatprep.mubr.f32.mxu0 %v266_v26 }
  0x2d   : > { %1053 = vmatmul.mubr.f32.gmra.mrb[2].mxu0 %v267_v27 }
  0x2e   : > { %1055 = vmatprep.mubr.f32.mxu0 %v268_v28 }
  0x31   : > { %1056 = vmatmul.mubr.f32.gmra.mrb[4].mxu0 %v269_v29 }
  0x32   : > { %1058 = vmatprep.mubr.f32.mxu0 %v270_v30 }
  0x35   : > { %1059 = vmatmul.mubr.f32.gmra.mrb[6].mxu0 %v271_v31 }
  0x36   : > { %1061 = vmatprep.mubr.f32.mxu0 %v272_v32 }
  0x39   : > { %1062 = vmatmul.mubr.f32.gmra.mrb[8].mxu0 %v273_v33 }
  0x3a   : > { %1064 = vmatprep.mubr.f32.mxu0 %v274_v34 }
  0x3d   : > { %1065 = vmatmul.mubr.f32.gmra.mrb[10].mxu0 %v275_v35 }
  0x3e   : > { %1067 = vmatprep.mubr.f32.mxu0 %v276_v36 }
  0x41   : > { %1068 = vmatmul.mubr.f32.gmra.mrb[12].mxu0 %v277_v37 }
  0x42   : > { %1070 = vmatprep.mubr.f32.mxu0 %v278_v38 }
  0x45   : > { %1071 = vmatmul.mubr.f32.gmra.mrb[14].mxu0 %v279_v39 }
  0x46   : > { %1073 = vmatprep.mubr.f32.mxu0 %v280_v40 }
  0x49   : > { %1074 = vmatmul.mubr.f32.gmra.mrb[16].mxu0 %v281_v41 }
  0x4a   : > { %1076 = vmatprep.mubr.f32.mxu0 %v282_v42 }
  0x4d   : > { %1077 = vmatmul.mubr.f32.gmra.mrb[18].mxu0 %v283_v43 }
  0x4e   : > { %1079 = vmatprep.mubr.f32.mxu0 %v284_v44 }
  0x51   : > { %1080 = vmatmul.mubr.f32.gmra.mrb[20].mxu0 %v285_v45 }
  0x52   : > { %1082 = vmatprep.mubr.f32.mxu0 %v286_v46 }
  0x55   : > { %1083 = vmatmul.mubr.f32.gmra.mrb[22].mxu0 %v287_v47 }
  0x56   : > { %1085 = vmatprep.mubr.f32.mxu0 %v288_v48 }
  0x59   : > { %1086 = vmatmul.mubr.f32.gmra.mrb[24].mxu0 %v289_v49 }
  0x5a   : > { %1088 = vmatprep.mubr.f32.mxu0 %v290_v50 }
  0x5d   : > { %1089 = vmatmul.mubr.f32.gmra.mrb[26].mxu0 %v291_v51 }
  0x5e   : > { %1091 = vmatprep.mubr.f32.mxu0 %v292_v52 }
  0x61   : > { %1092 = vmatmul.mubr.f32.gmra.mrb[28].mxu0 %v293_v53 }
  0x62   : > { %1094 = vmatprep.mubr.f32.mxu0 %v294_v54 }
  0x65   : > { %1095 = vmatmul.mubr.f32.gmra.mrb[30].mxu0 %v295_v55 }
  0xfc   : > { %v1384_v57 = vpop.f32.mrb[0].mxu0 }
  0xfd   : > { %538 = vst [vmem:[%s1382_s11 + $0x8] sm:$0xff] %v1384_v57  ;;  %v1390_v58 = vmul.f32 %v1384_v57, %v1384_v57  ;;  %v1392_v59 = vpop.f32.mrb[1].mxu0 }
  0xfe   : > { %537 = vst [vmem:[%s1382_s11] sm:$0xff] %v1392_v59  ;;  %v1398_v60 = vmul.f32 %v1392_v59, %v1392_v59  ;;  %v1131_v61 = vpack.c.bf16 %v1384_v57, %v1392_v59 }
 0x100   : > { %v1163_v62 = vpack.c.bf16 %v1390_v58, %v1398_v60  ;;  %v1404_v63 = vpop.f32.mrb[2].mxu0 }
 0x101   : > { %540 = vst [vmem:[%s1382_s11 + $0x18] sm:$0xff] %v1404_v63  ;;  %v1410_v0 = vmul.f32 %v1404_v63, %v1404_v63  ;;  %v1412_v1 = vpop.f32.mrb[3].mxu0 }
 0x102   : > { %539 = vst [vmem:[%s1382_s11 + $0x10] sm:$0xff] %v1412_v1  ;;  %v1135_v2 = vpack.c.bf16 %v1404_v63, %v1412_v1  ;;  %v1420_v3 = vmul.f32 %v1412_v1, %v1412_v1 }
 0x104   : > { %v1167_v4 = vpack.c.bf16 %v1410_v0, %v1420_v3  ;;  %v1424_v5 = vpop.f32.mrb[4].mxu0 }
 0x105   : > { %542 = vst [vmem:[%s1382_s11 + $0x28] sm:$0xff] %v1424_v5  ;;  %v1430_v6 = vmul.f32 %v1424_v5, %v1424_v5  ;;  %v1432_v7 = vpop.f32.mrb[5].mxu0 }
 0x106   : > { %541 = vst [vmem:[%s1382_s11 + $0x20] sm:$0xff] %v1432_v7  ;;  %v1139_v8 = vpack.c.bf16 %v1424_v5, %v1432_v7  ;;  %v1440_v9 = vmul.f32 %v1432_v7, %v1432_v7 }
 0x108   : > { %v1171_v10 = vpack.c.bf16 %v1430_v6, %v1440_v9  ;;  %v1444_v11 = vpop.f32.mrb[6].mxu0 }
 0x109   : > { %544 = vst [vmem:[%s1382_s11 + $0x38] sm:$0xff] %v1444_v11  ;;  %v1450_v12 = vmul.f32 %v1444_v11, %v1444_v11  ;;  %v1452_v13 = vpop.f32.mrb[7].mxu0 }
 0x10a   : > { %543 = vst [vmem:[%s1382_s11 + $0x30] sm:$0xff] %v1452_v13  ;;  %v1143_v14 = vpack.c.bf16 %v1444_v11, %v1452_v13  ;;  %v1460_v15 = vmul.f32 %v1452_v13, %v1452_v13 }
 0x10c   : > { %v1175_v16 = vpack.c.bf16 %v1450_v12, %v1460_v15  ;;  %v1464_v17 = vpop.f32.mrb[8].mxu0 }
 0x10d   : > { %546 = vst [vmem:[%s1382_s11 + $0x48] sm:$0xff] %v1464_v17  ;;  %v1470_v18 = vmul.f32 %v1464_v17, %v1464_v17  ;;  %v1472_v19 = vpop.f32.mrb[9].mxu0 }
 0x10e   : > { %545 = vst [vmem:[%s1382_s11 + $0x40] sm:$0xff] %v1472_v19  ;;  %v1147_v20 = vpack.c.bf16 %v1464_v17, %v1472_v19  ;;  %v1480_v21 = vmul.f32 %v1472_v19, %v1472_v19 }
 0x110   : > { %v1179_v22 = vpack.c.bf16 %v1470_v18, %v1480_v21  ;;  %v1484_v23 = vpop.f32.mrb[10].mxu0 }
 0x111   : > { %548 = vst [vmem:[%s1382_s11 + $0x58] sm:$0xff] %v1484_v23  ;;  %v1490_v24 = vmul.f32 %v1484_v23, %v1484_v23  ;;  %v1492_v25 = vpop.f32.mrb[11].mxu0 }
 0x112   : > { %547 = vst [vmem:[%s1382_s11 + $0x50] sm:$0xff] %v1492_v25  ;;  %v1151_v26 = vpack.c.bf16 %v1484_v23, %v1492_v25  ;;  %v1500_v27 = vmul.f32 %v1492_v25, %v1492_v25 }
 0x114   : > { %v1183_v28 = vpack.c.bf16 %v1490_v24, %v1500_v27  ;;  %v1504_v29 = vpop.f32.mrb[12].mxu0 }
 0x115   : > { %550 = vst [vmem:[%s1382_s11 + $0x68] sm:$0xff] %v1504_v29  ;;  %v1510_v30 = vmul.f32 %v1504_v29, %v1504_v29  ;;  %v1512_v31 = vpop.f32.mrb[13].mxu0 }
 0x116   : > { %549 = vst [vmem:[%s1382_s11 + $0x60] sm:$0xff] %v1512_v31  ;;  %v1155_v32 = vpack.c.bf16 %v1504_v29, %v1512_v31  ;;  %v1520_v33 = vmul.f32 %v1512_v31, %v1512_v31 }
 0x118   : > { %v1187_v34 = vpack.c.bf16 %v1510_v30, %v1520_v33  ;;  %v1524_v35 = vpop.f32.mrb[14].mxu0 }
 0x119   : > { %552 = vst [vmem:[%s1382_s11 + $0x78] sm:$0xff] %v1524_v35  ;;  %v1530_v36 = vmul.f32 %v1524_v35, %v1524_v35  ;;  %v1532_v37 = vpop.f32.mrb[15].mxu0 }
 0x11a   : > { %551 = vst [vmem:[%s1382_s11 + $0x70] sm:$0xff] %v1532_v37  ;;  %v1159_v38 = vpack.c.bf16 %v1524_v35, %v1532_v37  ;;  %v1540_v39 = vmul.f32 %v1532_v37, %v1532_v37 }
 0x11c   : > { %v1191_v40 = vpack.c.bf16 %v1530_v36, %v1540_v39  ;;  %v1075_v41 = vpop.f32.mrb[16].mxu0 }
 0x11d   : > { %554 = vst [vmem:[%s1382_s11 + $0x88] sm:$0xff] %v1075_v41  ;;  %v1545_v42 = vmul.f32 %v1075_v41, %v1075_v41  ;;  %v458_v43 = vpop.f32.mrb[17].mxu0 }
 0x11e   : > { %553 = vst [vmem:[%s1382_s11 + $0x80] sm:$0xff] %v458_v43  ;;  %v1548_v44 = vmul.f32 %v458_v43, %v458_v43  ;;  %v1129_v45 = vpack.c.bf16 %v1075_v41, %v458_v43 }
 0x120   : > { %v1078_v46 = vpop.f32.mrb[18].mxu0  ;;  %1130 = vmatprep.subr.bf16.mxu1 %v1129_v45  ;;  %v1161_v47 = vpack.c.bf16 %v1545_v42, %v1548_v44 }
 0x121   : > { %556 = vst [vmem:[%s1382_s11 + $0x98] sm:$0xff] %v1078_v46  ;;  %v1553_v48 = vmul.f32 %v1078_v46, %v1078_v46  ;;  %v468_v49 = vpop.f32.mrb[19].mxu0  ;;  %1132 = vmatpush3.bf16.msra.mxu1 %v1131_v61 }
 0x122   : > { %555 = vst [vmem:[%s1382_s11 + $0x90] sm:$0xff] %v468_v49  ;;  %v1133_v50 = vpack.c.bf16 %v1078_v46, %v468_v49  ;;  %v1559_v51 = vmul.f32 %v468_v49, %v468_v49 }
 0x124   : > { %v1081_v52 = vpop.f32.mrb[20].mxu0  ;;  %1134 = vmatprep.subr.bf16.mxu1 %v1133_v50  ;;  %v1165_v53 = vpack.c.bf16 %v1553_v48, %v1559_v51 }
 0x125   : > { %558 = vst [vmem:[%s1382_s11 + $0xa8] sm:$0xff] %v1081_v52  ;;  %v1564_v54 = vmul.f32 %v1081_v52, %v1081_v52  ;;  %v478_v55 = vpop.f32.mrb[21].mxu0  ;;  %1136 = vmatpush3.bf16.msra.mxu1 %v1135_v2 }
 0x126   : > { %557 = vst [vmem:[%s1382_s11 + $0xa0] sm:$0xff] %v478_v55  ;;  %v1137_v57 = vpack.c.bf16 %v1081_v52, %v478_v55  ;;  %v659_v59 = vmul.f32 %v478_v55, %v478_v55 }
 0x128   : > { %v1084_v61 = vpop.f32.mrb[22].mxu0  ;;  %1138 = vmatprep.subr.bf16.mxu1 %v1137_v57  ;;  %v1169_v41 = vpack.c.bf16 %v1564_v54, %v659_v59 }
 0x129   : > { %560 = vst [vmem:[%s1382_s11 + $0xb8] sm:$0xff] %v1084_v61  ;;  %v662_v43 = vmul.f32 %v1084_v61, %v1084_v61  ;;  %v488_v45 = vpop.f32.mrb[23].mxu0  ;;  %1140 = vmatpush3.bf16.msra.mxu1 %v1139_v8 }
 0x12a   : > { %559 = vst [vmem:[%s1382_s11 + $0xb0] sm:$0xff] %v488_v45  ;;  %v1141_v63 = vpack.c.bf16 %v1084_v61, %v488_v45  ;;  %v661_v1 = vmul.f32 %v488_v45, %v488_v45 }
 0x12c   : > { %v1087_v2 = vpop.f32.mrb[24].mxu0  ;;  %1142 = vmatprep.subr.bf16.mxu1 %v1141_v63  ;;  %v1173_v46 = vpack.c.bf16 %v662_v43, %v661_v1 }
 0x12d   : > { %562 = vst [vmem:[%s1382_s11 + $0xc8] sm:$0xff] %v1087_v2  ;;  %v664_v49 = vmul.f32 %v1087_v2, %v1087_v2  ;;  %v498_v50 = vpop.f32.mrb[25].mxu0  ;;  %1144 = vmatpush3.bf16.msra.mxu1 %v1143_v14 }
 0x12e   : > { %561 = vst [vmem:[%s1382_s11 + $0xc0] sm:$0xff] %v498_v50  ;;  %v1145_v52 = vpack.c.bf16 %v1087_v2, %v498_v50  ;;  %v663_v5 = vmul.f32 %v498_v50, %v498_v50 }
 0x130   : > { %v1090_v7 = vpop.f32.mrb[26].mxu0  ;;  %1146 = vmatprep.subr.bf16.mxu1 %v1145_v52  ;;  %v1177_v8 = vpack.c.bf16 %v664_v49, %v663_v5 }
 0x131   : > { %564 = vst [vmem:[%s1382_s11 + $0xd8] sm:$0xff] %v1090_v7  ;;  %v666_v54 = vmul.f32 %v1090_v7, %v1090_v7  ;;  %v508_v55 = vpop.f32.mrb[27].mxu0  ;;  %1148 = vmatpush3.bf16.msra.mxu1 %v1147_v20 }
 0x132   : > { %563 = vst [vmem:[%s1382_s11 + $0xd0] sm:$0xff] %v508_v55  ;;  %v1149_v57 = vpack.c.bf16 %v1090_v7, %v508_v55  ;;  %v665_v11 = vmul.f32 %v508_v55, %v508_v55 }
 0x134   : > { %v1093_v13 = vpop.f32.mrb[28].mxu0  ;;  %1150 = vmatprep.subr.bf16.mxu1 %v1149_v57  ;;  %v1181_v14 = vpack.c.bf16 %v666_v54, %v665_v11 }
 0x135   : > { %566 = vst [vmem:[%s1382_s11 + $0xe8] sm:$0xff] %v1093_v13  ;;  %v668_v59 = vmul.f32 %v1093_v13, %v1093_v13  ;;  %v518_v61 = vpop.f32.mrb[29].mxu0  ;;  %1152 = vmatpush3.bf16.msra.mxu1 %v1151_v26 }
 0x136   : > { %565 = vst [vmem:[%s1382_s11 + $0xe0] sm:$0xff] %v518_v61  ;;  %v1153_v43 = vpack.c.bf16 %v1093_v13, %v518_v61  ;;  %v667_v45 = vmul.f32 %v518_v61, %v518_v61 }
 0x138   : > { %v1096_v17 = vpop.f32.mrb[30].mxu0  ;;  %1154 = vmatprep.subr.bf16.mxu1 %v1153_v43  ;;  %v1185_v19 = vpack.c.bf16 %v668_v59, %v667_v45 }
 0x139   : > { %568 = vst [vmem:[%s1382_s11 + $0xf8] sm:$0xff] %v1096_v17  ;;  %v670_v20 = vmul.f32 %v1096_v17, %v1096_v17  ;;  %v528_v63 = vpop.f32.mrb[31].mxu0  ;;  %1156 = vmatpush3.bf16.msra.mxu1 %v1155_v32 }
 0x13a   : > { %567 = vst [vmem:[%s1382_s11 + $0xf0] sm:$0xff] %v528_v63  ;;  %v1157_v1 = vpack.c.bf16 %v1096_v17, %v528_v63  ;;  %v669_v2 = vmul.f32 %v528_v63, %v528_v63 }
 0x13c   : > { %v1189_v49 = vpack.c.bf16 %v670_v20, %v669_v2  ;;  %1158 = vmatprep.subr.bf16.mxu1 %v1157_v1 }
 0x13d   : > { %1160 = vmatpush3.bf16.msra.mxu1 %v1159_v38 }
 0x13e   : > { %1162 = vmatprep.subr.bf16.mxu1 %v1161_v47 }
 0x140   : > { %634 = vmatmul.mubr.f32.vlgmr.msra.gmra.mrb[0].mxu1 %v1242_v56 }
 0x141   : > { %1164 = vmatpush3.bf16.msra.mxu1 %v1163_v62  ;;  %735 = vmatprep.mubr.f32.mxu1 %v1242_v56 }
 0x142   : > { %1166 = vmatprep.subr.bf16.mxu1 %v1165_v53 }
 0x145   : > { %1168 = vmatpush3.bf16.msra.mxu1 %v1167_v4 }
 0x146   : > { %1170 = vmatprep.subr.bf16.mxu1 %v1169_v41 }
 0x149   : > { %1172 = vmatpush3.bf16.msra.mxu1 %v1171_v10 }
 0x14a   : > { %1174 = vmatprep.subr.bf16.mxu1 %v1173_v46 }
 0x14d   : > { %1176 = vmatpush3.bf16.msra.mxu1 %v1175_v16 }
 0x14e   : > { %1178 = vmatprep.subr.bf16.mxu1 %v1177_v8 }
 0x151   : > { %1180 = vmatpush3.bf16.msra.mxu1 %v1179_v22 }
 0x152   : > { %1182 = vmatprep.subr.bf16.mxu1 %v1181_v14 }
 0x155   : > { %1184 = vmatpush3.bf16.msra.mxu1 %v1183_v28 }
 0x156   : > { %1186 = vmatprep.subr.bf16.mxu1 %v1185_v19 }
 0x159   : > { %1188 = vmatpush3.bf16.msra.mxu1 %v1187_v34 }
 0x15a   : > { %1190 = vmatprep.subr.bf16.mxu1 %v1189_v49 }
 0x15d   : > { %1192 = vmatpush3.bf16.msra.mxu1 %v1191_v40 }
 0x160   : > { %736 = vmatmul.mubr.f32.vlgmr.msra.gmra.mrb[2].mxu1 %v1242_v56 }
 0x213   : > { %v979_v58 = vpop.f32.mrb[0].mxu1 }
 0x214   : > { %v980_v60 = vpop.f32.mrb[1].mxu1 }
 0x215   : > { %v981_v62 = vadd.f32 %v980_v60, %v979_v58 }
 0x217   : > { %741 = vst [vmem:[%s257_s12] sm:$0x1] %v981_v62 }
 0x233   : > { %v1014_v0 = vpop.f32.mrb[2].mxu1 }
 0x234   : > { %v1015_v3 = vpop.f32.mrb[3].mxu1 }
 0x235   : > { %v1016_v4 = vadd.f32 %v1015_v3, %v1014_v0 }
 0x237   : > { %742 = vst [vmem:[%s262_s19] sm:$0x1] %v1016_v4 }
 0x238 PF: > { %s15_s17 = sadd.s32 1, %s1240_s17   ;;  %s1654_s15 = smov %s1236_s16 }
 0x239   : > { %p12_p5 = scmp.ge.s32.totalorder %s15_s17, 4   ;;  %s1655_s16 = smov %s1657_s18 }
 0x23b   :  { %14 = sbr.rel (!%p12_p5) target bundleno = 2 (0x2), region = 82 }

// kernel: bottleneck_pallas.6
= control target key start
LH: loop header
LB: loop body
LE: loop exit
PB: predicated region body
PF: predicated region fallthrough
CT: control target
= control target key end

     0   :  { %s1742_s24 = smov 0   ;;  %s1744_s25 = smov 0   ;;  %s2300_s0 = inlined_call_operand.vmem [shape: f32[2,256,128], index: 0, kind: input, shape index: {}]   ;;  %s2301_s1 = inlined_call_operand.vmem [shape: f32[1,128], index: 1, kind: input, shape index: {}]   ;;  %s2302_s2 = inlined_call_operand.vmem [shape: f32[1,128], index: 2, kind: input, shape index: {}]   ;;  %s2303_s3 = inlined_call_operand.vmem [shape: f32[256,1], index: 3, kind: input, shape index: {}]   ;;  %s2304_s4 = inlined_call_operand.vmem [shape: f32[128,128], index: 4, kind: input, shape index: {}]   ;;  %s2305_s5 = inlined_call_operand.vmem [shape: f32[2,256,128], index: 5, kind: output, shape index: {0}]   ;;  %s2306_s6 = inlined_call_operand.vmem [shape: f32[2,1,128], index: 6, kind: output, shape index: {1}]   ;;  %s2307_s7 = inlined_call_operand.vmem [shape: f32[2,1,128], index: 7, kind: output, shape index: {2}]  }
   0x1   :  { %s1746_s26 = smov 0  }
   0x2 LB: > { %s30_s27 = sadd.s32 1, %s1694_s25  ;;  %p1343_p0 = scmp.ge.s32.totalorder %s1698_s26, 1  ;;  %s1698_s26 = sphi %s1746_s26, %s18_s26   ;;  %s1694_s25 = sphi %s1744_s25, %s2309_s25   ;;  %s1690_s24 = sphi %s1742_s24, %s2308_s24  }
   0x3   : > { %p32_p1 = scmp.ge.s32.totalorder %s30_s27, 2  ;;  %p278_p2 = scmp.lt.s32.totalorder %s1698_s26, 3 }
   0x5   : > { %s2311_s27 = smov (%p32_p1, %s30_s27), 0  ;;  %p279_p3 = pnand %p1343_p0, %p278_p2 }
   0x6   : > { %v511_v0 = vld [vmem:[%s2303_s3 + $0x10] sm:$0xff] (!%p279_p3)  ;;  %v509_v1 = vld [vmem:[%s2303_s3] sm:$0xff] (!%p279_p3)  ;;  %v1700_v2 = vmov (!%p279_p3), 0   ;;  %v512_v3 = vld [vmem:[%s2303_s3 + $0x18] sm:$0xff] (!%p279_p3)  ;;  %p332_p4 = scmp.lt.s32.totalorder (!%p279_p3), %s1690_s24, 1 }
   0x7   : > { %282 = sbr.rel (%p279_p3) target bundleno = 669 (0x29d), region = 40  ;;  %1675 = vset.pattern.permute.xlu1 (!%p279_p3), %v1700_v2  ;;  %1674 = vset.pattern.permute.xlu0 (!%p279_p3), %v1700_v2  ;;  %v510_v4 = vld [vmem:[%s2303_s3 + $0x8] sm:$0xff] (!%p279_p3)  ;;  %v513_v6 = vld [vmem:[%s2303_s3 + $0x20] sm:$0xff] (!%p279_p3)  ;;  %v516_v7 = vld [vmem:[%s2303_s3 + $0x38] sm:$0xff] (!%p279_p3) }
   0x8   : > { %553 = vperm.xlu1 (!%p279_p3), %1675, %v511_v0   ;;  %543 = vperm.xlu0 (!%p279_p3), %1674, %v509_v1   ;;  %v514_v5 = vld [vmem:[%s2303_s3 + $0x28] sm:$0xff] (!%p279_p3)  ;;  %v515_v8 = vld [vmem:[%s2303_s3 + $0x30] sm:$0xff] (!%p279_p3)  ;;  %v733_v9 = vld [vmem:[%s2304_s4] sm:$0xff] (!%p279_p3) }
   0x9   : > { %v734_v10 = vld [vmem:[%s2304_s4 + $0x8] sm:$0xff] (!%p279_p3)  ;;  %v735_v11 = vld [vmem:[%s2304_s4 + $0x10] sm:$0xff] (!%p279_p3)  ;;  %v736_v12 = vld [vmem:[%s2304_s4 + $0x18] sm:$0xff] (!%p279_p3) }
   0xa   : > { %v1552_v13 = vpack.c.bf16 (!%p279_p3), %v734_v10, %v733_v9  ;;  %v1556_v14 = vpack.c.bf16 (!%p279_p3), %v736_v12, %v735_v11  ;;  %v737_v15 = vld [vmem:[%s2304_s4 + $0x20] sm:$0xff] (!%p279_p3)  ;;  %v738_v16 = vld [vmem:[%s2304_s4 + $0x28] sm:$0xff] (!%p279_p3)  ;;  %v739_v20 = vld [vmem:[%s2304_s4 + $0x30] sm:$0xff] (!%p279_p3) }
   0xb   : > { %v518_v17 = vld [vmem:[%s2303_s3 + $0x48] sm:$0xff] (!%p279_p3)  ;;  %v517_v18 = vld [vmem:[%s2303_s3 + $0x40] sm:$0xff] (!%p279_p3)  ;;  %v1560_v19 = vpack.c.bf16 (!%p279_p3), %v738_v16, %v737_v15  ;;  %v740_v21 = vld [vmem:[%s2304_s4 + $0x38] sm:$0xff] (!%p279_p3) }
   0xc   : > { %558 = vperm.xlu1 (!%p279_p3), %1675, %v512_v3   ;;  %548 = vperm.xlu0 (!%p279_p3), %1674, %v510_v4   ;;  %v520_v22 = vld [vmem:[%s2303_s3 + $0x58] sm:$0xff] (!%p279_p3)  ;;  %v519_v23 = vld [vmem:[%s2303_s3 + $0x50] sm:$0xff] (!%p279_p3)  ;;  %v1564_v24 = vpack.c.bf16 (!%p279_p3), %v740_v21, %v739_v20  ;;  %v741_v25 = vld [vmem:[%s2304_s4 + $0x40] sm:$0xff] (!%p279_p3) }
   0xd   : > { %1553 = vmatprep.subr.bf16.mxu0 (!%p279_p3), %v1552_v13  ;;  %v742_v26 = vld [vmem:[%s2304_s4 + $0x48] sm:$0xff] (!%p279_p3)  ;;  %v521_v28 = vld [vmem:[%s2303_s3 + $0x60] sm:$0xff] (!%p279_p3)  ;;  %v743_v30 = vld [vmem:[%s2304_s4 + $0x50] sm:$0xff] (!%p279_p3) }
   0xe   : > { %1555 = vmatpush3.bf16.msra.mxu0 %v1552_v13  ;;  %v522_v27 = vld [vmem:[%s2303_s3 + $0x68] sm:$0xff]  ;;  %v1568_v29 = vpack.c.bf16 %v742_v26, %v741_v25  ;;  %v744_v31 = vld [vmem:[%s2304_s4 + $0x58] sm:$0xff]  ;;  %v523_v33 = vld [vmem:[%s2303_s3 + $0x70] sm:$0xff]  ;;  %s2313_s24 = smov (!%p332_p4, %s1690_s24), 1 }
   0xf   : > { %1557 = vmatprep.subr.bf16.mxu0 %v1556_v14  ;;  %v524_v32 = vld [vmem:[%s2303_s3 + $0x78] sm:$0xff]  ;;  %v1572_v34 = vpack.c.bf16 %v744_v31, %v743_v30  ;;  %v745_v35 = vld [vmem:[%s2304_s4 + $0x60] sm:$0xff]  ;;  %v746_v36 = vld [vmem:[%s2304_s4 + $0x68] sm:$0xff]  ;;  %s1352_s17 = sshll.u32 %s2313_s24, 8  ;;  %s360_s19 = scalar_lea.vmem %s2306_s6, %s2313_s24 }
  0x10   : > { %568 = vperm.xlu1 %1675, %v514_v5   ;;  %563 = vperm.xlu0 %1674, %v513_v6   ;;  %v526_v37 = vld [vmem:[%s2303_s3 + $0x88] sm:$0xff]  ;;  %v525_v38 = vld [vmem:[%s2303_s3 + $0x80] sm:$0xff]  ;;  %v1576_v39 = vpack.c.bf16 %v746_v36, %v745_v35  ;;  %v747_v40 = vld [vmem:[%s2304_s4 + $0x70] sm:$0xff]  ;;  %s1907_s22 = scalar_lea.vmem %s2300_s0, %s1352_s17  ;;  %s2033_s16 = scalar_lea.vmem %s2305_s5, %s1352_s17 }
  0x11   : > { %v748_v41 = vld [vmem:[%s2304_s4 + $0x78] sm:$0xff]  ;;  %v527_v43 = vld [vmem:[%s2303_s3 + $0x90] sm:$0xff]  ;;  %v530_v45 = vld [vmem:[%s2303_s3 + $0xa8] sm:$0xff] }
  0x12   : > { %1559 = vmatpush3.bf16.msra.mxu0 %v1556_v14  ;;  %v528_v42 = vld [vmem:[%s2303_s3 + $0x98] sm:$0xff]  ;;  %v1580_v44 = vpack.c.bf16 %v748_v41, %v747_v40  ;;  %v529_v46 = vld [vmem:[%s2303_s3 + $0xa0] sm:$0xff]  ;;  %v531_v48 = vld [vmem:[%s2303_s3 + $0xb0] sm:$0xff] }
  0x13   : > { %1561 = vmatprep.subr.bf16.mxu0 %v1560_v19  ;;  %v532_v47 = vld [vmem:[%s2303_s3 + $0xb8] sm:$0xff]  ;;  %v534_v49 = vld [vmem:[%s2303_s3 + $0xc8] sm:$0xff]  ;;  %v533_v50 = vld [vmem:[%s2303_s3 + $0xc0] sm:$0xff] }
  0x14   : > { %578 = vperm.xlu1 %1675, %v516_v7   ;;  %573 = vperm.xlu0 %1674, %v515_v8   ;;  %v536_v51 = vld [vmem:[%s2303_s3 + $0xd8] sm:$0xff]  ;;  %v535_v52 = vld [vmem:[%s2303_s3 + $0xd0] sm:$0xff]  ;;  %v538_v53 = vld [vmem:[%s2303_s3 + $0xe8] sm:$0xff] }
  0x15   : > { %v537_v54 = vld [vmem:[%s2303_s3 + $0xe0] sm:$0xff]  ;;  %v398_v56 = vld [vmem:[%s1907_s22 + $0xf8] sm:$0xff]  ;;  %v539_v61 = vld [vmem:[%s2303_s3 + $0xf0] sm:$0xff] }
  0x16   : > { %1563 = vmatpush3.bf16.msra.mxu0 %v1560_v19  ;;  %v1915_v55 = vld [vmem:[%s2301_s1] ss:$0 sm:$0xff]  ;;  %v540_v60 = vld [vmem:[%s2303_s3 + $0xf8] sm:$0xff]  ;;  %v369_v63 = vld [vmem:[%s1907_s22 + $0x10] sm:$0xff] }
  0x17   : > { %1565 = vmatprep.subr.bf16.mxu0 %v1564_v24  ;;  %v437_v57 = vmul.f32 %v1915_v55, %v398_v56  ;;  %v1922_v58 = vld [vmem:[%s2302_s2] ss:$0 sm:$0xff]  ;;  %v368_v1 = vld [vmem:[%s1907_s22 + $0x8] sm:$0xff]  ;;  %v408_v2 = vmul.f32 %v1915_v55, %v369_v63  ;;  %v370_v5 = vld [vmem:[%s1907_s22 + $0x18] sm:$0xff] }
  0x18   : > { %588 = vperm.xlu1 %1675, %v518_v17   ;;  %583 = vperm.xlu0 %1674, %v517_v18   ;;  %v367_v62 = vld [vmem:[%s1907_s22] sm:$0xff]  ;;  %v407_v4 = vmul.f32 %v1915_v55, %v368_v1  ;;  %v409_v9 = vmul.f32 %v1915_v55, %v370_v5  ;;  %v372_v11 = vld [vmem:[%s1907_s22 + $0x28] sm:$0xff]  ;;  %v373_v13 = vld [vmem:[%s1907_s22 + $0x30] sm:$0xff] }
  0x19   : > { %v1925_v59 = vadd.f32 %v1922_v58, %v437_v57  ;;  %v406_v0 = vmul.f32 %v1915_v55, %v367_v62  ;;  %v371_v6 = vld [vmem:[%s1907_s22 + $0x20] sm:$0xff]  ;;  %v447_v7 = vadd.f32 %v1922_v58, %v408_v2  ;;  %v411_v17 = vmul.f32 %v1915_v55, %v372_v11  ;;  %v377_v36 = vld [vmem:[%s1907_s22 + $0x50] sm:$0xff]  ;;  %v380_v62 = vld [vmem:[%s1907_s22 + $0x68] sm:$0xff] }
  0x1a   : > { %1567 = vmatpush3.bf16.msra.mxu0 %v1564_v24  ;;  %v446_v10 = vadd.f32 %v1922_v58, %v407_v4  ;;  %v410_v12 = vmul.f32 %v1915_v55, %v371_v6  ;;  %v412_v18 = vmul.f32 %v1915_v55, %v373_v13  ;;  %v448_v20 = vadd.f32 %v1922_v58, %v409_v9  ;;  %v375_v24 = vld [vmem:[%s1907_s22 + $0x40] sm:$0xff]  ;;  %v381_v63 = vld [vmem:[%s1907_s22 + $0x70] sm:$0xff] }
  0x1b   : > { %1569 = vmatprep.subr.bf16.mxu0 %v1568_v29  ;;  %v445_v3 = vadd.f32 %v1922_v58, %v406_v0  ;;  %v479_v15 = vmax.f32 %v447_v7, 0.0  ;;  %v414_v35 = vmul.f32 %v1915_v55, %v375_v24  ;;  %v419_v4 = vmul.f32 %v1915_v55, %v380_v62  ;;  %v383_v11 = vld [vmem:[%s1907_s22 + $0x80] sm:$0xff] }
  0x1c   : > { %598 = vperm.xlu1 %1675, %v520_v22   ;;  %593 = vperm.xlu0 %1674, %v519_v23   ;;  %v478_v21 = vmax.f32 %v446_v10, 0.0  ;;  %v449_v22 = vadd.f32 %v1922_v58, %v410_v12  ;;  %v374_v23 = vld [vmem:[%s1907_s22 + $0x38] sm:$0xff]  ;;  %v451_v30 = vadd.f32 %v1922_v58, %v412_v18  ;;  %v480_v31 = vmax.f32 %v448_v20, 0.0  ;;  %v391_v62 = vld [vmem:[%s1907_s22 + $0xc0] sm:$0xff] }
  0x1d   : > { %v477_v8 = vmax.f32 %v445_v3, 0.0  ;;  %v420_v5 = vmul.f32 %v1915_v55, %v381_v63  ;;  %v382_v10 = vld [vmem:[%s1907_s22 + $0x78] sm:$0xff] }
  0x1e   : > { %1571 = vmatpush3.bf16.msra.mxu0 %v1568_v29  ;;  %v413_v29 = vmul.f32 %v1915_v55, %v374_v23  ;;  %v483_v41 = vmax.f32 %v451_v30, 0.0  ;;  %v385_v23 = vld [vmem:[%s1907_s22 + $0x90] sm:$0xff] }
  0x1f   : > { %1573 = vmatprep.subr.bf16.mxu0 %v1572_v34 }
  0x20   : > { %608 = vperm.xlu1 %1675, %v522_v27   ;;  %603 = vperm.xlu0 %1674, %v521_v28   ;;  %v450_v28 = vadd.f32 %v1922_v58, %v411_v17  ;;  %v452_v40 = vadd.f32 %v1922_v58, %v413_v29  ;;  %v459_v17 = vadd.f32 %v1922_v58, %v420_v5 }
  0x22   : > { %1575 = vmatpush3.bf16.msra.mxu0 %v1572_v34  ;;  %v376_v34 = vld [vmem:[%s1907_s22 + $0x48] sm:$0xff] }
  0x23   : > { %1577 = vmatprep.subr.bf16.mxu0 %v1576_v39 }
  0x24   : > { %618 = vperm.xlu1 %1675, %v524_v32   ;;  %613 = vperm.xlu0 %1674, %v523_v33   ;;  %v481_v33 = vmax.f32 %v449_v22, 0.0  ;;  %v422_v22 = vmul.f32 %v1915_v55, %v383_v11 }
  0x26   : > { %1579 = vmatpush3.bf16.msra.mxu0 %v1576_v39 }
  0x27   : > { %1581 = vmatprep.subr.bf16.mxu0 %v1580_v44 }
  0x28   : > { %628 = vperm.xlu1 %1675, %v526_v37   ;;  %623 = vperm.xlu0 %1674, %v525_v38   ;;  %v482_v38 = vmax.f32 %v450_v28, 0.0  ;;  %v491_v28 = vmax.f32 %v459_v17, 0.0 }
  0x2a   : > { %1583 = vmatpush3.bf16.msra.mxu0 %v1580_v44 }
  0x2c   : > { %638 = vperm.xlu1 %1675, %v528_v42   ;;  %633 = vperm.xlu0 %1674, %v527_v43   ;;  %v415_v42 = vmul.f32 %v1915_v55, %v376_v34  ;;  %v424_v34 = vmul.f32 %v1915_v55, %v385_v23 }
  0x30   : > { %648 = vperm.xlu1 %1675, %v530_v45   ;;  %643 = vperm.xlu0 %1674, %v529_v46   ;;  %v453_v45 = vadd.f32 %v1922_v58, %v414_v35  ;;  %v378_v46 = vld [vmem:[%s1907_s22 + $0x58] sm:$0xff]  ;;  %v387_v35 = vld [vmem:[%s1907_s22 + $0xa0] sm:$0xff] }
  0x34   : > { %658 = vperm.xlu1 %1675, %v532_v47   ;;  %653 = vperm.xlu0 %1674, %v531_v48   ;;  %v416_v47 = vmul.f32 %v1915_v55, %v377_v36  ;;  %v379_v48 = vld [vmem:[%s1907_s22 + $0x60] sm:$0xff] }
  0x38   : > { %668 = vperm.xlu1 %1675, %v534_v49   ;;  %663 = vperm.xlu0 %1674, %v533_v50   ;;  %v484_v50 = vmax.f32 %v452_v40, 0.0 }
  0x3c   : > { %678 = vperm.xlu1 %1675, %v536_v51   ;;  %673 = vperm.xlu0 %1674, %v535_v52   ;;  %v454_v52 = vadd.f32 %v1922_v58, %v415_v42 }
  0x3e   : > { %v486_v1 = vmax.f32 %v454_v52, 0.0 }
  0x40   : > { %688 = vperm.xlu1 %1675, %v538_v53   ;;  %683 = vperm.xlu0 %1674, %v537_v54   ;;  %v417_v53 = vmul.f32 %v1915_v55, %v378_v46  ;;  %v418_v54 = vmul.f32 %v1915_v55, %v379_v48  ;;  %v388_v46 = vld [vmem:[%s1907_s22 + $0xa8] sm:$0xff] }
  0x41   : > { %v427_v52 = vmul.f32 %v1915_v55, %v388_v46 }
  0x42   : > { %v456_v3 = vadd.f32 %v1922_v58, %v417_v53  ;;  %v457_v9 = vadd.f32 %v1922_v58, %v418_v54 }
  0x44   : > { %698 = vperm.xlu1 %1675, %v540_v60   ;;  %693 = vperm.xlu0 %1674, %v539_v61   ;;  %v485_v60 = vmax.f32 %v453_v45, 0.0  ;;  %v455_v61 = vadd.f32 %v1922_v58, %v416_v47  ;;  %v488_v13 = vmax.f32 %v456_v3, 0.0  ;;  %v489_v20 = vmax.f32 %v457_v9, 0.0  ;;  %v389_v47 = vld [vmem:[%s1907_s22 + $0xb0] sm:$0xff] }
  0x45   : > { %v463_v45 = vadd.f32 %v1922_v58, %v424_v34  ;;  %v430_v9 = vmul.f32 %v1915_v55, %v391_v62  ;;  %v397_v34 = vld [vmem:[%s1907_s22 + $0xf0] sm:$0xff] }
  0x87   : > { %v554_v14 = vpop.permute.xlu1 %553  ;;  %v544_v16 = vpop.permute.xlu0 %543 }
  0x88   : > { %v701_v19 = vmul.f32 %v544_v16, %v477_v8  ;;  %v703_v25 = vmul.f32 %v554_v14, %v479_v15  ;;  %v487_v8 = vmax.f32 %v455_v61, 0.0  ;;  %v458_v15 = vadd.f32 %v1922_v58, %v419_v4 }
  0x89   : > { %v421_v16 = vmul.f32 %v1915_v55, %v382_v10  ;;  %v428_v61 = vmul.f32 %v1915_v55, %v389_v47  ;;  %v393_v10 = vld [vmem:[%s1907_s22 + $0xd0] sm:$0xff] }
  0x8a   : > { %1504 = vmatprep.mubr.f32.mxu0 %v701_v19 }
  0x8b   : > { %v559_v26 = vpop.permute.xlu1 %558  ;;  %v549_v27 = vpop.permute.xlu0 %548 }
  0x8c   : > { %v702_v32 = vmul.f32 %v549_v27, %v478_v21  ;;  %v704_v43 = vmul.f32 %v559_v26, %v480_v31  ;;  %v384_v21 = vld [vmem:[%s1907_s22 + $0x88] sm:$0xff]  ;;  %v460_v27 = vadd.f32 %v1922_v58, %v421_v16  ;;  %v432_v16 = vmul.f32 %v1915_v55, %v393_v10 }
  0x8d   : > { %v423_v29 = vmul.f32 %v1915_v55, %v384_v21  ;;  %v394_v21 = vld [vmem:[%s1907_s22 + $0xd8] sm:$0xff] }
  0x8e   : > { %1505 = vmatmul.mubr.f32.vlgmr.msra.gmra.mrb[0].mxu0 %v702_v32  ;;  %v461_v32 = vadd.f32 %v1922_v58, %v422_v22  ;;  %v395_v22 = vld [vmem:[%s1907_s22 + $0xe0] sm:$0xff] }
  0x8f   : > { %v569_v37 = vpop.permute.xlu1 %568  ;;  %v564_v39 = vpop.permute.xlu0 %563  ;;  %1507 = vmatprep.mubr.f32.mxu0 %v703_v25  ;;  %v490_v25 = vmax.f32 %v458_v15, 0.0 }
  0x90   : > { %v705_v44 = vmul.f32 %v564_v39, %v481_v33  ;;  %v706_v56 = vmul.f32 %v569_v37, %v482_v38  ;;  %v386_v33 = vld [vmem:[%s1907_s22 + $0x98] sm:$0xff]  ;;  %v492_v37 = vmax.f32 %v460_v27, 0.0  ;;  %v462_v39 = vadd.f32 %v1922_v58, %v423_v29 }
  0x91   : > { %v425_v40 = vmul.f32 %v1915_v55, %v386_v33  ;;  %v433_v27 = vmul.f32 %v1915_v55, %v394_v21  ;;  %v434_v33 = vmul.f32 %v1915_v55, %v395_v22 }
  0x92   : > { %1508 = vmatmul.mubr.f32.gmra.mrb[2].mxu0 %v704_v43 }
  0x93   : > { %v579_v49 = vpop.permute.xlu1 %578  ;;  %v574_v51 = vpop.permute.xlu0 %573  ;;  %1510 = vmatprep.mubr.f32.mxu0 %v705_v44  ;;  %v493_v44 = vmax.f32 %v461_v32, 0.0  ;;  %v396_v32 = vld [vmem:[%s1907_s22 + $0xe8] sm:$0xff] }
  0x94   : > { %v707_v57 = vmul.f32 %v574_v51, %v483_v41  ;;  %v708_v6 = vmul.f32 %v579_v49, %v484_v50  ;;  %v426_v41 = vmul.f32 %v1915_v55, %v387_v35  ;;  %v494_v49 = vmax.f32 %v462_v39, 0.0 }
  0x95   : > { %v464_v51 = vadd.f32 %v1922_v58, %v425_v40  ;;  %v435_v40 = vmul.f32 %v1915_v55, %v396_v32 }
  0x96   : > { %1511 = vmatmul.mubr.f32.gmra.mrb[4].mxu0 %v706_v56  ;;  %v465_v53 = vadd.f32 %v1922_v58, %v426_v41 }
  0x97   : > { %v589_v0 = vpop.permute.xlu1 %588  ;;  %v584_v2 = vpop.permute.xlu0 %583  ;;  %1513 = vmatprep.mubr.f32.mxu0 %v707_v57  ;;  %v495_v57 = vmax.f32 %v463_v45, 0.0 }
  0x98   : > { %v709_v7 = vmul.f32 %v584_v2, %v485_v60  ;;  %v710_v18 = vmul.f32 %v589_v0, %v486_v1  ;;  %v390_v60 = vld [vmem:[%s1907_s22 + $0xb8] sm:$0xff]  ;;  %v496_v0 = vmax.f32 %v464_v51, 0.0  ;;  %v466_v2 = vadd.f32 %v1922_v58, %v427_v52 }
  0x99   : > { %v497_v3 = vmax.f32 %v465_v53, 0.0  ;;  %v429_v4 = vmul.f32 %v1915_v55, %v390_v60 }
  0x9a   : > { %1514 = vmatmul.mubr.f32.gmra.mrb[6].mxu0 %v708_v6 }
  0x9b   : > { %v599_v12 = vpop.permute.xlu1 %598  ;;  %v594_v14 = vpop.permute.xlu0 %593  ;;  %1516 = vmatprep.mubr.f32.mxu0 %v709_v7  ;;  %v467_v7 = vadd.f32 %v1922_v58, %v428_v61 }
  0x9c   : > { %v711_v19 = vmul.f32 %v594_v14, %v487_v8  ;;  %v712_v30 = vmul.f32 %v599_v12, %v488_v13  ;;  %v392_v8 = vld [vmem:[%s1907_s22 + $0xc8] sm:$0xff]  ;;  %v498_v12 = vmax.f32 %v466_v2, 0.0  ;;  %v468_v14 = vadd.f32 %v1922_v58, %v429_v4  ;;  %s365_s22 = scalar_lea.vmem %s2307_s7, %s2313_s24 }
  0x9d   : > { %v431_v15 = vmul.f32 %v1915_v55, %v392_v8  ;;  %v1701_v2 = vmov 1.0  }
  0x9e   : > { %1517 = vmatmul.mubr.f32.gmra.mrb[8].mxu0 %v710_v18  ;;  %1070 = vmatprep.mubr.f32.mxu1 %v1701_v2 }
  0x9f   : > { %v609_v24 = vpop.permute.xlu1 %608  ;;  %v604_v26 = vpop.permute.xlu0 %603  ;;  %1519 = vmatprep.mubr.f32.mxu0 %v711_v19  ;;  %v499_v19 = vmax.f32 %v467_v7, 0.0 }
  0xa0   : > { %v713_v31 = vmul.f32 %v604_v26, %v489_v20  ;;  %v714_v42 = vmul.f32 %v609_v24, %v490_v25  ;;  %v469_v20 = vadd.f32 %v1922_v58, %v430_v9  ;;  %v500_v24 = vmax.f32 %v468_v14, 0.0 }
  0xa1   : > { %v470_v26 = vadd.f32 %v1922_v58, %v431_v15 }
  0xa2   : > { %1520 = vmatmul.mubr.f32.gmra.mrb[10].mxu0 %v712_v30 }
  0xa3   : > { %v619_v36 = vpop.permute.xlu1 %618  ;;  %v614_v38 = vpop.permute.xlu0 %613  ;;  %1522 = vmatprep.mubr.f32.mxu0 %v713_v31  ;;  %v501_v31 = vmax.f32 %v469_v20, 0.0 }
  0xa4   : > { %v715_v43 = vmul.f32 %v614_v38, %v491_v28  ;;  %v716_v54 = vmul.f32 %v619_v36, %v492_v37  ;;  %v471_v28 = vadd.f32 %v1922_v58, %v432_v16  ;;  %v502_v36 = vmax.f32 %v470_v26, 0.0 }
  0xa5   : > { %v472_v38 = vadd.f32 %v1922_v58, %v433_v27 }
  0xa6   : > { %1523 = vmatmul.mubr.f32.gmra.mrb[12].mxu0 %v714_v42  ;;  %v503_v39 = vmax.f32 %v471_v28, 0.0 }
  0xa7   : > { %v629_v48 = vpop.permute.xlu1 %628  ;;  %v624_v50 = vpop.permute.xlu0 %623  ;;  %1525 = vmatprep.mubr.f32.mxu0 %v715_v43  ;;  %v473_v43 = vadd.f32 %v1922_v58, %v434_v33  ;;  %v504_v46 = vmax.f32 %v472_v38, 0.0 }
  0xa8   : > { %v717_v56 = vmul.f32 %v624_v50, %v493_v44  ;;  %v718_v5 = vmul.f32 %v629_v48, %v494_v49  ;;  %v436_v44 = vmul.f32 %v1915_v55, %v397_v34  ;;  %v474_v48 = vadd.f32 %v1922_v58, %v435_v40 }
  0xa9   : > { %v505_v51 = vmax.f32 %v473_v43, 0.0 }
  0xaa   : > { %1526 = vmatmul.mubr.f32.gmra.mrb[14].mxu0 %v716_v54  ;;  %v475_v52 = vadd.f32 %v1922_v58, %v436_v44 }
  0xab   : > { %v639_v63 = vpop.permute.xlu1 %638  ;;  %v634_v1 = vpop.permute.xlu0 %633  ;;  %1528 = vmatprep.mubr.f32.mxu0 %v717_v56 }
  0xac   : > { %v719_v6 = vmul.f32 %v634_v1, %v495_v57  ;;  %v720_v17 = vmul.f32 %v639_v63, %v496_v0  ;;  %v506_v57 = vmax.f32 %v474_v48, 0.0  ;;  %v507_v60 = vmax.f32 %v475_v52, 0.0 }
  0xad   : > { %v508_v63 = vmax.f32 %v1925_v59, 0.0 }
  0xae   : > { %1529 = vmatmul.mubr.f32.gmra.mrb[16].mxu0 %v718_v5 }
  0xaf   : > { %v649_v11 = vpop.permute.xlu1 %648  ;;  %v644_v13 = vpop.permute.xlu0 %643  ;;  %1531 = vmatprep.mubr.f32.mxu0 %v719_v6 }
  0xb0   : > { %v721_v18 = vmul.f32 %v644_v13, %v497_v3  ;;  %v722_v29 = vmul.f32 %v649_v11, %v498_v12 }
  0xb2   : > { %1532 = vmatmul.mubr.f32.gmra.mrb[18].mxu0 %v720_v17 }
  0xb3   : > { %v659_v23 = vpop.permute.xlu1 %658  ;;  %v654_v25 = vpop.permute.xlu0 %653  ;;  %1534 = vmatprep.mubr.f32.mxu0 %v721_v18 }
  0xb4   : > { %v723_v30 = vmul.f32 %v654_v25, %v499_v19  ;;  %v724_v41 = vmul.f32 %v659_v23, %v500_v24 }
  0xb6   : > { %1535 = vmatmul.mubr.f32.gmra.mrb[20].mxu0 %v722_v29 }
  0xb7   : > { %v669_v35 = vpop.permute.xlu1 %668  ;;  %v664_v37 = vpop.permute.xlu0 %663  ;;  %1537 = vmatprep.mubr.f32.mxu0 %v723_v30 }
  0xb8   : > { %v725_v42 = vmul.f32 %v664_v37, %v501_v31  ;;  %v726_v49 = vmul.f32 %v669_v35, %v502_v36 }
  0xba   : > { %1538 = vmatmul.mubr.f32.gmra.mrb[22].mxu0 %v724_v41 }
  0xbb   : > { %v679_v45 = vpop.permute.xlu1 %678  ;;  %v674_v47 = vpop.permute.xlu0 %673  ;;  %1540 = vmatprep.mubr.f32.mxu0 %v725_v42 }
  0xbc   : > { %v727_v50 = vmul.f32 %v674_v47, %v503_v39  ;;  %v728_v56 = vmul.f32 %v679_v45, %v504_v46 }
  0xbe   : > { %1541 = vmatmul.mubr.f32.gmra.mrb[24].mxu0 %v726_v49 }
  0xbf   : > { %v689_v53 = vpop.permute.xlu1 %688  ;;  %v684_v54 = vpop.permute.xlu0 %683  ;;  %1543 = vmatprep.mubr.f32.mxu0 %v727_v50 }
  0xc0   : > { %v729_v55 = vmul.f32 %v684_v54, %v505_v51  ;;  %v730_v62 = vmul.f32 %v689_v53, %v506_v57 }
  0xc2   : > { %1544 = vmatmul.mubr.f32.gmra.mrb[26].mxu0 %v728_v56 }
  0xc3   : > { %v694_v61 = vpop.permute.xlu0 %693  ;;  %1546 = vmatprep.mubr.f32.mxu0 %v729_v55  ;;  %v699_v1 = vpop.permute.xlu1 %698 }
  0xc4   : > { %v731_v0 = vmul.f32 %v694_v61, %v507_v60  ;;  %v732_v58 = vmul.f32 %v699_v1, %v508_v63 }
  0xc6   : > { %1547 = vmatmul.mubr.f32.gmra.mrb[28].mxu0 %v730_v62 }
  0xc7   : > { %1549 = vmatprep.mubr.f32.mxu0 %v731_v0 }
  0xca   : > { %1550 = vmatmul.mubr.f32.gmra.mrb[30].mxu0 %v732_v58 }
 0x161   : > { %v2035_v59 = vpop.f32.mrb[0].mxu0 }
 0x162   : > { %975 = vst [vmem:[%s2033_s16 + $0x8] sm:$0xff] %v2035_v59  ;;  %v2041_v3 = vmul.f32 %v2035_v59, %v2035_v59  ;;  %v2043_v4 = vpop.f32.mrb[1].mxu0 }
 0x163   : > { %974 = vst [vmem:[%s2033_s16] sm:$0xff] %v2043_v4  ;;  %v2049_v5 = vmul.f32 %v2043_v4, %v2043_v4  ;;  %v1586_v6 = vpack.c.bf16 %v2035_v59, %v2043_v4 }
 0x165   : > { %v1618_v7 = vpack.c.bf16 %v2041_v3, %v2049_v5  ;;  %v2055_v8 = vpop.f32.mrb[2].mxu0 }
 0x166   : > { %977 = vst [vmem:[%s2033_s16 + $0x18] sm:$0xff] %v2055_v8  ;;  %v2061_v9 = vmul.f32 %v2055_v8, %v2055_v8  ;;  %v2063_v10 = vpop.f32.mrb[3].mxu0 }
 0x167   : > { %976 = vst [vmem:[%s2033_s16 + $0x10] sm:$0xff] %v2063_v10  ;;  %v1590_v11 = vpack.c.bf16 %v2055_v8, %v2063_v10  ;;  %v2071_v12 = vmul.f32 %v2063_v10, %v2063_v10 }
 0x169   : > { %v1622_v13 = vpack.c.bf16 %v2061_v9, %v2071_v12  ;;  %v2075_v14 = vpop.f32.mrb[4].mxu0 }
 0x16a   : > { %979 = vst [vmem:[%s2033_s16 + $0x28] sm:$0xff] %v2075_v14  ;;  %v2081_v15 = vmul.f32 %v2075_v14, %v2075_v14  ;;  %v2083_v16 = vpop.f32.mrb[5].mxu0 }
 0x16b   : > { %978 = vst [vmem:[%s2033_s16 + $0x20] sm:$0xff] %v2083_v16  ;;  %v1594_v17 = vpack.c.bf16 %v2075_v14, %v2083_v16  ;;  %v2091_v18 = vmul.f32 %v2083_v16, %v2083_v16 }
 0x16d   : > { %v1626_v19 = vpack.c.bf16 %v2081_v15, %v2091_v18  ;;  %v2095_v20 = vpop.f32.mrb[6].mxu0 }
 0x16e   : > { %981 = vst [vmem:[%s2033_s16 + $0x38] sm:$0xff] %v2095_v20  ;;  %v2101_v21 = vmul.f32 %v2095_v20, %v2095_v20  ;;  %v2103_v22 = vpop.f32.mrb[7].mxu0 }
 0x16f   : > { %980 = vst [vmem:[%s2033_s16 + $0x30] sm:$0xff] %v2103_v22  ;;  %v1598_v23 = vpack.c.bf16 %v2095_v20, %v2103_v22  ;;  %v2111_v24 = vmul.f32 %v2103_v22, %v2103_v22 }
 0x171   : > { %v1630_v25 = vpack.c.bf16 %v2101_v21, %v2111_v24  ;;  %v2115_v26 = vpop.f32.mrb[8].mxu0 }
 0x172   : > { %983 = vst [vmem:[%s2033_s16 + $0x48] sm:$0xff] %v2115_v26  ;;  %v2121_v27 = vmul.f32 %v2115_v26, %v2115_v26  ;;  %v2123_v28 = vpop.f32.mrb[9].mxu0 }
 0x173   : > { %982 = vst [vmem:[%s2033_s16 + $0x40] sm:$0xff] %v2123_v28  ;;  %v1602_v29 = vpack.c.bf16 %v2115_v26, %v2123_v28  ;;  %v2131_v30 = vmul.f32 %v2123_v28, %v2123_v28 }
 0x175   : > { %v1634_v31 = vpack.c.bf16 %v2121_v27, %v2131_v30  ;;  %v2135_v32 = vpop.f32.mrb[10].mxu0 }
 0x176   : > { %985 = vst [vmem:[%s2033_s16 + $0x58] sm:$0xff] %v2135_v32  ;;  %v2141_v33 = vmul.f32 %v2135_v32, %v2135_v32  ;;  %v2143_v34 = vpop.f32.mrb[11].mxu0 }
 0x177   : > { %984 = vst [vmem:[%s2033_s16 + $0x50] sm:$0xff] %v2143_v34  ;;  %v1606_v35 = vpack.c.bf16 %v2135_v32, %v2143_v34  ;;  %v2151_v36 = vmul.f32 %v2143_v34, %v2143_v34 }
 0x179   : > { %v1638_v37 = vpack.c.bf16 %v2141_v33, %v2151_v36  ;;  %v2155_v38 = vpop.f32.mrb[12].mxu0 }
 0x17a   : > { %987 = vst [vmem:[%s2033_s16 + $0x68] sm:$0xff] %v2155_v38  ;;  %v2161_v39 = vmul.f32 %v2155_v38, %v2155_v38  ;;  %v2163_v40 = vpop.f32.mrb[13].mxu0 }
 0x17b   : > { %986 = vst [vmem:[%s2033_s16 + $0x60] sm:$0xff] %v2163_v40  ;;  %v1610_v41 = vpack.c.bf16 %v2155_v38, %v2163_v40  ;;  %v2171_v42 = vmul.f32 %v2163_v40, %v2163_v40 }
 0x17d   : > { %v1642_v43 = vpack.c.bf16 %v2161_v39, %v2171_v42  ;;  %v2175_v44 = vpop.f32.mrb[14].mxu0 }
 0x17e   : > { %989 = vst [vmem:[%s2033_s16 + $0x78] sm:$0xff] %v2175_v44  ;;  %v2181_v45 = vmul.f32 %v2175_v44, %v2175_v44  ;;  %v2183_v46 = vpop.f32.mrb[15].mxu0 }
 0x17f   : > { %988 = vst [vmem:[%s2033_s16 + $0x70] sm:$0xff] %v2183_v46  ;;  %v1614_v47 = vpack.c.bf16 %v2175_v44, %v2183_v46  ;;  %v2191_v48 = vmul.f32 %v2183_v46, %v2183_v46 }
 0x181   : > { %v1646_v49 = vpack.c.bf16 %v2181_v45, %v2191_v48  ;;  %v1530_v50 = vpop.f32.mrb[16].mxu0 }
 0x182   : > { %991 = vst [vmem:[%s2033_s16 + $0x88] sm:$0xff] %v1530_v50  ;;  %v2196_v51 = vmul.f32 %v1530_v50, %v1530_v50  ;;  %v895_v52 = vpop.f32.mrb[17].mxu0 }
 0x183   : > { %990 = vst [vmem:[%s2033_s16 + $0x80] sm:$0xff] %v895_v52  ;;  %v2199_v53 = vmul.f32 %v895_v52, %v895_v52  ;;  %v1584_v54 = vpack.c.bf16 %v1530_v50, %v895_v52 }
 0x185   : > { %v1533_v56 = vpop.f32.mrb[18].mxu0  ;;  %1585 = vmatprep.subr.bf16.mxu1 %v1584_v54  ;;  %v1616_v57 = vpack.c.bf16 %v2196_v51, %v2199_v53 }
 0x186   : > { %993 = vst [vmem:[%s2033_s16 + $0x98] sm:$0xff] %v1533_v56  ;;  %v2204_v55 = vmul.f32 %v1533_v56, %v1533_v56  ;;  %v905_v60 = vpop.f32.mrb[19].mxu0  ;;  %1587 = vmatpush3.bf16.msra.mxu1 %v1586_v6 }
 0x187   : > { %992 = vst [vmem:[%s2033_s16 + $0x90] sm:$0xff] %v905_v60  ;;  %v1588_v61 = vpack.c.bf16 %v1533_v56, %v905_v60  ;;  %v2210_v62 = vmul.f32 %v905_v60, %v905_v60 }
 0x189   : > { %v1536_v63 = vpop.f32.mrb[20].mxu0  ;;  %1589 = vmatprep.subr.bf16.mxu1 %v1588_v61  ;;  %v1620_v0 = vpack.c.bf16 %v2204_v55, %v2210_v62 }
 0x18a   : > { %995 = vst [vmem:[%s2033_s16 + $0xa8] sm:$0xff] %v1536_v63  ;;  %v2215_v1 = vmul.f32 %v1536_v63, %v1536_v63  ;;  %v915_v58 = vpop.f32.mrb[21].mxu0  ;;  %1591 = vmatpush3.bf16.msra.mxu1 %v1590_v11 }
 0x18b   : > { %994 = vst [vmem:[%s2033_s16 + $0xa0] sm:$0xff] %v915_v58  ;;  %v1592_v59 = vpack.c.bf16 %v1536_v63, %v915_v58  ;;  %v1096_v4 = vmul.f32 %v915_v58, %v915_v58 }
 0x18d   : > { %v1539_v6 = vpop.f32.mrb[22].mxu0  ;;  %1593 = vmatprep.subr.bf16.mxu1 %v1592_v59  ;;  %v1624_v50 = vpack.c.bf16 %v2215_v1, %v1096_v4 }
 0x18e   : > { %997 = vst [vmem:[%s2033_s16 + $0xb8] sm:$0xff] %v1539_v6  ;;  %v1099_v52 = vmul.f32 %v1539_v6, %v1539_v6  ;;  %v925_v54 = vpop.f32.mrb[23].mxu0  ;;  %1595 = vmatpush3.bf16.msra.mxu1 %v1594_v17 }
 0x18f   : > { %996 = vst [vmem:[%s2033_s16 + $0xb0] sm:$0xff] %v925_v54  ;;  %v1596_v8 = vpack.c.bf16 %v1539_v6, %v925_v54  ;;  %v1098_v10 = vmul.f32 %v925_v54, %v925_v54 }
 0x191   : > { %v1542_v11 = vpop.f32.mrb[24].mxu0  ;;  %1597 = vmatprep.subr.bf16.mxu1 %v1596_v8  ;;  %v1628_v56 = vpack.c.bf16 %v1099_v52, %v1098_v10 }
 0x192   : > { %999 = vst [vmem:[%s2033_s16 + $0xc8] sm:$0xff] %v1542_v11  ;;  %v1101_v60 = vmul.f32 %v1542_v11, %v1542_v11  ;;  %v935_v61 = vpop.f32.mrb[25].mxu0  ;;  %1599 = vmatpush3.bf16.msra.mxu1 %v1598_v23 }
 0x193   : > { %998 = vst [vmem:[%s2033_s16 + $0xc0] sm:$0xff] %v935_v61  ;;  %v1600_v63 = vpack.c.bf16 %v1542_v11, %v935_v61  ;;  %v1100_v14 = vmul.f32 %v935_v61, %v935_v61 }
 0x195   : > { %v1545_v16 = vpop.f32.mrb[26].mxu0  ;;  %1601 = vmatprep.subr.bf16.mxu1 %v1600_v63  ;;  %v1632_v17 = vpack.c.bf16 %v1101_v60, %v1100_v14 }
 0x196   : > { %1001 = vst [vmem:[%s2033_s16 + $0xd8] sm:$0xff] %v1545_v16  ;;  %v1103_v1 = vmul.f32 %v1545_v16, %v1545_v16  ;;  %v945_v58 = vpop.f32.mrb[27].mxu0  ;;  %1603 = vmatpush3.bf16.msra.mxu1 %v1602_v29 }
 0x197   : > { %1000 = vst [vmem:[%s2033_s16 + $0xd0] sm:$0xff] %v945_v58  ;;  %v1604_v59 = vpack.c.bf16 %v1545_v16, %v945_v58  ;;  %v1102_v20 = vmul.f32 %v945_v58, %v945_v58 }
 0x199   : > { %v1548_v22 = vpop.f32.mrb[28].mxu0  ;;  %1605 = vmatprep.subr.bf16.mxu1 %v1604_v59  ;;  %v1636_v23 = vpack.c.bf16 %v1103_v1, %v1102_v20 }
 0x19a   : > { %1003 = vst [vmem:[%s2033_s16 + $0xe8] sm:$0xff] %v1548_v22  ;;  %v1105_v4 = vmul.f32 %v1548_v22, %v1548_v22  ;;  %v955_v6 = vpop.f32.mrb[29].mxu0  ;;  %1607 = vmatpush3.bf16.msra.mxu1 %v1606_v35 }
 0x19b   : > { %1002 = vst [vmem:[%s2033_s16 + $0xe0] sm:$0xff] %v955_v6  ;;  %v1608_v52 = vpack.c.bf16 %v1548_v22, %v955_v6  ;;  %v1104_v54 = vmul.f32 %v955_v6, %v955_v6 }
 0x19d   : > { %v1551_v26 = vpop.f32.mrb[30].mxu0  ;;  %1609 = vmatprep.subr.bf16.mxu1 %v1608_v52  ;;  %v1640_v28 = vpack.c.bf16 %v1105_v4, %v1104_v54 }
 0x19e   : > { %1005 = vst [vmem:[%s2033_s16 + $0xf8] sm:$0xff] %v1551_v26  ;;  %v1107_v29 = vmul.f32 %v1551_v26, %v1551_v26  ;;  %v965_v8 = vpop.f32.mrb[31].mxu0  ;;  %1611 = vmatpush3.bf16.msra.mxu1 %v1610_v41 }
 0x19f   : > { %1004 = vst [vmem:[%s2033_s16 + $0xf0] sm:$0xff] %v965_v8  ;;  %v1612_v10 = vpack.c.bf16 %v1551_v26, %v965_v8  ;;  %v1106_v11 = vmul.f32 %v965_v8, %v965_v8 }
 0x1a1   : > { %v1644_v60 = vpack.c.bf16 %v1107_v29, %v1106_v11  ;;  %1613 = vmatprep.subr.bf16.mxu1 %v1612_v10 }
 0x1a2   : > { %1615 = vmatpush3.bf16.msra.mxu1 %v1614_v47 }
 0x1a3   : > { %1617 = vmatprep.subr.bf16.mxu1 %v1616_v57 }
 0x1a5   : > { %1071 = vmatmul.mubr.f32.vlgmr.msra.gmra.mrb[0].mxu1 %v1701_v2 }
 0x1a6   : > { %1619 = vmatpush3.bf16.msra.mxu1 %v1618_v7  ;;  %1172 = vmatprep.mubr.f32.mxu1 %v1701_v2 }
 0x1a7   : > { %1621 = vmatprep.subr.bf16.mxu1 %v1620_v0 }
 0x1aa   : > { %1623 = vmatpush3.bf16.msra.mxu1 %v1622_v13 }
 0x1ab   : > { %1625 = vmatprep.subr.bf16.mxu1 %v1624_v50 }
 0x1ae   : > { %1627 = vmatpush3.bf16.msra.mxu1 %v1626_v19 }
 0x1af   : > { %1629 = vmatprep.subr.bf16.mxu1 %v1628_v56 }
 0x1b2   : > { %1631 = vmatpush3.bf16.msra.mxu1 %v1630_v25 }
 0x1b3   : > { %1633 = vmatprep.subr.bf16.mxu1 %v1632_v17 }
 0x1b6   : > { %1635 = vmatpush3.bf16.msra.mxu1 %v1634_v31 }
 0x1b7   : > { %1637 = vmatprep.subr.bf16.mxu1 %v1636_v23 }
 0x1ba   : > { %1639 = vmatpush3.bf16.msra.mxu1 %v1638_v37 }
 0x1bb   : > { %1641 = vmatprep.subr.bf16.mxu1 %v1640_v28 }
 0x1be   : > { %1643 = vmatpush3.bf16.msra.mxu1 %v1642_v43 }
 0x1bf   : > { %1645 = vmatprep.subr.bf16.mxu1 %v1644_v60 }
 0x1c2   : > { %1647 = vmatpush3.bf16.msra.mxu1 %v1646_v49 }
 0x1c5   : > { %1173 = vmatmul.mubr.f32.vlgmr.msra.gmra.mrb[2].mxu1 %v1701_v2 }
 0x278   : > { %v1434_v3 = vpop.f32.mrb[0].mxu1 }
 0x279   : > { %v1435_v5 = vpop.f32.mrb[1].mxu1 }
 0x27a   : > { %v1436_v7 = vadd.f32 %v1435_v5, %v1434_v3 }
 0x27c   : > { %1178 = vst [vmem:[%s360_s19] sm:$0x1] %v1436_v7 }
 0x298   : > { %v1469_v9 = vpop.f32.mrb[2].mxu1 }
 0x299   : > { %v1470_v12 = vpop.f32.mrb[3].mxu1 }
 0x29a   : > { %v1471_v13 = vadd.f32 %v1470_v12, %v1469_v9 }
 0x29c   : > { %1179 = vst [vmem:[%s365_s22] sm:$0x1] %v1471_v13 }
 0x29d PF: > { %s18_s26 = sadd.s32 1, %s1698_s26   ;;  %s2308_s24 = smov %s1694_s25 }
 0x29e   : > { %p15_p5 = scmp.ge.s32.totalorder %s18_s26, 4   ;;  %s2309_s25 = smov %s2311_s27 }
 0x2a0   :  { %17 = sbr.rel (!%p15_p5) target bundleno = 2 (0x2), region = 97 }

// kernel: bottleneck_pallas.7
= control target key start
LH: loop header
LB: loop body
LE: loop exit
PB: predicated region body
PF: predicated region fallthrough
CT: control target
= control target key end

     0   :  { %s707_s15 = smov 0   ;;  %s709_s16 = smov 0   ;;  %s924_s0 = inlined_call_operand.vmem [shape: f32[2,256,128], index: 0, kind: input, shape index: {}]   ;;  %s925_s1 = inlined_call_operand.vmem [shape: f32[1,128], index: 1, kind: input, shape index: {}]   ;;  %s926_s2 = inlined_call_operand.vmem [shape: f32[1,128], index: 2, kind: input, shape index: {}]   ;;  %s927_s3 = inlined_call_operand.vmem [shape: f32[2,256,128], index: 3, kind: input, shape index: {}]   ;;  %s928_s4 = inlined_call_operand.vmem [shape: f32[2,256,128], index: 4, kind: output, shape index: {}]  }
   0x1   :  { %s711_s17 = smov 0  }
   0x2 LB: > { %s26_s18 = sadd.s32 1, %s676_s16  ;;  %p620_p0 = scmp.ge.s32.totalorder %s680_s17, 1  ;;  %s680_s17 = sphi %s711_s17, %s14_s17   ;;  %s676_s16 = sphi %s709_s16, %s930_s16   ;;  %s672_s15 = sphi %s707_s15, %s929_s15  }
   0x3   : > { %p28_p1 = scmp.ge.s32.totalorder %s26_s18, 2  ;;  %p200_p2 = scmp.lt.s32.totalorder %s680_s17, 3 }
   0x5   : > { %s932_s18 = smov (%p28_p1, %s26_s18), 0  ;;  %p201_p3 = pnand %p620_p0, %p200_p2 }
   0x6   : > { %p244_p4 = scmp.lt.s32.totalorder (!%p201_p3), %s672_s15, 1  ;;  %v730_v0 = vld [vmem:[%s925_s1] ss:$0 sm:$0xff] (!%p201_p3) }
   0x7   : > { %204 = sbr.rel (%p201_p3) target bundleno = 56 (0x38), region = 36  ;;  %v748_v2 = vld [vmem:[%s926_s2] ss:$0 sm:$0xff] (!%p201_p3) }
   0xe   : > { %s934_s15 = smov (!%p244_p4, %s672_s15), 1 }
   0xf   : > { %s725_s19 = sshll.u32 %s934_s15, 8 }
  0x10   : > { %s736_s24 = scalar_lea.vmem %s924_s0, %s725_s19  ;;  %s742_s27 = scalar_lea.vmem %s927_s3, %s725_s19 }
  0x11   : > { %v273_v1 = vld [vmem:[%s736_s24] sm:$0xff]  ;;  %v274_v3 = vld [vmem:[%s736_s24 + $0x8] sm:$0xff]  ;;  %v275_v7 = vld [vmem:[%s736_s24 + $0x10] sm:$0xff]  ;;  %s778_s6 = scalar_lea.vmem %s928_s4, %s725_s19 }
  0x12   : > { %v305_v4 = vld [vmem:[%s742_s27] sm:$0xff]  ;;  %v344_v5 = vmul.f32 %v730_v0, %v273_v1  ;;  %v345_v6 = vmul.f32 %v730_v0, %v274_v3  ;;  %v306_v8 = vld [vmem:[%s742_s27 + $0x8] sm:$0xff]  ;;  %v346_v9 = vmul.f32 %v730_v0, %v275_v7  ;;  %v276_v10 = vld [vmem:[%s736_s24 + $0x18] sm:$0xff] }
  0x13   : > { %v277_v11 = vld [vmem:[%s736_s24 + $0x20] sm:$0xff]  ;;  %v307_v14 = vld [vmem:[%s742_s27 + $0x10] sm:$0xff]  ;;  %v308_v15 = vld [vmem:[%s742_s27 + $0x18] sm:$0xff]  ;;  %v347_v16 = vmul.f32 %v730_v0, %v276_v10 }
  0x14   : > { %v383_v12 = vadd.f32 %v748_v2, %v344_v5  ;;  %v384_v13 = vadd.f32 %v748_v2, %v345_v6  ;;  %v348_v17 = vmul.f32 %v730_v0, %v277_v11  ;;  %v278_v18 = vld [vmem:[%s736_s24 + $0x28] sm:$0xff]  ;;  %v385_v19 = vadd.f32 %v748_v2, %v346_v9  ;;  %v309_v20 = vld [vmem:[%s742_s27 + $0x20] sm:$0xff]  ;;  %v279_v22 = vld [vmem:[%s736_s24 + $0x30] sm:$0xff] }
  0x15   : > { %v349_v21 = vmul.f32 %v730_v0, %v278_v18  ;;  %v280_v23 = vld [vmem:[%s736_s24 + $0x38] sm:$0xff]  ;;  %v386_v26 = vadd.f32 %v748_v2, %v347_v16  ;;  %v310_v28 = vld [vmem:[%s742_s27 + $0x28] sm:$0xff]  ;;  %v350_v31 = vmul.f32 %v730_v0, %v279_v22  ;;  %v281_v33 = vld [vmem:[%s736_s24 + $0x40] sm:$0xff] }
  0x16   : > { %v415_v24 = vadd.f32 %v383_v12, %v305_v4  ;;  %v416_v25 = vadd.f32 %v384_v13, %v306_v8  ;;  %v387_v27 = vadd.f32 %v748_v2, %v348_v17  ;;  %v417_v29 = vadd.f32 %v385_v19, %v307_v14  ;;  %v282_v34 = vld [vmem:[%s736_s24 + $0x48] sm:$0xff]  ;;  %v311_v39 = vld [vmem:[%s742_s27 + $0x30] sm:$0xff]  ;;  %v312_v40 = vld [vmem:[%s742_s27 + $0x38] sm:$0xff] }
  0x17   : > { %v388_v30 = vadd.f32 %v748_v2, %v349_v21  ;;  %v351_v32 = vmul.f32 %v730_v0, %v280_v23  ;;  %v418_v37 = vadd.f32 %v386_v26, %v308_v15  ;;  %v283_v41 = vld [vmem:[%s736_s24 + $0x50] sm:$0xff]  ;;  %v389_v44 = vadd.f32 %v748_v2, %v350_v31  ;;  %v284_v46 = vld [vmem:[%s736_s24 + $0x58] sm:$0xff]  ;;  %v285_v47 = vld [vmem:[%s736_s24 + $0x60] sm:$0xff] }
  0x18   : > { %v447_v35 = vmax.f32 %v415_v24, 0.0  ;;  %v448_v36 = vmax.f32 %v416_v25, 0.0  ;;  %v419_v38 = vadd.f32 %v387_v27, %v309_v20  ;;  %v449_v42 = vmax.f32 %v417_v29, 0.0  ;;  %v286_v52 = vld [vmem:[%s736_s24 + $0x68] sm:$0xff]  ;;  %v313_v56 = vld [vmem:[%s742_s27 + $0x40] sm:$0xff]  ;;  %v315_v61 = vld [vmem:[%s742_s27 + $0x50] sm:$0xff] }
  0x19   : > { %v420_v43 = vadd.f32 %v388_v30, %v310_v28  ;;  %v390_v45 = vadd.f32 %v748_v2, %v351_v32  ;;  %v450_v48 = vmax.f32 %v418_v37, 0.0  ;;  %v352_v50 = vmul.f32 %v730_v0, %v281_v33  ;;  %v314_v57 = vld [vmem:[%s742_s27 + $0x48] sm:$0xff]  ;;  %v287_v1 = vld [vmem:[%s736_s24 + $0x70] sm:$0xff]  ;;  %v288_v3 = vld [vmem:[%s736_s24 + $0x78] sm:$0xff] }
  0x1a   : > { %479 = vst [vmem:[%s778_s6] sm:$0xff] %v447_v35  ;;  %480 = vst [vmem:[%s778_s6 + $0x8] sm:$0xff] %v448_v36  ;;  %v451_v49 = vmax.f32 %v419_v38, 0.0  ;;  %v353_v51 = vmul.f32 %v730_v0, %v282_v34  ;;  %v421_v54 = vadd.f32 %v389_v44, %v311_v39  ;;  %v354_v58 = vmul.f32 %v730_v0, %v283_v41  ;;  %v316_v7 = vld [vmem:[%s742_s27 + $0x58] sm:$0xff]  ;;  %v317_v8 = vld [vmem:[%s742_s27 + $0x60] sm:$0xff] }
  0x1b   : > { %481 = vst [vmem:[%s778_s6 + $0x10] sm:$0xff] %v449_v42  ;;  %v452_v53 = vmax.f32 %v420_v43, 0.0  ;;  %v422_v55 = vadd.f32 %v390_v45, %v312_v40  ;;  %482 = vst [vmem:[%s778_s6 + $0x18] sm:$0xff] %v450_v48  ;;  %v391_v59 = vadd.f32 %v748_v2, %v352_v50  ;;  %v355_v62 = vmul.f32 %v730_v0, %v284_v46  ;;  %v318_v14 = vld [vmem:[%s742_s27 + $0x68] sm:$0xff]  ;;  %v289_v19 = vld [vmem:[%s736_s24 + $0x80] sm:$0xff] }
  0x1c   : > { %483 = vst [vmem:[%s778_s6 + $0x20] sm:$0xff] %v451_v49  ;;  %v392_v60 = vadd.f32 %v748_v2, %v353_v51  ;;  %v356_v63 = vmul.f32 %v730_v0, %v285_v47  ;;  %v453_v4 = vmax.f32 %v421_v54, 0.0  ;;  %v393_v6 = vadd.f32 %v748_v2, %v354_v58  ;;  %v290_v20 = vld [vmem:[%s736_s24 + $0x88] sm:$0xff]  ;;  %v319_v25 = vld [vmem:[%s742_s27 + $0x70] sm:$0xff]  ;;  %v320_v26 = vld [vmem:[%s742_s27 + $0x78] sm:$0xff] }
  0x1d   : > { %484 = vst [vmem:[%s778_s6 + $0x28] sm:$0xff] %v452_v53  ;;  %v454_v5 = vmax.f32 %v422_v55, 0.0  ;;  %v357_v9 = vmul.f32 %v730_v0, %v286_v52  ;;  %v423_v10 = vadd.f32 %v391_v59, %v313_v56  ;;  %v394_v12 = vadd.f32 %v748_v2, %v355_v62  ;;  %v291_v27 = vld [vmem:[%s736_s24 + $0x90] sm:$0xff]  ;;  %v292_v32 = vld [vmem:[%s736_s24 + $0x98] sm:$0xff]  ;;  %v293_v33 = vld [vmem:[%s736_s24 + $0xa0] sm:$0xff] }
  0x1e   : > { %v424_v11 = vadd.f32 %v392_v60, %v314_v57  ;;  %v395_v13 = vadd.f32 %v748_v2, %v356_v63  ;;  %485 = vst [vmem:[%s778_s6 + $0x30] sm:$0xff] %v453_v4  ;;  %v425_v15 = vadd.f32 %v393_v6, %v315_v61  ;;  %v358_v17 = vmul.f32 %v730_v0, %v287_v1  ;;  %v294_v38 = vld [vmem:[%s736_s24 + $0xa8] sm:$0xff]  ;;  %v321_v42 = vld [vmem:[%s742_s27 + $0x80] sm:$0xff]  ;;  %v323_v47 = vld [vmem:[%s742_s27 + $0x90] sm:$0xff] }
  0x1f   : > { %486 = vst [vmem:[%s778_s6 + $0x38] sm:$0xff] %v454_v5  ;;  %v396_v16 = vadd.f32 %v748_v2, %v357_v9  ;;  %v359_v18 = vmul.f32 %v730_v0, %v288_v3  ;;  %v455_v21 = vmax.f32 %v423_v10, 0.0  ;;  %v426_v23 = vadd.f32 %v394_v12, %v316_v7  ;;  %v322_v43 = vld [vmem:[%s742_s27 + $0x88] sm:$0xff]  ;;  %v295_v50 = vld [vmem:[%s736_s24 + $0xb0] sm:$0xff]  ;;  %v296_v51 = vld [vmem:[%s736_s24 + $0xb8] sm:$0xff] }
  0x20   : > { %v456_v22 = vmax.f32 %v424_v11, 0.0  ;;  %v427_v24 = vadd.f32 %v395_v13, %v317_v8  ;;  %v457_v28 = vmax.f32 %v425_v15, 0.0  ;;  %v397_v30 = vadd.f32 %v748_v2, %v358_v17  ;;  %v324_v55 = vld [vmem:[%s742_s27 + $0x98] sm:$0xff]  ;;  %v325_v56 = vld [vmem:[%s742_s27 + $0xa0] sm:$0xff]  ;;  %v326_v62 = vld [vmem:[%s742_s27 + $0xa8] sm:$0xff] }
  0x21   : > { %v428_v29 = vadd.f32 %v396_v16, %v318_v14  ;;  %v398_v31 = vadd.f32 %v748_v2, %v359_v18  ;;  %487 = vst [vmem:[%s778_s6 + $0x40] sm:$0xff] %v455_v21  ;;  %v458_v34 = vmax.f32 %v426_v23, 0.0  ;;  %v360_v36 = vmul.f32 %v730_v0, %v289_v19  ;;  %v297_v5 = vld [vmem:[%s736_s24 + $0xc0] sm:$0xff]  ;;  %v298_v6 = vld [vmem:[%s736_s24 + $0xc8] sm:$0xff]  ;;  %v327_v11 = vld [vmem:[%s742_s27 + $0xb0] sm:$0xff] }
  0x22   : > { %488 = vst [vmem:[%s778_s6 + $0x48] sm:$0xff] %v456_v22  ;;  %v459_v35 = vmax.f32 %v427_v24, 0.0  ;;  %v361_v37 = vmul.f32 %v730_v0, %v290_v20  ;;  %489 = vst [vmem:[%s778_s6 + $0x50] sm:$0xff] %v457_v28  ;;  %v429_v40 = vadd.f32 %v397_v30, %v319_v25  ;;  %v362_v44 = vmul.f32 %v730_v0, %v291_v27  ;;  %v328_v12 = vld [vmem:[%s742_s27 + $0xb8] sm:$0xff]  ;;  %v299_v13 = vld [vmem:[%s736_s24 + $0xd0] sm:$0xff] }
  0x23   : > { %v460_v39 = vmax.f32 %v428_v29, 0.0  ;;  %v430_v41 = vadd.f32 %v398_v31, %v320_v26  ;;  %490 = vst [vmem:[%s778_s6 + $0x58] sm:$0xff] %v458_v34  ;;  %v399_v45 = vadd.f32 %v748_v2, %v360_v36  ;;  %v363_v48 = vmul.f32 %v730_v0, %v292_v32  ;;  %v300_v18 = vld [vmem:[%s736_s24 + $0xd8] sm:$0xff]  ;;  %v301_v19 = vld [vmem:[%s736_s24 + $0xe0] sm:$0xff]  ;;  %v302_v24 = vld [vmem:[%s736_s24 + $0xe8] sm:$0xff] }
  0x24   : > { %491 = vst [vmem:[%s778_s6 + $0x60] sm:$0xff] %v459_v35  ;;  %v400_v46 = vadd.f32 %v748_v2, %v361_v37  ;;  %v364_v49 = vmul.f32 %v730_v0, %v293_v33  ;;  %v461_v52 = vmax.f32 %v429_v40, 0.0  ;;  %v401_v54 = vadd.f32 %v748_v2, %v362_v44  ;;  %v329_v28 = vld [vmem:[%s742_s27 + $0xc0] sm:$0xff]  ;;  %v330_v29 = vld [vmem:[%s742_s27 + $0xc8] sm:$0xff]  ;;  %v331_v33 = vld [vmem:[%s742_s27 + $0xd0] sm:$0xff] }
  0x25   : > { %492 = vst [vmem:[%s778_s6 + $0x68] sm:$0xff] %v460_v39  ;;  %v462_v53 = vmax.f32 %v430_v41, 0.0  ;;  %v365_v57 = vmul.f32 %v730_v0, %v294_v38  ;;  %v431_v58 = vadd.f32 %v399_v45, %v321_v42  ;;  %v402_v60 = vadd.f32 %v748_v2, %v363_v48  ;;  %v303_v36 = vld [vmem:[%s736_s24 + $0xf0] sm:$0xff]  ;;  %v304_v37 = vld [vmem:[%s736_s24 + $0xf8] sm:$0xff]  ;;  %v333_v42 = vld [vmem:[%s742_s27 + $0xe0] sm:$0xff] }
  0x26   : > { %v432_v59 = vadd.f32 %v400_v46, %v322_v43  ;;  %v403_v61 = vadd.f32 %v748_v2, %v364_v49  ;;  %493 = vst [vmem:[%s778_s6 + $0x70] sm:$0xff] %v461_v52  ;;  %v433_v63 = vadd.f32 %v401_v54, %v323_v47  ;;  %v366_v3 = vmul.f32 %v730_v0, %v295_v50  ;;  %v332_v41 = vld [vmem:[%s742_s27 + $0xd8] sm:$0xff]  ;;  %v334_v48 = vld [vmem:[%s742_s27 + $0xe8] sm:$0xff] }
  0x27   : > { %494 = vst [vmem:[%s778_s6 + $0x78] sm:$0xff] %v462_v53  ;;  %v404_v1 = vadd.f32 %v748_v2, %v365_v57  ;;  %v367_v4 = vmul.f32 %v730_v0, %v296_v51  ;;  %v463_v7 = vmax.f32 %v431_v58, 0.0  ;;  %v434_v9 = vadd.f32 %v402_v60, %v324_v55  ;;  %v335_v57 = vld [vmem:[%s742_s27 + $0xf0] sm:$0xff]  ;;  %v336_v58 = vld [vmem:[%s742_s27 + $0xf8] sm:$0xff] }
  0x28   : > { %v464_v8 = vmax.f32 %v432_v59, 0.0  ;;  %v435_v10 = vadd.f32 %v403_v61, %v325_v56  ;;  %v465_v14 = vmax.f32 %v433_v63, 0.0  ;;  %v405_v16 = vadd.f32 %v748_v2, %v366_v3 }
  0x29   : > { %v436_v15 = vadd.f32 %v404_v1, %v326_v62  ;;  %v406_v17 = vadd.f32 %v748_v2, %v367_v4  ;;  %495 = vst [vmem:[%s778_s6 + $0x80] sm:$0xff] %v463_v7  ;;  %v466_v20 = vmax.f32 %v434_v9, 0.0  ;;  %v368_v22 = vmul.f32 %v730_v0, %v297_v5 }
  0x2a   : > { %496 = vst [vmem:[%s778_s6 + $0x88] sm:$0xff] %v464_v8  ;;  %v467_v21 = vmax.f32 %v435_v10, 0.0  ;;  %v369_v23 = vmul.f32 %v730_v0, %v298_v6  ;;  %497 = vst [vmem:[%s778_s6 + $0x90] sm:$0xff] %v465_v14  ;;  %v437_v26 = vadd.f32 %v405_v16, %v327_v11  ;;  %v370_v30 = vmul.f32 %v730_v0, %v299_v13 }
  0x2b   : > { %v468_v25 = vmax.f32 %v436_v15, 0.0  ;;  %v438_v27 = vadd.f32 %v406_v17, %v328_v12  ;;  %498 = vst [vmem:[%s778_s6 + $0x98] sm:$0xff] %v466_v20  ;;  %v407_v31 = vadd.f32 %v748_v2, %v368_v22  ;;  %v371_v34 = vmul.f32 %v730_v0, %v300_v18 }
  0x2c   : > { %499 = vst [vmem:[%s778_s6 + $0xa0] sm:$0xff] %v467_v21  ;;  %v408_v32 = vadd.f32 %v748_v2, %v369_v23  ;;  %v372_v35 = vmul.f32 %v730_v0, %v301_v19  ;;  %v469_v38 = vmax.f32 %v437_v26, 0.0  ;;  %v409_v40 = vadd.f32 %v748_v2, %v370_v30 }
  0x2d   : > { %500 = vst [vmem:[%s778_s6 + $0xa8] sm:$0xff] %v468_v25  ;;  %v470_v39 = vmax.f32 %v438_v27, 0.0  ;;  %v373_v43 = vmul.f32 %v730_v0, %v302_v24  ;;  %v439_v44 = vadd.f32 %v407_v31, %v329_v28  ;;  %v410_v46 = vadd.f32 %v748_v2, %v371_v34 }
  0x2e   : > { %v440_v45 = vadd.f32 %v408_v32, %v330_v29  ;;  %v411_v47 = vadd.f32 %v748_v2, %v372_v35  ;;  %501 = vst [vmem:[%s778_s6 + $0xb0] sm:$0xff] %v469_v38  ;;  %v441_v49 = vadd.f32 %v409_v40, %v331_v33  ;;  %v374_v51 = vmul.f32 %v730_v0, %v303_v36 }
  0x2f   : > { %502 = vst [vmem:[%s778_s6 + $0xb8] sm:$0xff] %v470_v39  ;;  %v412_v50 = vadd.f32 %v748_v2, %v373_v43  ;;  %v375_v52 = vmul.f32 %v730_v0, %v304_v37  ;;  %v471_v53 = vmax.f32 %v439_v44, 0.0  ;;  %v442_v55 = vadd.f32 %v410_v46, %v332_v41 }
  0x30   : > { %v472_v54 = vmax.f32 %v440_v45, 0.0  ;;  %v443_v56 = vadd.f32 %v411_v47, %v333_v42  ;;  %v473_v59 = vmax.f32 %v441_v49, 0.0  ;;  %v413_v61 = vadd.f32 %v748_v2, %v374_v51 }
  0x31   : > { %v444_v60 = vadd.f32 %v412_v50, %v334_v48  ;;  %v414_v62 = vadd.f32 %v748_v2, %v375_v52  ;;  %503 = vst [vmem:[%s778_s6 + $0xc0] sm:$0xff] %v471_v53  ;;  %v474_v0 = vmax.f32 %v442_v55, 0.0 }
  0x32   : > { %504 = vst [vmem:[%s778_s6 + $0xc8] sm:$0xff] %v472_v54  ;;  %v475_v63 = vmax.f32 %v443_v56, 0.0  ;;  %505 = vst [vmem:[%s778_s6 + $0xd0] sm:$0xff] %v473_v59  ;;  %v445_v3 = vadd.f32 %v413_v61, %v335_v57 }
  0x33   : > { %v476_v1 = vmax.f32 %v444_v60, 0.0  ;;  %v446_v4 = vadd.f32 %v414_v62, %v336_v58  ;;  %506 = vst [vmem:[%s778_s6 + $0xd8] sm:$0xff] %v474_v0 }
  0x34   : > { %507 = vst [vmem:[%s778_s6 + $0xe0] sm:$0xff] %v475_v63  ;;  %v477_v5 = vmax.f32 %v445_v3, 0.0 }
  0x35   : > { %508 = vst [vmem:[%s778_s6 + $0xe8] sm:$0xff] %v476_v1  ;;  %v478_v6 = vmax.f32 %v446_v4, 0.0 }
  0x36   : > { %509 = vst [vmem:[%s778_s6 + $0xf0] sm:$0xff] %v477_v5 }
  0x37   : > { %510 = vst [vmem:[%s778_s6 + $0xf8] sm:$0xff] %v478_v6 }
  0x38 PF: > { %s14_s17 = sadd.s32 1, %s680_s17   ;;  %s929_s15 = smov %s676_s16 }
  0x39   : > { %p11_p5 = scmp.ge.s32.totalorder %s14_s17, 4   ;;  %s930_s16 = smov %s932_s18 }
  0x3b   :  { %13 = sbr.rel (!%p11_p5) target bundleno = 2 (0x2), region = 69 }

// kernel: bottleneck_pallas.5
= control target key start
LH: loop header
LB: loop body
LE: loop exit
PB: predicated region body
PF: predicated region fallthrough
CT: control target
= control target key end

     0   :  { %s4913_s24 = smov 0   ;;  %s7637_s0 = inlined_call_operand.vmem [shape: f32[2,256,128], index: 0, kind: input, shape index: {}]   ;;  %s7638_s1 = inlined_call_operand.vmem [shape: f32[9,256,1], index: 1, kind: input, shape index: {}]   ;;  %s7639_s2 = inlined_call_operand.vmem [shape: f32[1,128], index: 2, kind: input, shape index: {}]   ;;  %s7640_s3 = inlined_call_operand.vmem [shape: f32[1,128], index: 3, kind: input, shape index: {}]   ;;  %s7641_s4 = inlined_call_operand.vmem [shape: f32[1152,128], index: 4, kind: input, shape index: {}]   ;;  %s7642_s5 = inlined_call_operand.vmem [shape: f32[2,256,128], index: 5, kind: output, shape index: {0}]   ;;  %s7643_s6 = inlined_call_operand.vmem [shape: f32[2,1,128], index: 6, kind: output, shape index: {1}]   ;;  %s7644_s7 = inlined_call_operand.vmem [shape: f32[2,1,128], index: 7, kind: output, shape index: {2}]  }
   0x1 LB: > { %s3949_s25 = sadd.s32 4294967295, %s4868_s24   ;;  %p3953_p0 = scmp.ge.s32.totalorder %s4868_s24, 1  ;;  %s4868_s24 = sphi %s4913_s24, %s18_s24  }
   0x2   : > { %p242_p1 = scmp.lt.s32.totalorder %s4868_s24, 3 }
   0x4   : > { %p243_p2 = pnand %p3953_p0, %p242_p1 }
   0x6   : > { %246 = sbr.rel (%p243_p2) target bundleno = 1123 (0x463), region = 40 }
   0xd   : > { %v507_v0 = vld [vmem:[%s7638_s1 + $0x10] sm:$0xff]  ;;  %v505_v1 = vld [vmem:[%s7638_s1] sm:$0xff]  ;;  %v4870_v2 = vmov 0   ;;  %v508_v3 = vld [vmem:[%s7638_s1 + $0x18] sm:$0xff]  ;;  %v7646_v5 = vmov 0.0|0.0   ;;  %p280_p3 = scmp.lt.s32.totalorder %s3949_s25, 1 }
   0xe   : > { %4859 = vset.pattern.permute.xlu1 %v4870_v2  ;;  %4858 = vset.pattern.permute.xlu0 %v4870_v2  ;;  %v506_v4 = vld [vmem:[%s7638_s1 + $0x8] sm:$0xff]  ;;  %v509_v7 = vld [vmem:[%s7638_s1 + $0x20] sm:$0xff]  ;;  %v512_v8 = vld [vmem:[%s7638_s1 + $0x38] sm:$0xff] }
   0xf   : > { %549 = vperm.xlu1 %4859, %v507_v0   ;;  %539 = vperm.xlu0 %4858, %v505_v1   ;;  %v510_v6 = vld [vmem:[%s7638_s1 + $0x28] sm:$0xff]  ;;  %v511_v9 = vld [vmem:[%s7638_s1 + $0x30] sm:$0xff]  ;;  %v513_v11 = vld [vmem:[%s7638_s1 + $0x40] sm:$0xff]  ;;  %s7977_s25 = smov (!%p280_p3, %s3949_s25), 1 }
  0x10   : > { %4386 = vmatprep.subr.bf16.mxu1 %v7646_v5  ;;  %4434 = vmatprep.subr.bf16.mxu0 %v7646_v5  ;;  %v514_v10 = vld [vmem:[%s7638_s1 + $0x48] sm:$0xff]  ;;  %v516_v12 = vld [vmem:[%s7638_s1 + $0x58] sm:$0xff]  ;;  %v515_v13 = vld [vmem:[%s7638_s1 + $0x50] sm:$0xff]  ;;  %s4186_s9 = sshll.u32 %s7977_s25, 8  ;;  %s292_s12 = scalar_lea.vmem %s7643_s6, %s7977_s25 }
  0x11   : > { %v518_v14 = vld [vmem:[%s7638_s1 + $0x68] sm:$0xff]  ;;  %v517_v15 = vld [vmem:[%s7638_s1 + $0x60] sm:$0xff]  ;;  %v2371_v19 = vld [vmem:[%s7641_s4 + $0x10] sm:$0xff]  ;;  %s5015_s16 = scalar_lea.vmem %s7637_s0, %s4186_s9  ;;  %s7375_s10 = scalar_lea.vmem %s7642_s5, %s4186_s9 }
  0x12   : > { %v2369_v16 = vld [vmem:[%s7641_s4] sm:$0xff]  ;;  %v2370_v17 = vld [vmem:[%s7641_s4 + $0x8] sm:$0xff]  ;;  %v2372_v20 = vld [vmem:[%s7641_s4 + $0x18] sm:$0xff]  ;;  %s295_s15 = scalar_lea.vmem %s7644_s7, %s7977_s25 }
  0x13   : > { %554 = vperm.xlu1 %4859, %v508_v3   ;;  %544 = vperm.xlu0 %4858, %v506_v4   ;;  %v4387_v18 = vpack.c.bf16 %v2370_v17, %v2369_v16  ;;  %v520_v21 = vld [vmem:[%s7638_s1 + $0x78] sm:$0xff]  ;;  %v519_v22 = vld [vmem:[%s7638_s1 + $0x70] sm:$0xff]  ;;  %v4390_v23 = vpack.c.bf16 %v2372_v20, %v2371_v19  ;;  %v2373_v24 = vld [vmem:[%s7641_s4 + $0x20] sm:$0xff] }
  0x14   : > { %v2374_v25 = vld [vmem:[%s7641_s4 + $0x28] sm:$0xff]  ;;  %v521_v27 = vld [vmem:[%s7638_s1 + $0x80] sm:$0xff]  ;;  %v2375_v29 = vld [vmem:[%s7641_s4 + $0x30] sm:$0xff] }
  0x15   : > { %4388 = vmatpush1.bf16.msra.mxu1 %v4387_v18  ;;  %v522_v26 = vld [vmem:[%s7638_s1 + $0x88] sm:$0xff]  ;;  %v4393_v28 = vpack.c.bf16 %v2374_v25, %v2373_v24  ;;  %v2376_v30 = vld [vmem:[%s7641_s4 + $0x38] sm:$0xff]  ;;  %v523_v32 = vld [vmem:[%s7638_s1 + $0x90] sm:$0xff] }
  0x16   : > { %4389 = vmatprep.subr.bf16.mxu1 %v7646_v5  ;;  %v524_v31 = vld [vmem:[%s7638_s1 + $0x98] sm:$0xff]  ;;  %v4396_v34 = vpack.c.bf16 %v2376_v30, %v2375_v29  ;;  %v5027_v35 = vld [vmem:[%s7639_s2] ss:$0 sm:$0xff]  ;;  %v2378_v37 = vld [vmem:[%s7641_s4 + $0x48] sm:$0xff] }
  0x17   : > { %564 = vperm.xlu1 %4859, %v510_v6   ;;  %559 = vperm.xlu0 %4858, %v509_v7   ;;  %v307_v33 = vld [vmem:[%s5015_s16 + $0x58] sm:$0xff]  ;;  %v2377_v36 = vld [vmem:[%s7641_s4 + $0x40] sm:$0xff]  ;;  %v526_v40 = vld [vmem:[%s7638_s1 + $0xa8] sm:$0xff] }
  0x18   : > { %v346_v38 = vmul.f32 %v5027_v35, %v307_v33  ;;  %v308_v39 = vld [vmem:[%s5015_s16 + $0x60] sm:$0xff]  ;;  %v4399_v43 = vpack.c.bf16 %v2378_v37, %v2377_v36  ;;  %v2379_v45 = vld [vmem:[%s7641_s4 + $0x50] sm:$0xff]  ;;  %v309_v46 = vld [vmem:[%s5015_s16 + $0x68] sm:$0xff] }
  0x19   : > { %4391 = vmatpush1.bf16.msra.mxu1 %v4390_v23  ;;  %v525_v41 = vld [vmem:[%s7638_s1 + $0xa0] sm:$0xff]  ;;  %v2380_v47 = vld [vmem:[%s7641_s4 + $0x58] sm:$0xff]  ;;  %v347_v48 = vmul.f32 %v5027_v35, %v308_v39  ;;  %v2402_v50 = vld [vmem:[%s7641_s4 + $0x108] sm:$0xff]  ;;  %v348_v55 = vmul.f32 %v5027_v35, %v309_v46 }
  0x1a   : > { %4392 = vmatprep.subr.bf16.mxu1 %v7646_v5  ;;  %v5047_v42 = vld [vmem:[%s7640_s3] ss:$0 sm:$0xff]  ;;  %v310_v51 = vld [vmem:[%s5015_s16 + $0x70] sm:$0xff]  ;;  %v311_v52 = vld [vmem:[%s5015_s16 + $0x78] sm:$0xff]  ;;  %v4402_v57 = vpack.c.bf16 %v2380_v47, %v2379_v45 }
  0x1b   : > { %574 = vperm.xlu1 %4859, %v512_v8   ;;  %569 = vperm.xlu0 %4858, %v511_v9   ;;  %v5050_v44 = vadd.f32 %v5047_v42, %v346_v38  ;;  %v2401_v49 = vld [vmem:[%s7641_s4 + $0x100] sm:$0xff]  ;;  %v528_v53 = vld [vmem:[%s7638_s1 + $0xb8] sm:$0xff]  ;;  %v527_v54 = vld [vmem:[%s7638_s1 + $0xb0] sm:$0xff]  ;;  %v5077_v56 = vadd.f32 %v5047_v42, %v347_v48  ;;  %v5090_v62 = vadd.f32 %v5047_v42, %v348_v55 }
  0x1c   : > { %v2381_v58 = vld [vmem:[%s7641_s4 + $0x60] sm:$0xff]  ;;  %v2382_v59 = vld [vmem:[%s7641_s4 + $0x68] sm:$0xff]  ;;  %v4435_v60 = vpack.c.bf16 %v2402_v50, %v2401_v49  ;;  %v2403_v61 = vld [vmem:[%s7641_s4 + $0x110] sm:$0xff]  ;;  %v349_v63 = vmul.f32 %v5027_v35, %v310_v51  ;;  %v350_v0 = vmul.f32 %v5027_v35, %v311_v52 }
  0x1d   : > { %4394 = vmatpush1.bf16.msra.mxu1 %v4393_v28  ;;  %v2404_v1 = vld [vmem:[%s7641_s4 + $0x118] sm:$0xff]  ;;  %v312_v2 = vld [vmem:[%s5015_s16 + $0x80] sm:$0xff]  ;;  %v313_v3 = vld [vmem:[%s5015_s16 + $0x88] sm:$0xff]  ;;  %v4405_v7 = vpack.c.bf16 %v2382_v59, %v2381_v58 }
  0x1e   : > { %4395 = vmatprep.subr.bf16.mxu1 %v7646_v5  ;;  %v530_v4 = vld [vmem:[%s7638_s1 + $0xc8] sm:$0xff]  ;;  %v529_v6 = vld [vmem:[%s7638_s1 + $0xc0] sm:$0xff]  ;;  %4436 = vmatpush1.bf16.msra.mxu0 %v4435_v60  ;;  %v5106_v8 = vadd.f32 %v5047_v42, %v349_v63  ;;  %v5109_v9 = vadd.f32 %v5047_v42, %v350_v0  ;;  %v2384_v16 = vld [vmem:[%s7641_s4 + $0x78] sm:$0xff] }
  0x1f   : > { %584 = vperm.xlu1 %4859, %v514_v10   ;;  %579 = vperm.xlu0 %4858, %v513_v11   ;;  %v2383_v10 = vld [vmem:[%s7641_s4 + $0x70] sm:$0xff]  ;;  %v4438_v11 = vpack.c.bf16 %v2404_v1, %v2403_v61  ;;  %v315_v18 = vld [vmem:[%s5015_s16 + $0x98] sm:$0xff]  ;;  %v316_v29 = vld [vmem:[%s5015_s16 + $0xa0] sm:$0xff] }
  0x20   : > { %4437 = vmatprep.subr.bf16.mxu0 %v7646_v5  ;;  %v314_v17 = vld [vmem:[%s5015_s16 + $0x90] sm:$0xff]  ;;  %v4408_v25 = vpack.c.bf16 %v2384_v16, %v2383_v10  ;;  %v2408_v28 = vld [vmem:[%s7641_s4 + $0x138] sm:$0xff]  ;;  %v317_v30 = vld [vmem:[%s5015_s16 + $0xa8] sm:$0xff] }
  0x21   : > { %4397 = vmatpush1.bf16.msra.mxu1 %v4396_v34  ;;  %v2407_v24 = vld [vmem:[%s7641_s4 + $0x130] sm:$0xff]  ;;  %v319_v37 = vld [vmem:[%s5015_s16 + $0xb8] sm:$0xff]  ;;  %v534_v38 = vld [vmem:[%s7638_s1 + $0xe8] sm:$0xff] }
  0x22   : > { %4398 = vmatprep.subr.bf16.mxu1 %v7646_v5  ;;  %4439 = vmatpush1.bf16.msra.mxu0 %v4438_v11  ;;  %v318_v36 = vld [vmem:[%s5015_s16 + $0xb0] sm:$0xff]  ;;  %v533_v39 = vld [vmem:[%s7638_s1 + $0xe0] sm:$0xff]  ;;  %v2410_v47 = vld [vmem:[%s7641_s4 + $0x148] sm:$0xff] }
  0x23   : > { %594 = vperm.xlu1 %4859, %v516_v12   ;;  %589 = vperm.xlu0 %4858, %v515_v13   ;;  %v351_v12 = vmul.f32 %v5027_v35, %v312_v2  ;;  %v352_v13 = vmul.f32 %v5027_v35, %v313_v3  ;;  %v2409_v46 = vld [vmem:[%s7641_s4 + $0x140] sm:$0xff]  ;;  %v2387_v48 = vld [vmem:[%s7641_s4 + $0x90] sm:$0xff]  ;;  %v2388_v49 = vld [vmem:[%s7641_s4 + $0x98] sm:$0xff]  ;;  %v357_v52 = vmul.f32 %v5027_v35, %v318_v36 }
  0x24   : > { %4440 = vmatprep.subr.bf16.mxu0 %v7646_v5  ;;  %v325_v55 = vld [vmem:[%s5015_s16 + $0xe8] sm:$0xff]  ;;  %v535_v58 = vld [vmem:[%s7638_s1 + $0xf0] sm:$0xff]  ;;  %v4447_v59 = vpack.c.bf16 %v2410_v47, %v2409_v46  ;;  %v4414_v0 = vpack.c.bf16 %v2388_v49, %v2387_v48  ;;  %v2412_v2 = vld [vmem:[%s7641_s4 + $0x158] sm:$0xff] }
  0x25   : > { %4400 = vmatpush1.bf16.msra.mxu1 %v4399_v43  ;;  %v5130_v19 = vadd.f32 %v5047_v42, %v351_v12  ;;  %v5133_v20 = vadd.f32 %v5047_v42, %v352_v13  ;;  %v356_v43 = vmul.f32 %v5027_v35, %v317_v30  ;;  %v5206_v60 = vadd.f32 %v5047_v42, %v357_v52  ;;  %v321_v63 = vld [vmem:[%s5015_s16 + $0xc8] sm:$0xff]  ;;  %v2411_v1 = vld [vmem:[%s7641_s4 + $0x150] sm:$0xff]  ;;  %v323_v13 = vld [vmem:[%s5015_s16 + $0xd8] sm:$0xff] }
  0x26   : > { %4401 = vmatprep.subr.bf16.mxu1 %v7646_v5  ;;  %v322_v10 = vld [vmem:[%s5015_s16 + $0xd0] sm:$0xff]  ;;  %v360_v11 = vmul.f32 %v5027_v35, %v321_v63  ;;  %v4450_v16 = vpack.c.bf16 %v2412_v2, %v2411_v1  ;;  %v2394_v46 = vld [vmem:[%s7641_s4 + $0xc8] sm:$0xff]  ;;  %v3964_v52 = vld [vmem:[%s7638_s1 + $0x120] sm:$0xff] }
  0x27   : > { %604 = vperm.xlu1 %4859, %v518_v14   ;;  %599 = vperm.xlu0 %4858, %v517_v15   ;;  %v2405_v14 = vld [vmem:[%s7641_s4 + $0x120] sm:$0xff]  ;;  %v2406_v15 = vld [vmem:[%s7641_s4 + $0x128] sm:$0xff]  ;;  %v5193_v51 = vadd.f32 %v5047_v42, %v356_v43  ;;  %v2395_v63 = vld [vmem:[%s7641_s4 + $0xd0] sm:$0xff] }
  0x28   : > { %v4441_v23 = vpack.c.bf16 %v2406_v15, %v2405_v14  ;;  %v3961_v14 = vld [vmem:[%s7638_s1 + $0x108] sm:$0xff]  ;;  %v3960_v15 = vld [vmem:[%s7638_s1 + $0x100] sm:$0xff]  ;;  %v3967_v2 = vld [vmem:[%s7638_s1 + $0x138] sm:$0xff] }
  0x29   : > { %4403 = vmatpush1.bf16.msra.mxu1 %v4402_v57  ;;  %v536_v57 = vld [vmem:[%s7638_s1 + $0xf8] sm:$0xff]  ;;  %v3965_v49 = vld [vmem:[%s7638_s1 + $0x128] sm:$0xff] }
  0x2a   : > { %4404 = vmatprep.subr.bf16.mxu1 %v7646_v5  ;;  %4442 = vmatpush1.bf16.msra.mxu0 %v4441_v23  ;;  %v361_v23 = vmul.f32 %v5027_v35, %v322_v10  ;;  %v2419_v10 = vld [vmem:[%s7641_s4 + $0x190] sm:$0xff] }
  0x2b   : > { %614 = vperm.xlu1 %4859, %v520_v21   ;;  %609 = vperm.xlu0 %4858, %v519_v22   ;;  %v532_v21 = vld [vmem:[%s7638_s1 + $0xd8] sm:$0xff]  ;;  %v531_v22 = vld [vmem:[%s7638_s1 + $0xd0] sm:$0xff] }
  0x2c   : > { %4443 = vmatprep.subr.bf16.mxu0 %v7646_v5  ;;  %v5262_v30 = vadd.f32 %v5047_v42, %v361_v23  ;;  %v2422_v23 = vld [vmem:[%s7641_s4 + $0x1a8] sm:$0xff] }
  0x2d   : > { %4406 = vmatpush1.bf16.msra.mxu1 %v4405_v7  ;;  %v2390_v7 = vld [vmem:[%s7641_s4 + $0xa8] sm:$0xff] }
  0x2e   : > { %4407 = vmatprep.subr.bf16.mxu1 %v7646_v5  ;;  %7762 = vst [vmem:[#allocation2_spill] sm:$0xff] %v5262_v30 }
  0x2f   : > { %624 = vperm.xlu1 %4859, %v522_v26   ;;  %619 = vperm.xlu0 %4858, %v521_v27   ;;  %v353_v26 = vmul.f32 %v5027_v35, %v314_v17  ;;  %v354_v27 = vmul.f32 %v5027_v35, %v315_v18  ;;  %v5242_v18 = vadd.f32 %v5047_v42, %v360_v11  ;;  %v2420_v11 = vld [vmem:[%s7641_s4 + $0x198] sm:$0xff] }
  0x31   : > { %v5160_v33 = vadd.f32 %v5047_v42, %v353_v26  ;;  %v5163_v34 = vadd.f32 %v5047_v42, %v354_v27  ;;  %4409 = vmatpush1.bf16.msra.mxu1 %v4408_v25  ;;  %v2391_v26 = vld [vmem:[%s7641_s4 + $0xb0] sm:$0xff]  ;;  %v2392_v27 = vld [vmem:[%s7641_s4 + $0xb8] sm:$0xff] }
  0x32   : > { %4410 = vmatprep.subr.bf16.mxu1 %v7646_v5 }
  0x33   : > { %634 = vperm.xlu1 %4859, %v524_v31   ;;  %629 = vperm.xlu0 %4858, %v523_v32   ;;  %v2385_v31 = vld [vmem:[%s7641_s4 + $0x80] sm:$0xff]  ;;  %v2386_v32 = vld [vmem:[%s7641_s4 + $0x88] sm:$0xff] }
  0x34   : > { %v4411_v45 = vpack.c.bf16 %v2386_v32, %v2385_v31  ;;  %v3963_v31 = vld [vmem:[%s7638_s1 + $0x118] sm:$0xff]  ;;  %v3962_v32 = vld [vmem:[%s7638_s1 + $0x110] sm:$0xff] }
  0x36   : > { %4412 = vmatpush1.bf16.msra.mxu1 %v4411_v45  ;;  %v2393_v45 = vld [vmem:[%s7641_s4 + $0xc0] sm:$0xff] }
  0x37   : > { %644 = vperm.xlu1 %4859, %v526_v40   ;;  %639 = vperm.xlu0 %4858, %v525_v41   ;;  %v4444_v40 = vpack.c.bf16 %v2408_v28, %v2407_v24  ;;  %v355_v41 = vmul.f32 %v5027_v35, %v316_v29  ;;  %v324_v24 = vld [vmem:[%s5015_s16 + $0xe0] sm:$0xff]  ;;  %v362_v28 = vmul.f32 %v5027_v35, %v323_v13  ;;  %v470_v29 = vlaneseq }
  0x38   : > { %4413 = vmatprep.subr.bf16.mxu1 %v7646_v5  ;;  %v2397_v13 = vld [vmem:[%s7641_s4 + $0xe0] sm:$0xff] }
  0x39   : > { %v5190_v50 = vadd.f32 %v5047_v42, %v355_v41  ;;  %4445 = vmatpush1.bf16.msra.mxu0 %v4444_v40  ;;  %v2415_v40 = vld [vmem:[%s7641_s4 + $0x170] sm:$0xff]  ;;  %v2416_v41 = vld [vmem:[%s7641_s4 + $0x178] sm:$0xff]  ;;  %v5291_v48 = vshrl.u32 %v470_v29, 7 }
  0x3a   : > { %4446 = vmatprep.subr.bf16.mxu0 %v7646_v5  ;;  %4415 = vmatpush1.bf16.msra.mxu1 %v4414_v0  ;;  %v2396_v0 = vld [vmem:[%s7641_s4 + $0xd8] sm:$0xff] }
  0x3b   : > { %654 = vperm.xlu1 %4859, %v528_v53   ;;  %649 = vperm.xlu0 %4858, %v527_v54   ;;  %v358_v53 = vmul.f32 %v5027_v35, %v319_v37  ;;  %v320_v54 = vld [vmem:[%s5015_s16 + $0xc0] sm:$0xff]  ;;  %v5271_v37 = vadd.f32 %v5047_v42, %v362_v28  ;;  %vm472_vm0 = vcmp.lt.s32.totalorder %v5291_v48, 1  ;;  %vm986_vm1 = vcmp.lt.s32.totalorder %v5291_v48, 7 }
  0x3c   : > { %v359_v3 = vmul.f32 %v5027_v35, %v320_v54  ;;  %4416 = vmatprep.subr.bf16.mxu1 %v7646_v5 }
  0x3d   : > { %v5209_v61 = vadd.f32 %v5047_v42, %v358_v53  ;;  %4448 = vmatpush1.bf16.msra.mxu0 %v4447_v59  ;;  %7763 = vst [vmem:[#allocation3_spill] sm:$0xff] %v5271_v37  ;;  %v4456_v53 = vpack.c.bf16 %v2416_v41, %v2415_v40  ;;  %v2425_v40 = vld [vmem:[%s7641_s4 + $0x1c0] sm:$0xff]  ;;  %v2426_v41 = vld [vmem:[%s7641_s4 + $0x1c8] sm:$0xff] }
  0x3e   : > { %v5231_v12 = vadd.f32 %v5047_v42, %v359_v3  ;;  %4449 = vmatprep.subr.bf16.mxu0 %v7646_v5  ;;  %v3966_v3 = vld [vmem:[%s7638_s1 + $0x130] sm:$0xff] }
  0x3f   : > { %664 = vperm.xlu1 %4859, %v530_v4   ;;  %659 = vperm.xlu0 %4858, %v529_v6   ;;  %v364_v4 = vmul.f32 %v5027_v35, %v325_v55  ;;  %v2389_v6 = vld [vmem:[%s7641_s4 + $0xa0] sm:$0xff]  ;;  %v4423_v55 = vpack.c.bf16 %v2394_v46, %v2393_v45  ;;  %v4025_v45 = vld [vmem:[%s7638_s1 + $0x308] sm:$0xff] }
  0x40   : > { %v4417_v17 = vpack.c.bf16 %v2390_v7, %v2389_v6  ;;  %v4426_v7 = vpack.c.bf16 %v2396_v0, %v2395_v63  ;;  %v3992_v46 = vld [vmem:[%s7638_s1 + $0x200] sm:$0xff]  ;;  %v2430_v63 = vld [vmem:[%s7641_s4 + $0x1e8] sm:$0xff]  ;;  %v4027_v0 = vld [vmem:[%s7638_s1 + $0x318] sm:$0xff] }
  0x41   : > { %v403_v25 = vadd.f32 %v5047_v42, %v364_v4  ;;  %4451 = vmatpush1.bf16.msra.mxu0 %v4450_v16  ;;  %v3968_v16 = vld [vmem:[%s7638_s1 + $0x140] sm:$0xff] }
  0x42   : > { %4418 = vmatpush1.bf16.msra.mxu1 %v4417_v17  ;;  %4452 = vmatprep.subr.bf16.mxu0 %v7646_v5  ;;  %v4462_v17 = vpack.c.bf16 %v2420_v11, %v2419_v10  ;;  %v4028_v10 = vld [vmem:[%s7638_s1 + $0x320] sm:$0xff]  ;;  %v3995_v11 = vld [vmem:[%s7638_s1 + $0x218] sm:$0xff] }
  0x43   : > { %674 = vperm.xlu1 %4859, %v532_v21   ;;  %669 = vperm.xlu0 %4858, %v531_v22   ;;  %v2413_v21 = vld [vmem:[%s7641_s4 + $0x160] sm:$0xff]  ;;  %v2414_v22 = vld [vmem:[%s7641_s4 + $0x168] sm:$0xff]  ;;  %v5281_v43 = vmax.f32 %v403_v25, 0.0  ;;  %v2400_v25 = vld [vmem:[%s7641_s4 + $0xf8] sm:$0xff] }
  0x44   : > { %v4453_v36 = vpack.c.bf16 %v2414_v22, %v2413_v21  ;;  %4419 = vmatprep.subr.bf16.mxu1 %v7646_v5  ;;  %v2421_v22 = vld [vmem:[%s7641_s4 + $0x1a0] sm:$0xff] }
  0x45   : > { %7764 = vst [vmem:[#allocation4_spill] sm:$0xff] %v5281_v43  ;;  %v7648_v59 = vrot.slane %v5281_v43, 7  ;;  %v4465_v28 = vpack.c.bf16 %v2422_v23, %v2421_v22  ;;  %v3998_v22 = vld [vmem:[%s7638_s1 + $0x230] sm:$0xff]  ;;  %v4032_v23 = vld [vmem:[%s7638_s1 + $0x340] sm:$0xff] }
  0x46   : > { %4454 = vmatpush1.bf16.msra.mxu0 %v4453_v36  ;;  %v4024_v36 = vld [vmem:[%s7638_s1 + $0x300] sm:$0xff] }
  0x47   : > { %684 = vperm.xlu1 %4859, %v534_v38   ;;  %679 = vperm.xlu0 %4858, %v533_v39   ;;  %v363_v38 = vmul.f32 %v5027_v35, %v324_v24  ;;  %v4420_v39 = vpack.c.bf16 %v2392_v27, %v2391_v26  ;;  %v2399_v24 = vld [vmem:[%s7641_s4 + $0xf0] sm:$0xff]  ;;  %v3971_v26 = vld [vmem:[%s7638_s1 + $0x158] sm:$0xff] }
  0x48   : > { %4455 = vmatprep.subr.bf16.mxu0 %v7646_v5  ;;  %v3970_v27 = vld [vmem:[%s7638_s1 + $0x150] sm:$0xff]  ;;  %v4432_v29 = vpack.c.bf16 %v2400_v25, %v2399_v24  ;;  %v3999_v24 = vld [vmem:[%s7638_s1 + $0x238] sm:$0xff]  ;;  %v4033_v25 = vld [vmem:[%s7638_s1 + $0x348] sm:$0xff] }
  0x49   : > { %v402_v47 = vadd.f32 %v5047_v42, %v363_v38  ;;  %4421 = vmatpush1.bf16.msra.mxu1 %v4420_v39  ;;  %v3972_v38 = vld [vmem:[%s7638_s1 + $0x160] sm:$0xff] }
  0x4a   : > { %4422 = vmatprep.subr.bf16.mxu1 %v7646_v5  ;;  %4457 = vmatpush1.bf16.msra.mxu0 %v4456_v53  ;;  %v4026_v53 = vld [vmem:[%s7638_s1 + $0x310] sm:$0xff] }
  0x4b   : > { %694 = vperm.xlu1 %4859, %v536_v57   ;;  %689 = vperm.xlu0 %4858, %v535_v58   ;;  %v5299_v54 = vmax.f32 %v402_v47, 0.0  ;;  %v2417_v57 = vld [vmem:[%s7641_s4 + $0x180] sm:$0xff]  ;;  %v2418_v58 = vld [vmem:[%s7641_s4 + $0x188] sm:$0xff]  ;;  %v4471_v47 = vpack.c.bf16 %v2426_v41, %v2425_v40  ;;  %v4003_v41 = vld [vmem:[%s7638_s1 + $0x258] sm:$0xff] }
  0x4c   : > { %v4459_v6 = vpack.c.bf16 %v2418_v58, %v2417_v57  ;;  %4458 = vmatprep.subr.bf16.mxu0 %v7646_v5  ;;  %v2429_v58 = vld [vmem:[%s7641_s4 + $0x1e0] sm:$0xff] }
  0x4d   : > { %7765 = vst [vmem:[#allocation5_spill] sm:$0xff] %v5299_v54  ;;  %v7645_v1 = vrot.slane %v5299_v54, 7  ;;  %4424 = vmatpush1.bf16.msra.mxu1 %v4423_v55  ;;  %v3993_v55 = vld [vmem:[%s7638_s1 + $0x208] sm:$0xff]  ;;  %v4036_v40 = vld [vmem:[%s7638_s1 + $0x360] sm:$0xff] }
  0x4e   : > { %4425 = vmatprep.subr.bf16.mxu1 %v7646_v5  ;;  %4460 = vmatpush1.bf16.msra.mxu0 %v4459_v6  ;;  %v2431_v6 = vld [vmem:[%s7641_s4 + $0x1f0] sm:$0xff]  ;;  %v304_v54 = vld [vmem:[%s5015_s16 + $0x40] sm:$0xff] }
  0x4f   : > { %769 = vperm.xlu1 %4859, %v3961_v14   ;;  %764 = vperm.xlu0 %4858, %v3960_v15   ;;  %v5330_v4 = vsel %vm472_vm0, %v7645_v1, %v7648_v59  ;;  %v2398_v14 = vld [vmem:[%s7641_s4 + $0xe8] sm:$0xff] }
  0x50   : > { %7766 = vst [vmem:[#allocation6_spill] sm:$0xff] %v5330_v4  ;;  %v3969_v15 = vld [vmem:[%s7638_s1 + $0x148] sm:$0xff]  ;;  %v4429_v21 = vpack.c.bf16 %v2398_v14, %v2397_v13  ;;  %4461 = vmatprep.subr.bf16.mxu0 %v7646_v5 }
  0x51   : > { %4427 = vmatpush1.bf16.msra.mxu1 %v4426_v7  ;;  %v2432_v7 = vld [vmem:[%s7641_s4 + $0x1f8] sm:$0xff]  ;;  %v4029_v14 = vld [vmem:[%s7638_s1 + $0x328] sm:$0xff] }
  0x52   : > { %4428 = vmatprep.subr.bf16.mxu1 %v7646_v5  ;;  %4463 = vmatpush1.bf16.msra.mxu0 %v4462_v17  ;;  %v4480_v13 = vpack.c.bf16 %v2432_v7, %v2431_v6  ;;  %v3997_v17 = vld [vmem:[%s7638_s1 + $0x228] sm:$0xff]  ;;  %v4040_v7 = vld [vmem:[%s7638_s1 + $0x380] sm:$0xff] }
  0x53   : > { %779 = vperm.xlu1 %4859, %v3963_v31   ;;  %774 = vperm.xlu0 %4858, %v3962_v32   ;;  %v2423_v31 = vld [vmem:[%s7641_s4 + $0x1b0] sm:$0xff]  ;;  %v2424_v32 = vld [vmem:[%s7641_s4 + $0x1b8] sm:$0xff]  ;;  %v297_v1 = vld [vmem:[%s5015_s16 + $0x8] sm:$0xff] }
  0x54   : > { %4464 = vmatprep.subr.bf16.mxu0 %v7646_v5  ;;  %v4468_v39 = vpack.c.bf16 %v2424_v32, %v2423_v31  ;;  %v4035_v32 = vld [vmem:[%s7638_s1 + $0x358] sm:$0xff] }
  0x55   : > { %4430 = vmatpush1.bf16.msra.mxu1 %v4429_v21  ;;  %v4031_v21 = vld [vmem:[%s7638_s1 + $0x338] sm:$0xff] }
  0x56   : > { %4431 = vmatprep.subr.bf16.mxu1 %v7646_v5  ;;  %4466 = vmatpush1.bf16.msra.mxu0 %v4465_v28  ;;  %v4001_v28 = vld [vmem:[%s7638_s1 + $0x248] sm:$0xff] }
  0x57   : > { %789 = vperm.xlu1 %4859, %v3965_v49   ;;  %784 = vperm.xlu0 %4858, %v3964_v52   ;;  %v2427_v49 = vld [vmem:[%s7641_s4 + $0x1d0] sm:$0xff]  ;;  %v2428_v52 = vld [vmem:[%s7641_s4 + $0x1d8] sm:$0xff] }
  0x58   : > { %4467 = vmatprep.subr.bf16.mxu0 %v7646_v5  ;;  %v4474_v57 = vpack.c.bf16 %v2428_v52, %v2427_v49  ;;  %v4004_v49 = vld [vmem:[%s7638_s1 + $0x260] sm:$0xff] }
  0x59   : > { %4433 = vmatpush1.bf16.msra.mxu1 %v4432_v29 }
  0x5a   : > { %4674 = vmatprep.subr.bf16.mxu1 %v7646_v5  ;;  %4469 = vmatpush1.bf16.msra.mxu0 %v4468_v39 }
  0x5b   : > { %799 = vperm.xlu1 %4859, %v3967_v2   ;;  %794 = vperm.xlu0 %4858, %v3966_v3   ;;  %v3994_v2 = vld [vmem:[%s7638_s1 + $0x210] sm:$0xff]  ;;  %v4477_v3 = vpack.c.bf16 %v2430_v63, %v2429_v58 }
  0x5c   : > { %4470 = vmatprep.subr.bf16.mxu0 %v7646_v5 }
  0x5e   : > { %4472 = vmatpush1.bf16.msra.mxu0 %v4471_v47  ;;  %v4037_v47 = vld [vmem:[%s7638_s1 + $0x368] sm:$0xff] }
  0x5f   : > { %809 = vperm.xlu1 %4859, %v3969_v15   ;;  %804 = vperm.xlu0 %4858, %v3968_v16   ;;  %v3996_v15 = vld [vmem:[%s7638_s1 + $0x220] sm:$0xff]  ;;  %v4030_v16 = vld [vmem:[%s7638_s1 + $0x330] sm:$0xff] }
  0x60   : > { %4473 = vmatprep.subr.bf16.mxu0 %v7646_v5 }
  0x62   : > { %4475 = vmatpush1.bf16.msra.mxu0 %v4474_v57  ;;  %v4005_v57 = vld [vmem:[%s7638_s1 + $0x268] sm:$0xff] }
  0x63   : > { %819 = vperm.xlu1 %4859, %v3971_v26   ;;  %814 = vperm.xlu0 %4858, %v3970_v27   ;;  %v4000_v26 = vld [vmem:[%s7638_s1 + $0x240] sm:$0xff]  ;;  %v4034_v27 = vld [vmem:[%s7638_s1 + $0x350] sm:$0xff] }
  0x64   : > { %4476 = vmatprep.subr.bf16.mxu0 %v7646_v5 }
  0x66   : > { %4478 = vmatpush1.bf16.msra.mxu0 %v4477_v3 }
  0x67   : > { %1279 = vperm.xlu1 %4859, %v4024_v36   ;;  %824 = vperm.xlu0 %4858, %v3972_v38   ;;  %v4002_v36 = vld [vmem:[%s7638_s1 + $0x250] sm:$0xff] }
  0x68   : > { %4479 = vmatprep.subr.bf16.mxu0 %v7646_v5 }
  0x6a   : > { %4481 = vmatpush1.bf16.msra.mxu0 %v4480_v13 }
  0x6b   : > { %1284 = vperm.xlu1 %4859, %v4025_v45   ;;  %1054 = vperm.xlu0 %4858, %v3992_v46  }
  0x6c   : > { %4482 = vmatprep.subr.bf16.mxu0 %v7646_v5 }
  0x6f   : > { %1289 = vperm.xlu1 %4859, %v4026_v53   ;;  %1059 = vperm.xlu0 %4858, %v3993_v55   ;;  %v4038_v55 = vld [vmem:[%s7638_s1 + $0x370] sm:$0xff] }
  0x73   : > { %1294 = vperm.xlu1 %4859, %v4027_v0   ;;  %1064 = vperm.xlu0 %4858, %v3994_v2   ;;  %v4039_v0 = vld [vmem:[%s7638_s1 + $0x378] sm:$0xff]  ;;  %v4006_v2 = vld [vmem:[%s7638_s1 + $0x270] sm:$0xff] }
  0x77   : > { %1299 = vperm.xlu1 %4859, %v4028_v10   ;;  %1069 = vperm.xlu0 %4858, %v3995_v11   ;;  %v4007_v10 = vld [vmem:[%s7638_s1 + $0x278] sm:$0xff] }
  0x7b   : > { %1304 = vperm.xlu1 %4859, %v4029_v14   ;;  %1074 = vperm.xlu0 %4858, %v3996_v15   ;;  %v4041_v14 = vld [vmem:[%s7638_s1 + $0x388] sm:$0xff]  ;;  %v4008_v15 = vld [vmem:[%s7638_s1 + $0x280] sm:$0xff] }
  0x7f   : > { %1309 = vperm.xlu1 %4859, %v4030_v16   ;;  %1079 = vperm.xlu0 %4858, %v3997_v17  }
  0x83   : > { %1314 = vperm.xlu1 %4859, %v4031_v21   ;;  %1084 = vperm.xlu0 %4858, %v3998_v22   ;;  %v4042_v21 = vld [vmem:[%s7638_s1 + $0x390] sm:$0xff]  ;;  %v4009_v22 = vld [vmem:[%s7638_s1 + $0x288] sm:$0xff] }
  0x87   : > { %1319 = vperm.xlu1 %4859, %v4032_v23   ;;  %1089 = vperm.xlu0 %4858, %v3999_v24  }
  0x8b   : > { %1324 = vperm.xlu1 %4859, %v4033_v25   ;;  %1094 = vperm.xlu0 %4858, %v4000_v26   ;;  %v4043_v25 = vld [vmem:[%s7638_s1 + $0x398] sm:$0xff]  ;;  %v4010_v26 = vld [vmem:[%s7638_s1 + $0x290] sm:$0xff] }
  0x8e   : > { %v5477_v29 = vpop.permute.xlu1 %549  ;;  %v5479_v31 = vpop.permute.xlu0 %539 }
  0x8f   : > { %1329 = vperm.xlu1 %4859, %v4034_v27   ;;  %1099 = vperm.xlu0 %4858, %v4001_v28  }
  0x92   : > { %v5487_v38 = vpop.permute.xlu1 %554  ;;  %v5489_v39 = vpop.permute.xlu0 %544 }
  0x93   : > { %1334 = vperm.xlu1 %4859, %v4035_v32   ;;  %1104 = vperm.xlu0 %4858, %v4002_v36   ;;  %v4044_v32 = vld [vmem:[%s7638_s1 + $0x3a0] sm:$0xff]  ;;  %v4011_v36 = vld [vmem:[%s7638_s1 + $0x298] sm:$0xff] }
  0x96   : > { %v5497_v45 = vpop.permute.xlu1 %564  ;;  %v5499_v46 = vpop.permute.xlu0 %559 }
  0x97   : > { %1339 = vperm.xlu1 %4859, %v4036_v40   ;;  %1109 = vperm.xlu0 %4858, %v4003_v41  }
  0x9a   : > { %v5507_v52 = vpop.permute.xlu1 %574  ;;  %v5509_v53 = vpop.permute.xlu0 %569 }
  0x9b   : > { %1344 = vperm.xlu1 %4859, %v4037_v47   ;;  %1114 = vperm.xlu0 %4858, %v4004_v49   ;;  %v4045_v47 = vld [vmem:[%s7638_s1 + $0x3a8] sm:$0xff]  ;;  %v4012_v49 = vld [vmem:[%s7638_s1 + $0x2a0] sm:$0xff] }
  0x9e   : > { %v5517_v58 = vpop.permute.xlu1 %584  ;;  %v5519_v63 = vpop.permute.xlu0 %579 }
  0x9f   : > { %1349 = vperm.xlu1 %4859, %v4038_v55   ;;  %1119 = vperm.xlu0 %4858, %v4005_v57   ;;  %v326_v55 = vld [vmem:[%s5015_s16 + $0xf0] sm:$0xff] }
  0xa2   : > { %v5527_v3 = vpop.permute.xlu1 %594  ;;  %v5529_v6 = vpop.permute.xlu0 %589 }
  0xa3   : > { %1354 = vperm.xlu1 %4859, %v4039_v0   ;;  %1124 = vperm.xlu0 %4858, %v4006_v2   ;;  %v4046_v2 = vld [vmem:[%s7638_s1 + $0x3b0] sm:$0xff] }
  0xa6   : > { %v5537_v11 = vpop.permute.xlu1 %604  ;;  %v5539_v13 = vpop.permute.xlu0 %599 }
  0xa7   : > { %1359 = vperm.xlu1 %4859, %v4040_v7   ;;  %1129 = vperm.xlu0 %4858, %v4007_v10   ;;  %v4013_v7 = vld [vmem:[%s7638_s1 + $0x2a8] sm:$0xff]  ;;  %v365_v10 = vmul.f32 %v5027_v35, %v326_v55 }
  0xa8   : > { %v3973_v55 = vld [vmem:[%s7638_s1 + $0x168] sm:$0xff] }
  0xaa   : > { %v5547_v16 = vpop.permute.xlu1 %614  ;;  %v5549_v17 = vpop.permute.xlu0 %609 }
  0xab   : > { %7767 = vst [vmem:[#allocation7_spill] sm:$0xff] %v5547_v16  ;;  %7768 = vst [vmem:[#allocation8_spill] sm:$0xff] %v5549_v17  ;;  %1364 = vperm.xlu1 %4859, %v4041_v14   ;;  %1134 = vperm.xlu0 %4858, %v4008_v15  }
  0xae   : > { %v5557_v23 = vpop.permute.xlu1 %624  ;;  %v5559_v24 = vpop.permute.xlu0 %619 }
  0xaf   : > { %7769 = vst [vmem:[#allocation9_spill] sm:$0xff] %v5557_v23  ;;  %7770 = vst [vmem:[#allocation10_spill] sm:$0xff] %v5559_v24  ;;  %1369 = vperm.xlu1 %4859, %v4042_v21   ;;  %1139 = vperm.xlu0 %4858, %v4009_v22   ;;  %v327_v21 = vld [vmem:[%s5015_s16 + $0xf8] sm:$0xff]  ;;  %v343_v23 = vmul.f32 %v5027_v35, %v304_v54  ;;  %v305_v24 = vld [vmem:[%s5015_s16 + $0x48] sm:$0xff] }
  0xb0   : > { %v4047_v22 = vld [vmem:[%s7638_s1 + $0x3b8] sm:$0xff] }
  0xb2   : > { %v5567_v27 = vpop.permute.xlu1 %634  ;;  %v5569_v28 = vpop.permute.xlu0 %629 }
  0xb3   : > { %7771 = vst [vmem:[#allocation11_spill] sm:$0xff] %v5567_v27  ;;  %7772 = vst [vmem:[#allocation12_spill] sm:$0xff] %v5569_v28  ;;  %1374 = vperm.xlu1 %4859, %v4043_v25   ;;  %1144 = vperm.xlu0 %4858, %v4010_v26   ;;  %v4014_v25 = vld [vmem:[%s7638_s1 + $0x2b0] sm:$0xff]  ;;  %v404_v26 = vadd.f32 %v5047_v42, %v365_v10 }
  0xb5   : > { %v5624_v10 = vmax.f32 %v404_v26, 0.0 }
  0xb6   : > { %v5577_v40 = vpop.permute.xlu1 %644  ;;  %v5579_v41 = vpop.permute.xlu0 %639 }
  0xb7   : > { %7773 = vst [vmem:[#allocation13_spill] sm:$0xff] %v5577_v40  ;;  %7774 = vst [vmem:[#allocation14_spill] sm:$0xff] %v5579_v41  ;;  %1379 = vperm.xlu1 %4859, %v4044_v32   ;;  %1149 = vperm.xlu0 %4858, %v4011_v36   ;;  %v296_v32 = vld [vmem:[%s5015_s16] sm:$0xff] }
  0xb8   : > { %7781 = vst [vmem:[#allocation21_spill] sm:$0xff] %v5624_v10 }
  0xba   : > { %v5588_v57 = vpop.permute.xlu1 %654  ;;  %v5590_v0 = vpop.permute.xlu0 %649 }
  0xbb   : > { %7775 = vst [vmem:[#allocation15_spill] sm:$0xff] %v5588_v57  ;;  %7776 = vst [vmem:[#allocation16_spill] sm:$0xff] %v5590_v0  ;;  %1384 = vperm.xlu1 %4859, %v4045_v47   ;;  %1154 = vperm.xlu0 %4858, %v4012_v49   ;;  %v366_v49 = vmul.f32 %v5027_v35, %v327_v21 }
  0xbd   : > { %v405_v21 = vadd.f32 %v5047_v42, %v366_v49 }
  0xbe   : > { %v5599_v14 = vpop.permute.xlu1 %664  ;;  %v5601_v15 = vpop.permute.xlu0 %659  ;;  %v7876_v48 = vld [vmem:[#allocation13_spill] sm:$0xff] }
  0xbf   : > { %7777 = vst [vmem:[#allocation17_spill] sm:$0xff] %v5599_v14  ;;  %7778 = vst [vmem:[#allocation18_spill] sm:$0xff] %v5601_v15  ;;  %1389 = vperm.xlu1 %4859, %v4046_v2   ;;  %1159 = vperm.xlu0 %4858, %v4013_v7   ;;  %v4015_v2 = vld [vmem:[%s7638_s1 + $0x2b8] sm:$0xff]  ;;  %v335_v7 = vmul.f32 %v5027_v35, %v296_v32  ;;  %v468_v32 = vrot.slane %v5624_v10, 7 }
  0xc1   : > { %v374_v26 = vadd.f32 %v5047_v42, %v335_v7  ;;  %v3974_v7 = vld [vmem:[%s7638_s1 + $0x170] sm:$0xff] }
  0xc2   : > { %v5612_v36 = vpop.permute.xlu1 %674  ;;  %v5614_v47 = vpop.permute.xlu0 %669 }
  0xc3   : > { %7779 = vst [vmem:[#allocation19_spill] sm:$0xff] %v5612_v36  ;;  %7780 = vst [vmem:[#allocation20_spill] sm:$0xff] %v5614_v47  ;;  %1394 = vperm.xlu1 %4859, %v4047_v22   ;;  %1164 = vperm.xlu0 %4858, %v4014_v25   ;;  %v4016_v22 = vld [vmem:[%s7638_s1 + $0x2c0] sm:$0xff]  ;;  %v5654_v47 = vmax.f32 %v374_v26, 0.0 }
  0xc4   : > { %v4048_v25 = vld [vmem:[%s7638_s1 + $0x3c0] sm:$0xff] }
  0xc5   : > { %7787 = vst [vmem:[#allocation27_spill] sm:$0xff] %v5654_v47  ;;  %v438_v0 = vrot.slane %v5654_v47, 7 }
  0xc6   : > { %v5627_v5 = vpop.permute.xlu1 %684  ;;  %v5629_v59 = vpop.permute.xlu0 %679 }
  0xc7   : > { %7782 = vst [vmem:[#allocation22_spill] sm:$0xff] %v5627_v5  ;;  %7783 = vst [vmem:[#allocation23_spill] sm:$0xff] %v5629_v59  ;;  %829 = vperm.xlu1 %4859, %v3973_v55   ;;  %1169 = vperm.xlu0 %4858, %v4015_v2   ;;  %v336_v5 = vmul.f32 %v5027_v35, %v297_v1  ;;  %v298_v59 = vld [vmem:[%s5015_s16 + $0x10] sm:$0xff]  ;;  %v5646_v55 = vmax.f32 %v405_v21, 0.0  ;;  %v4049_v2 = vld [vmem:[%s7638_s1 + $0x3c8] sm:$0xff]  ;;  %v7788_v1 = vrot.slane %v5281_v43, 7 }
  0xc9   : > { %7786 = vst [vmem:[#allocation26_spill] sm:$0xff] %v5646_v55  ;;  %v375_v21 = vadd.f32 %v5047_v42, %v336_v5  ;;  %v469_v15 = vrot.slane %v5646_v55, 7  ;;  %v3975_v5 = vld [vmem:[%s7638_s1 + $0x178] sm:$0xff] }
  0xca   : > { %v5642_v36 = vpop.permute.xlu1 %694  ;;  %v5644_v49 = vpop.permute.xlu0 %689 }
  0xcb   : > { %7784 = vst [vmem:[#allocation24_spill] sm:$0xff] %v5642_v36  ;;  %7785 = vst [vmem:[#allocation25_spill] sm:$0xff] %v5644_v49  ;;  %1174 = vperm.xlu1 %4859, %v4016_v22   ;;  %1399 = vperm.xlu0 %4858, %v4048_v25   ;;  %v5660_v36 = vsel %vm472_vm0, %v7788_v1, %v468_v32  ;;  %v299_v22 = vld [vmem:[%s5015_s16 + $0x18] sm:$0xff]  ;;  %v337_v25 = vmul.f32 %v5027_v35, %v298_v59  ;;  %v4017_v59 = vld [vmem:[%s7638_s1 + $0x2c8] sm:$0xff]  ;;  %v5677_v40 = vmax.f32 %v375_v21, 0.0 }
  0xcc   : > { %7789 = vst [vmem:[#allocation28_spill] sm:$0xff] %v5660_v36  ;;  %v697_v57 = vmul.f32 %v5479_v31, %v5660_v36  ;;  %v338_v1 = vmul.f32 %v5027_v35, %v299_v22 }
  0xcd   : > { %v376_v31 = vadd.f32 %v5047_v42, %v337_v25  ;;  %v4050_v25 = vld [vmem:[%s7638_s1 + $0x3d0] sm:$0xff] }
  0xce   : > { %v770_v49 = vpop.permute.xlu1 %769  ;;  %v765_v14 = vpop.permute.xlu0 %764  ;;  %v377_v36 = vadd.f32 %v5047_v42, %v338_v1 }
  0xcf   : > { %1404 = vperm.xlu1 %4859, %v4049_v2   ;;  %834 = vperm.xlu0 %4858, %v3974_v7   ;;  %v922_v26 = vmul.f32 %v765_v14, %v5624_v10  ;;  %v5681_v14 = vsel %vm472_vm0, %v468_v32, %v469_v15  ;;  %v300_v2 = vld [vmem:[%s5015_s16 + $0x20] sm:$0xff]  ;;  %v923_v7 = vmul.f32 %v770_v49, %v5646_v55  ;;  %v4018_v32 = vld [vmem:[%s7638_s1 + $0x2d0] sm:$0xff] }
  0xd0   : > { %7790 = vst [vmem:[#allocation29_spill] sm:$0xff] %v5681_v14  ;;  %v698_v21 = vmul.f32 %v5489_v39, %v5681_v14  ;;  %v5697_v49 = vsel %vm472_vm0, %v469_v15, %v438_v0  ;;  %v301_v39 = vld [vmem:[%s5015_s16 + $0x28] sm:$0xff]  ;;  %v339_v1 = vmul.f32 %v5027_v35, %v300_v2  ;;  %v3976_v2 = vld [vmem:[%s7638_s1 + $0x180] sm:$0xff] }
  0xd1   : > { %2577 = vmatprep.mubr.f32.mxu1 %v922_v26  ;;  %7791 = vst [vmem:[#allocation30_spill] sm:$0xff] %v5697_v49  ;;  %v5700_v26 = vmax.f32 %v376_v31, 0.0  ;;  %v699_v14 = vmul.f32 %v5477_v29, %v5697_v49  ;;  %v340_v15 = vmul.f32 %v5027_v35, %v301_v39  ;;  %v4051_v31 = vld [vmem:[%s7638_s1 + $0x3d8] sm:$0xff] }
  0xd2   : > { %v780_v22 = vpop.permute.xlu1 %779  ;;  %v775_v41 = vpop.permute.xlu0 %774  ;;  %2578 = vmatmul.mubr.f32.vlgmr.msra.gmra.mrb[0].mxu1 %v697_v57  ;;  %v439_v57 = vrot.slane %v5677_v40, 7  ;;  %v378_v29 = vadd.f32 %v5047_v42, %v339_v1  ;;  %v3977_v1 = vld [vmem:[%s7638_s1 + $0x188] sm:$0xff] }
  0xd3   : > { %839 = vperm.xlu1 %4859, %v3975_v5   ;;  %1179 = vperm.xlu0 %4858, %v4017_v59   ;;  %v924_v5 = vmul.f32 %v775_v41, %v5654_v47  ;;  %v925_v39 = vmul.f32 %v780_v22, %v5677_v40  ;;  %v4019_v22 = vld [vmem:[%s7638_s1 + $0x2d8] sm:$0xff] }
  0xd4   : > { %2582 = vmatprep.mubr.f32.mxu1 %v923_v7  ;;  %v5716_v41 = vsel %vm472_vm0, %v438_v0, %v439_v57 }
  0xd5   : > { %7792 = vst [vmem:[#allocation31_spill] sm:$0xff] %v5716_v41  ;;  %v700_v0 = vmul.f32 %v5487_v38, %v5716_v41  ;;  %v303_v38 = vld [vmem:[%s5015_s16 + $0x38] sm:$0xff] }
  0xd6   : > { %v790_v59 = vpop.permute.xlu1 %789  ;;  %v785_v7 = vpop.permute.xlu0 %784  ;;  %2583 = vmatmul.mubr.f32.gmra.mrb[2].mxu1 %v698_v21  ;;  %v5718_v21 = vmax.f32 %v377_v36, 0.0  ;;  %v379_v36 = vadd.f32 %v5047_v42, %v340_v15 }
  0xd7   : > { %1184 = vperm.xlu1 %4859, %v4018_v32   ;;  %1409 = vperm.xlu0 %4858, %v4050_v25   ;;  %v440_v32 = vrot.slane %v5700_v26, 7  ;;  %v302_v25 = vld [vmem:[%s5015_s16 + $0x30] sm:$0xff] }
  0xd8   : > { %2587 = vmatprep.mubr.f32.mxu1 %v924_v5  ;;  %v441_v43 = vrot.slane %v5718_v21, 7  ;;  %v341_v15 = vmul.f32 %v5027_v35, %v302_v25 }
  0xda   : > { %v5724_v5 = vpop.permute.xlu1 %799  ;;  %v795_v27 = vpop.permute.xlu0 %794  ;;  %2588 = vmatmul.mubr.f32.gmra.mrb[4].mxu1 %v699_v14  ;;  %v5738_v14 = vsel %vm472_vm0, %v439_v57, %v440_v32  ;;  %v342_v57 = vmul.f32 %v5027_v35, %v303_v38  ;;  %v5761_v25 = vsel %vm472_vm0, %v440_v32, %v441_v43  ;;  %v985_v35 = vrot.slane %v5646_v55, 1 }
  0xdb   : > { %1414 = vperm.xlu1 %4859, %v4051_v31   ;;  %844 = vperm.xlu0 %4858, %v3976_v2   ;;  %7793 = vst [vmem:[#allocation32_spill] sm:$0xff] %v5738_v14  ;;  %v5740_v31 = vmax.f32 %v378_v29, 0.0  ;;  %v926_v2 = vmul.f32 %v785_v7, %v5700_v26  ;;  %v701_v4 = vmul.f32 %v5499_v46, %v5738_v14  ;;  %v4020_v29 = vld [vmem:[%s7638_s1 + $0x2e0] sm:$0xff]  ;;  %7794 = vst [vmem:[#allocation33_spill] sm:$0xff] %v5761_v25 }
  0xdc   : > { %2592 = vmatprep.mubr.f32.mxu1 %v925_v39  ;;  %v4052_v7 = vld [vmem:[%s7638_s1 + $0x3e0] sm:$0xff]  ;;  %v702_v32 = vmul.f32 %v5497_v45, %v5761_v25 }
  0xdd   : > { %v442_v46 = vrot.slane %v5740_v31, 7 }
  0xde   : > { %v5745_v39 = vpop.permute.xlu1 %809  ;;  %v5747_v28 = vpop.permute.xlu0 %804  ;;  %2593 = vmatmul.mubr.f32.gmra.mrb[6].mxu1 %v700_v0  ;;  %v5763_v0 = vmax.f32 %v379_v36, 0.0  ;;  %v381_v36 = vadd.f32 %v5047_v42, %v342_v57  ;;  %v928_v57 = vmul.f32 %v795_v27, %v5740_v31  ;;  %v7798_v27 = vrot.slane %v5624_v10, 1 }
  0xdf   : > { %849 = vperm.xlu1 %4859, %v3977_v1   ;;  %1189 = vperm.xlu0 %4858, %v4019_v22   ;;  %v380_v1 = vadd.f32 %v5047_v42, %v341_v15  ;;  %v927_v22 = vmul.f32 %v790_v59, %v5718_v21  ;;  %v4053_v59 = vld [vmem:[%s7638_s1 + $0x3e8] sm:$0xff]  ;;  %v3978_v15 = vld [vmem:[%s7638_s1 + $0x190] sm:$0xff]  ;;  %v5788_v45 = vsel %vm472_vm0, %v441_v43, %v442_v46 }
  0xe0   : > { %2597 = vmatprep.mubr.f32.mxu1 %v926_v2  ;;  %7795 = vst [vmem:[#allocation34_spill] sm:$0xff] %v5763_v0  ;;  %v443_v54 = vrot.slane %v5763_v0, 7  ;;  %7796 = vst [vmem:[#allocation35_spill] sm:$0xff] %v5788_v45  ;;  %v5806_v55 = vsel %vm986_vm1, %v7798_v27, %v985_v35 }
  0xe1   : > { %v5790_v42 = vmax.f32 %v380_v1, 0.0  ;;  %v703_v1 = vmul.f32 %v5509_v53, %v5788_v45  ;;  %7799 = vst [vmem:[#allocation37_spill] sm:$0xff] %v5806_v55 }
  0xe2   : > { %v5768_v38 = vpop.permute.xlu1 %819  ;;  %v5770_v2 = vpop.permute.xlu0 %814  ;;  %2598 = vmatmul.mubr.f32.gmra.mrb[8].mxu1 %v701_v4  ;;  %v5817_v53 = vsel %vm472_vm0, %v442_v46, %v443_v54  ;;  %v306_v46 = vld [vmem:[%s5015_s16 + $0x50] sm:$0xff] }
  0xe3   : > { %1194 = vperm.xlu1 %4859, %v4020_v29   ;;  %1419 = vperm.xlu0 %4858, %v4052_v7   ;;  %7797 = vst [vmem:[#allocation36_spill] sm:$0xff] %v5790_v42  ;;  %7800 = vst [vmem:[#allocation38_spill] sm:$0xff] %v5817_v53 }
  0xe4   : > { %2602 = vmatprep.mubr.f32.mxu1 %v927_v22  ;;  %v4860_v22 = vld [vmem:[%s7639_s2] ss:$0 sm:$0xff] }
  0xe5   : > { %v344_v4 = vmul.f32 %v4860_v22, %v305_v24  ;;  %v4021_v24 = vld [vmem:[%s7638_s1 + $0x2e8] sm:$0xff] }
  0xe6   : > { %v1280_v29 = vpop.permute.xlu1 %1279  ;;  %v5794_v7 = vpop.permute.xlu0 %824  ;;  %2603 = vmatmul.mubr.f32.gmra.mrb[10].mxu1 %v702_v32  ;;  %v3979_v32 = vld [vmem:[%s7638_s1 + $0x198] sm:$0xff] }
  0xe7   : > { %1424 = vperm.xlu1 %4859, %v4053_v59   ;;  %854 = vperm.xlu0 %4858, %v3978_v15   ;;  %v1437_v43 = vmul.f32 %v1280_v29, %v5697_v49  ;;  %v954_v59 = vrot.slane %v5654_v47, 1  ;;  %v5819_v15 = vmax.f32 %v381_v36, 0.0  ;;  %v4861_v29 = vld [vmem:[%s7640_s3] ss:$0 sm:$0xff]  ;;  %v2434_v47 = vld [vmem:[%s7641_s4 + $0x208] sm:$0xff]  ;;  %v929_v36 = vmul.f32 %v5724_v5, %v5763_v0  ;;  %v4022_v5 = vld [vmem:[%s7638_s1 + $0x2f0] sm:$0xff] }
  0xe8   : > { %2607 = vmatprep.mubr.f32.mxu1 %v928_v57  ;;  %v444_v57 = vrot.slane %v5790_v42, 7  ;;  %v382_v27 = vadd.f32 %v4861_v29, %v343_v23  ;;  %v2433_v49 = vld [vmem:[%s7641_s4 + $0x200] sm:$0xff]  ;;  %v383_v37 = vadd.f32 %v4861_v29, %v344_v4 }
  0xe9   : > { %7801 = vst [vmem:[#allocation39_spill] sm:$0xff] %v5819_v15  ;;  %2802 = vmatprep.mubr.f32.mxu0 %v1437_v43  ;;  %v704_v43 = vmul.f32 %v5507_v52, %v5817_v53  ;;  %v5840_v30 = vsel %vm986_vm1, %v985_v35, %v954_v59  ;;  %v4483_v4 = vpack.c.bf16 %v2434_v47, %v2433_v49 }
  0xea   : > { %v1285_v10 = vpop.permute.xlu1 %1284  ;;  %v1055_v16 = vpop.permute.xlu0 %1054  ;;  %2608 = vmatmul.mubr.f32.gmra.mrb[12].mxu1 %v703_v1  ;;  %7802 = vst [vmem:[#allocation40_spill] sm:$0xff] %v5840_v30  ;;  %v445_v1 = vrot.slane %v5819_v15, 7  ;;  %v5852_v52 = vsel %vm472_vm0, %v443_v54, %v444_v57  ;;  %v345_v35 = vmul.f32 %v4860_v22, %v306_v46  ;;  %v930_v47 = vmul.f32 %v5747_v28, %v5790_v42  ;;  %v4055_v28 = vld [vmem:[%s7638_s1 + $0x3f8] sm:$0xff] }
  0xeb   : > { %v1438_v17 = vmul.f32 %v1285_v10, %v5716_v41  ;;  %v1212_v23 = vmul.f32 %v1055_v16, %v5806_v55  ;;  %859 = vperm.xlu1 %4859, %v3979_v32   ;;  %1199 = vperm.xlu0 %4858, %v4021_v24   ;;  %v4054_v10 = vld [vmem:[%s7638_s1 + $0x3f0] sm:$0xff]  ;;  %v955_v16 = vrot.slane %v5677_v40, 1  ;;  %7803 = vst [vmem:[#allocation41_spill] sm:$0xff] %v5852_v52  ;;  %v5854_v32 = vmax.f32 %v382_v27, 0.0 }
  0xec   : > { %2612 = vmatprep.mubr.f32.mxu1 %v929_v36  ;;  %v2435_v24 = vld [vmem:[%s7641_s4 + $0x210] sm:$0xff]  ;;  %v2436_v36 = vld [vmem:[%s7641_s4 + $0x218] sm:$0xff]  ;;  %v705_v27 = vmul.f32 %v5519_v63, %v5852_v52  ;;  %v5881_v63 = vsel %vm472_vm0, %v444_v57, %v445_v1  ;;  %v931_v57 = vmul.f32 %v5745_v39, %v5819_v15  ;;  %v3981_v39 = vld [vmem:[%s7638_s1 + $0x1a8] sm:$0xff] }
  0xed   : > { %7804 = vst [vmem:[#allocation42_spill] sm:$0xff] %v5854_v32  ;;  %2803 = vmatmul.mubr.f32.vlgmr.msra.gmra.mrb[0].mxu0 %v1212_v23  ;;  %v5870_v46 = vsel %vm986_vm1, %v954_v59, %v955_v16  ;;  %v4486_v23 = vpack.c.bf16 %v2436_v36, %v2435_v24  ;;  %7806 = vst [vmem:[#allocation44_spill] sm:$0xff] %v5881_v63  ;;  %v446_v59 = vrot.slane %v5854_v32, 7 }
  0xee   : > { %v1290_v49 = vpop.permute.xlu1 %1289  ;;  %v1060_v55 = vpop.permute.xlu0 %1059  ;;  %2613 = vmatmul.mubr.f32.gmra.mrb[14].mxu1 %v704_v43  ;;  %2807 = vmatprep.mubr.f32.mxu0 %v1438_v17  ;;  %7805 = vst [vmem:[#allocation43_spill] sm:$0xff] %v5870_v46  ;;  %v3980_v17 = vld [vmem:[%s7638_s1 + $0x1a0] sm:$0xff]  ;;  %v5883_v43 = vmax.f32 %v383_v37, 0.0  ;;  %v706_v36 = vmul.f32 %v5517_v58, %v5881_v63 }
  0xef   : > { %v1439_v54 = vmul.f32 %v1290_v49, %v5738_v14  ;;  %v1213_v22 = vmul.f32 %v1060_v55, %v5840_v30  ;;  %1204 = vperm.xlu1 %4859, %v4022_v5   ;;  %1429 = vperm.xlu0 %4858, %v4054_v10   ;;  %v956_v55 = vrot.slane %v5700_v26, 1  ;;  %v384_v5 = vadd.f32 %v4861_v29, %v345_v35 }
  0xf0   : > { %2617 = vmatprep.mubr.f32.mxu1 %v930_v47  ;;  %4484 = vmatpush1.bf16.msra.mxu0 %v4483_v4  ;;  %7807 = vst [vmem:[#allocation45_spill] sm:$0xff] %v5883_v43  ;;  %v7808_v10 = vmov 0.0|0.0   ;;  %v2437_v47 = vld [vmem:[%s7641_s4 + $0x220] sm:$0xff]  ;;  %v2438_v4 = vld [vmem:[%s7641_s4 + $0x228] sm:$0xff]  ;;  %v5913_v58 = vsel %vm472_vm0, %v445_v1, %v446_v59 }
  0xf1   : > { %2808 = vmatmul.mubr.f32.gmra.mrb[2].mxu0 %v1213_v22  ;;  %4485 = vmatprep.subr.bf16.mxu0 %v7808_v10  ;;  %v5901_v49 = vsel %vm986_vm1, %v955_v16, %v956_v55  ;;  %v957_v22 = vrot.slane %v5718_v21, 1  ;;  %7810 = vst [vmem:[#allocation47_spill] sm:$0xff] %v5913_v58  ;;  %v5915_v16 = vmax.f32 %v384_v5, 0.0 }
  0xf2   : > { %v1295_v24 = vpop.permute.xlu1 %1294  ;;  %v1065_v37 = vpop.permute.xlu0 %1064  ;;  %2618 = vmatmul.mubr.f32.gmra.mrb[16].mxu1 %v705_v27  ;;  %2812 = vmatprep.mubr.f32.mxu0 %v1439_v54  ;;  %7809 = vst [vmem:[#allocation46_spill] sm:$0xff] %v5901_v49  ;;  %v4023_v54 = vld [vmem:[%s7638_s1 + $0x2f8] sm:$0xff]  ;;  %v4489_v27 = vpack.c.bf16 %v2438_v4, %v2437_v47  ;;  %v932_v47 = vmul.f32 %v5770_v2, %v5854_v32  ;;  %v3982_v2 = vld [vmem:[%s7638_s1 + $0x1b0] sm:$0xff] }
  0xf3   : > { %v1440_v29 = vmul.f32 %v1295_v24, %v5761_v25  ;;  %v1214_v35 = vmul.f32 %v1065_v37, %v5870_v46  ;;  %1434 = vperm.xlu1 %4859, %v4055_v28   ;;  %864 = vperm.xlu0 %4858, %v3980_v17   ;;  %v447_v28 = vrot.slane %v5883_v43, 7  ;;  %7811 = vst [vmem:[#allocation48_spill] sm:$0xff] %v5915_v16  ;;  %v2439_v17 = vld [vmem:[%s7641_s4 + $0x230] sm:$0xff] }
  0xf4   : > { %2622 = vmatprep.mubr.f32.mxu1 %v931_v57  ;;  %4487 = vmatpush1.bf16.msra.mxu0 %v4486_v23  ;;  %v2440_v23 = vld [vmem:[%s7641_s4 + $0x238] sm:$0xff]  ;;  %v707_v24 = vmul.f32 %v5529_v6, %v5913_v58  ;;  %v5932_v37 = vsel %vm986_vm1, %v956_v55, %v957_v22  ;;  %v2441_v55 = vld [vmem:[%s7641_s4 + $0x240] sm:$0xff] }
  0xf5   : > { %2813 = vmatmul.mubr.f32.gmra.mrb[4].mxu0 %v1214_v35  ;;  %4488 = vmatprep.subr.bf16.mxu0 %v7808_v10  ;;  %v958_v35 = vrot.slane %v5740_v31, 1  ;;  %v5943_v6 = vsel %vm472_vm0, %v446_v59, %v447_v28 }
  0xf6   : > { %v1300_v4 = vpop.permute.xlu1 %1299  ;;  %v1070_v57 = vpop.permute.xlu0 %1069  ;;  %2623 = vmatmul.mubr.f32.gmra.mrb[18].mxu1 %v706_v36  ;;  %2817 = vmatprep.mubr.f32.mxu0 %v1440_v29  ;;  %v4056_v29 = vld [vmem:[%s7638_s1 + $0x500] sm:$0xff]  ;;  %v4492_v36 = vpack.c.bf16 %v2440_v23, %v2439_v17  ;;  %7812 = vst [vmem:[#allocation49_spill] sm:$0xff] %v5943_v6 }
  0xf7   : > { %v1441_v1 = vmul.f32 %v1300_v4, %v5788_v45  ;;  %v1215_v5 = vmul.f32 %v1070_v57, %v5901_v49  ;;  %869 = vperm.xlu1 %4859, %v3981_v39   ;;  %1209 = vperm.xlu0 %4858, %v4023_v54   ;;  %v7667_v39 = vrot.slane %v5915_v16, 7  ;;  %v2442_v54 = vld [vmem:[%s7641_s4 + $0x248] sm:$0xff]  ;;  %v959_v4 = vrot.slane %v5763_v0, 1 }
  0xf8   : > { %2627 = vmatprep.mubr.f32.mxu1 %v932_v47  ;;  %4490 = vmatpush1.bf16.msra.mxu0 %v4489_v27  ;;  %v933_v27 = vmul.f32 %v5768_v38, %v5883_v43  ;;  %v708_v57 = vmul.f32 %v5527_v3, %v5943_v6  ;;  %v3983_v38 = vld [vmem:[%s7638_s1 + $0x1b8] sm:$0xff] }
  0xf9   : > { %2818 = vmatmul.mubr.f32.gmra.mrb[6].mxu0 %v1215_v5  ;;  %4491 = vmatprep.subr.bf16.mxu0 %v7808_v10  ;;  %v5962_v5 = vsel %vm986_vm1, %v957_v22, %v958_v35  ;;  %v5977_v3 = vsel %vm472_vm0, %v447_v28, %v7667_v39  ;;  %v2444_v22 = vld [vmem:[%s7641_s4 + $0x258] sm:$0xff]  ;;  %v962_v39 = vrot.slane %v5854_v32, 1 }
  0xfa   : > { %v1305_v17 = vpop.permute.xlu1 %1304  ;;  %v1075_v23 = vpop.permute.xlu0 %1074  ;;  %2628 = vmatmul.mubr.f32.gmra.mrb[20].mxu1 %v707_v24  ;;  %2822 = vmatprep.mubr.f32.mxu0 %v1441_v1  ;;  %v4057_v1 = vld [vmem:[%s7638_s1 + $0x508] sm:$0xff]  ;;  %v4495_v24 = vpack.c.bf16 %v2442_v54, %v2441_v55  ;;  %7813 = vst [vmem:[#allocation50_spill] sm:$0xff] %v5977_v3  ;;  %v934_v55 = vmul.f32 %v5794_v7, %v5915_v16  ;;  %v3984_v7 = vld [vmem:[%s7638_s1 + $0x1c0] sm:$0xff] }
  0xfb   : > { %v1442_v59 = vmul.f32 %v1305_v17, %v5817_v53  ;;  %v1216_v47 = vmul.f32 %v1075_v23, %v5932_v37  ;;  %874 = vperm.xlu1 %4859, %v3982_v2   ;;  %1504 = vperm.xlu0 %4858, %v4056_v29   ;;  %v2443_v2 = vld [vmem:[%s7641_s4 + $0x250] sm:$0xff]  ;;  %v2465_v29 = vld [vmem:[%s7641_s4 + $0x300] sm:$0xff]  ;;  %v5995_v23 = vsel %vm986_vm1, %v958_v35, %v959_v4  ;;  %v964_v53 = vrot.slane %v5915_v16, 1 }
  0xfc   : > { %2632 = vmatprep.mubr.f32.mxu1 %v933_v27  ;;  %4493 = vmatpush1.bf16.msra.mxu0 %v4492_v36  ;;  %v2466_v36 = vld [vmem:[%s7641_s4 + $0x308] sm:$0xff]  ;;  %v2445_v35 = vld [vmem:[%s7641_s4 + $0x260] sm:$0xff] }
  0xfd   : > { %2823 = vmatmul.mubr.f32.gmra.mrb[8].mxu0 %v1216_v47  ;;  %4494 = vmatprep.subr.bf16.mxu0 %v7808_v10  ;;  %v709_v47 = vmul.f32 %v5539_v13, %v5977_v3  ;;  %v2446_v13 = vld [vmem:[%s7641_s4 + $0x268] sm:$0xff] }
  0xfe   : > { %v1310_v28 = vpop.permute.xlu1 %1309  ;;  %v1080_v54 = vpop.permute.xlu0 %1079  ;;  %2633 = vmatmul.mubr.f32.gmra.mrb[22].mxu1 %v708_v57  ;;  %2827 = vmatprep.mubr.f32.mxu0 %v1442_v59  ;;  %v4058_v59 = vld [vmem:[%s7638_s1 + $0x510] sm:$0xff]  ;;  %v960_v57 = vrot.slane %v5790_v42, 1 }
  0xff   : > { %v1443_v27 = vmul.f32 %v1310_v28, %v5852_v52  ;;  %v1217_v17 = vmul.f32 %v1080_v54, %v5962_v5  ;;  %879 = vperm.xlu1 %4859, %v3983_v38   ;;  %1509 = vperm.xlu0 %4858, %v4057_v1   ;;  %v4498_v38 = vpack.c.bf16 %v2444_v22, %v2443_v2  ;;  %v3985_v54 = vld [vmem:[%s7638_s1 + $0x1c8] sm:$0xff] }
 0x100   : > { %2637 = vmatprep.mubr.f32.mxu1 %v934_v55  ;;  %4496 = vmatpush1.bf16.msra.mxu0 %v4495_v24  ;;  %v6009_v1 = vpack.c.bf16 %v2466_v36, %v2465_v29  ;;  %v2467_v55 = vld [vmem:[%s7641_s4 + $0x310] sm:$0xff]  ;;  %v2468_v24 = vld [vmem:[%s7641_s4 + $0x318] sm:$0xff]  ;;  %v6025_v28 = vsel %vm986_vm1, %v959_v4, %v960_v57 }
 0x101   : > { %2828 = vmatmul.mubr.f32.gmra.mrb[10].mxu0 %v1217_v17  ;;  %4497 = vmatprep.subr.bf16.mxu0 %v7808_v10  ;;  %v4059_v17 = vld [vmem:[%s7638_s1 + $0x518] sm:$0xff]  ;;  %v6038_v4 = vpack.c.bf16 %v2468_v24, %v2467_v55 }
 0x102   : > { %v1315_v2 = vpop.permute.xlu1 %1314  ;;  %v1085_v22 = vpop.permute.xlu0 %1084  ;;  %2638 = vmatmul.mubr.f32.gmra.mrb[24].mxu1 %v709_v47  ;;  %2832 = vmatprep.mubr.f32.mxu0 %v1443_v27  ;;  %v961_v27 = vrot.slane %v5819_v15, 1  ;;  %v4501_v47 = vpack.c.bf16 %v2446_v13, %v2445_v35  ;;  %v2470_v35 = vld [vmem:[%s7641_s4 + $0x328] sm:$0xff] }
 0x103   : > { %v1444_v29 = vmul.f32 %v1315_v2, %v5881_v63  ;;  %v1218_v36 = vmul.f32 %v1085_v22, %v5995_v23  ;;  %884 = vperm.xlu1 %4859, %v3984_v7   ;;  %1514 = vperm.xlu0 %4858, %v4058_v59   ;;  %v2447_v7 = vld [vmem:[%s7641_s4 + $0x270] sm:$0xff]  ;;  %v2448_v59 = vld [vmem:[%s7641_s4 + $0x278] sm:$0xff]  ;;  %v963_v63 = vrot.slane %v5883_v43, 1 }
 0x104   : > { %4499 = vmatpush1.bf16.msra.mxu0 %v4498_v38  ;;  %4690 = vmatpush1.bf16.msra.mxu1 %v6009_v1  ;;  %v2469_v38 = vld [vmem:[%s7641_s4 + $0x320] sm:$0xff]  ;;  %v6055_v22 = vsel %vm986_vm1, %v960_v57, %v961_v27 }
 0x105   : > { %2833 = vmatmul.mubr.f32.gmra.mrb[12].mxu0 %v1218_v36  ;;  %4500 = vmatprep.subr.bf16.mxu0 %v7808_v10  ;;  %v3986_v36 = vld [vmem:[%s7638_s1 + $0x1d0] sm:$0xff]  ;;  %v6068_v57 = vpack.c.bf16 %v2470_v35, %v2469_v38  ;;  %v6122_v52 = vsel %vm986_vm1, %v962_v39, %v963_v63 }
 0x106   : > { %v1320_v13 = vpop.permute.xlu1 %1319  ;;  %v1090_v2 = vpop.permute.xlu0 %1089  ;;  %2837 = vmatprep.mubr.f32.mxu0 %v1444_v29  ;;  %4675 = vmatprep.subr.bf16.mxu1 %v7808_v10  ;;  %v4060_v29 = vld [vmem:[%s7638_s1 + $0x520] sm:$0xff]  ;;  %7818 = vst [vmem:[#allocation55_spill] sm:$0xff] %v6122_v52 }
 0x107   : > { %v1445_v55 = vmul.f32 %v1320_v13, %v5913_v58  ;;  %v1219_v24 = vmul.f32 %v1090_v2, %v6025_v28  ;;  %889 = vperm.xlu1 %4859, %v3985_v54   ;;  %1519 = vperm.xlu0 %4858, %v4059_v17   ;;  %v4504_v13 = vpack.c.bf16 %v2448_v59, %v2447_v7  ;;  %v2449_v54 = vld [vmem:[%s7641_s4 + $0x280] sm:$0xff]  ;;  %v2450_v17 = vld [vmem:[%s7641_s4 + $0x288] sm:$0xff]  ;;  %v2472_v7 = vld [vmem:[%s7641_s4 + $0x338] sm:$0xff]  ;;  %v6081_v59 = vmax.f32 %v5050_v44, 0.0 }
 0x108   : > { %4502 = vmatpush1.bf16.msra.mxu0 %v4501_v47  ;;  %4691 = vmatpush1.bf16.msra.mxu1 %v6038_v4  ;;  %v2471_v47 = vld [vmem:[%s7641_s4 + $0x330] sm:$0xff]  ;;  %v6088_v58 = vsel %vm986_vm1, %v961_v27, %v962_v39  ;;  %v3987_v44 = vld [vmem:[%s7638_s1 + $0x1d8] sm:$0xff] }
 0x109   : > { %2838 = vmatmul.mubr.f32.gmra.mrb[14].mxu0 %v1219_v24  ;;  %4503 = vmatprep.subr.bf16.mxu0 %v7808_v10  ;;  %7814 = vst [vmem:[#allocation51_spill] sm:$0xff] %v6081_v59  ;;  %7815 = vst [vmem:[#allocation52_spill] sm:$0xff] %v6088_v58  ;;  %v6101_v27 = vpack.c.bf16 %v2472_v7, %v2471_v47  ;;  %v6115_v47 = vmax.f32 %v5077_v56, 0.0  ;;  %v3988_v56 = vld [vmem:[%s7638_s1 + $0x1e0] sm:$0xff]  ;;  %v965_v14 = vrot.slane %v6081_v59, 1 }
 0x10a   : > { %v1325_v38 = vpop.permute.xlu1 %1324  ;;  %v1095_v35 = vpop.permute.xlu0 %1094  ;;  %2842 = vmatprep.mubr.f32.mxu0 %v1445_v55  ;;  %4676 = vmatprep.subr.bf16.mxu1 %v7808_v10  ;;  %v4061_v55 = vld [vmem:[%s7638_s1 + $0x528] sm:$0xff] }
 0x10b   : > { %v1446_v2 = vmul.f32 %v1325_v38, %v5943_v6  ;;  %v1220_v24 = vmul.f32 %v1095_v35, %v6055_v22  ;;  %894 = vperm.xlu1 %4859, %v3986_v36   ;;  %1524 = vperm.xlu0 %4858, %v4060_v29   ;;  %v4507_v38 = vpack.c.bf16 %v2450_v17, %v2449_v54  ;;  %v2451_v36 = vld [vmem:[%s7641_s4 + $0x290] sm:$0xff]  ;;  %v2452_v29 = vld [vmem:[%s7641_s4 + $0x298] sm:$0xff]  ;;  %v2474_v54 = vld [vmem:[%s7641_s4 + $0x348] sm:$0xff]  ;;  %v449_v17 = vrot.slane %v6081_v59, 7 }
 0x10c   : > { %4505 = vmatpush1.bf16.msra.mxu0 %v4504_v13  ;;  %4692 = vmatpush1.bf16.msra.mxu1 %v6068_v57  ;;  %7816 = vst [vmem:[#allocation53_spill] sm:$0xff] %v6101_v27  ;;  %v2473_v13 = vld [vmem:[%s7641_s4 + $0x340] sm:$0xff]  ;;  %7817 = vst [vmem:[#allocation54_spill] sm:$0xff] %v6115_v47 }
 0x10d   : > { %2843 = vmatmul.mubr.f32.gmra.mrb[16].mxu0 %v1220_v24  ;;  %4506 = vmatprep.subr.bf16.mxu0 %v7808_v10  ;;  %v6135_v39 = vpack.c.bf16 %v2474_v54, %v2473_v13  ;;  %v450_v54 = vrot.slane %v6115_v47, 7 }
 0x10e   : > { %v1330_v7 = vpop.permute.xlu1 %1329  ;;  %v1100_v35 = vpop.permute.xlu0 %1099  ;;  %2847 = vmatprep.mubr.f32.mxu0 %v1446_v2  ;;  %4677 = vmatprep.subr.bf16.mxu1 %v7808_v10  ;;  %v4062_v2 = vld [vmem:[%s7638_s1 + $0x530] sm:$0xff] }
 0x10f   : > { %v1447_v24 = vmul.f32 %v1330_v7, %v5977_v3  ;;  %v1221_v6 = vmul.f32 %v1100_v35, %v6088_v58  ;;  %899 = vperm.xlu1 %4859, %v3987_v44   ;;  %1529 = vperm.xlu0 %4858, %v4061_v55   ;;  %v4510_v7 = vpack.c.bf16 %v2452_v29, %v2451_v36  ;;  %v2453_v44 = vld [vmem:[%s7641_s4 + $0x2a0] sm:$0xff]  ;;  %v2454_v55 = vld [vmem:[%s7641_s4 + $0x2a8] sm:$0xff]  ;;  %v2476_v36 = vld [vmem:[%s7641_s4 + $0x358] sm:$0xff]  ;;  %v7820_v29 = vrot.slane %v5915_v16, 7 }
 0x110   : > { %4508 = vmatpush1.bf16.msra.mxu0 %v4507_v38  ;;  %4693 = vmatpush1.bf16.msra.mxu1 %v6101_v27  ;;  %7819 = vst [vmem:[#allocation56_spill] sm:$0xff] %v6135_v39  ;;  %v2475_v38 = vld [vmem:[%s7641_s4 + $0x350] sm:$0xff]  ;;  %v6200_v16 = vsel %vm986_vm1, %v964_v53, %v965_v14 }
 0x111   : > { %2848 = vmatmul.mubr.f32.gmra.mrb[18].mxu0 %v1221_v6  ;;  %4509 = vmatprep.subr.bf16.mxu0 %v7808_v10  ;;  %v6151_v13 = vsel %vm472_vm0, %v7820_v29, %v449_v17  ;;  %v6154_v6 = vmax.f32 %v5090_v62, 0.0  ;;  %v6162_v29 = vsel %vm986_vm1, %v963_v63, %v964_v53  ;;  %v3989_v62 = vld [vmem:[%s7638_s1 + $0x1e8] sm:$0xff]  ;;  %v6175_v63 = vpack.c.bf16 %v2476_v36, %v2475_v38 }
 0x112   : > { %7821 = vst [vmem:[#allocation57_spill] sm:$0xff] %v6151_v13  ;;  %v1335_v35 = vpop.permute.xlu1 %1334  ;;  %v1105_v3 = vpop.permute.xlu0 %1104  ;;  %2852 = vmatprep.mubr.f32.mxu0 %v1447_v24  ;;  %4678 = vmatprep.subr.bf16.mxu1 %v7808_v10  ;;  %7823 = vst [vmem:[#allocation59_spill] sm:$0xff] %v6162_v29  ;;  %v4063_v24 = vld [vmem:[%s7638_s1 + $0x538] sm:$0xff] }
 0x113   : > { %7822 = vst [vmem:[#allocation58_spill] sm:$0xff] %v6154_v6  ;;  %v1448_v45 = vmul.f32 %v1335_v35, %v6151_v13  ;;  %v1222_v25 = vmul.f32 %v1105_v3, %v6122_v52  ;;  %904 = vperm.xlu1 %4859, %v3988_v56   ;;  %1534 = vperm.xlu0 %4858, %v4062_v2   ;;  %v2455_v3 = vld [vmem:[%s7641_s4 + $0x2b0] sm:$0xff]  ;;  %7824 = vst [vmem:[#allocation60_spill] sm:$0xff] %v6175_v63  ;;  %v2456_v56 = vld [vmem:[%s7641_s4 + $0x2b8] sm:$0xff] }
 0x114   : > { %4511 = vmatpush1.bf16.msra.mxu0 %v4510_v7  ;;  %v4513_v35 = vpack.c.bf16 %v2454_v55, %v2453_v44  ;;  %4694 = vmatpush1.bf16.msra.mxu1 %v6135_v39  ;;  %v2477_v2 = vld [vmem:[%s7641_s4 + $0x360] sm:$0xff]  ;;  %v2478_v7 = vld [vmem:[%s7641_s4 + $0x368] sm:$0xff]  ;;  %v451_v44 = vrot.slane %v6154_v6, 7  ;;  %v6190_v55 = vsel %vm472_vm0, %v449_v17, %v450_v54  ;;  %7827 = vst [vmem:[#allocation63_spill] sm:$0xff] %v6200_v16  ;;  %v966_v17 = vrot.slane %v6115_v47, 1 }
 0x115   : > { %2853 = vmatmul.mubr.f32.gmra.mrb[20].mxu0 %v1222_v25  ;;  %4512 = vmatprep.subr.bf16.mxu0 %v7808_v10  ;;  %7825 = vst [vmem:[#allocation61_spill] sm:$0xff] %v6190_v55  ;;  %v6193_v25 = vmax.f32 %v5106_v8, 0.0  ;;  %v3990_v8 = vld [vmem:[%s7638_s1 + $0x1f0] sm:$0xff]  ;;  %v6213_v53 = vpack.c.bf16 %v2478_v7, %v2477_v2  ;;  %v967_v39 = vrot.slane %v6154_v6, 1 }
 0x116   : > { %v1340_v38 = vpop.permute.xlu1 %1339  ;;  %v1110_v36 = vpop.permute.xlu0 %1109  ;;  %2857 = vmatprep.mubr.f32.mxu0 %v1448_v45  ;;  %4679 = vmatprep.subr.bf16.mxu1 %v7808_v10  ;;  %v4064_v45 = vld [vmem:[%s7638_s1 + $0x540] sm:$0xff] }
 0x117   : > { %7826 = vst [vmem:[#allocation62_spill] sm:$0xff] %v6193_v25  ;;  %v1449_v30 = vmul.f32 %v1340_v38, %v6190_v55  ;;  %v1223_v41 = vmul.f32 %v1110_v36, %v6162_v29  ;;  %909 = vperm.xlu1 %4859, %v3989_v62   ;;  %1539 = vperm.xlu0 %4858, %v4063_v24   ;;  %v2457_v62 = vld [vmem:[%s7641_s4 + $0x2c0] sm:$0xff]  ;;  %7828 = vst [vmem:[#allocation64_spill] sm:$0xff] %v6213_v53  ;;  %v2458_v24 = vld [vmem:[%s7641_s4 + $0x2c8] sm:$0xff]  ;;  %v452_v2 = vrot.slane %v6193_v25, 7 }
 0x118   : > { %4514 = vmatpush1.bf16.msra.mxu0 %v4513_v35  ;;  %v4516_v38 = vpack.c.bf16 %v2456_v56, %v2455_v3  ;;  %4695 = vmatpush1.bf16.msra.mxu1 %v6175_v63  ;;  %v2479_v35 = vld [vmem:[%s7641_s4 + $0x370] sm:$0xff]  ;;  %v2480_v3 = vld [vmem:[%s7641_s4 + $0x378] sm:$0xff]  ;;  %v6227_v56 = vsel %vm472_vm0, %v450_v54, %v451_v44  ;;  %v6238_v54 = vsel %vm986_vm1, %v965_v14, %v966_v17 }
 0x119   : > { %2858 = vmatmul.mubr.f32.gmra.mrb[22].mxu0 %v1223_v41  ;;  %4515 = vmatprep.subr.bf16.mxu0 %v7808_v10  ;;  %7829 = vst [vmem:[#allocation65_spill] sm:$0xff] %v6227_v56  ;;  %v6230_v41 = vmax.f32 %v5109_v9, 0.0  ;;  %7830 = vst [vmem:[#allocation66_spill] sm:$0xff] %v6238_v54  ;;  %v3991_v9 = vld [vmem:[%s7638_s1 + $0x1f8] sm:$0xff]  ;;  %v6251_v14 = vpack.c.bf16 %v2480_v3, %v2479_v35  ;;  %v6266_v35 = vsel %vm472_vm0, %v451_v44, %v452_v2 }
 0x11a   : > { %v1345_v7 = vpop.permute.xlu1 %1344  ;;  %v1115_v36 = vpop.permute.xlu0 %1114  ;;  %2862 = vmatprep.mubr.f32.mxu0 %v1449_v30  ;;  %4680 = vmatprep.subr.bf16.mxu1 %v7808_v10  ;;  %v4065_v30 = vld [vmem:[%s7638_s1 + $0x548] sm:$0xff]  ;;  %7832 = vst [vmem:[#allocation68_spill] sm:$0xff] %v6266_v35  ;;  %v6276_v29 = vsel %vm986_vm1, %v966_v17, %v967_v39  ;;  %v968_v44 = vrot.slane %v6193_v25, 1 }
 0x11b   : > { %v1450_v63 = vmul.f32 %v1345_v7, %v6227_v56  ;;  %v1224_v43 = vmul.f32 %v1115_v36, %v6200_v16  ;;  %914 = vperm.xlu1 %4859, %v3990_v8   ;;  %1544 = vperm.xlu0 %4858, %v4064_v45   ;;  %v4519_v7 = vpack.c.bf16 %v2458_v24, %v2457_v62  ;;  %v2459_v8 = vld [vmem:[%s7641_s4 + $0x2d0] sm:$0xff]  ;;  %v2460_v45 = vld [vmem:[%s7641_s4 + $0x2d8] sm:$0xff]  ;;  %v2482_v62 = vld [vmem:[%s7641_s4 + $0x388] sm:$0xff]  ;;  %v453_v24 = vrot.slane %v6230_v41, 7 }
 0x11c   : > { %4517 = vmatpush1.bf16.msra.mxu0 %v4516_v38  ;;  %4696 = vmatpush1.bf16.msra.mxu1 %v6213_v53  ;;  %7831 = vst [vmem:[#allocation67_spill] sm:$0xff] %v6251_v14  ;;  %v2481_v38 = vld [vmem:[%s7641_s4 + $0x380] sm:$0xff]  ;;  %7833 = vst [vmem:[#allocation69_spill] sm:$0xff] %v6276_v29  ;;  %v969_v32 = vrot.slane %v6230_v41, 1 }
 0x11d   : > { %2863 = vmatmul.mubr.f32.gmra.mrb[24].mxu0 %v1224_v43  ;;  %4518 = vmatprep.subr.bf16.mxu0 %v7808_v10  ;;  %v6269_v43 = vmax.f32 %v5130_v19, 0.0  ;;  %v4067_v19 = vld [vmem:[%s7638_s1 + $0x558] sm:$0xff]  ;;  %v6289_v17 = vpack.c.bf16 %v2482_v62, %v2481_v38 }
 0x11e   : > { %v1350_v3 = vpop.permute.xlu1 %1349  ;;  %v1120_v36 = vpop.permute.xlu0 %1119  ;;  %2867 = vmatprep.mubr.f32.mxu0 %v1450_v63  ;;  %4681 = vmatprep.subr.bf16.mxu1 %v7808_v10  ;;  %v4066_v63 = vld [vmem:[%s7638_s1 + $0x550] sm:$0xff]  ;;  %v6352_v52 = vsel %vm986_vm1, %v968_v44, %v969_v32 }
 0x11f   : > { %v1451_v53 = vmul.f32 %v1350_v3, %v6266_v35  ;;  %v1225_v16 = vmul.f32 %v1120_v36, %v6238_v54  ;;  %919 = vperm.xlu1 %4859, %v3991_v9   ;;  %1549 = vperm.xlu0 %4858, %v4065_v30   ;;  %v4522_v3 = vpack.c.bf16 %v2460_v45, %v2459_v8  ;;  %v2461_v9 = vld [vmem:[%s7641_s4 + $0x2e0] sm:$0xff]  ;;  %v2462_v30 = vld [vmem:[%s7641_s4 + $0x2e8] sm:$0xff]  ;;  %v2484_v8 = vld [vmem:[%s7641_s4 + $0x398] sm:$0xff]  ;;  %v454_v38 = vrot.slane %v6269_v43, 7 }
 0x120   : > { %4520 = vmatpush1.bf16.msra.mxu0 %v4519_v7  ;;  %4697 = vmatpush1.bf16.msra.mxu1 %v6251_v14  ;;  %7834 = vst [vmem:[#allocation70_spill] sm:$0xff] %v6289_v17  ;;  %v2483_v7 = vld [vmem:[%s7641_s4 + $0x390] sm:$0xff]  ;;  %v6303_v45 = vsel %vm472_vm0, %v452_v2, %v453_v24  ;;  %v6314_v2 = vsel %vm986_vm1, %v967_v39, %v968_v44  ;;  %7837 = vst [vmem:[#allocation73_spill] sm:$0xff] %v6352_v52 }
 0x121   : > { %2868 = vmatmul.mubr.f32.gmra.mrb[26].mxu0 %v1225_v16  ;;  %4521 = vmatprep.subr.bf16.mxu0 %v7808_v10  ;;  %v6306_v16 = vmax.f32 %v5133_v20, 0.0  ;;  %7835 = vst [vmem:[#allocation71_spill] sm:$0xff] %v6314_v2  ;;  %v4101_v20 = vld [vmem:[%s7638_s1 + $0x668] sm:$0xff]  ;;  %v6327_v39 = vpack.c.bf16 %v2484_v8, %v2483_v7  ;;  %v6342_v7 = vsel %vm472_vm0, %v453_v24, %v454_v38  ;;  %v970_v24 = vrot.slane %v6269_v43, 1  ;;  %v2487_v44 = vld [vmem:[%s7641_s4 + $0x3b0] sm:$0xff] }
 0x122   : > { %v1355_v62 = vpop.permute.xlu1 %1354  ;;  %v1125_v36 = vpop.permute.xlu0 %1124  ;;  %2872 = vmatprep.mubr.f32.mxu0 %v1451_v53  ;;  %4682 = vmatprep.subr.bf16.mxu1 %v7808_v10  ;;  %v4133_v53 = vld [vmem:[%s7638_s1 + $0x768] sm:$0xff] }
 0x123   : > { %v1452_v14 = vmul.f32 %v1355_v62, %v6303_v45  ;;  %v1226_v54 = vmul.f32 %v1125_v36, %v6276_v29  ;;  %1559 = vperm.xlu1 %4859, %v4067_v19   ;;  %1554 = vperm.xlu0 %4858, %v4066_v63   ;;  %v4525_v62 = vpack.c.bf16 %v2462_v30, %v2461_v9  ;;  %v2463_v19 = vld [vmem:[%s7641_s4 + $0x2f0] sm:$0xff]  ;;  %v2464_v63 = vld [vmem:[%s7641_s4 + $0x2f8] sm:$0xff]  ;;  %v2486_v9 = vld [vmem:[%s7641_s4 + $0x3a8] sm:$0xff]  ;;  %v455_v30 = vrot.slane %v6306_v16, 7 }
 0x124   : > { %4523 = vmatpush1.bf16.msra.mxu0 %v4522_v3  ;;  %4698 = vmatpush1.bf16.msra.mxu1 %v6289_v17  ;;  %7836 = vst [vmem:[#allocation72_spill] sm:$0xff] %v6327_v39  ;;  %v2485_v3 = vld [vmem:[%s7641_s4 + $0x3a0] sm:$0xff] }
 0x125   : > { %2873 = vmatmul.mubr.f32.gmra.mrb[28].mxu0 %v1226_v54  ;;  %4524 = vmatprep.subr.bf16.mxu0 %v7808_v10  ;;  %v6345_v54 = vmax.f32 %v5160_v33, 0.0  ;;  %v4134_v33 = vld [vmem:[%s7638_s1 + $0x770] sm:$0xff] }
 0x126   : > { %v1360_v8 = vpop.permute.xlu1 %1359  ;;  %v1130_v36 = vpop.permute.xlu0 %1129  ;;  %2877 = vmatprep.mubr.f32.mxu0 %v1452_v14  ;;  %4683 = vmatprep.subr.bf16.mxu1 %v7808_v10  ;;  %v4068_v14 = vld [vmem:[%s7638_s1 + $0x560] sm:$0xff] }
 0x127   : > { %v1453_v17 = vmul.f32 %v1360_v8, %v6342_v7  ;;  %v1227_v29 = vmul.f32 %v1130_v36, %v6314_v2  ;;  %1794 = vperm.xlu1 %4859, %v4101_v20   ;;  %2019 = vperm.xlu0 %4858, %v4133_v53   ;;  %v4528_v8 = vpack.c.bf16 %v2464_v63, %v2463_v19  ;;  %v2488_v53 = vld [vmem:[%s7641_s4 + $0x3b8] sm:$0xff]  ;;  %v456_v19 = vrot.slane %v6345_v54, 7 }
 0x128   : > { %4526 = vmatpush1.bf16.msra.mxu0 %v4525_v62  ;;  %4699 = vmatpush1.bf16.msra.mxu1 %v6327_v39  ;;  %v6362_v20 = vpack.c.bf16 %v2486_v9, %v2485_v3  ;;  %v6373_v36 = vsel %vm472_vm0, %v454_v38, %v455_v30  ;;  %v6376_v62 = vmax.f32 %v5163_v34, 0.0  ;;  %v6384_v38 = vsel %vm986_vm1, %v969_v32, %v970_v24  ;;  %v4069_v34 = vld [vmem:[%s7638_s1 + $0x568] sm:$0xff]  ;;  %v2489_v32 = vld [vmem:[%s7641_s4 + $0x3c0] sm:$0xff] }
 0x129   : > { %2878 = vmatmul.mubr.f32.gmra.mrb[30].mxu0 %v1227_v29  ;;  %4527 = vmatprep.subr.bf16.mxu0 %v7808_v10  ;;  %7839 = vst [vmem:[#allocation75_spill] sm:$0xff] %v6384_v38  ;;  %v971_v39 = vrot.slane %v6306_v16, 1 }
 0x12a   : > { %7838 = vst [vmem:[#allocation74_spill] sm:$0xff] %v6362_v20  ;;  %v1365_v29 = vpop.permute.xlu1 %1364  ;;  %v1135_v63 = vpop.permute.xlu0 %1134  ;;  %2882 = vmatprep.mubr.f32.mxu0 %v1453_v17  ;;  %4684 = vmatprep.subr.bf16.mxu1 %v7808_v10  ;;  %v4102_v17 = vld [vmem:[%s7638_s1 + $0x670] sm:$0xff] }
 0x12b   : > { %v1454_v3 = vmul.f32 %v1365_v29, %v6373_v36  ;;  %v1228_v9 = vmul.f32 %v1135_v63, %v6352_v52  ;;  %2024 = vperm.xlu1 %4859, %v4134_v33   ;;  %1564 = vperm.xlu0 %4858, %v4068_v14   ;;  %v6394_v29 = vpack.c.bf16 %v2488_v53, %v2487_v44  ;;  %v2490_v33 = vld [vmem:[%s7641_s4 + $0x3c8] sm:$0xff]  ;;  %v457_v14 = vrot.slane %v6376_v62, 7 }
 0x12c   : > { %4529 = vmatpush1.bf16.msra.mxu0 %v4528_v8  ;;  %4700 = vmatpush1.bf16.msra.mxu1 %v6362_v20  ;;  %v6406_v8 = vsel %vm472_vm0, %v455_v30, %v456_v19  ;;  %v6409_v44 = vmax.f32 %v5190_v50, 0.0  ;;  %v6416_v52 = vsel %vm986_vm1, %v970_v24, %v971_v39  ;;  %v4103_v50 = vld [vmem:[%s7638_s1 + $0x678] sm:$0xff]  ;;  %v2491_v24 = vld [vmem:[%s7641_s4 + $0x3d0] sm:$0xff] }
 0x12d   : > { %7840 = vst [vmem:[#allocation76_spill] sm:$0xff] %v6394_v29  ;;  %2883 = vmatmul.mubr.f32.gmra.mrb[32].mxu0 %v1228_v9  ;;  %4685 = vmatprep.subr.bf16.mxu1 %v7808_v10  ;;  %7841 = vst [vmem:[#allocation77_spill] sm:$0xff] %v6416_v52  ;;  %v4135_v30 = vld [vmem:[%s7638_s1 + $0x778] sm:$0xff] }
 0x12e   : > { %v1370_v53 = vpop.permute.xlu1 %1369  ;;  %v1140_v63 = vpop.permute.xlu0 %1139  ;;  %2887 = vmatprep.mubr.f32.mxu0 %v1454_v3  ;;  %4530 = vmatprep.subr.bf16.mxu0 %v7808_v10  ;;  %v972_v3 = vrot.slane %v6345_v54, 1 }
 0x12f   : > { %v1455_v9 = vmul.f32 %v1370_v53, %v6406_v8  ;;  %v1229_v20 = vmul.f32 %v1140_v63, %v6384_v38  ;;  %1569 = vperm.xlu1 %4859, %v4069_v34   ;;  %1799 = vperm.xlu0 %4858, %v4102_v17   ;;  %v6426_v53 = vpack.c.bf16 %v2490_v33, %v2489_v32  ;;  %v2492_v34 = vld [vmem:[%s7641_s4 + $0x3d8] sm:$0xff]  ;;  %v6440_v63 = vmax.f32 %v5193_v51, 0.0  ;;  %v4136_v51 = vld [vmem:[%s7638_s1 + $0x780] sm:$0xff] }
 0x130   : > { %4701 = vmatpush1.bf16.msra.mxu1 %v6394_v29  ;;  %v6437_v17 = vsel %vm472_vm0, %v456_v19, %v457_v14  ;;  %v458_v32 = vrot.slane %v6409_v44, 7  ;;  %v6447_v2 = vsel %vm986_vm1, %v971_v39, %v972_v3  ;;  %v4070_v19 = vld [vmem:[%s7638_s1 + $0x570] sm:$0xff]  ;;  %v2493_v39 = vld [vmem:[%s7641_s4 + $0x3e0] sm:$0xff] }
 0x131   : > { %7842 = vst [vmem:[#allocation78_spill] sm:$0xff] %v6426_v53  ;;  %2888 = vmatmul.mubr.f32.gmra.mrb[34].mxu0 %v1229_v20  ;;  %4686 = vmatprep.subr.bf16.mxu1 %v7808_v10  ;;  %7843 = vst [vmem:[#allocation79_spill] sm:$0xff] %v6447_v2 }
 0x132   : > { %v1375_v20 = vpop.permute.xlu1 %1374  ;;  %v1145_v33 = vpop.permute.xlu0 %1144  ;;  %2892 = vmatprep.mubr.f32.mxu0 %v1455_v9  ;;  %v973_v9 = vrot.slane %v6376_v62, 1 }
 0x133   : > { %v1456_v29 = vmul.f32 %v1375_v20, %v6437_v17  ;;  %v1230_v38 = vmul.f32 %v1145_v33, %v6416_v52  ;;  %1804 = vperm.xlu1 %4859, %v4103_v50   ;;  %2029 = vperm.xlu0 %4858, %v4135_v30   ;;  %v6457_v20 = vpack.c.bf16 %v2492_v34, %v2491_v24  ;;  %v2494_v50 = vld [vmem:[%s7641_s4 + $0x3e8] sm:$0xff]  ;;  %v459_v30 = vrot.slane %v6440_v63, 7 }
 0x134   : > { %4702 = vmatpush1.bf16.msra.mxu1 %v6426_v53  ;;  %v6469_v33 = vsel %vm472_vm0, %v457_v14, %v458_v32  ;;  %v6472_v24 = vmax.f32 %v5206_v60, 0.0  ;;  %v6478_v15 = vsel %vm986_vm1, %v972_v3, %v973_v9  ;;  %v4071_v14 = vld [vmem:[%s7638_s1 + $0x578] sm:$0xff]  ;;  %v4104_v60 = vld [vmem:[%s7638_s1 + $0x680] sm:$0xff]  ;;  %v2495_v3 = vld [vmem:[%s7641_s4 + $0x3f0] sm:$0xff] }
 0x135   : > { %7844 = vst [vmem:[#allocation80_spill] sm:$0xff] %v6457_v20  ;;  %2893 = vmatmul.mubr.f32.gmra.mrb[36].mxu0 %v1230_v38  ;;  %4687 = vmatprep.subr.bf16.mxu1 %v7808_v10  ;;  %7845 = vst [vmem:[#allocation81_spill] sm:$0xff] %v6478_v15 }
 0x136   : > { %v1380_v38 = vpop.permute.xlu1 %1379  ;;  %v1150_v34 = vpop.permute.xlu0 %1149  ;;  %2897 = vmatprep.mubr.f32.mxu0 %v1456_v29  ;;  %v974_v29 = vrot.slane %v6409_v44, 1 }
 0x137   : > { %v1457_v53 = vmul.f32 %v1380_v38, %v6469_v33  ;;  %v1231_v52 = vmul.f32 %v1150_v34, %v6447_v2  ;;  %2034 = vperm.xlu1 %4859, %v4136_v51   ;;  %1574 = vperm.xlu0 %4858, %v4070_v19   ;;  %v6488_v38 = vpack.c.bf16 %v2494_v50, %v2493_v39  ;;  %v2496_v51 = vld [vmem:[%s7641_s4 + $0x3f8] sm:$0xff]  ;;  %v6502_v34 = vmax.f32 %v5209_v61, 0.0  ;;  %v4105_v61 = vld [vmem:[%s7638_s1 + $0x688] sm:$0xff] }
 0x138   : > { %4703 = vmatpush1.bf16.msra.mxu1 %v6457_v20  ;;  %v6499_v19 = vsel %vm472_vm0, %v458_v32, %v459_v30  ;;  %v460_v39 = vrot.slane %v6472_v24, 7  ;;  %v6509_v27 = vsel %vm986_vm1, %v973_v9, %v974_v29  ;;  %v4137_v32 = vld [vmem:[%s7638_s1 + $0x788] sm:$0xff] }
 0x139   : > { %7846 = vst [vmem:[#allocation82_spill] sm:$0xff] %v6488_v38  ;;  %2898 = vmatmul.mubr.f32.gmra.mrb[38].mxu0 %v1231_v52  ;;  %4688 = vmatprep.subr.bf16.mxu1 %v7808_v10  ;;  %7847 = vst [vmem:[#allocation83_spill] sm:$0xff] %v6509_v27  ;;  %v461_v9 = vrot.slane %v6502_v34, 7 }
 0x13a   : > { %v1385_v52 = vpop.permute.xlu1 %1384  ;;  %v1155_v50 = vpop.permute.xlu0 %1154  ;;  %2902 = vmatprep.mubr.f32.mxu0 %v1457_v53  ;;  %v975_v53 = vrot.slane %v6440_v63, 1 }
 0x13b   : > { %v1458_v20 = vmul.f32 %v1385_v52, %v6499_v19  ;;  %v1232_v2 = vmul.f32 %v1155_v50, %v6478_v15  ;;  %1579 = vperm.xlu1 %4859, %v4071_v14   ;;  %1809 = vperm.xlu0 %4858, %v4104_v60   ;;  %v6519_v52 = vpack.c.bf16 %v2496_v51, %v2495_v3  ;;  %v4138_v3 = vld [vmem:[%s7638_s1 + $0x790] sm:$0xff] }
 0x13c   : > { %4704 = vmatpush1.bf16.msra.mxu1 %v6488_v38  ;;  %v6525_v14 = vsel %vm472_vm0, %v459_v30, %v460_v39  ;;  %v4072_v30 = vld [vmem:[%s7638_s1 + $0x580] sm:$0xff]  ;;  %v6543_v51 = vsel %vm472_vm0, %v460_v39, %v461_v9  ;;  %v6562_v39 = vmax.f32 %v5242_v18, 0.0  ;;  %v4107_v18 = vld [vmem:[%s7638_s1 + $0x698] sm:$0xff] }
 0x13d   : > { %7848 = vst [vmem:[#allocation84_spill] sm:$0xff] %v6519_v52  ;;  %2903 = vmatmul.mubr.f32.gmra.mrb[40].mxu0 %v1232_v2  ;;  %4689 = vmatprep.subr.bf16.mxu1 %v7808_v10  ;;  %v6531_v2 = vsel %vm986_vm1, %v974_v29, %v975_v53  ;;  %v6546_v29 = vmax.f32 %v5231_v12, 0.0  ;;  %v4106_v12 = vld [vmem:[%s7638_s1 + $0x690] sm:$0xff] }
 0x13e   : > { %v1390_v60 = vpop.permute.xlu1 %1389  ;;  %v1160_v50 = vpop.permute.xlu0 %1159  ;;  %2907 = vmatprep.mubr.f32.mxu0 %v1458_v20  ;;  %7849 = vst [vmem:[#allocation85_spill] sm:$0xff] %v6531_v2  ;;  %v976_v20 = vrot.slane %v6472_v24, 1 }
 0x13f   : > { %v1459_v15 = vmul.f32 %v1390_v60, %v6525_v14  ;;  %v1233_v58 = vmul.f32 %v1160_v50, %v6509_v27  ;;  %1814 = vperm.xlu1 %4859, %v4105_v61   ;;  %2039 = vperm.xlu0 %4858, %v4137_v32   ;;  %v7856_v27 = vld [vmem:[#allocation7_spill] sm:$0xff] }
 0x140   : > { %4705 = vmatpush1.bf16.msra.mxu1 %v6519_v52  ;;  %v6552_v52 = vsel %vm986_vm1, %v975_v53, %v976_v20 }
 0x141   : > { %2908 = vmatmul.mubr.f32.gmra.mrb[42].mxu0 %v1233_v58  ;;  %7850 = vst [vmem:[#allocation86_spill] sm:$0xff] %v6552_v52  ;;  %v4073_v58 = vld [vmem:[%s7638_s1 + $0x588] sm:$0xff] }
 0x142   : > { %v1395_v61 = vpop.permute.xlu1 %1394  ;;  %v1165_v32 = vpop.permute.xlu0 %1164  ;;  %2912 = vmatprep.mubr.f32.mxu0 %v1459_v15  ;;  %v977_v15 = vrot.slane %v6502_v34, 1 }
 0x143   : > { %v1460_v60 = vmul.f32 %v1395_v61, %v6543_v51  ;;  %v1234_v50 = vmul.f32 %v1165_v32, %v6531_v2  ;;  %2044 = vperm.xlu1 %4859, %v4138_v3   ;;  %1584 = vperm.xlu0 %4858, %v4072_v30   ;;  %v462_v3 = vrot.slane %v6546_v29, 7  ;;  %v710_v2 = vmul.f32 %v5537_v11, %v6151_v13 }
 0x145   : > { %2913 = vmatmul.mubr.f32.gmra.mrb[44].mxu0 %v1234_v50  ;;  %v6571_v50 = vsel %vm986_vm1, %v976_v20, %v977_v15 }
 0x146   : > { %v830_v30 = vpop.permute.xlu1 %829  ;;  %v1170_v61 = vpop.permute.xlu0 %1169  ;;  %2917 = vmatprep.mubr.f32.mxu0 %v1460_v60  ;;  %7851 = vst [vmem:[#allocation87_spill] sm:$0xff] %v6571_v50  ;;  %v4139_v60 = vld [vmem:[%s7638_s1 + $0x798] sm:$0xff] }
 0x147   : > { %v935_v53 = vmul.f32 %v830_v30, %v6081_v59  ;;  %v1235_v32 = vmul.f32 %v1170_v61, %v6552_v52  ;;  %1589 = vperm.xlu1 %4859, %v4073_v58   ;;  %1819 = vperm.xlu0 %4858, %v4106_v12   ;;  %v463_v58 = vrot.slane %v6562_v39, 7  ;;  %v6582_v12 = vsel %vm472_vm0, %v461_v9, %v462_v3  ;;  %v7853_v52 = vld [vmem:[#allocation8_spill] sm:$0xff] }
 0x148   : > { %v978_v9 = vrot.slane %v6546_v29, 1  ;;  %v711_v38 = vmul.f32 %v7853_v52, %v6190_v55 }
 0x149   : > { %2642 = vmatprep.mubr.f32.mxu1 %v935_v53  ;;  %2918 = vmatmul.mubr.f32.gmra.mrb[46].mxu0 %v1235_v32  ;;  %v4140_v53 = vld [vmem:[%s7638_s1 + $0x7a0] sm:$0xff]  ;;  %v4074_v32 = vld [vmem:[%s7638_s1 + $0x590] sm:$0xff] }
 0x14a   : > { %v1175_v11 = vpop.permute.xlu1 %1174  ;;  %v1400_v30 = vpop.permute.xlu0 %1399  ;;  %2643 = vmatmul.mubr.f32.gmra.mrb[26].mxu1 %v710_v2  ;;  %v6595_v2 = vsel %vm472_vm0, %v462_v3, %v463_v58  ;;  %v4075_v3 = vld [vmem:[%s7638_s1 + $0x598] sm:$0xff] }
 0x14b   : > { %v1236_v20 = vmul.f32 %v1175_v11, %v6571_v50  ;;  %v1461_v61 = vmul.f32 %v1400_v30, %v6582_v12  ;;  %1824 = vperm.xlu1 %4859, %v4107_v18   ;;  %2049 = vperm.xlu0 %4858, %v4139_v60   ;;  %v7852_v11 = vld [vmem:[#allocation2_spill] sm:$0xff] }
 0x14c   : > { %v6598_v13 = vmax.f32 %v7852_v11, 0.0  ;;  %v979_v11 = vrot.slane %v6562_v39, 1 }
 0x14d   : > { %2922 = vmatprep.mubr.f32.mxu0 %v1461_v61  ;;  %v6606_v61 = vsel %vm986_vm1, %v977_v15, %v978_v9 }
 0x14e   : > { %v1405_v18 = vpop.permute.xlu1 %1404  ;;  %v835_v60 = vpop.permute.xlu0 %834  ;;  %2923 = vmatmul.mubr.f32.gmra.mrb[48].mxu0 %v1236_v20  ;;  %7854 = vst [vmem:[#allocation2_spill] sm:$0xff] %v6606_v61  ;;  %v4108_v20 = vld [vmem:[%s7638_s1 + $0x6a0] sm:$0xff]  ;;  %v464_v52 = vrot.slane %v6598_v13, 7 }
 0x14f   : > { %v1462_v30 = vmul.f32 %v1405_v18, %v6595_v2  ;;  %v936_v50 = vmul.f32 %v835_v60, %v6115_v47  ;;  %2054 = vperm.xlu1 %4859, %v4140_v53   ;;  %1594 = vperm.xlu0 %4858, %v4074_v32   ;;  %v7855_v53 = vld [vmem:[#allocation3_spill] sm:$0xff]  ;;  %v712_v47 = vmul.f32 %v7856_v27, %v6227_v56 }
 0x150   : > { %v6616_v32 = vmax.f32 %v7855_v53, 0.0 }
 0x151   : > { %2647 = vmatprep.mubr.f32.mxu1 %v936_v50  ;;  %2927 = vmatprep.mubr.f32.mxu0 %v1462_v30  ;;  %v6625_v50 = vsel %vm986_vm1, %v978_v9, %v979_v11  ;;  %v4109_v30 = vld [vmem:[%s7638_s1 + $0x6a8] sm:$0xff] }
 0x152   : > { %v840_v18 = vpop.permute.xlu1 %839  ;;  %v1180_v15 = vpop.permute.xlu0 %1179  ;;  %2648 = vmatmul.mubr.f32.gmra.mrb[28].mxu1 %v711_v38  ;;  %7857 = vst [vmem:[#allocation8_spill] sm:$0xff] %v6625_v50  ;;  %v4141_v38 = vld [vmem:[%s7638_s1 + $0x7a8] sm:$0xff] }
 0x153   : > { %v937_v60 = vmul.f32 %v840_v18, %v6154_v6  ;;  %v1237_v55 = vmul.f32 %v1180_v15, %v6606_v61  ;;  %1599 = vperm.xlu1 %4859, %v4075_v3   ;;  %1829 = vperm.xlu0 %4858, %v4108_v20   ;;  %v465_v3 = vrot.slane %v6616_v32, 7  ;;  %v6636_v20 = vsel %vm472_vm0, %v463_v58, %v464_v52  ;;  %v4142_v15 = vld [vmem:[%s7638_s1 + $0x7b0] sm:$0xff] }
 0x154   : > { %v980_v58 = vrot.slane %v6598_v13, 1 }
 0x155   : > { %2652 = vmatprep.mubr.f32.mxu1 %v937_v60  ;;  %2928 = vmatmul.mubr.f32.gmra.mrb[50].mxu0 %v1237_v55  ;;  %v4076_v55 = vld [vmem:[%s7638_s1 + $0x5a0] sm:$0xff] }
 0x156   : > { %v1185_v27 = vpop.permute.xlu1 %1184  ;;  %v1410_v53 = vpop.permute.xlu0 %1409  ;;  %2653 = vmatmul.mubr.f32.gmra.mrb[30].mxu1 %v712_v47  ;;  %v6649_v47 = vsel %vm472_vm0, %v464_v52, %v465_v3  ;;  %v4077_v52 = vld [vmem:[%s7638_s1 + $0x5a8] sm:$0xff] }
 0x157   : > { %v1238_v9 = vmul.f32 %v1185_v27, %v6625_v50  ;;  %v1463_v18 = vmul.f32 %v1410_v53, %v6636_v20  ;;  %1834 = vperm.xlu1 %4859, %v4109_v30   ;;  %2059 = vperm.xlu0 %4858, %v4141_v38   ;;  %v7858_v53 = vld [vmem:[#allocation10_spill] sm:$0xff]  ;;  %v6657_v50 = vsel %vm986_vm1, %v979_v11, %v980_v58 }
 0x158   : > { %v713_v56 = vmul.f32 %v7858_v53, %v6266_v35  ;;  %7859 = vst [vmem:[#allocation3_spill] sm:$0xff] %v6657_v50 }
 0x159   : > { %2932 = vmatprep.mubr.f32.mxu0 %v1463_v18  ;;  %v981_v18 = vrot.slane %v6616_v32, 1 }
 0x15a   : > { %v1415_v60 = vpop.permute.xlu1 %1414  ;;  %v845_v27 = vpop.permute.xlu0 %844  ;;  %2933 = vmatmul.mubr.f32.gmra.mrb[52].mxu0 %v1238_v9  ;;  %v4110_v9 = vld [vmem:[%s7638_s1 + $0x6b0] sm:$0xff] }
 0x15b   : > { %v1464_v30 = vmul.f32 %v1415_v60, %v6649_v47  ;;  %v938_v38 = vmul.f32 %v845_v27, %v6193_v25  ;;  %2064 = vperm.xlu1 %4859, %v4142_v15   ;;  %1604 = vperm.xlu0 %4858, %v4076_v55   ;;  %v7860_v27 = vld [vmem:[#allocation9_spill] sm:$0xff]  ;;  %v6672_v35 = vsel %vm986_vm1, %v980_v58, %v981_v18 }
 0x15c   : > { %v714_v53 = vmul.f32 %v7860_v27, %v6303_v45  ;;  %7861 = vst [vmem:[#allocation7_spill] sm:$0xff] %v6672_v35 }
 0x15d   : > { %2657 = vmatprep.mubr.f32.mxu1 %v938_v38  ;;  %2937 = vmatprep.mubr.f32.mxu0 %v1464_v30  ;;  %v4111_v30 = vld [vmem:[%s7638_s1 + $0x6b8] sm:$0xff] }
 0x15e   : > { %v850_v15 = vpop.permute.xlu1 %849  ;;  %v1190_v55 = vpop.permute.xlu0 %1189  ;;  %2658 = vmatmul.mubr.f32.gmra.mrb[32].mxu1 %v713_v56  ;;  %v4143_v56 = vld [vmem:[%s7638_s1 + $0x7b8] sm:$0xff] }
 0x15f   : > { %v939_v60 = vmul.f32 %v850_v15, %v6230_v41  ;;  %v1239_v11 = vmul.f32 %v1190_v55, %v6657_v50  ;;  %1609 = vperm.xlu1 %4859, %v4077_v52   ;;  %1839 = vperm.xlu0 %4858, %v4110_v9   ;;  %v7862_v38 = vld [vmem:[#allocation5_spill] sm:$0xff] }
 0x160   : > { %v7863_v52 = vrot.slane %v7862_v38, 7 }
 0x161   : > { %2662 = vmatprep.mubr.f32.mxu1 %v939_v60  ;;  %2938 = vmatmul.mubr.f32.gmra.mrb[54].mxu0 %v1239_v11  ;;  %v4144_v60 = vld [vmem:[%s7638_s1 + $0x7c0] sm:$0xff]  ;;  %v4078_v11 = vld [vmem:[%s7638_s1 + $0x5b0] sm:$0xff] }
 0x162   : > { %v6684_v9 = vsel %vm472_vm0, %v465_v3, %v7863_v52  ;;  %v1195_v15 = vpop.permute.xlu1 %1194  ;;  %v1420_v55 = vpop.permute.xlu0 %1419  ;;  %2663 = vmatmul.mubr.f32.gmra.mrb[34].mxu1 %v714_v53  ;;  %v982_v3 = vrot.slane %v7862_v38, 1  ;;  %v7864_v53 = vld [vmem:[#allocation6_spill] sm:$0xff] }
 0x163   : > { %v1240_v58 = vmul.f32 %v1195_v15, %v6672_v35  ;;  %v1465_v27 = vmul.f32 %v1420_v55, %v6684_v9  ;;  %1844 = vperm.xlu1 %4859, %v4111_v30   ;;  %2069 = vperm.xlu0 %4858, %v4143_v56   ;;  %v7865_v30 = vld [vmem:[#allocation12_spill] sm:$0xff] }
 0x164   : > { %v715_v56 = vmul.f32 %v7865_v30, %v6342_v7  ;;  %v6701_v35 = vsel %vm986_vm1, %v981_v18, %v982_v3  ;;  %v7868_v30 = vld [vmem:[#allocation11_spill] sm:$0xff] }
 0x165   : > { %2942 = vmatprep.mubr.f32.mxu0 %v1465_v27  ;;  %7866 = vst [vmem:[#allocation10_spill] sm:$0xff] %v6701_v35  ;;  %v4079_v27 = vld [vmem:[%s7638_s1 + $0x5b8] sm:$0xff]  ;;  %v716_v25 = vmul.f32 %v7868_v30, %v6373_v36  ;;  %v4080_v30 = vld [vmem:[%s7638_s1 + $0x5c0] sm:$0xff] }
 0x166   : > { %v1425_v52 = vpop.permute.xlu1 %1424  ;;  %v855_v50 = vpop.permute.xlu0 %854  ;;  %2943 = vmatmul.mubr.f32.gmra.mrb[56].mxu0 %v1240_v58  ;;  %v4112_v58 = vld [vmem:[%s7638_s1 + $0x6c0] sm:$0xff] }
 0x167   : > { %v1466_v15 = vmul.f32 %v1425_v52, %v7864_v53  ;;  %v940_v55 = vmul.f32 %v855_v50, %v6269_v43  ;;  %2074 = vperm.xlu1 %4859, %v4144_v60   ;;  %1614 = vperm.xlu0 %4858, %v4078_v11   ;;  %v7867_v52 = vld [vmem:[#allocation4_spill] sm:$0xff] }
 0x168   : > { %v983_v61 = vrot.slane %v7867_v52, 1 }
 0x169   : > { %2667 = vmatprep.mubr.f32.mxu1 %v940_v55  ;;  %2947 = vmatprep.mubr.f32.mxu0 %v1466_v15  ;;  %v4113_v15 = vld [vmem:[%s7638_s1 + $0x6c8] sm:$0xff] }
 0x16a   : > { %v860_v50 = vpop.permute.xlu1 %859  ;;  %v1200_v60 = vpop.permute.xlu0 %1199  ;;  %2668 = vmatmul.mubr.f32.gmra.mrb[36].mxu1 %v715_v56  ;;  %v6716_v6 = vsel %vm986_vm1, %v982_v3, %v983_v61  ;;  %v4145_v55 = vld [vmem:[%s7638_s1 + $0x7c8] sm:$0xff]  ;;  %v4146_v3 = vld [vmem:[%s7638_s1 + $0x7d0] sm:$0xff] }
 0x16b   : > { %v941_v11 = vmul.f32 %v860_v50, %v6306_v16  ;;  %v1241_v18 = vmul.f32 %v1200_v60, %v6701_v35  ;;  %1619 = vperm.xlu1 %4859, %v4079_v27   ;;  %1849 = vperm.xlu0 %4858, %v4112_v58   ;;  %7869 = vst [vmem:[#allocation9_spill] sm:$0xff] %v6716_v6  ;;  %v7870_v50 = vld [vmem:[#allocation28_spill] sm:$0xff]  ;;  %v7871_v35 = vld [vmem:[#allocation29_spill] sm:$0xff] }
 0x16d   : > { %2672 = vmatprep.mubr.f32.mxu1 %v941_v11  ;;  %2948 = vmatmul.mubr.f32.gmra.mrb[58].mxu0 %v1241_v18 }
 0x16e   : > { %v1205_v56 = vpop.permute.xlu1 %1204  ;;  %v1430_v27 = vpop.permute.xlu0 %1429  ;;  %2673 = vmatmul.mubr.f32.gmra.mrb[38].mxu1 %v716_v25 }
 0x16f   : > { %v1242_v58 = vmul.f32 %v1205_v56, %v6716_v6  ;;  %v1467_v60 = vmul.f32 %v1430_v27, %v7870_v50  ;;  %1854 = vperm.xlu1 %4859, %v4113_v15   ;;  %2079 = vperm.xlu0 %4858, %v4145_v55   ;;  %v7872_v15 = vld [vmem:[#allocation14_spill] sm:$0xff]  ;;  %v7873_v27 = vld [vmem:[#allocation21_spill] sm:$0xff] }
 0x170   : > { %v717_v55 = vmul.f32 %v7872_v15, %v6406_v8  ;;  %v7874_v6 = vrot.slane %v7873_v27, 1 }
 0x171   : > { %2952 = vmatprep.mubr.f32.mxu0 %v1467_v60  ;;  %v4081_v60 = vld [vmem:[%s7638_s1 + $0x5c8] sm:$0xff] }
 0x172   : > { %v1435_v11 = vpop.permute.xlu1 %1434  ;;  %v865_v18 = vpop.permute.xlu0 %864  ;;  %2953 = vmatmul.mubr.f32.gmra.mrb[60].mxu0 %v1242_v58  ;;  %v6740_v50 = vsel %vm986_vm1, %v983_v61, %v7874_v6  ;;  %v4114_v58 = vld [vmem:[%s7638_s1 + $0x6d0] sm:$0xff]  ;;  %v718_v6 = vmul.f32 %v7876_v48, %v6437_v17  ;;  %v4115_v61 = vld [vmem:[%s7638_s1 + $0x6d8] sm:$0xff]  ;;  %v2498_v48 = vld [vmem:[%s7641_s4 + $0x408] sm:$0xff] }
 0x173   : > { %v1468_v25 = vmul.f32 %v1435_v11, %v7871_v35  ;;  %v942_v56 = vmul.f32 %v865_v18, %v6345_v54  ;;  %2084 = vperm.xlu1 %4859, %v4146_v3   ;;  %1624 = vperm.xlu0 %4858, %v4080_v30   ;;  %7875 = vst [vmem:[#allocation5_spill] sm:$0xff] %v6740_v50 }
 0x175   : > { %2677 = vmatprep.mubr.f32.mxu1 %v942_v56  ;;  %2957 = vmatprep.mubr.f32.mxu0 %v1468_v25  ;;  %v4147_v25 = vld [vmem:[%s7638_s1 + $0x7d8] sm:$0xff] }
 0x176   : > { %v870_v3 = vpop.permute.xlu1 %869  ;;  %v1210_v30 = vpop.permute.xlu0 %1209  ;;  %2678 = vmatmul.mubr.f32.gmra.mrb[40].mxu1 %v717_v55 }
 0x177   : > { %v943_v11 = vmul.f32 %v870_v3, %v6376_v62  ;;  %v1243_v18 = vmul.f32 %v1210_v30, %v6740_v50  ;;  %1629 = vperm.xlu1 %4859, %v4081_v60   ;;  %1859 = vperm.xlu0 %4858, %v4114_v58   ;;  %v2497_v58 = vld [vmem:[%s7641_s4 + $0x400] sm:$0xff]  ;;  %v7877_v3 = vld [vmem:[#allocation16_spill] sm:$0xff] }
 0x178   : > { %v719_v30 = vmul.f32 %v7877_v3, %v6469_v33 }
 0x179   : > { %2682 = vmatprep.mubr.f32.mxu1 %v943_v11  ;;  %2958 = vmatmul.mubr.f32.gmra.mrb[62].mxu0 %v1243_v18  ;;  %v4148_v11 = vld [vmem:[%s7638_s1 + $0x7e0] sm:$0xff]  ;;  %v4082_v18 = vld [vmem:[%s7638_s1 + $0x5d0] sm:$0xff] }
 0x17a   : > { %v875_v56 = vpop.permute.xlu1 %874  ;;  %v1505_v15 = vpop.permute.xlu0 %1504  ;;  %2683 = vmatmul.mubr.f32.gmra.mrb[42].mxu1 %v718_v6  ;;  %v6774_v6 = vpack.c.bf16 %v2498_v48, %v2497_v58 }
 0x17b   : > { %v944_v55 = vmul.f32 %v875_v56, %v6409_v44  ;;  %v1662_v60 = vmul.f32 %v1505_v15, %v5870_v46  ;;  %1864 = vperm.xlu1 %4859, %v4115_v61   ;;  %2089 = vperm.xlu0 %4858, %v4147_v25   ;;  %v7878_v56 = vld [vmem:[#allocation27_spill] sm:$0xff] }
 0x17c   : > { %v7879_v46 = vld [vmem:[#allocation15_spill] sm:$0xff]  ;;  %4579 = vmatprep.subr.bf16.mxu1 %v6774_v6 }
 0x17d   : > { %2687 = vmatprep.mubr.f32.mxu1 %v944_v55  ;;  %3027 = vmatprep.mubr.f32.mxu0 %v1662_v60  ;;  %v720_v50 = vmul.f32 %v7879_v46, %v6499_v19  ;;  %v4083_v55 = vld [vmem:[%s7638_s1 + $0x5d8] sm:$0xff]  ;;  %v4116_v60 = vld [vmem:[%s7638_s1 + $0x6e0] sm:$0xff] }
 0x17e   : > { %v880_v61 = vpop.permute.xlu1 %879  ;;  %v1510_v25 = vpop.permute.xlu0 %1509  ;;  %2688 = vmatmul.mubr.f32.gmra.mrb[44].mxu1 %v719_v30  ;;  %3028 = vmatmul.mubr.f32.vlgmr.msra.gmra.mrb[0].mxu0 %v7878_v56 }
 0x17f   : > { %v945_v15 = vmul.f32 %v880_v61, %v6440_v63  ;;  %v1663_v3 = vmul.f32 %v1510_v25, %v5901_v49  ;;  %2094 = vperm.xlu1 %4859, %v4148_v11   ;;  %1634 = vperm.xlu0 %4858, %v4082_v18   ;;  %v7880_v18 = vld [vmem:[#allocation18_spill] sm:$0xff]  ;;  %v4149_v61 = vld [vmem:[%s7638_s1 + $0x7e8] sm:$0xff] }
 0x180   : > { %4532 = vmatpush1.bf16.msra.mxu0 %v6009_v1  ;;  %v721_v48 = vmul.f32 %v7880_v18, %v6525_v14  ;;  %v4117_v1 = vld [vmem:[%s7638_s1 + $0x6e8] sm:$0xff]  ;;  %v4156_v49 = vld [vmem:[%s7638_s1 + $0x820] sm:$0xff] }
 0x181   : > { %2692 = vmatprep.mubr.f32.mxu1 %v945_v15  ;;  %3032 = vmatprep.mubr.f32.mxu0 %v1663_v3 }
 0x182   : > { %v885_v58 = vpop.permute.xlu1 %884  ;;  %v1515_v30 = vpop.permute.xlu0 %1514  ;;  %2693 = vmatmul.mubr.f32.gmra.mrb[46].mxu1 %v720_v50  ;;  %3033 = vmatmul.mubr.f32.gmra.mrb[2].mxu0 %v5677_v40 }
 0x183   : > { %v946_v46 = vmul.f32 %v885_v58, %v6472_v24  ;;  %v1664_v11 = vmul.f32 %v1515_v30, %v5932_v37  ;;  %1639 = vperm.xlu1 %4859, %v4083_v55   ;;  %1869 = vperm.xlu0 %4858, %v4116_v60   ;;  %v7881_v55 = vld [vmem:[#allocation17_spill] sm:$0xff]  ;;  %v4150_v58 = vld [vmem:[%s7638_s1 + $0x7f0] sm:$0xff]  ;;  %v4084_v30 = vld [vmem:[%s7638_s1 + $0x5e0] sm:$0xff] }
 0x184   : > { %4533 = vmatprep.subr.bf16.mxu0 %v7808_v10  ;;  %v722_v60 = vmul.f32 %v7881_v55, %v6543_v51 }
 0x185   : > { %2697 = vmatprep.mubr.f32.mxu1 %v946_v46  ;;  %3037 = vmatprep.mubr.f32.mxu0 %v1664_v11 }
 0x186   : > { %v890_v50 = vpop.permute.xlu1 %889  ;;  %v1520_v25 = vpop.permute.xlu0 %1519  ;;  %2698 = vmatmul.mubr.f32.gmra.mrb[48].mxu1 %v721_v48  ;;  %3038 = vmatmul.mubr.f32.gmra.mrb[4].mxu0 %v5700_v26 }
 0x187   : > { %v947_v15 = vmul.f32 %v890_v50, %v6502_v34  ;;  %v1665_v3 = vmul.f32 %v1520_v25, %v5962_v5  ;;  %1874 = vperm.xlu1 %4859, %v4117_v1   ;;  %2099 = vperm.xlu0 %4858, %v4149_v61   ;;  %v7882_v1 = vld [vmem:[#allocation20_spill] sm:$0xff] }
 0x188   : > { %4535 = vmatpush1.bf16.msra.mxu0 %v6038_v4  ;;  %v723_v61 = vmul.f32 %v7882_v1, %v6582_v12  ;;  %v4085_v4 = vld [vmem:[%s7638_s1 + $0x5e8] sm:$0xff]  ;;  %v4118_v50 = vld [vmem:[%s7638_s1 + $0x6f0] sm:$0xff] }
 0x189   : > { %2702 = vmatprep.mubr.f32.mxu1 %v947_v15  ;;  %3042 = vmatprep.mubr.f32.mxu0 %v1665_v3 }
 0x18a   : > { %v895_v46 = vpop.permute.xlu1 %894  ;;  %v1525_v11 = vpop.permute.xlu0 %1524  ;;  %2703 = vmatmul.mubr.f32.gmra.mrb[50].mxu1 %v722_v60  ;;  %3043 = vmatmul.mubr.f32.gmra.mrb[6].mxu0 %v5718_v21  ;;  %v7883_v60 = vld [vmem:[#allocation19_spill] sm:$0xff] }
 0x18b   : > { %v948_v18 = vmul.f32 %v895_v46, %v6546_v29  ;;  %v1666_v48 = vmul.f32 %v1525_v11, %v5995_v23  ;;  %2104 = vperm.xlu1 %4859, %v4150_v58   ;;  %1644 = vperm.xlu0 %4858, %v4084_v30   ;;  %v724_v58 = vmul.f32 %v7883_v60, %v6595_v2  ;;  %v4119_v30 = vld [vmem:[%s7638_s1 + $0x6f8] sm:$0xff] }
 0x18c   : > { %4536 = vmatprep.subr.bf16.mxu0 %v7808_v10  ;;  %v4151_v46 = vld [vmem:[%s7638_s1 + $0x7f8] sm:$0xff] }
 0x18d   : > { %2707 = vmatprep.mubr.f32.mxu1 %v948_v18  ;;  %3047 = vmatprep.mubr.f32.mxu0 %v1666_v48 }
 0x18e   : > { %v900_v25 = vpop.permute.xlu1 %899  ;;  %v1530_v15 = vpop.permute.xlu0 %1529  ;;  %2708 = vmatmul.mubr.f32.gmra.mrb[52].mxu1 %v723_v61  ;;  %3048 = vmatmul.mubr.f32.gmra.mrb[8].mxu0 %v5740_v31  ;;  %v7884_v61 = vld [vmem:[#allocation23_spill] sm:$0xff] }
 0x18f   : > { %v949_v3 = vmul.f32 %v900_v25, %v6562_v39  ;;  %v1667_v55 = vmul.f32 %v1530_v15, %v6025_v28  ;;  %1649 = vperm.xlu1 %4859, %v4085_v4   ;;  %1879 = vperm.xlu0 %4858, %v4118_v50   ;;  %v725_v4 = vmul.f32 %v7884_v61, %v6636_v20  ;;  %v4086_v50 = vld [vmem:[%s7638_s1 + $0x5f0] sm:$0xff]  ;;  %v7888_v61 = vld [vmem:[#allocation39_spill] sm:$0xff] }
 0x190   : > { %4538 = vmatpush1.bf16.msra.mxu0 %v6068_v57  ;;  %v4152_v57 = vld [vmem:[%s7638_s1 + $0x800] sm:$0xff] }
 0x191   : > { %2712 = vmatprep.mubr.f32.mxu1 %v949_v3  ;;  %3052 = vmatprep.mubr.f32.mxu0 %v1667_v55  ;;  %v7885_v55 = vld [vmem:[#allocation52_spill] sm:$0xff] }
 0x192   : > { %v905_v11 = vpop.permute.xlu1 %904  ;;  %v1535_v18 = vpop.permute.xlu0 %1534  ;;  %2713 = vmatmul.mubr.f32.gmra.mrb[54].mxu1 %v724_v58  ;;  %3053 = vmatmul.mubr.f32.gmra.mrb[10].mxu0 %v5763_v0  ;;  %v7886_v58 = vld [vmem:[#allocation22_spill] sm:$0xff] }
 0x193   : > { %v950_v48 = vmul.f32 %v905_v11, %v6598_v13  ;;  %v1668_v1 = vmul.f32 %v1535_v18, %v6055_v22  ;;  %1884 = vperm.xlu1 %4859, %v4119_v30   ;;  %2109 = vperm.xlu0 %4858, %v4151_v46   ;;  %v726_v30 = vmul.f32 %v7886_v58, %v6649_v47  ;;  %v4087_v46 = vld [vmem:[%s7638_s1 + $0x5f8] sm:$0xff]  ;;  %v4153_v11 = vld [vmem:[%s7638_s1 + $0x808] sm:$0xff] }
 0x194   : > { %4539 = vmatprep.subr.bf16.mxu0 %v7808_v10  ;;  %v7887_v18 = vld [vmem:[#allocation53_spill] sm:$0xff] }
 0x195   : > { %2717 = vmatprep.mubr.f32.mxu1 %v950_v48  ;;  %3057 = vmatprep.mubr.f32.mxu0 %v1668_v1  ;;  %v4155_v58 = vld [vmem:[%s7638_s1 + $0x818] sm:$0xff] }
 0x196   : > { %v910_v25 = vpop.permute.xlu1 %909  ;;  %v1540_v15 = vpop.permute.xlu0 %1539  ;;  %2718 = vmatmul.mubr.f32.gmra.mrb[56].mxu1 %v725_v4  ;;  %3058 = vmatmul.mubr.f32.gmra.mrb[12].mxu0 %v5790_v42 }
 0x197   : > { %v951_v3 = vmul.f32 %v910_v25, %v6616_v32  ;;  %v1669_v60 = vmul.f32 %v1540_v15, %v7885_v55  ;;  %2179 = vperm.xlu1 %4859, %v4152_v57   ;;  %1654 = vperm.xlu0 %4858, %v4086_v50   ;;  %v7889_v57 = vld [vmem:[#allocation55_spill] sm:$0xff]  ;;  %v7890_v25 = vld [vmem:[#allocation25_spill] sm:$0xff] }
 0x198   : > { %4541 = vmatpush1.bf16.msra.mxu0 %v7887_v18  ;;  %v727_v15 = vmul.f32 %v7890_v25, %v6684_v9  ;;  %v7892_v18 = vld [vmem:[#allocation59_spill] sm:$0xff] }
 0x199   : > { %2722 = vmatprep.mubr.f32.mxu1 %v951_v3  ;;  %3062 = vmatprep.mubr.f32.mxu0 %v1669_v60  ;;  %v4154_v3 = vld [vmem:[%s7638_s1 + $0x810] sm:$0xff] }
 0x19a   : > { %v915_v48 = vpop.permute.xlu1 %914  ;;  %v1545_v1 = vpop.permute.xlu0 %1544  ;;  %2723 = vmatmul.mubr.f32.gmra.mrb[58].mxu1 %v726_v30  ;;  %3063 = vmatmul.mubr.f32.gmra.mrb[14].mxu0 %v7888_v61 }
 0x19b   : > { %v952_v4 = vmul.f32 %v915_v48, %v7862_v38  ;;  %v1670_v50 = vmul.f32 %v1545_v1, %v7889_v57  ;;  %1659 = vperm.xlu1 %4859, %v4087_v46   ;;  %2184 = vperm.xlu0 %4858, %v4153_v11   ;;  %v7891_v46 = vld [vmem:[#allocation42_spill] sm:$0xff]  ;;  %v7893_v1 = vld [vmem:[#allocation24_spill] sm:$0xff] }
 0x19c   : > { %4542 = vmatprep.subr.bf16.mxu0 %v7808_v10  ;;  %v728_v25 = vmul.f32 %v7893_v1, %v7864_v53  ;;  %v4157_v1 = vld [vmem:[%s7638_s1 + $0x828] sm:$0xff] }
 0x19d   : > { %2727 = vmatprep.mubr.f32.mxu1 %v952_v4  ;;  %3067 = vmatprep.mubr.f32.mxu0 %v1670_v50  ;;  %v4120_v4 = vld [vmem:[%s7638_s1 + $0x700] sm:$0xff]  ;;  %v7894_v50 = vld [vmem:[#allocation56_spill] sm:$0xff] }
 0x19e   : > { %v920_v60 = vpop.permute.xlu1 %919  ;;  %v1550_v30 = vpop.permute.xlu0 %1549  ;;  %2728 = vmatmul.mubr.f32.gmra.mrb[60].mxu1 %v727_v15  ;;  %3068 = vmatmul.mubr.f32.gmra.mrb[16].mxu0 %v7891_v46  ;;  %v4088_v46 = vld [vmem:[%s7638_s1 + $0x600] sm:$0xff] }
 0x19f   : > { %v953_v11 = vmul.f32 %v920_v60, %v7867_v52  ;;  %v1671_v48 = vmul.f32 %v1550_v30, %v7892_v18  ;;  %2194 = vperm.xlu1 %4859, %v4155_v58   ;;  %2189 = vperm.xlu0 %4858, %v4154_v3   ;;  %v7895_v58 = vld [vmem:[#allocation45_spill] sm:$0xff]  ;;  %v7896_v3 = vld [vmem:[#allocation63_spill] sm:$0xff] }
 0x1a0   : > { %4544 = vmatpush1.bf16.msra.mxu0 %v7894_v50 }
 0x1a1   : > { %2732 = vmatprep.mubr.f32.mxu1 %v953_v11  ;;  %3072 = vmatprep.mubr.f32.mxu0 %v1671_v48  ;;  %v7898_v48 = vld [vmem:[#allocation60_spill] sm:$0xff] }
 0x1a2   : > { %v1560_v15 = vpop.permute.xlu1 %1559  ;;  %v1555_v60 = vpop.permute.xlu0 %1554  ;;  %2733 = vmatmul.mubr.f32.gmra.mrb[62].mxu1 %v728_v25  ;;  %3073 = vmatmul.mubr.f32.gmra.mrb[18].mxu0 %v7895_v58  ;;  %v7899_v25 = vld [vmem:[#allocation66_spill] sm:$0xff] }
 0x1a3   : > { %v1672_v30 = vmul.f32 %v1555_v60, %v7896_v3  ;;  %2199 = vperm.xlu1 %4859, %v4156_v49   ;;  %1954 = vperm.xlu0 %4858, %v4120_v4   ;;  %v1673_v50 = vmul.f32 %v1560_v15, %v7899_v25  ;;  %v7900_v4 = vld [vmem:[#allocation48_spill] sm:$0xff]  ;;  %v2500_v15 = vld [vmem:[%s7641_s4 + $0x418] sm:$0xff] }
 0x1a4   : > { %4545 = vmatprep.subr.bf16.mxu0 %v7808_v10 }
 0x1a5   : > { %v6894_v11 = vpop.f32.mrb[0].mxu1  ;;  %3077 = vmatprep.mubr.f32.mxu0 %v1672_v30  ;;  %4547 = vmatpush1.bf16.msra.mxu0 %v7898_v48  ;;  %v2499_v30 = vld [vmem:[%s7641_s4 + $0x410] sm:$0xff] }
 0x1a6   : > { %7897 = vst [vmem:[#allocation6_spill] sm:$0xff] %v6894_v11  ;;  %v1795_v60 = vpop.permute.xlu1 %1794  ;;  %v2020_v49 = vpop.permute.xlu0 %2019  ;;  %3078 = vmatmul.mubr.f32.gmra.mrb[20].mxu0 %v7900_v4  ;;  %4548 = vmatprep.subr.bf16.mxu0 %v7808_v10  ;;  %v4158_v48 = vld [vmem:[%s7638_s1 + $0x830] sm:$0xff]  ;;  %v7903_v11 = vld [vmem:[#allocation69_spill] sm:$0xff] }
 0x1a7   : > { %v1900_v58 = vmul.f32 %v1795_v60, %v6303_v45  ;;  %v2125_v61 = vmul.f32 %v2020_v49, %v6230_v41  ;;  %v2581_v42 = vpop.f32.mrb[1].mxu1  ;;  %2204 = vperm.xlu1 %4859, %v4157_v1   ;;  %1729 = vperm.xlu0 %4858, %v4088_v46   ;;  %v4121_v45 = vld [vmem:[%s7638_s1 + $0x708] sm:$0xff]  ;;  %v7902_v46 = vld [vmem:[#allocation64_spill] sm:$0xff]  ;;  %v4582_v49 = vpack.c.bf16 %v2500_v15, %v2499_v30 }
 0x1a8   : > { %3082 = vmatprep.mubr.f32.mxu0 %v1673_v50  ;;  %v4089_v30 = vld [vmem:[%s7638_s1 + $0x608] sm:$0xff] }
 0x1a9   : > { %v6914_v42 = vpop.f32.mrb[2].mxu1  ;;  %3317 = vmatprep.mubr.f32.mxu1 %v2125_v61  ;;  %4550 = vmatpush1.bf16.msra.mxu0 %v7902_v46  ;;  %v2502_v61 = vld [vmem:[%s7641_s4 + $0x428] sm:$0xff] }
 0x1aa   : > { %7901 = vst [vmem:[#allocation12_spill] sm:$0xff] %v6914_v42  ;;  %v2025_v1 = vpop.permute.xlu1 %2024  ;;  %v1565_v60 = vpop.permute.xlu0 %1564  ;;  %3083 = vmatmul.mubr.f32.gmra.mrb[22].mxu0 %v6081_v59  ;;  %3318 = vmatmul.mubr.f32.vlgmr.msra.gmra.mrb[64].mxu1 %v1900_v58  ;;  %v2501_v42 = vld [vmem:[%s7641_s4 + $0x420] sm:$0xff]  ;;  %v4159_v58 = vld [vmem:[%s7638_s1 + $0x838] sm:$0xff] }
 0x1ab   : > { %v2126_v50 = vmul.f32 %v2025_v1, %v6269_v43  ;;  %v1674_v4 = vmul.f32 %v1565_v60, %v7903_v11  ;;  %v2586_v0 = vpop.f32.mrb[3].mxu1  ;;  %2209 = vperm.xlu1 %4859, %v4158_v48   ;;  %1959 = vperm.xlu0 %4858, %v4121_v45   ;;  %v7905_v45 = vld [vmem:[#allocation54_spill] sm:$0xff]  ;;  %v4586_v46 = vpack.c.bf16 %v2502_v61, %v2501_v42  ;;  %v2503_v1 = vld [vmem:[%s7641_s4 + $0x430] sm:$0xff]  ;;  %v7906_v60 = vld [vmem:[#allocation71_spill] sm:$0xff] }
 0x1ac   : > { %4581 = vmatpush3.bf16.msra.mxu1 %v6774_v6  ;;  %4551 = vmatprep.subr.bf16.mxu0 %v7808_v10  ;;  %v2504_v6 = vld [vmem:[%s7641_s4 + $0x438] sm:$0xff]  ;;  %v4122_v42 = vld [vmem:[%s7638_s1 + $0x710] sm:$0xff]  ;;  %v7907_v61 = vld [vmem:[#allocation67_spill] sm:$0xff] }
 0x1ad   : > { %v6934_v0 = vpop.f32.mrb[4].mxu1  ;;  %3087 = vmatprep.mubr.f32.mxu0 %v1674_v4  ;;  %3322 = vmatprep.mubr.f32.mxu1 %v2126_v50  ;;  %v4160_v50 = vld [vmem:[%s7638_s1 + $0x840] sm:$0xff] }
 0x1ae   : > { %7904 = vst [vmem:[#allocation4_spill] sm:$0xff] %v6934_v0  ;;  %v1570_v15 = vpop.permute.xlu1 %1569  ;;  %v1800_v48 = vpop.permute.xlu0 %1799  ;;  %3088 = vmatmul.mubr.f32.gmra.mrb[24].mxu0 %v7905_v45  ;;  %4583 = vmatprep.subr.bf16.mxu1 %v4582_v49 }
 0x1af   : > { %v1675_v59 = vmul.f32 %v1570_v15, %v7906_v60  ;;  %v1901_v0 = vmul.f32 %v1800_v48, %v6342_v7  ;;  %v2591_v4 = vpop.f32.mrb[5].mxu1  ;;  %2214 = vperm.xlu1 %4859, %v4159_v58   ;;  %1734 = vperm.xlu0 %4858, %v4089_v30   ;;  %v4590_v15 = vpack.c.bf16 %v2504_v6, %v2503_v1  ;;  %v7909_v58 = vld [vmem:[#allocation58_spill] sm:$0xff] }
 0x1b0   : > { %4585 = vmatpush3.bf16.msra.mxu1 %v4582_v49  ;;  %4553 = vmatpush1.bf16.msra.mxu0 %v7907_v61  ;;  %v2505_v49 = vld [vmem:[%s7641_s4 + $0x440] sm:$0xff] }
 0x1b1   : > { %v6952_v45 = vpop.f32.mrb[6].mxu1  ;;  %3092 = vmatprep.mubr.f32.mxu0 %v1675_v59  ;;  %3323 = vmatmul.mubr.f32.gmra.mrb[66].mxu1 %v1901_v0  ;;  %v2506_v59 = vld [vmem:[%s7641_s4 + $0x448] sm:$0xff] }
 0x1b2   : > { %7908 = vst [vmem:[#allocation11_spill] sm:$0xff] %v6952_v45  ;;  %v1805_v7 = vpop.permute.xlu1 %1804  ;;  %v2030_v48 = vpop.permute.xlu0 %2029  ;;  %3093 = vmatmul.mubr.f32.gmra.mrb[26].mxu0 %v7909_v58  ;;  %4587 = vmatprep.subr.bf16.mxu1 %v4586_v46  ;;  %v4161_v0 = vld [vmem:[%s7638_s1 + $0x848] sm:$0xff] }
 0x1b3   : > { %v1902_v30 = vmul.f32 %v1805_v7, %v6373_v36  ;;  %v2127_v4 = vmul.f32 %v2030_v48, %v6306_v16  ;;  %v2596_v60 = vpop.f32.mrb[7].mxu1  ;;  %2219 = vperm.xlu1 %4859, %v4160_v50   ;;  %1964 = vperm.xlu0 %4858, %v4122_v42   ;;  %v4090_v36 = vld [vmem:[%s7638_s1 + $0x610] sm:$0xff]  ;;  %v7911_v50 = vld [vmem:[#allocation70_spill] sm:$0xff]  ;;  %v4594_v42 = vpack.c.bf16 %v2506_v59, %v2505_v49  ;;  %v7912_v7 = vld [vmem:[#allocation73_spill] sm:$0xff] }
 0x1b4   : > { %4589 = vmatpush3.bf16.msra.mxu1 %v4586_v46  ;;  %4554 = vmatprep.subr.bf16.mxu0 %v7808_v10  ;;  %v4162_v46 = vld [vmem:[%s7638_s1 + $0x850] sm:$0xff]  ;;  %v2508_v49 = vld [vmem:[%s7641_s4 + $0x458] sm:$0xff] }
 0x1b5   : > { %v6970_v1 = vpop.f32.mrb[8].mxu1  ;;  %3327 = vmatprep.mubr.f32.mxu1 %v2127_v4  ;;  %4591 = vmatprep.subr.bf16.mxu1 %v4590_v15  ;;  %v4123_v4 = vld [vmem:[%s7638_s1 + $0x718] sm:$0xff] }
 0x1b6   : > { %7910 = vst [vmem:[#allocation29_spill] sm:$0xff] %v6970_v1  ;;  %v2035_v6 = vpop.permute.xlu1 %2034  ;;  %v1575_v60 = vpop.permute.xlu0 %1574  ;;  %3328 = vmatmul.mubr.f32.gmra.mrb[68].mxu1 %v1902_v30  ;;  %4556 = vmatpush1.bf16.msra.mxu0 %v7911_v50 }
 0x1b7   : > { %v2128_v61 = vmul.f32 %v2035_v6, %v6345_v54  ;;  %v1676_v48 = vmul.f32 %v1575_v60, %v7912_v7  ;;  %v2601_v45 = vpop.f32.mrb[9].mxu1  ;;  %2224 = vperm.xlu1 %4859, %v4161_v0   ;;  %1739 = vperm.xlu0 %4858, %v4090_v36   ;;  %v7914_v36 = vld [vmem:[#allocation62_spill] sm:$0xff] }
 0x1b8   : > { %4593 = vmatpush3.bf16.msra.mxu1 %v4590_v15  ;;  %4557 = vmatprep.subr.bf16.mxu0 %v7808_v10  ;;  %v2507_v45 = vld [vmem:[%s7641_s4 + $0x450] sm:$0xff]  ;;  %v7915_v15 = vld [vmem:[#allocation75_spill] sm:$0xff] }
 0x1b9   : > { %v6982_v30 = vpop.f32.mrb[10].mxu1  ;;  %3097 = vmatprep.mubr.f32.mxu0 %v1676_v48  ;;  %3332 = vmatprep.mubr.f32.mxu1 %v2128_v61  ;;  %v4163_v61 = vld [vmem:[%s7638_s1 + $0x858] sm:$0xff]  ;;  %v4598_v1 = vpack.c.bf16 %v2508_v49, %v2507_v45  ;;  %v4164_v49 = vld [vmem:[%s7638_s1 + $0x860] sm:$0xff] }
 0x1ba   : > { %7913 = vst [vmem:[#allocation14_spill] sm:$0xff] %v6982_v30  ;;  %v1580_v59 = vpop.permute.xlu1 %1579  ;;  %v1810_v0 = vpop.permute.xlu0 %1809  ;;  %3098 = vmatmul.mubr.f32.gmra.mrb[28].mxu0 %v7914_v36  ;;  %4595 = vmatprep.subr.bf16.mxu1 %v4594_v42  ;;  %v4091_v48 = vld [vmem:[%s7638_s1 + $0x618] sm:$0xff]  ;;  %v7916_v30 = vld [vmem:[#allocation72_spill] sm:$0xff] }
 0x1bb   : > { %v1677_v6 = vmul.f32 %v1580_v59, %v7915_v15  ;;  %v1903_v60 = vmul.f32 %v1810_v0, %v6406_v8  ;;  %v2606_v50 = vpop.f32.mrb[11].mxu1  ;;  %2229 = vperm.xlu1 %4859, %v4162_v46   ;;  %1969 = vperm.xlu0 %4858, %v4123_v4   ;;  %v2509_v8 = vld [vmem:[%s7641_s4 + $0x460] sm:$0xff]  ;;  %v2510_v46 = vld [vmem:[%s7641_s4 + $0x468] sm:$0xff] }
 0x1bc   : > { %4559 = vmatpush1.bf16.msra.mxu0 %v7916_v30  ;;  %4597 = vmatpush3.bf16.msra.mxu1 %v4594_v42  ;;  %v4124_v0 = vld [vmem:[%s7638_s1 + $0x720] sm:$0xff]  ;;  %v2512_v50 = vld [vmem:[%s7641_s4 + $0x478] sm:$0xff] }
 0x1bd   : > { %v7000_v36 = vpop.f32.mrb[12].mxu1  ;;  %3102 = vmatprep.mubr.f32.mxu0 %v1677_v6  ;;  %3333 = vmatmul.mubr.f32.gmra.mrb[70].mxu1 %v1903_v60  ;;  %v7917_v6 = vld [vmem:[#allocation74_spill] sm:$0xff] }
 0x1be   : > { %v1815_v4 = vpop.permute.xlu1 %1814  ;;  %v2040_v59 = vpop.permute.xlu0 %2039  ;;  %3103 = vmatmul.mubr.f32.gmra.mrb[30].mxu0 %v6230_v41  ;;  %4560 = vmatprep.subr.bf16.mxu0 %v7808_v10  ;;  %v4602_v41 = vpack.c.bf16 %v2510_v46, %v2509_v8  ;;  %v7919_v8 = vld [vmem:[#allocation77_spill] sm:$0xff] }
 0x1bf   : > { %v1904_v42 = vmul.f32 %v1815_v4, %v6437_v17  ;;  %v2129_v30 = vmul.f32 %v2040_v59, %v6376_v62  ;;  %v2611_v45 = vpop.f32.mrb[13].mxu1  ;;  %2234 = vperm.xlu1 %4859, %v4163_v61   ;;  %1744 = vperm.xlu0 %4858, %v4091_v48   ;;  %v2511_v17 = vld [vmem:[%s7641_s4 + $0x470] sm:$0xff] }
 0x1c0   : > { %4599 = vmatprep.subr.bf16.mxu1 %v4598_v1  ;;  %4562 = vmatpush1.bf16.msra.mxu0 %v7917_v6  ;;  %v7920_v45 = vld [vmem:[#allocation76_spill] sm:$0xff] }
 0x1c1   : > { %v7019_v60 = vpop.f32.mrb[14].mxu1  ;;  %3337 = vmatprep.mubr.f32.mxu1 %v2129_v30  ;;  %4601 = vmatpush3.bf16.msra.mxu1 %v4598_v1  ;;  %v4165_v1 = vld [vmem:[%s7638_s1 + $0x868] sm:$0xff]  ;;  %v4092_v30 = vld [vmem:[%s7638_s1 + $0x620] sm:$0xff] }
 0x1c2   : > { %7918 = vst [vmem:[#allocation21_spill] sm:$0xff] %v7019_v60  ;;  %v2045_v61 = vpop.permute.xlu1 %2044  ;;  %v1585_v48 = vpop.permute.xlu0 %1584  ;;  %3338 = vmatmul.mubr.f32.gmra.mrb[72].mxu1 %v1904_v42  ;;  %4563 = vmatprep.subr.bf16.mxu0 %v7808_v10  ;;  %v4606_v42 = vpack.c.bf16 %v2512_v50, %v2511_v17  ;;  %v4166_v17 = vld [vmem:[%s7638_s1 + $0x870] sm:$0xff]  ;;  %v4125_v50 = vld [vmem:[%s7638_s1 + $0x728] sm:$0xff] }
 0x1c3   : > { %v2130_v4 = vmul.f32 %v2045_v61, %v6409_v44  ;;  %v1678_v46 = vmul.f32 %v1585_v48, %v7919_v8  ;;  %v2616_v59 = vpop.f32.mrb[15].mxu1  ;;  %2239 = vperm.xlu1 %4859, %v4164_v49   ;;  %1974 = vperm.xlu0 %4858, %v4124_v0   ;;  %v7921_v49 = vld [vmem:[#allocation79_spill] sm:$0xff] }
 0x1c4   : > { %4603 = vmatprep.subr.bf16.mxu1 %v4602_v41  ;;  %4565 = vmatpush1.bf16.msra.mxu0 %v7920_v45  ;;  %v7922_v45 = vld [vmem:[#allocation78_spill] sm:$0xff] }
 0x1c5   : > { %v7037_v6 = vpop.f32.mrb[16].mxu1  ;;  %3107 = vmatprep.mubr.f32.mxu0 %v1678_v46  ;;  %3342 = vmatprep.mubr.f32.mxu1 %v2130_v4 }
 0x1c6   : > { %v1590_v61 = vpop.permute.xlu1 %1589  ;;  %v1820_v48 = vpop.permute.xlu0 %1819  ;;  %3108 = vmatmul.mubr.f32.gmra.mrb[32].mxu0 %v6269_v43  ;;  %4605 = vmatpush3.bf16.msra.mxu1 %v4602_v41 }
 0x1c7   : > { %v1679_v0 = vmul.f32 %v1590_v61, %v7921_v49  ;;  %v1905_v59 = vmul.f32 %v1820_v48, %v6469_v33  ;;  %v2621_v60 = vpop.f32.mrb[17].mxu1  ;;  %2244 = vperm.xlu1 %4859, %v4165_v1   ;;  %1749 = vperm.xlu0 %4858, %v4092_v30   ;;  %v4167_v1 = vld [vmem:[%s7638_s1 + $0x878] sm:$0xff]  ;;  %v4093_v30 = vld [vmem:[%s7638_s1 + $0x628] sm:$0xff] }
 0x1c8   : > { %4566 = vmatprep.subr.bf16.mxu0 %v7808_v10  ;;  %4607 = vmatprep.subr.bf16.mxu1 %v4606_v42  ;;  %v7923_v48 = vld [vmem:[#allocation81_spill] sm:$0xff] }
 0x1c9   : > { %v7049_v43 = vpop.f32.mrb[18].mxu1  ;;  %3112 = vmatprep.mubr.f32.mxu0 %v1679_v0  ;;  %3343 = vmatmul.mubr.f32.gmra.mrb[74].mxu1 %v1905_v59 }
 0x1ca   : > { %v1825_v41 = vpop.permute.xlu1 %1824  ;;  %v2050_v33 = vpop.permute.xlu0 %2049  ;;  %3113 = vmatmul.mubr.f32.gmra.mrb[34].mxu0 %v6306_v16  ;;  %4609 = vmatpush3.bf16.msra.mxu1 %v4606_v42 }
 0x1cb   : > { %v1906_v60 = vmul.f32 %v1825_v41, %v6499_v19  ;;  %v2131_v4 = vmul.f32 %v2050_v33, %v6440_v63  ;;  %v2626_v46 = vpop.f32.mrb[19].mxu1  ;;  %2249 = vperm.xlu1 %4859, %v4166_v17   ;;  %1979 = vperm.xlu0 %4858, %v4125_v50   ;;  %v4168_v17 = vld [vmem:[%s7638_s1 + $0x880] sm:$0xff]  ;;  %v4126_v50 = vld [vmem:[%s7638_s1 + $0x730] sm:$0xff] }
 0x1cc   : > { %4568 = vmatpush1.bf16.msra.mxu0 %v7922_v45  ;;  %v7924_v41 = vld [vmem:[#allocation80_spill] sm:$0xff]  ;;  %v7925_v46 = vld [vmem:[#allocation83_spill] sm:$0xff] }
 0x1cd   : > { %v7061_v61 = vpop.f32.mrb[20].mxu1  ;;  %3347 = vmatprep.mubr.f32.mxu1 %v2131_v4  ;;  %4569 = vmatprep.subr.bf16.mxu0 %v7808_v10 }
 0x1ce   : > { %v2055_v16 = vpop.permute.xlu1 %2054  ;;  %v1595_v19 = vpop.permute.xlu0 %1594  ;;  %3348 = vmatmul.mubr.f32.gmra.mrb[76].mxu1 %v1906_v60 }
 0x1cf   : > { %v2132_v42 = vmul.f32 %v2055_v16, %v6472_v24  ;;  %v1680_v0 = vmul.f32 %v1595_v19, %v7923_v48  ;;  %v2631_v59 = vpop.f32.mrb[21].mxu1  ;;  %2254 = vperm.xlu1 %4859, %v4167_v1   ;;  %1754 = vperm.xlu0 %4858, %v4093_v30   ;;  %v4169_v16 = vld [vmem:[%s7638_s1 + $0x888] sm:$0xff]  ;;  %v4094_v19 = vld [vmem:[%s7638_s1 + $0x630] sm:$0xff] }
 0x1d0   : > { %4571 = vmatpush1.bf16.msra.mxu0 %v7924_v41  ;;  %v4170_v41 = vld [vmem:[%s7638_s1 + $0x890] sm:$0xff] }
 0x1d1   : > { %v7073_v33 = vpop.f32.mrb[22].mxu1  ;;  %3117 = vmatprep.mubr.f32.mxu0 %v1680_v0  ;;  %3352 = vmatprep.mubr.f32.mxu1 %v2132_v42  ;;  %v7926_v42 = vld [vmem:[#allocation82_spill] sm:$0xff] }
 0x1d2   : > { %v1600_v60 = vpop.permute.xlu1 %1599  ;;  %v1830_v4 = vpop.permute.xlu0 %1829  ;;  %3118 = vmatmul.mubr.f32.gmra.mrb[36].mxu0 %v6345_v54  ;;  %4572 = vmatprep.subr.bf16.mxu0 %v7808_v10 }
 0x1d3   : > { %v1681_v1 = vmul.f32 %v1600_v60, %v7925_v46  ;;  %v1907_v30 = vmul.f32 %v1830_v4, %v6525_v14  ;;  %v2636_v45 = vpop.f32.mrb[23].mxu1  ;;  %2259 = vperm.xlu1 %4859, %v4168_v17   ;;  %1984 = vperm.xlu0 %4858, %v4126_v50   ;;  %v4127_v60 = vld [vmem:[%s7638_s1 + $0x738] sm:$0xff]  ;;  %v7927_v4 = vld [vmem:[#allocation84_spill] sm:$0xff] }
 0x1d4   : > { %4574 = vmatpush1.bf16.msra.mxu0 %v7926_v42  ;;  %v4171_v45 = vld [vmem:[%s7638_s1 + $0x898] sm:$0xff] }
 0x1d5   : > { %v7086_v54 = vpop.f32.mrb[24].mxu1  ;;  %3122 = vmatprep.mubr.f32.mxu0 %v1681_v1  ;;  %3353 = vmatmul.mubr.f32.gmra.mrb[78].mxu1 %v1907_v30  ;;  %v7928_v1 = vld [vmem:[#allocation85_spill] sm:$0xff] }
 0x1d6   : > { %v1835_v0 = vpop.permute.xlu1 %1834  ;;  %v2060_v59 = vpop.permute.xlu0 %2059  ;;  %3123 = vmatmul.mubr.f32.gmra.mrb[38].mxu0 %v6376_v62  ;;  %4575 = vmatprep.subr.bf16.mxu0 %v7808_v10 }
 0x1d7   : > { %v1908_v14 = vmul.f32 %v1835_v0, %v6543_v51  ;;  %v2133_v17 = vmul.f32 %v2060_v59, %v6502_v34  ;;  %v2641_v50 = vpop.f32.mrb[25].mxu1  ;;  %2264 = vperm.xlu1 %4859, %v4169_v16   ;;  %1759 = vperm.xlu0 %4858, %v4094_v19   ;;  %v4095_v16 = vld [vmem:[%s7638_s1 + $0x638] sm:$0xff]  ;;  %v7929_v0 = vld [vmem:[#allocation86_spill] sm:$0xff] }
 0x1d8   : > { %4577 = vmatpush1.bf16.msra.mxu0 %v7927_v4  ;;  %v4128_v50 = vld [vmem:[%s7638_s1 + $0x740] sm:$0xff]  ;;  %v4173_v4 = vld [vmem:[%s7638_s1 + $0x8a8] sm:$0xff] }
 0x1d9   : > { %3357 = vmatprep.mubr.f32.mxu1 %v2133_v17  ;;  %v4172_v17 = vld [vmem:[%s7638_s1 + $0x8a0] sm:$0xff] }
 0x1da   : > { %v2065_v62 = vpop.permute.xlu1 %2064  ;;  %v1605_v10 = vpop.permute.xlu0 %1604  ;;  %3358 = vmatmul.mubr.f32.gmra.mrb[80].mxu1 %v1908_v14 }
 0x1db   : > { %v2134_v51 = vmul.f32 %v2065_v62, %v6546_v29  ;;  %v1682_v30 = vmul.f32 %v1605_v10, %v7928_v1  ;;  %2269 = vperm.xlu1 %4859, %v4170_v41   ;;  %1989 = vperm.xlu0 %4858, %v4127_v60   ;;  %v4096_v62 = vld [vmem:[%s7638_s1 + $0x640] sm:$0xff] }
 0x1dd   : > { %3127 = vmatprep.mubr.f32.mxu0 %v1682_v30  ;;  %3362 = vmatprep.mubr.f32.mxu1 %v2134_v51  ;;  %v7930_v30 = vld [vmem:[#allocation87_spill] sm:$0xff] }
 0x1de   : > { %v1610_v19 = vpop.permute.xlu1 %1609  ;;  %v1840_v42 = vpop.permute.xlu0 %1839  ;;  %3128 = vmatmul.mubr.f32.gmra.mrb[40].mxu0 %v6409_v44 }
 0x1df   : > { %v1683_v59 = vmul.f32 %v1610_v19, %v7929_v0  ;;  %v1909_v14 = vmul.f32 %v1840_v42, %v6582_v12  ;;  %2274 = vperm.xlu1 %4859, %v4171_v45   ;;  %1764 = vperm.xlu0 %4858, %v4095_v16   ;;  %v4174_v45 = vld [vmem:[%s7638_s1 + $0x8b0] sm:$0xff]  ;;  %v4129_v16 = vld [vmem:[%s7638_s1 + $0x748] sm:$0xff] }
 0x1e1   : > { %3132 = vmatprep.mubr.f32.mxu0 %v1683_v59  ;;  %3363 = vmatmul.mubr.f32.gmra.mrb[82].mxu1 %v1909_v14  ;;  %v7931_v59 = vld [vmem:[#allocation2_spill] sm:$0xff] }
 0x1e2   : > { %v1845_v41 = vpop.permute.xlu1 %1844  ;;  %v2070_v60 = vpop.permute.xlu0 %2069  ;;  %3133 = vmatmul.mubr.f32.gmra.mrb[42].mxu0 %v6440_v63 }
 0x1e3   : > { %v1910_v44 = vmul.f32 %v1845_v41, %v6595_v2  ;;  %v2135_v12 = vmul.f32 %v2070_v60, %v6562_v39  ;;  %2279 = vperm.xlu1 %4859, %v4172_v17   ;;  %1994 = vperm.xlu0 %4858, %v4128_v50   ;;  %v4175_v50 = vld [vmem:[%s7638_s1 + $0x8b8] sm:$0xff]  ;;  %v4097_v41 = vld [vmem:[%s7638_s1 + $0x648] sm:$0xff] }
 0x1e5   : > { %3367 = vmatprep.mubr.f32.mxu1 %v2135_v12  ;;  %v4176_v12 = vld [vmem:[%s7638_s1 + $0x8c0] sm:$0xff] }
 0x1e6   : > { %v2075_v10 = vpop.permute.xlu1 %2074  ;;  %v1615_v51 = vpop.permute.xlu0 %1614  ;;  %3368 = vmatmul.mubr.f32.gmra.mrb[84].mxu1 %v1910_v44 }
 0x1e7   : > { %v2136_v63 = vmul.f32 %v2075_v10, %v6598_v13  ;;  %v1684_v2 = vmul.f32 %v1615_v51, %v7930_v30  ;;  %2284 = vperm.xlu1 %4859, %v4173_v4   ;;  %1769 = vperm.xlu0 %4858, %v4096_v62   ;;  %v4130_v4 = vld [vmem:[%s7638_s1 + $0x750] sm:$0xff] }
 0x1e8   : > { %v7932_v51 = vld [vmem:[#allocation8_spill] sm:$0xff] }
 0x1e9   : > { %3137 = vmatprep.mubr.f32.mxu0 %v1684_v2  ;;  %3372 = vmatprep.mubr.f32.mxu1 %v2136_v63  ;;  %v4177_v63 = vld [vmem:[%s7638_s1 + $0x8c8] sm:$0xff]  ;;  %v4098_v2 = vld [vmem:[%s7638_s1 + $0x650] sm:$0xff] }
 0x1ea   : > { %v1620_v19 = vpop.permute.xlu1 %1619  ;;  %v1850_v42 = vpop.permute.xlu0 %1849  ;;  %3138 = vmatmul.mubr.f32.gmra.mrb[44].mxu0 %v6472_v24 }
 0x1eb   : > { %v1685_v14 = vmul.f32 %v1620_v19, %v7931_v59  ;;  %v1911_v17 = vmul.f32 %v1850_v42, %v6636_v20  ;;  %2289 = vperm.xlu1 %4859, %v4174_v45   ;;  %1999 = vperm.xlu0 %4858, %v4129_v16   ;;  %v7933_v19 = vld [vmem:[#allocation3_spill] sm:$0xff] }
 0x1ed   : > { %3142 = vmatprep.mubr.f32.mxu0 %v1685_v14  ;;  %3373 = vmatmul.mubr.f32.gmra.mrb[86].mxu1 %v1911_v17  ;;  %v4178_v17 = vld [vmem:[%s7638_s1 + $0x8d0] sm:$0xff] }
 0x1ee   : > { %v1855_v60 = vpop.permute.xlu1 %1854  ;;  %v2080_v44 = vpop.permute.xlu0 %2079  ;;  %3143 = vmatmul.mubr.f32.gmra.mrb[46].mxu0 %v6502_v34 }
 0x1ef   : > { %v1912_v24 = vmul.f32 %v1855_v60, %v6649_v47  ;;  %v2137_v20 = vmul.f32 %v2080_v44, %v6616_v32  ;;  %2294 = vperm.xlu1 %4859, %v4175_v50   ;;  %1774 = vperm.xlu0 %4858, %v4097_v41   ;;  %v4131_v50 = vld [vmem:[%s7638_s1 + $0x758] sm:$0xff] }
 0x1f0   : > { %v4179_v44 = vld [vmem:[%s7638_s1 + $0x8d8] sm:$0xff] }
 0x1f1   : > { %3377 = vmatprep.mubr.f32.mxu1 %v2137_v20 }
 0x1f2   : > { %v2085_v62 = vpop.permute.xlu1 %2084  ;;  %v1625_v10 = vpop.permute.xlu0 %1624  ;;  %3378 = vmatmul.mubr.f32.gmra.mrb[88].mxu1 %v1912_v24  ;;  %v4099_v24 = vld [vmem:[%s7638_s1 + $0x658] sm:$0xff] }
 0x1f3   : > { %v2138_v34 = vmul.f32 %v2085_v62, %v7862_v38  ;;  %v1686_v47 = vmul.f32 %v1625_v10, %v7932_v51  ;;  %2299 = vperm.xlu1 %4859, %v4176_v12   ;;  %2004 = vperm.xlu0 %4858, %v4130_v4   ;;  %v7934_v4 = vld [vmem:[#allocation7_spill] sm:$0xff]  ;;  %v4180_v62 = vld [vmem:[%s7638_s1 + $0x8e0] sm:$0xff] }
 0x1f4   : > { %v4132_v10 = vld [vmem:[%s7638_s1 + $0x760] sm:$0xff] }
 0x1f5   : > { %3147 = vmatprep.mubr.f32.mxu0 %v1686_v47  ;;  %3382 = vmatprep.mubr.f32.mxu1 %v2138_v34 }
 0x1f6   : > { %v1630_v45 = vpop.permute.xlu1 %1629  ;;  %v1860_v16 = vpop.permute.xlu0 %1859  ;;  %3148 = vmatmul.mubr.f32.gmra.mrb[48].mxu0 %v6546_v29 }
 0x1f7   : > { %v1687_v42 = vmul.f32 %v1630_v45, %v7933_v19  ;;  %v1913_v14 = vmul.f32 %v1860_v16, %v6684_v9  ;;  %2304 = vperm.xlu1 %4859, %v4177_v63   ;;  %1779 = vperm.xlu0 %4858, %v4098_v2   ;;  %v7935_v63 = vld [vmem:[#allocation10_spill] sm:$0xff]  ;;  %v7936_v45 = vld [vmem:[#allocation28_spill] sm:$0xff] }
 0x1f9   : > { %3152 = vmatprep.mubr.f32.mxu0 %v1687_v42  ;;  %3383 = vmatmul.mubr.f32.gmra.mrb[90].mxu1 %v1913_v14  ;;  %v4181_v42 = vld [vmem:[%s7638_s1 + $0x8e8] sm:$0xff]  ;;  %v4100_v14 = vld [vmem:[%s7638_s1 + $0x660] sm:$0xff] }
 0x1fa   : > { %v1865_v41 = vpop.permute.xlu1 %1864  ;;  %v2090_v60 = vpop.permute.xlu0 %2089  ;;  %3153 = vmatmul.mubr.f32.gmra.mrb[50].mxu0 %v6562_v39 }
 0x1fb   : > { %v1914_v29 = vmul.f32 %v1865_v41, %v7864_v53  ;;  %v2139_v9 = vmul.f32 %v2090_v60, %v7867_v52  ;;  %2309 = vperm.xlu1 %4859, %v4178_v17   ;;  %2009 = vperm.xlu0 %4858, %v4131_v50   ;;  %v7937_v41 = vld [vmem:[#allocation26_spill] sm:$0xff] }
 0x1fd   : > { %3387 = vmatprep.mubr.f32.mxu1 %v2139_v9  ;;  %v4182_v9 = vld [vmem:[%s7638_s1 + $0x8f0] sm:$0xff] }
 0x1fe   : > { %v2095_v20 = vpop.permute.xlu1 %2094  ;;  %v1635_v12 = vpop.permute.xlu0 %1634  ;;  %3388 = vmatmul.mubr.f32.gmra.mrb[92].mxu1 %v1914_v29  ;;  %v4183_v29 = vld [vmem:[%s7638_s1 + $0x8f8] sm:$0xff] }
 0x1ff   : > { %v2140_v39 = vmul.f32 %v2095_v20, %v7873_v27  ;;  %v1688_v53 = vmul.f32 %v1635_v12, %v7934_v4  ;;  %2314 = vperm.xlu1 %4859, %v4179_v44   ;;  %1784 = vperm.xlu0 %4858, %v4099_v24   ;;  %v7938_v20 = vld [vmem:[#allocation9_spill] sm:$0xff] }
 0x201   : > { %3157 = vmatprep.mubr.f32.mxu0 %v1688_v53  ;;  %3392 = vmatprep.mubr.f32.mxu1 %v2140_v39  ;;  %v7939_v53 = vld [vmem:[#allocation5_spill] sm:$0xff] }
 0x202   : > { %v1640_v34 = vpop.permute.xlu1 %1639  ;;  %v1870_v47 = vpop.permute.xlu0 %1869  ;;  %3158 = vmatmul.mubr.f32.gmra.mrb[52].mxu0 %v6598_v13 }
 0x203   : > { %v1689_v2 = vmul.f32 %v1640_v34, %v7935_v63  ;;  %v1915_v16 = vmul.f32 %v1870_v47, %v7936_v45  ;;  %2319 = vperm.xlu1 %4859, %v4180_v62   ;;  %2014 = vperm.xlu0 %4858, %v4132_v10   ;;  %v7940_v10 = vld [vmem:[#allocation30_spill] sm:$0xff] }
 0x205   : > { %3162 = vmatprep.mubr.f32.mxu0 %v1689_v2  ;;  %3393 = vmatmul.mubr.f32.gmra.mrb[94].mxu1 %v1915_v16 }
 0x206   : > { %v1875_v17 = vpop.permute.xlu1 %1874  ;;  %v2100_v50 = vpop.permute.xlu0 %2099  ;;  %3163 = vmatmul.mubr.f32.gmra.mrb[54].mxu0 %v6616_v32 }
 0x207   : > { %v1916_v13 = vmul.f32 %v1875_v17, %v7871_v35  ;;  %v2141_v60 = vmul.f32 %v2100_v50, %v7937_v41  ;;  %2324 = vperm.xlu1 %4859, %v4181_v42   ;;  %1789 = vperm.xlu0 %4858, %v4100_v14   ;;  %v7942_v17 = vld [vmem:[#allocation37_spill] sm:$0xff] }
 0x209   : > { %3397 = vmatprep.mubr.f32.mxu1 %v2141_v60 }
 0x20a   : > { %v2105_v44 = vpop.permute.xlu1 %2104  ;;  %v1645_v24 = vpop.permute.xlu0 %1644  ;;  %3398 = vmatmul.mubr.f32.gmra.mrb[96].mxu1 %v1916_v13 }
 0x20b   : > { %v2142_v32 = vmul.f32 %v2105_v44, %v7878_v56  ;;  %v1690_v35 = vmul.f32 %v1645_v24, %v7938_v20  ;;  %2334 = vperm.xlu1 %4859, %v4183_v29   ;;  %2329 = vperm.xlu0 %4858, %v4182_v9   ;;  %v7941_v56 = vld [vmem:[#allocation31_spill] sm:$0xff]  ;;  %v7943_v29 = vld [vmem:[#allocation40_spill] sm:$0xff] }
 0x20d   : > { %3167 = vmatprep.mubr.f32.mxu0 %v1690_v35  ;;  %3402 = vmatprep.mubr.f32.mxu1 %v2142_v32 }
 0x20e   : > { %v1650_v12 = vpop.permute.xlu1 %1649  ;;  %v1880_v39 = vpop.permute.xlu0 %1879  ;;  %3168 = vmatmul.mubr.f32.gmra.mrb[56].mxu0 %v7862_v38 }
 0x20f   : > { %v1691_v62 = vmul.f32 %v1650_v12, %v7939_v53  ;;  %v1917_v34 = vmul.f32 %v1880_v39, %v7940_v10 }
 0x211   : > { %3172 = vmatprep.mubr.f32.mxu0 %v1691_v62  ;;  %3403 = vmatmul.mubr.f32.gmra.mrb[98].mxu1 %v1917_v34 }
 0x212   : > { %v1885_v47 = vpop.permute.xlu1 %1884  ;;  %v2110_v2 = vpop.permute.xlu0 %2109  ;;  %3173 = vmatmul.mubr.f32.gmra.mrb[58].mxu0 %v7867_v52 }
 0x213   : > { %v1918_v45 = vmul.f32 %v1885_v47, %v7941_v56  ;;  %v2143_v16 = vmul.f32 %v2110_v2, %v5677_v40 }
 0x215   : > { %3407 = vmatprep.mubr.f32.mxu1 %v2143_v16 }
 0x216   : > { %v2180_v42 = vpop.permute.xlu1 %2179  ;;  %v1655_v14 = vpop.permute.xlu0 %1654  ;;  %3408 = vmatmul.mubr.f32.gmra.mrb[100].mxu1 %v1918_v45 }
 0x217   : > { %v2337_v38 = vmul.f32 %v2180_v42, %v5932_v37  ;;  %v1692_v50 = vmul.f32 %v1655_v14, %v7942_v17 }
 0x219   : > { %3177 = vmatprep.mubr.f32.mxu0 %v1692_v50  ;;  %4338 = vmatprep.mubr.f32.mxu1 %v2337_v38  ;;  %v7945_v38 = vld [vmem:[#allocation33_spill] sm:$0xff] }
 0x21a   : > { %v1660_v13 = vpop.permute.xlu1 %1659  ;;  %v2185_v60 = vpop.permute.xlu0 %2184  ;;  %3178 = vmatmul.mubr.f32.gmra.mrb[60].mxu0 %v7873_v27 }
 0x21b   : > { %v1693_v52 = vmul.f32 %v1660_v13, %v7943_v29  ;;  %v2338_v9 = vmul.f32 %v2185_v60, %v5962_v5 }
 0x21d   : > { %v7216_v44 = vpop.f32.mrb[26].mxu1  ;;  %3182 = vmatprep.mubr.f32.mxu0 %v1693_v52  ;;  %4339 = vmatmul.mubr.f32.vlgmr.msra.gmra.mrb[102].mxu1 %v2338_v9 }
 0x21e   : > { %v2195_v40 = vpop.permute.xlu1 %2194  ;;  %v2190_v24 = vpop.permute.xlu0 %2189  ;;  %3183 = vmatmul.mubr.f32.gmra.mrb[62].mxu0 %v7937_v41 }
 0x21f   : > { %v2340_v37 = vmul.f32 %v2195_v40, %v6025_v28  ;;  %v2339_v32 = vmul.f32 %v2190_v24, %v5995_v23  ;;  %v2646_v35 = vpop.f32.mrb[27].mxu1  ;;  %v7944_v28 = vld [vmem:[#allocation32_spill] sm:$0xff] }
 0x221   : > { %4341 = vmatprep.mubr.f32.mxu1 %v2339_v32  ;;  %v7946_v32 = vld [vmem:[#allocation35_spill] sm:$0xff] }
 0x222   : > { %v2200_v12 = vpop.permute.xlu1 %2199  ;;  %v1955_v27 = vpop.permute.xlu0 %1954  ;;  %4342 = vmatmul.mubr.f32.gmra.mrb[104].mxu1 %v2340_v37 }
 0x223   : > { %v2341_v39 = vmul.f32 %v2200_v12, %v6055_v22  ;;  %v2112_v5 = vmul.f32 %v1955_v27, %v5700_v26 }
 0x225   : > { %v7223_v62 = vpop.f32.mrb[28].mxu1  ;;  %3252 = vmatprep.mubr.f32.mxu0 %v2112_v5  ;;  %4344 = vmatprep.mubr.f32.mxu1 %v2341_v39  ;;  %v7947_v5 = vld [vmem:[#allocation34_spill] sm:$0xff] }
 0x226   : > { %v2205_v10 = vpop.permute.xlu1 %2204  ;;  %v1730_v34 = vpop.permute.xlu0 %1729 }
 0x227   : > { %v2342_v41 = vmul.f32 %v2205_v10, %v7885_v55  ;;  %v1887_v47 = vmul.f32 %v1730_v34, %v7944_v28  ;;  %v2651_v23 = vpop.f32.mrb[29].mxu1  ;;  %v7948_v28 = vld [vmem:[#allocation71_spill] sm:$0xff] }
 0x229   : > { %v7227_v2 = vpop.f32.mrb[30].mxu1  ;;  %3253 = vmatmul.mubr.f32.vlgmr.msra.gmra.mrb[0].mxu0 %v1887_v47  ;;  %4345 = vmatmul.mubr.f32.gmra.mrb[106].mxu1 %v2342_v41 }
 0x22a   : > { %v2210_v56 = vpop.permute.xlu1 %2209  ;;  %v1960_v45 = vpop.permute.xlu0 %1959 }
 0x22b   : > { %v2343_v22 = vmul.f32 %v2210_v56, %v7889_v57  ;;  %v2113_v26 = vmul.f32 %v1960_v45, %v5718_v21  ;;  %v2656_v16 = vpop.f32.mrb[31].mxu1 }
 0x22c   : > { %v7950_v16 = vld [vmem:[#allocation36_spill] sm:$0xff] }
 0x22d   : > { %3257 = vmatprep.mubr.f32.mxu0 %v2113_v26  ;;  %4347 = vmatprep.mubr.f32.mxu1 %v2343_v22 }
 0x22e   : > { %v2215_v42 = vpop.permute.xlu1 %2214  ;;  %v1735_v14 = vpop.permute.xlu0 %1734 }
 0x22f   : > { %v2344_v55 = vmul.f32 %v2215_v42, %v7892_v18  ;;  %v1888_v50 = vmul.f32 %v1735_v14, %v7945_v38 }
 0x231   : > { %v7233_v13 = vpop.f32.mrb[32].mxu1  ;;  %3258 = vmatmul.mubr.f32.gmra.mrb[2].mxu0 %v1888_v50  ;;  %4348 = vmatmul.mubr.f32.gmra.mrb[108].mxu1 %v2344_v55 }
 0x232   : > { %v2220_v60 = vpop.permute.xlu1 %2219  ;;  %v1965_v52 = vpop.permute.xlu0 %1964 }
 0x233   : > { %v2345_v9 = vmul.f32 %v2220_v60, %v7896_v3  ;;  %v2114_v57 = vmul.f32 %v1965_v52, %v5740_v31  ;;  %v2661_v21 = vpop.f32.mrb[33].mxu1  ;;  %v7951_v60 = vld [vmem:[#allocation41_spill] sm:$0xff] }
 0x235   : > { %v7237_v40 = vpop.f32.mrb[34].mxu1  ;;  %3262 = vmatprep.mubr.f32.mxu0 %v2114_v57  ;;  %4350 = vmatprep.mubr.f32.mxu1 %v2345_v9 }
 0x236   : > { %v2225_v24 = vpop.permute.xlu1 %2224  ;;  %v1740_v37 = vpop.permute.xlu0 %1739 }
 0x237   : > { %v2346_v18 = vmul.f32 %v2225_v24, %v7899_v25  ;;  %v1889_v35 = vmul.f32 %v1740_v37, %v7946_v32  ;;  %v2666_v12 = vpop.f32.mrb[35].mxu1  ;;  %v7949_v25 = vld [vmem:[#allocation38_spill] sm:$0xff] }
 0x239   : > { %3263 = vmatmul.mubr.f32.gmra.mrb[4].mxu0 %v1889_v35  ;;  %4351 = vmatmul.mubr.f32.gmra.mrb[110].mxu1 %v2346_v18 }
 0x23a   : > { %v2230_v27 = vpop.permute.xlu1 %2229  ;;  %v1970_v39 = vpop.permute.xlu0 %1969 }
 0x23b   : > { %v2347_v3 = vmul.f32 %v2230_v27, %v7903_v11  ;;  %v2115_v31 = vmul.f32 %v1970_v39, %v7947_v5  ;;  %v7953_v27 = vld [vmem:[#allocation44_spill] sm:$0xff] }
 0x23d   : > { %v7243_v10 = vpop.f32.mrb[36].mxu1  ;;  %3267 = vmatprep.mubr.f32.mxu0 %v2115_v31  ;;  %4353 = vmatprep.mubr.f32.mxu1 %v2347_v3 }
 0x23e   : > { %v2235_v34 = vpop.permute.xlu1 %2234  ;;  %v1745_v41 = vpop.permute.xlu0 %1744 }
 0x23f   : > { %v2348_v47 = vmul.f32 %v2235_v34, %v7948_v28  ;;  %v1890_v23 = vmul.f32 %v1745_v41, %v7949_v25  ;;  %v2671_v56 = vpop.f32.mrb[37].mxu1  ;;  %v7954_v41 = vld [vmem:[#allocation42_spill] sm:$0xff] }
 0x241   : > { %v7247_v45 = vpop.f32.mrb[38].mxu1  ;;  %3268 = vmatmul.mubr.f32.gmra.mrb[6].mxu0 %v1890_v23  ;;  %4354 = vmatmul.mubr.f32.gmra.mrb[112].mxu1 %v2348_v47 }
 0x242   : > { %v2240_v22 = vpop.permute.xlu1 %2239  ;;  %v1975_v26 = vpop.permute.xlu0 %1974 }
 0x243   : > { %v2349_v11 = vmul.f32 %v2240_v22, %v7912_v7  ;;  %v2116_v42 = vmul.f32 %v1975_v26, %v7950_v16  ;;  %v2676_v14 = vpop.f32.mrb[39].mxu1  ;;  %v7952_v7 = vld [vmem:[#allocation39_spill] sm:$0xff] }
 0x244   : > { %v7955_v22 = vld [vmem:[#allocation47_spill] sm:$0xff] }
 0x245   : > { %3272 = vmatprep.mubr.f32.mxu0 %v2116_v42  ;;  %4356 = vmatprep.mubr.f32.mxu1 %v2349_v11 }
 0x246   : > { %v2245_v55 = vpop.permute.xlu1 %2244  ;;  %v1750_v38 = vpop.permute.xlu0 %1749 }
 0x247   : > { %v2350_v50 = vmul.f32 %v2245_v55, %v7915_v15  ;;  %v1891_v52 = vmul.f32 %v1750_v38, %v7951_v60  ;;  %v7956_v55 = vld [vmem:[#allocation45_spill] sm:$0xff] }
 0x249   : > { %v7253_v9 = vpop.f32.mrb[40].mxu1  ;;  %3273 = vmatmul.mubr.f32.gmra.mrb[8].mxu0 %v1891_v52  ;;  %4357 = vmatmul.mubr.f32.gmra.mrb[114].mxu1 %v2350_v50 }
 0x24a   : > { %v2250_v57 = vpop.permute.xlu1 %2249  ;;  %v1980_v21 = vpop.permute.xlu0 %1979 }
 0x24b   : > { %v2351_v24 = vmul.f32 %v2250_v57, %v7919_v8  ;;  %v2117_v37 = vmul.f32 %v1980_v21, %v7952_v7  ;;  %v2681_v18 = vpop.f32.mrb[41].mxu1  ;;  %v7957_v21 = vld [vmem:[#allocation49_spill] sm:$0xff] }
 0x24d   : > { %v7257_v32 = vpop.f32.mrb[42].mxu1  ;;  %3277 = vmatprep.mubr.f32.mxu0 %v2117_v37  ;;  %4359 = vmatprep.mubr.f32.mxu1 %v2351_v24 }
 0x24e   : > { %v2255_v35 = vpop.permute.xlu1 %2254  ;;  %v1755_v12 = vpop.permute.xlu0 %1754 }
 0x24f   : > { %v2352_v15 = vmul.f32 %v2255_v35, %v7921_v49  ;;  %v1892_v39 = vmul.f32 %v1755_v12, %v7953_v27  ;;  %v2686_v3 = vpop.f32.mrb[43].mxu1  ;;  %v7958_v12 = vld [vmem:[#allocation48_spill] sm:$0xff] }
 0x251   : > { %v7261_v5 = vpop.f32.mrb[44].mxu1  ;;  %3278 = vmatmul.mubr.f32.gmra.mrb[10].mxu0 %v1892_v39  ;;  %4360 = vmatmul.mubr.f32.gmra.mrb[116].mxu1 %v2352_v15 }
 0x252   : > { %v2260_v31 = vpop.permute.xlu1 %2259  ;;  %v1985_v8 = vpop.permute.xlu0 %1984 }
 0x253   : > { %v2353_v34 = vmul.f32 %v2260_v31, %v7923_v48  ;;  %v2118_v28 = vmul.f32 %v1985_v8, %v7954_v41  ;;  %v2691_v47 = vpop.f32.mrb[45].mxu1  ;;  %v7959_v8 = vld [vmem:[#allocation50_spill] sm:$0xff] }
 0x255   : > { %v7265_v25 = vpop.f32.mrb[46].mxu1  ;;  %3282 = vmatprep.mubr.f32.mxu0 %v2118_v28  ;;  %4362 = vmatprep.mubr.f32.mxu1 %v2353_v34 }
 0x256   : > { %v2265_v23 = vpop.permute.xlu1 %2264  ;;  %v1760_v49 = vpop.permute.xlu0 %1759 }
 0x257   : > { %v2354_v56 = vmul.f32 %v2265_v23, %v7925_v46  ;;  %v1893_v26 = vmul.f32 %v1760_v49, %v7955_v22  ;;  %v2696_v11 = vpop.f32.mrb[47].mxu1  ;;  %v7960_v49 = vld [vmem:[#allocation51_spill] sm:$0xff] }
 0x259   : > { %v7269_v16 = vpop.f32.mrb[48].mxu1  ;;  %3283 = vmatmul.mubr.f32.gmra.mrb[12].mxu0 %v1893_v26  ;;  %4363 = vmatmul.mubr.f32.gmra.mrb[118].mxu1 %v2354_v56 }
 0x25a   : > { %v2270_v42 = vpop.permute.xlu1 %2269  ;;  %v1990_v48 = vpop.permute.xlu0 %1989 }
 0x25b   : > { %v2355_v14 = vmul.f32 %v2270_v42, %v7928_v1  ;;  %v2119_v38 = vmul.f32 %v1990_v48, %v7956_v55  ;;  %v2701_v50 = vpop.f32.mrb[49].mxu1  ;;  %v7961_v48 = vld [vmem:[#allocation57_spill] sm:$0xff] }
 0x25d   : > { %v7273_v60 = vpop.f32.mrb[50].mxu1  ;;  %3287 = vmatprep.mubr.f32.mxu0 %v2119_v38  ;;  %4365 = vmatprep.mubr.f32.mxu1 %v2355_v14 }
 0x25e   : > { %v2275_v52 = vpop.permute.xlu1 %2274  ;;  %v1765_v46 = vpop.permute.xlu0 %1764 }
 0x25f   : > { %v2356_v57 = vmul.f32 %v2275_v52, %v7929_v0  ;;  %v1894_v24 = vmul.f32 %v1765_v46, %v7957_v21  ;;  %v2706_v7 = vpop.f32.mrb[51].mxu1  ;;  %v7962_v46 = vld [vmem:[#allocation54_spill] sm:$0xff] }
 0x261   : > { %v7277_v37 = vpop.f32.mrb[52].mxu1  ;;  %3288 = vmatmul.mubr.f32.gmra.mrb[14].mxu0 %v1894_v24  ;;  %4366 = vmatmul.mubr.f32.gmra.mrb[120].mxu1 %v2356_v57 }
 0x262   : > { %v2280_v18 = vpop.permute.xlu1 %2279  ;;  %v1995_v1 = vpop.permute.xlu0 %1994 }
 0x263   : > { %v2357_v35 = vmul.f32 %v2280_v18, %v7930_v30  ;;  %v2120_v15 = vmul.f32 %v1995_v1, %v7958_v12  ;;  %v2711_v27 = vpop.f32.mrb[53].mxu1  ;;  %v7963_v1 = vld [vmem:[#allocation61_spill] sm:$0xff] }
 0x265   : > { %v7281_v39 = vpop.f32.mrb[54].mxu1  ;;  %3292 = vmatprep.mubr.f32.mxu0 %v2120_v15  ;;  %4368 = vmatprep.mubr.f32.mxu1 %v2357_v35 }
 0x266   : > { %v2285_v3 = vpop.permute.xlu1 %2284  ;;  %v1770_v0 = vpop.permute.xlu0 %1769 }
 0x267   : > { %v2358_v31 = vmul.f32 %v2285_v3, %v7931_v59  ;;  %v1895_v34 = vmul.f32 %v1770_v0, %v7959_v8  ;;  %v2716_v41 = vpop.f32.mrb[55].mxu1 }
 0x268   : > { %v7964_v41 = vld [vmem:[#allocation65_spill] sm:$0xff] }
 0x269   : > { %v7285_v28 = vpop.f32.mrb[56].mxu1  ;;  %3293 = vmatmul.mubr.f32.gmra.mrb[16].mxu0 %v1895_v34  ;;  %4369 = vmatmul.mubr.f32.gmra.mrb[122].mxu1 %v2358_v31 }
 0x26a   : > { %v2290_v47 = vpop.permute.xlu1 %2289  ;;  %v2000_v30 = vpop.permute.xlu0 %1999 }
 0x26b   : > { %v2359_v23 = vmul.f32 %v2290_v47, %v7932_v51  ;;  %v2121_v56 = vmul.f32 %v2000_v30, %v7960_v49  ;;  %v2721_v22 = vpop.f32.mrb[57].mxu1 }
 0x26d   : > { %v7289_v26 = vpop.f32.mrb[58].mxu1  ;;  %3297 = vmatprep.mubr.f32.mxu0 %v2121_v56  ;;  %4371 = vmatprep.mubr.f32.mxu1 %v2359_v23  ;;  %v7965_v56 = vld [vmem:[#allocation62_spill] sm:$0xff] }
 0x26e   : > { %v2295_v11 = vpop.permute.xlu1 %2294  ;;  %v1775_v59 = vpop.permute.xlu0 %1774 }
 0x26f   : > { %v2360_v42 = vmul.f32 %v2295_v11, %v7933_v19  ;;  %v1896_v14 = vmul.f32 %v1775_v59, %v7961_v48  ;;  %v2726_v55 = vpop.f32.mrb[59].mxu1 }
 0x271   : > { %v7293_v38 = vpop.f32.mrb[60].mxu1  ;;  %3298 = vmatmul.mubr.f32.gmra.mrb[18].mxu0 %v1896_v14  ;;  %4372 = vmatmul.mubr.f32.gmra.mrb[124].mxu1 %v2360_v42  ;;  %v7966_v14 = vld [vmem:[#allocation68_spill] sm:$0xff] }
 0x272   : > { %v2300_v50 = vpop.permute.xlu1 %2299  ;;  %v2005_v51 = vpop.permute.xlu0 %2004 }
 0x273   : > { %v2361_v52 = vmul.f32 %v2300_v50, %v7934_v4  ;;  %v2122_v57 = vmul.f32 %v2005_v51, %v7962_v46  ;;  %v2731_v21 = vpop.f32.mrb[61].mxu1 }
 0x275   : > { %v7297_v24 = vpop.f32.mrb[62].mxu1  ;;  %3302 = vmatprep.mubr.f32.mxu0 %v2122_v57  ;;  %4374 = vmatprep.mubr.f32.mxu1 %v2361_v52  ;;  %v7967_v57 = vld [vmem:[#allocation46_spill] sm:$0xff] }
 0x276   : > { %v2305_v7 = vpop.permute.xlu1 %2304  ;;  %v1780_v19 = vpop.permute.xlu0 %1779 }
 0x277   : > { %v2362_v18 = vmul.f32 %v2305_v7, %v7935_v63  ;;  %v1897_v35 = vmul.f32 %v1780_v19, %v7963_v1  ;;  %v2736_v12 = vpop.f32.mrb[63].mxu1  ;;  %v7968_v7 = vld [vmem:[#allocation43_spill] sm:$0xff] }
 0x279   : > { %3303 = vmatmul.mubr.f32.gmra.mrb[20].mxu0 %v1897_v35  ;;  %4375 = vmatmul.mubr.f32.gmra.mrb[126].mxu1 %v2362_v18 }
 0x27a   : > { %v2310_v15 = vpop.permute.xlu1 %2309  ;;  %v2010_v27 = vpop.permute.xlu0 %2009 }
 0x27b   : > { %v2363_v4 = vmul.f32 %v2310_v15, %v7938_v20  ;;  %v2123_v3 = vmul.f32 %v2010_v27, %v7909_v58 }
 0x27d   : > { %3307 = vmatprep.mubr.f32.mxu0 %v2123_v3  ;;  %v3319_v0 = vpop.f32.mrb[64].mxu1  ;;  %4377 = vmatprep.mubr.f32.mxu1 %v2363_v4 }
 0x27e   : > { %v2315_v31 = vpop.permute.xlu1 %2314  ;;  %v1785_v8 = vpop.permute.xlu0 %1784 }
 0x27f   : > { %v2364_v34 = vmul.f32 %v2315_v31, %v7939_v53  ;;  %v1898_v63 = vmul.f32 %v1785_v8, %v7964_v41  ;;  %v3321_v47 = vpop.f32.mrb[65].mxu1 }
 0x281   : > { %3308 = vmatmul.mubr.f32.gmra.mrb[22].mxu0 %v1898_v63  ;;  %4378 = vmatmul.mubr.f32.gmra.mrb[128].mxu1 %v2364_v34 }
 0x282   : > { %v2320_v30 = vpop.permute.xlu1 %2319  ;;  %v2015_v23 = vpop.permute.xlu0 %2014 }
 0x283   : > { %v2365_v49 = vmul.f32 %v2320_v30, %v7942_v17  ;;  %v2124_v20 = vmul.f32 %v2015_v23, %v7965_v56 }
 0x284   : > { %v3324_v22 = vpop.f32.mrb[66].mxu1 }
 0x285   : > { %v3094_v58 = vpop.f32.mrb[26].mxu0  ;;  %3312 = vmatprep.mubr.f32.mxu0 %v2124_v20  ;;  %v3326_v11 = vpop.f32.mrb[67].mxu1  ;;  %4380 = vmatprep.mubr.f32.mxu1 %v2365_v49 }
 0x286   : > { %v4719_v59 = vadd.f32 %v3094_v58, %v7216_v44  ;;  %v2325_v42 = vpop.permute.xlu1 %2324  ;;  %v1790_v53 = vpop.permute.xlu0 %1789 }
 0x287   : > { %v2366_v48 = vmul.f32 %v2325_v42, %v7943_v29  ;;  %v1899_v55 = vmul.f32 %v1790_v53, %v7966_v14  ;;  %v3096_v50 = vpop.f32.mrb[27].mxu0 }
 0x288   : > { %v7310_v51 = vadd.f32 %v4719_v59, %v3319_v0 }
 0x289   : > { %3313 = vmatmul.mubr.f32.gmra.mrb[24].mxu0 %v1899_v55  ;;  %v3329_v17 = vpop.f32.mrb[68].mxu1  ;;  %4381 = vmatmul.mubr.f32.gmra.mrb[130].mxu1 %v2366_v48 }
 0x28a   : > { %v2335_v52 = vpop.permute.xlu1 %2334  ;;  %v2330_v46 = vpop.permute.xlu0 %2329 }
 0x28b   : > { %v2368_v21 = vmul.f32 %v2335_v52, %v7967_v57  ;;  %v2367_v19 = vmul.f32 %v2330_v46, %v7968_v7  ;;  %v3331_v18 = vpop.f32.mrb[69].mxu1 }
 0x28d   : > { %v3099_v44 = vpop.f32.mrb[28].mxu0  ;;  %4383 = vmatprep.mubr.f32.mxu1 %v2367_v19 }
 0x28e   : > { %v4721_v1 = vadd.f32 %v3099_v44, %v7223_v62  ;;  %v3101_v29 = vpop.f32.mrb[29].mxu0  ;;  %4384 = vmatmul.mubr.f32.gmra.mrb[132].mxu1 %v2368_v21 }
 0x290   : > { %v3334_v35 = vpop.f32.mrb[70].mxu1  ;;  %v7315_v12 = vadd.f32 %v4721_v1, %v3324_v22 }
 0x291   : > { %v3104_v15 = vpop.f32.mrb[30].mxu0  ;;  %v3336_v27 = vpop.f32.mrb[71].mxu1 }
 0x292   : > { %v4723_v4 = vadd.f32 %v3104_v15, %v7227_v2  ;;  %v3106_v3 = vpop.f32.mrb[31].mxu0 }
 0x294   : > { %v7318_v0 = vadd.f32 %v4723_v4, %v3329_v17 }
 0x295   : > { %v3339_v31 = vpop.f32.mrb[72].mxu1 }
 0x296   : > { %v3341_v8 = vpop.f32.mrb[73].mxu1 }
 0x299   : > { %v3109_v34 = vpop.f32.mrb[32].mxu0 }
 0x29a   : > { %v4725_v41 = vadd.f32 %v3109_v34, %v7233_v13  ;;  %v3111_v63 = vpop.f32.mrb[33].mxu0 }
 0x29c   : > { %v3344_v47 = vpop.f32.mrb[74].mxu1  ;;  %v7321_v62 = vadd.f32 %v4725_v41, %v3334_v35 }
 0x29d   : > { %v3114_v30 = vpop.f32.mrb[34].mxu0  ;;  %v3346_v23 = vpop.f32.mrb[75].mxu1 }
 0x29e   : > { %v4727_v49 = vadd.f32 %v3114_v30, %v7237_v40  ;;  %v3116_v56 = vpop.f32.mrb[35].mxu0 }
 0x2a0   : > { %v7324_v20 = vadd.f32 %v4727_v49, %v3339_v31 }
 0x2a1   : > { %v3349_v2 = vpop.f32.mrb[76].mxu1 }
 0x2a2   : > { %v3351_v22 = vpop.f32.mrb[77].mxu1 }
 0x2a5   : > { %v3119_v58 = vpop.f32.mrb[36].mxu0 }
 0x2a6   : > { %v4729_v11 = vadd.f32 %v3119_v58, %v7243_v10  ;;  %v3121_v59 = vpop.f32.mrb[37].mxu0 }
 0x2a8   : > { %v3354_v42 = vpop.f32.mrb[78].mxu1  ;;  %v7327_v53 = vadd.f32 %v4729_v11, %v3344_v47 }
 0x2a9   : > { %v3124_v13 = vpop.f32.mrb[38].mxu0  ;;  %v3356_v48 = vpop.f32.mrb[79].mxu1 }
 0x2aa   : > { %v4731_v14 = vadd.f32 %v3124_v13, %v7247_v45  ;;  %v3126_v55 = vpop.f32.mrb[39].mxu0 }
 0x2ac   : > { %v7330_v50 = vadd.f32 %v4731_v14, %v3349_v2 }
 0x2ad   : > { %v3359_v40 = vpop.f32.mrb[80].mxu1 }
 0x2ae   : > { %v3361_v17 = vpop.f32.mrb[81].mxu1 }
 0x2b1   : > { %v3129_v52 = vpop.f32.mrb[40].mxu0 }
 0x2b2   : > { %v4733_v46 = vadd.f32 %v3129_v52, %v7253_v9  ;;  %v3131_v57 = vpop.f32.mrb[41].mxu0 }
 0x2b4   : > { %v3364_v21 = vpop.f32.mrb[82].mxu1  ;;  %v7333_v7 = vadd.f32 %v4733_v46, %v3354_v42 }
 0x2b5   : > { %v3134_v10 = vpop.f32.mrb[42].mxu0  ;;  %v3366_v19 = vpop.f32.mrb[83].mxu1 }
 0x2b6   : > { %v4735_v18 = vadd.f32 %v3134_v10, %v7257_v32  ;;  %v3136_v44 = vpop.f32.mrb[43].mxu0 }
 0x2b8   : > { %v7336_v1 = vadd.f32 %v4735_v18, %v3359_v40 }
 0x2b9   : > { %v3369_v45 = vpop.f32.mrb[84].mxu1 }
 0x2ba   : > { %v3371_v29 = vpop.f32.mrb[85].mxu1 }
 0x2bd   : > { %v3139_v35 = vpop.f32.mrb[44].mxu0 }
 0x2be   : > { %v4737_v15 = vadd.f32 %v3139_v35, %v7261_v5  ;;  %v3141_v27 = vpop.f32.mrb[45].mxu0 }
 0x2c0   : > { %v3374_v4 = vpop.f32.mrb[86].mxu1  ;;  %v7339_v3 = vadd.f32 %v4737_v15, %v3364_v21 }
 0x2c1   : > { %v3144_v9 = vpop.f32.mrb[46].mxu0  ;;  %v3376_v31 = vpop.f32.mrb[87].mxu1 }
 0x2c2   : > { %v4739_v8 = vadd.f32 %v3144_v9, %v7265_v25  ;;  %v3146_v34 = vpop.f32.mrb[47].mxu0 }
 0x2c4   : > { %v7342_v41 = vadd.f32 %v4739_v8, %v3369_v45 }
 0x2c5   : > { %v3379_v32 = vpop.f32.mrb[88].mxu1 }
 0x2c6   : > { %v3381_v63 = vpop.f32.mrb[89].mxu1 }
 0x2c9   : > { %v3149_v47 = vpop.f32.mrb[48].mxu0 }
 0x2ca   : > { %v4741_v30 = vadd.f32 %v3149_v47, %v7269_v16  ;;  %v3151_v23 = vpop.f32.mrb[49].mxu0 }
 0x2cc   : > { %v3384_v49 = vpop.f32.mrb[90].mxu1  ;;  %v7345_v56 = vadd.f32 %v4741_v30, %v3374_v4  ;;  %v4872_v4 = vmov 1.0  }
 0x2cd   : > { %v3154_v5 = vpop.f32.mrb[50].mxu0  ;;  %v3386_v2 = vpop.f32.mrb[91].mxu1  ;;  %3734 = vmatprep.mubr.f32.mxu1 %v4872_v4 }
 0x2ce   : > { %v4743_v22 = vadd.f32 %v3154_v5, %v7273_v60  ;;  %v3156_v58 = vpop.f32.mrb[51].mxu0 }
 0x2d0   : > { %v7348_v11 = vadd.f32 %v4743_v22, %v3379_v32  ;;  %v7969_v22 = vld [vmem:[#allocation6_spill] sm:$0xff] }
 0x2d1   : > { %v3389_v25 = vpop.f32.mrb[92].mxu1 }
 0x2d2   : > { %v3391_v59 = vpop.f32.mrb[93].mxu1 }
 0x2d5   : > { %v3159_v42 = vpop.f32.mrb[52].mxu0 }
 0x2d6   : > { %v4745_v13 = vadd.f32 %v3159_v42, %v7277_v37  ;;  %v3161_v48 = vpop.f32.mrb[53].mxu0 }
 0x2d8   : > { %v3394_v14 = vpop.f32.mrb[94].mxu1  ;;  %v7351_v55 = vadd.f32 %v4745_v13, %v3384_v49  ;;  %v7970_v13 = vld [vmem:[#allocation12_spill] sm:$0xff] }
 0x2d9   : > { %v3164_v16 = vpop.f32.mrb[54].mxu0  ;;  %v3396_v40 = vpop.f32.mrb[95].mxu1 }
 0x2da   : > { %v4747_v17 = vadd.f32 %v3164_v16, %v7281_v39  ;;  %v3166_v52 = vpop.f32.mrb[55].mxu0 }
 0x2dc   : > { %v7354_v46 = vadd.f32 %v4747_v17, %v3389_v25 }
 0x2dd   : > { %v3399_v60 = vpop.f32.mrb[96].mxu1 }
 0x2de   : > { %v3401_v57 = vpop.f32.mrb[97].mxu1 }
 0x2e1   : > { %v3169_v21 = vpop.f32.mrb[56].mxu0 }
 0x2e2   : > { %v4749_v10 = vadd.f32 %v3169_v21, %v7285_v28  ;;  %v3171_v19 = vpop.f32.mrb[57].mxu0 }
 0x2e3   : > { %v7971_v19 = vld [vmem:[#allocation4_spill] sm:$0xff] }
 0x2e4   : > { %v3404_v18 = vpop.f32.mrb[98].mxu1  ;;  %v7357_v44 = vadd.f32 %v4749_v10, %v3394_v14 }
 0x2e5   : > { %v3174_v37 = vpop.f32.mrb[58].mxu0  ;;  %v3406_v45 = vpop.f32.mrb[99].mxu1 }
 0x2e6   : > { %v4751_v29 = vadd.f32 %v3174_v37, %v7289_v26  ;;  %v3176_v35 = vpop.f32.mrb[59].mxu0 }
 0x2e8   : > { %v7360_v15 = vadd.f32 %v4751_v29, %v3399_v60 }
 0x2e9   : > { %v3409_v39 = vpop.f32.mrb[100].mxu1 }
 0x2ea   : > { %v3411_v27 = vpop.f32.mrb[101].mxu1 }
 0x2eb   : > { %v7972_v27 = vld [vmem:[#allocation11_spill] sm:$0xff] }
 0x2ed   : > { %v3179_v9 = vpop.f32.mrb[60].mxu0 }
 0x2ee   : > { %v4753_v31 = vadd.f32 %v3179_v9, %v7293_v38  ;;  %v3181_v28 = vpop.f32.mrb[61].mxu0 }
 0x2f0   : > { %v4340_v8 = vpop.f32.mrb[102].mxu1  ;;  %v7364_v34 = vadd.f32 %v4753_v31, %v3404_v18 }
 0x2f1   : > { %v3184_v32 = vpop.f32.mrb[62].mxu0  ;;  %v3479_v63 = vpop.f32.mrb[103].mxu1 }
 0x2f2   : > { %v4755_v26 = vadd.f32 %v3184_v32, %v7297_v24  ;;  %v3186_v47 = vpop.f32.mrb[63].mxu0 }
 0x2f4   : > { %v7367_v30 = vadd.f32 %v4755_v26, %v3409_v39 }
 0x2f5   : > { %v4343_v23 = vpop.f32.mrb[104].mxu1 }
 0x2f6   : > { %v3489_v49 = vpop.f32.mrb[105].mxu1 }
 0x2fc   : > { %v3254_v5 = vpop.f32.mrb[0].mxu0  ;;  %v4346_v2 = vpop.f32.mrb[106].mxu1 }
 0x2fd   : > { %v4706_v58 = vadd.f32 %v3254_v5, %v7969_v22  ;;  %v3256_v25 = vpop.f32.mrb[1].mxu0  ;;  %v3499_v38 = vpop.f32.mrb[107].mxu1 }
 0x2ff   : > { %v7377_v24 = vadd.f32 %v4706_v58, %v3479_v63 }
 0x301   : > { %3638 = vst [vmem:[%s7375_s10] sm:$0xff] %v7377_v24  ;;  %v7388_v17 = vmul.f32 %v7377_v24, %v7377_v24 }
 0x304   : > { %v3259_v59 = vpop.f32.mrb[2].mxu0  ;;  %v7381_v42 = vpop.f32.mrb[108].mxu1 }
 0x305   : > { %v4707_v48 = vadd.f32 %v3259_v59, %v7970_v13  ;;  %v3261_v14 = vpop.f32.mrb[3].mxu0  ;;  %v3509_v16 = vpop.f32.mrb[109].mxu1 }
 0x307   : > { %v7384_v40 = vadd.f32 %v4707_v48, %v4340_v8 }
 0x309   : > { %3639 = vst [vmem:[%s7375_s10 + $0x8] sm:$0xff] %v7384_v40  ;;  %v4612_v52 = vpack.c.bf16 %v7384_v40, %v7377_v24  ;;  %v7396_v60 = vmul.f32 %v7384_v40, %v7384_v40 }
 0x30b   : > { %v4644_v57 = vpack.c.bf16 %v7396_v60, %v7388_v17 }
 0x30c   : > { %v3264_v21 = vpop.f32.mrb[4].mxu0  ;;  %v7400_v10 = vpop.f32.mrb[110].mxu1 }
 0x30d   : > { %v4708_v18 = vadd.f32 %v3264_v21, %v7971_v19  ;;  %v3266_v37 = vpop.f32.mrb[5].mxu0  ;;  %v7403_v45 = vpop.f32.mrb[111].mxu1  ;;  %v7974_v21 = vld [vmem:[#allocation14_spill] sm:$0xff] }
 0x30f   : > { %v7405_v29 = vadd.f32 %v4708_v18, %v3489_v49 }
 0x311   : > { %3640 = vst [vmem:[%s7375_s10 + $0x10] sm:$0xff] %v7405_v29  ;;  %v7418_v32 = vmul.f32 %v7405_v29, %v7405_v29 }
 0x314   : > { %v3269_v35 = vpop.f32.mrb[6].mxu0  ;;  %v7409_v39 = vpop.f32.mrb[112].mxu1 }
 0x315   : > { %v4709_v9 = vadd.f32 %v3269_v35, %v7972_v27  ;;  %v3271_v31 = vpop.f32.mrb[7].mxu0  ;;  %v7412_v28 = vpop.f32.mrb[113].mxu1 }
 0x317   : > { %v7414_v8 = vadd.f32 %v4709_v9, %v4343_v23  ;;  %v7973_v23 = vld [vmem:[#allocation29_spill] sm:$0xff] }
 0x319   : > { %3641 = vst [vmem:[%s7375_s10 + $0x18] sm:$0xff] %v7414_v8  ;;  %v4616_v63 = vpack.c.bf16 %v7414_v8, %v7405_v29  ;;  %v7426_v26 = vmul.f32 %v7414_v8, %v7414_v8 }
 0x31b   : > { %v4648_v47 = vpack.c.bf16 %v7426_v26, %v7418_v32 }
 0x31c   : > { %v3274_v49 = vpop.f32.mrb[8].mxu0  ;;  %v4358_v5 = vpop.f32.mrb[114].mxu1 }
 0x31d   : > { %v4710_v22 = vadd.f32 %v3274_v49, %v7973_v23  ;;  %v7432_v58 = vadd.f32 %v7310_v51, %v4358_v5  ;;  %v3276_v25 = vpop.f32.mrb[9].mxu0  ;;  %v7434_v59 = vpop.f32.mrb[115].mxu1 }
 0x31f   : > { %v7436_v13 = vadd.f32 %v4710_v22, %v3499_v38  ;;  %3651 = vst [vmem:[%s7375_s10 + $0x68] sm:$0xff] %v7432_v58 }
 0x321   : > { %3642 = vst [vmem:[%s7375_s10 + $0x20] sm:$0xff] %v7436_v13 }
 0x324   : > { %v3279_v48 = vpop.f32.mrb[10].mxu0  ;;  %v4361_v14 = vpop.f32.mrb[116].mxu1 }
 0x325   : > { %v4711_v19 = vadd.f32 %v3279_v48, %v7974_v21  ;;  %v7444_v18 = vadd.f32 %v7318_v0, %v4361_v14  ;;  %v3281_v51 = vpop.f32.mrb[11].mxu0  ;;  %v3549_v37 = vpop.f32.mrb[117].mxu1 }
 0x326   : > { %v7447_v35 = vadd.f32 %v7315_v12, %v3549_v37  ;;  %v7467_v12 = vmul.f32 %v7436_v13, %v7436_v13 }
 0x327   : > { %v7449_v27 = vadd.f32 %v4711_v19, %v4346_v2  ;;  %3653 = vst [vmem:[%s7375_s10 + $0x78] sm:$0xff] %v7444_v18  ;;  %v7455_v38 = vmul.f32 %v7444_v18, %v7444_v18 }
 0x328   : > { %3652 = vst [vmem:[%s7375_s10 + $0x70] sm:$0xff] %v7447_v35  ;;  %v4640_v9 = vpack.c.bf16 %v7444_v18, %v7447_v35  ;;  %v7463_v0 = vmul.f32 %v7447_v35, %v7447_v35 }
 0x329   : > { %3643 = vst [vmem:[%s7375_s10 + $0x28] sm:$0xff] %v7449_v27  ;;  %v4620_v2 = vpack.c.bf16 %v7449_v27, %v7436_v13  ;;  %v7475_v31 = vmul.f32 %v7449_v27, %v7449_v27 }
 0x32a   : > { %v4672_v49 = vpack.c.bf16 %v7455_v38, %v7463_v0 }
 0x32b   : > { %v4652_v5 = vpack.c.bf16 %v7475_v31, %v7467_v12 }
 0x32c   : > { %v3284_v23 = vpop.f32.mrb[12].mxu0  ;;  %v4364_v22 = vpop.f32.mrb[118].mxu1 }
 0x32d   : > { %v4712_v25 = vadd.f32 %v3284_v23, %v7000_v36  ;;  %v3565_v48 = vadd.f32 %v7324_v20, %v4364_v22  ;;  %v3286_v14 = vpop.f32.mrb[13].mxu0  ;;  %v3559_v21 = vpop.f32.mrb[119].mxu1 }
 0x32e   : > { %v3560_v13 = vadd.f32 %v7321_v62, %v3559_v21 }
 0x32f   : > { %v7484_v19 = vadd.f32 %v4712_v25, %v3509_v16  ;;  %3655 = vst [vmem:[%s7375_s10 + $0x88] sm:$0xff] %v3565_v48  ;;  %v7487_v51 = vmul.f32 %v3565_v48, %v3565_v48  ;;  %v7975_v16 = vld [vmem:[#allocation21_spill] sm:$0xff] }
 0x330   : > { %3654 = vst [vmem:[%s7375_s10 + $0x80] sm:$0xff] %v3560_v13  ;;  %v7490_v37 = vmul.f32 %v3560_v13, %v3560_v13  ;;  %v4610_v27 = vpack.c.bf16 %v3565_v48, %v3560_v13 }
 0x331   : > { %3644 = vst [vmem:[%s7375_s10 + $0x30] sm:$0xff] %v7484_v19  ;;  %v7511_v40 = vmul.f32 %v7484_v19, %v7484_v19 }
 0x332   : > { %4611 = vmatprep.subr.bf16.mxu1 %v4610_v27  ;;  %v4642_v36 = vpack.c.bf16 %v7487_v51, %v7490_v37 }
 0x333   : > { %4613 = vmatpush3.bf16.msra.mxu1 %v4612_v52 }
 0x334   : > { %v3289_v62 = vpop.f32.mrb[14].mxu0  ;;  %v4367_v20 = vpop.f32.mrb[120].mxu1 }
 0x335   : > { %v4713_v23 = vadd.f32 %v3289_v62, %v7975_v16  ;;  %v3575_v22 = vadd.f32 %v7330_v50, %v4367_v20  ;;  %v3291_v25 = vpop.f32.mrb[15].mxu0  ;;  %v3569_v14 = vpop.f32.mrb[121].mxu1 }
 0x336   : > { %v3570_v48 = vadd.f32 %v7327_v53, %v3569_v14 }
 0x337   : > { %v3515_v21 = vadd.f32 %v4713_v23, %v7381_v42  ;;  %3657 = vst [vmem:[%s7375_s10 + $0x98] sm:$0xff] %v3575_v22  ;;  %v7504_v13 = vmul.f32 %v3575_v22, %v3575_v22 }
 0x338   : > { %3656 = vst [vmem:[%s7375_s10 + $0x90] sm:$0xff] %v3570_v48  ;;  %v7507_v27 = vmul.f32 %v3570_v48, %v3570_v48  ;;  %v4614_v24 = vpack.c.bf16 %v3575_v22, %v3570_v48 }
 0x339   : > { %3645 = vst [vmem:[%s7375_s10 + $0x38] sm:$0xff] %v3515_v21  ;;  %v4624_v50 = vpack.c.bf16 %v3515_v21, %v7484_v19  ;;  %v7515_v52 = vmul.f32 %v3515_v21, %v3515_v21 }
 0x33a   : > { %4615 = vmatprep.subr.bf16.mxu1 %v4614_v24  ;;  %v4646_v53 = vpack.c.bf16 %v7504_v13, %v7507_v27 }
 0x33b   : > { %4617 = vmatpush3.bf16.msra.mxu1 %v4616_v63  ;;  %v4656_v42 = vpack.c.bf16 %v7515_v52, %v7511_v40 }
 0x33c   : > { %v3294_v62 = vpop.f32.mrb[16].mxu0  ;;  %v4370_v20 = vpop.f32.mrb[122].mxu1 }
 0x33d   : > { %v4714_v16 = vadd.f32 %v3294_v62, %v7037_v6  ;;  %v3585_v19 = vadd.f32 %v7336_v1, %v4370_v20  ;;  %v3296_v23 = vpop.f32.mrb[17].mxu0  ;;  %v3579_v22 = vpop.f32.mrb[123].mxu1 }
 0x33e   : > { %v3580_v25 = vadd.f32 %v7333_v7, %v3579_v22 }
 0x33f   : > { %v3520_v14 = vadd.f32 %v4714_v16, %v7403_v45  ;;  %3659 = vst [vmem:[%s7375_s10 + $0xa8] sm:$0xff] %v3585_v19  ;;  %v7529_v48 = vmul.f32 %v3585_v19, %v3585_v19 }
 0x340   : > { %3658 = vst [vmem:[%s7375_s10 + $0xa0] sm:$0xff] %v3580_v25  ;;  %v7532_v29 = vmul.f32 %v3580_v25, %v3580_v25  ;;  %v4618_v8 = vpack.c.bf16 %v3585_v19, %v3580_v25 }
 0x341   : > { %3646 = vst [vmem:[%s7375_s10 + $0x40] sm:$0xff] %v3520_v14 }
 0x342   : > { %4619 = vmatprep.subr.bf16.mxu1 %v4618_v8  ;;  %v4650_v6 = vpack.c.bf16 %v7529_v48, %v7532_v29 }
 0x343   : > { %4621 = vmatpush3.bf16.msra.mxu1 %v4620_v2  ;;  %v7547_v2 = vmul.f32 %v3520_v14, %v3520_v14 }
 0x344   : > { %v3299_v1 = vpop.f32.mrb[18].mxu0  ;;  %v4373_v7 = vpop.f32.mrb[124].mxu1 }
 0x345   : > { %v4715_v45 = vadd.f32 %v3299_v1, %v7049_v43  ;;  %v3595_v63 = vadd.f32 %v7342_v41, %v4373_v7  ;;  %v3301_v21 = vpop.f32.mrb[19].mxu0  ;;  %v3589_v24 = vpop.f32.mrb[125].mxu1 }
 0x346   : > { %v3590_v62 = vadd.f32 %v7339_v3, %v3589_v24 }
 0x347   : > { %v3525_v20 = vadd.f32 %v4715_v45, %v7400_v10  ;;  %3661 = vst [vmem:[%s7375_s10 + $0xb8] sm:$0xff] %v3595_v63  ;;  %v7542_v16 = vmul.f32 %v3595_v63, %v3595_v63 }
 0x348   : > { %3660 = vst [vmem:[%s7375_s10 + $0xb0] sm:$0xff] %v3590_v62  ;;  %v7545_v19 = vmul.f32 %v3590_v62, %v3590_v62  ;;  %v4622_v23 = vpack.c.bf16 %v3595_v63, %v3590_v62 }
 0x349   : > { %3647 = vst [vmem:[%s7375_s10 + $0x48] sm:$0xff] %v3525_v20  ;;  %v4628_v43 = vpack.c.bf16 %v3525_v20, %v3520_v14  ;;  %v7550_v41 = vmul.f32 %v3525_v20, %v3525_v20 }
 0x34a   : > { %4623 = vmatprep.subr.bf16.mxu1 %v4622_v23  ;;  %v4654_v3 = vpack.c.bf16 %v7542_v16, %v7545_v19 }
 0x34b   : > { %4625 = vmatpush3.bf16.msra.mxu1 %v4624_v50  ;;  %v4660_v10 = vpack.c.bf16 %v7550_v41, %v7547_v2 }
 0x34c   : > { %v3304_v22 = vpop.f32.mrb[20].mxu0  ;;  %v4376_v25 = vpop.f32.mrb[126].mxu1 }
 0x34d   : > { %v4716_v8 = vadd.f32 %v3304_v22, %v7061_v61  ;;  %v3605_v1 = vadd.f32 %v7348_v11, %v4376_v25  ;;  %v3306_v7 = vpop.f32.mrb[21].mxu0  ;;  %v3599_v14 = vpop.f32.mrb[127].mxu1 }
 0x34e   : > { %v3600_v45 = vadd.f32 %v7345_v56, %v3599_v14 }
 0x34f   : > { %v3530_v63 = vadd.f32 %v4716_v8, %v7412_v28  ;;  %3663 = vst [vmem:[%s7375_s10 + $0xc8] sm:$0xff] %v3605_v1  ;;  %v7561_v21 = vmul.f32 %v3605_v1, %v3605_v1 }
 0x350   : > { %3662 = vst [vmem:[%s7375_s10 + $0xc0] sm:$0xff] %v3600_v45  ;;  %v7564_v50 = vmul.f32 %v3600_v45, %v3600_v45  ;;  %v4626_v24 = vpack.c.bf16 %v3605_v1, %v3600_v45 }
 0x351   : > { %3648 = vst [vmem:[%s7375_s10 + $0x50] sm:$0xff] %v3530_v63  ;;  %v3750_v14 = vmul.f32 %v3530_v63, %v3530_v63 }
 0x352   : > { %4627 = vmatprep.subr.bf16.mxu1 %v4626_v24  ;;  %v4658_v61 = vpack.c.bf16 %v7561_v21, %v7564_v50 }
 0x353   : > { %4629 = vmatpush3.bf16.msra.mxu1 %v4628_v43 }
 0x354   : > { %v3309_v11 = vpop.f32.mrb[22].mxu0  ;;  %v4379_v56 = vpop.f32.mrb[128].mxu1 }
 0x355   : > { %v4717_v28 = vadd.f32 %v3309_v11, %v7073_v33  ;;  %v3615_v62 = vadd.f32 %v7354_v46, %v4379_v56  ;;  %v3311_v20 = vpop.f32.mrb[23].mxu0  ;;  %v3609_v23 = vpop.f32.mrb[129].mxu1 }
 0x356   : > { %v3610_v22 = vadd.f32 %v7351_v55, %v3609_v23 }
 0x357   : > { %v3535_v25 = vadd.f32 %v4717_v28, %v7409_v39  ;;  %3665 = vst [vmem:[%s7375_s10 + $0xd8] sm:$0xff] %v3615_v62  ;;  %v3767_v8 = vmul.f32 %v3615_v62, %v3615_v62 }
 0x358   : > { %3664 = vst [vmem:[%s7375_s10 + $0xd0] sm:$0xff] %v3610_v22  ;;  %v3766_v1 = vmul.f32 %v3610_v22, %v3610_v22  ;;  %v4630_v7 = vpack.c.bf16 %v3615_v62, %v3610_v22 }
 0x359   : > { %3649 = vst [vmem:[%s7375_s10 + $0x58] sm:$0xff] %v3535_v25  ;;  %v4632_v43 = vpack.c.bf16 %v3535_v25, %v3530_v63  ;;  %v3751_v45 = vmul.f32 %v3535_v25, %v3535_v25 }
 0x35a   : > { %4631 = vmatprep.subr.bf16.mxu1 %v4630_v7  ;;  %v4662_v33 = vpack.c.bf16 %v3767_v8, %v3766_v1 }
 0x35b   : > { %4633 = vmatpush3.bf16.msra.mxu1 %v4632_v43  ;;  %v4664_v46 = vpack.c.bf16 %v3751_v45, %v3750_v14 }
 0x35c   : > { %v3314_v21 = vpop.f32.mrb[24].mxu0  ;;  %v4382_v55 = vpop.f32.mrb[130].mxu1 }
 0x35d   : > { %v4718_v39 = vadd.f32 %v3314_v21, %v7086_v54  ;;  %v3625_v50 = vadd.f32 %v7360_v15, %v4382_v55  ;;  %v3316_v24 = vpop.f32.mrb[25].mxu0  ;;  %v3619_v11 = vpop.f32.mrb[131].mxu1 }
 0x35e   : > { %v3620_v56 = vadd.f32 %v7357_v44, %v3619_v11 }
 0x35f   : > { %v3540_v63 = vadd.f32 %v4718_v39, %v7434_v59  ;;  %3667 = vst [vmem:[%s7375_s10 + $0xe8] sm:$0xff] %v3625_v50  ;;  %v3769_v28 = vmul.f32 %v3625_v50, %v3625_v50 }
 0x360   : > { %3666 = vst [vmem:[%s7375_s10 + $0xe0] sm:$0xff] %v3620_v56  ;;  %v3768_v62 = vmul.f32 %v3620_v56, %v3620_v56  ;;  %v4634_v20 = vpack.c.bf16 %v3625_v50, %v3620_v56 }
 0x361   : > { %3650 = vst [vmem:[%s7375_s10 + $0x60] sm:$0xff] %v3540_v63  ;;  %v4636_v23 = vpack.c.bf16 %v7432_v58, %v3540_v63  ;;  %v4385_v22 = vpop.f32.mrb[132].mxu1 }
 0x362   : > { %v3635_v54 = vadd.f32 %v7367_v30, %v4385_v22  ;;  %v3629_v15 = vpop.f32.mrb[133].mxu1  ;;  %4635 = vmatprep.subr.bf16.mxu1 %v4634_v20  ;;  %v4666_v25 = vpack.c.bf16 %v3769_v28, %v3768_v62  ;;  %v3753_v30 = vmul.f32 %v7432_v58, %v7432_v58 }
 0x363   : > { %v3630_v44 = vadd.f32 %v7364_v34, %v3629_v15  ;;  %4637 = vmatpush3.bf16.msra.mxu1 %v4636_v23  ;;  %v3752_v34 = vmul.f32 %v3540_v63, %v3540_v63 }
 0x364   : > { %3669 = vst [vmem:[%s7375_s10 + $0xf8] sm:$0xff] %v3635_v54  ;;  %v3771_v59 = vmul.f32 %v3635_v54, %v3635_v54 }
 0x365   : > { %3668 = vst [vmem:[%s7375_s10 + $0xf0] sm:$0xff] %v3630_v44  ;;  %v3770_v8 = vmul.f32 %v3630_v44, %v3630_v44  ;;  %v4638_v1 = vpack.c.bf16 %v3635_v54, %v3630_v44  ;;  %v4668_v17 = vpack.c.bf16 %v3753_v30, %v3752_v34 }
 0x367   : > { %4639 = vmatprep.subr.bf16.mxu1 %v4638_v1  ;;  %v4670_v7 = vpack.c.bf16 %v3771_v59, %v3770_v8 }
 0x368   : > { %4641 = vmatpush3.bf16.msra.mxu1 %v4640_v9 }
 0x369   : > { %4643 = vmatprep.subr.bf16.mxu1 %v4642_v36 }
 0x36b   : > { %3735 = vmatmul.mubr.f32.vlgmr.msra.gmra.mrb[134].mxu1 %v4872_v4 }
 0x36c   : > { %4645 = vmatpush3.bf16.msra.mxu1 %v4644_v57  ;;  %3836 = vmatprep.mubr.f32.mxu1 %v4872_v4 }
 0x36d   : > { %4647 = vmatprep.subr.bf16.mxu1 %v4646_v53 }
 0x370   : > { %4649 = vmatpush3.bf16.msra.mxu1 %v4648_v47 }
 0x371   : > { %4651 = vmatprep.subr.bf16.mxu1 %v4650_v6 }
 0x374   : > { %4653 = vmatpush3.bf16.msra.mxu1 %v4652_v5 }
 0x375   : > { %4655 = vmatprep.subr.bf16.mxu1 %v4654_v3 }
 0x378   : > { %4657 = vmatpush3.bf16.msra.mxu1 %v4656_v42 }
 0x379   : > { %4659 = vmatprep.subr.bf16.mxu1 %v4658_v61 }
 0x37c   : > { %4661 = vmatpush3.bf16.msra.mxu1 %v4660_v10 }
 0x37d   : > { %4663 = vmatprep.subr.bf16.mxu1 %v4662_v33 }
 0x380   : > { %4665 = vmatpush3.bf16.msra.mxu1 %v4664_v46 }
 0x381   : > { %4667 = vmatprep.subr.bf16.mxu1 %v4666_v25 }
 0x384   : > { %4669 = vmatpush3.bf16.msra.mxu1 %v4668_v17 }
 0x385   : > { %4671 = vmatprep.subr.bf16.mxu1 %v4670_v7 }
 0x388   : > { %4673 = vmatpush3.bf16.msra.mxu1 %v4672_v49 }
 0x38b   : > { %3837 = vmatmul.mubr.f32.vlgmr.msra.gmra.mrb[136].mxu1 %v4872_v4 }
 0x43e   : > { %v4268_v60 = vpop.f32.mrb[134].mxu1 }
 0x43f   : > { %v4269_v57 = vpop.f32.mrb[135].mxu1 }
 0x440   : > { %v4270_v32 = vadd.f32 %v4269_v57, %v4268_v60 }
 0x442   : > { %3842 = vst [vmem:[%s292_s12] sm:$0x1] %v4270_v32 }
 0x45e   : > { %v4303_v26 = vpop.f32.mrb[136].mxu1 }
 0x45f   : > { %v4304_v47 = vpop.f32.mrb[137].mxu1 }
 0x460   : > { %v4305_v58 = vadd.f32 %v4304_v47, %v4303_v26 }
 0x462   : > { %3843 = vst [vmem:[%s295_s15] sm:$0x1] %v4305_v58 }
 0x463 PF: > { %s18_s24 = sadd.s32 1, %s4868_s24  }
 0x464   : > { %p15_p4 = scmp.ge.s32.totalorder %s18_s24, 4  }
 0x466   :  { %17 = sbr.rel (!%p15_p4) target bundleno = 1 (0x1), region = 101 }

</bundles_post_ra>
